<compile_context>
chip_gen: v6e
topology: v6e:2x2x1
jax: 0.10.0
libtpu: 0.0.40
codegen_flags: <defaults>
</compile_context>

<pallas_src>
import math

import jax
import jax.numpy as jnp
from jax import lax
from jax.experimental import pallas as pl
from jax.experimental.pallas import tpu as pltpu

BN_EPS = 1e-5
LANES = 128


def _next_pow2(n):
    # smallest power of two >= n, and at least 8 (sublane multiple)
    return 1 << max(3, (n - 1).bit_length())


def basic_block_forward(x_nchw, w1, w2, s1, b1, s2, b2):
    """Fused BasicBlock forward.

    x_nchw: (N, C, H, W) f32; w1/w2: (C, C, 3, 3) torch OIHW; s*/b*: (C,)
    eval-mode BN folded scale/bias.  stride=1, downsample=None, so the
    identity residual requires inplanes == planes.
    """
    N, C, H, W = x_nchw.shape
    assert w1.shape[0] == C, "identity residual requires inplanes == planes"

    Cp = max(LANES, -(-C // LANES) * LANES)   # channels padded to lane width
    Hp = H + 2                                # spatially padded height
    Wpp = _next_pow2(W + 2)                   # padded width (pow2, >= W+2)
    L = Hp * Wpp                              # rows of the flattened padded grid
    M2 = H * Wpp                              # rows actually written back
    pad0 = Wpp + 8                            # top/bottom halo, multiple of 8
    Lext = L + 2 * pad0

    # ---- wrapper glue (plain XLA): NCHW -> NHWC, pad spatial + channels, flatten
    x_nhwc = jnp.transpose(x_nchw, (0, 2, 3, 1))
    x_pad = jnp.pad(x_nhwc, ((0, 0), (1, 1), (1, Wpp - W - 1), (0, Cp - C)))
    x_flat = x_pad.reshape(N, L, Cp)
    x_ext = jnp.pad(x_flat, ((0, 0), (pad0, pad0), (0, 0))).astype(jnp.bfloat16)

    def pack_w(w, s):
        # fold BN scale into output channels; OIHW -> (ky, kx*Cin, Cout) with
        # the 3 kx taps packed along the matmul K axis; pad to Cp; bf16.
        wf = w.astype(jnp.float32) * s.astype(jnp.float32)[:, None, None, None]
        wf = jnp.transpose(wf, (2, 3, 1, 0))                  # (3, 3, Cin, Cout)
        wf = jnp.pad(wf, ((0, 0), (0, 0), (0, Cp - C), (0, Cp - C)))
        return wf.reshape(3, 3 * Cp, Cp).astype(jnp.bfloat16)

    w1_k = pack_w(w1, s1)
    w2_k = pack_w(w2, s2)
    bias = jnp.stack([jnp.pad(b1.astype(jnp.float32), (0, Cp - C)),
                      jnp.pad(b2.astype(jnp.float32), (0, Cp - C))])  # (2, Cp)

    # interior mask of the flattened padded grid (conv zero-padding for conv2),
    # precomputed once and streamed with a constant index_map (VMEM-resident).
    idx = jnp.arange(L, dtype=jnp.int32)
    row, col = idx // Wpp, idx % Wpp
    interior = (row >= 1) & (row <= H) & (col >= 1) & (col <= W)
    mask = jnp.broadcast_to(interior[:, None], (L, Cp)).astype(jnp.float32)

    def kernel(x_ref, w1_ref, w2_ref, b_ref, m_ref, o_ref, pk_ref):
        # x_ref: (Lext, Cp) bf16 | w*_ref: (3, 3*Cp, Cp) bf16 (BN scale folded)
        # b_ref: (2, Cp) f32 | m_ref: (L, Cp) f32 | o_ref: (M2, Cp) f32
        # pk_ref: (Lext, 3*Cp) bf16 scratch -- K-packed dx taps, reused by both convs.

        # ---- stage K-packed x taps once (hoisted out of the dy loop) ----
        # only rows [8, Lext-8) are ever read by the matmuls below.
        pk_ref[:, Cp:2 * Cp] = x_ref[...]
        pk_ref[pl.ds(8, Lext - 16), 0:Cp] = x_ref[pl.ds(7, Lext - 16), :]
        pk_ref[pl.ds(8, Lext - 16), 2 * Cp:3 * Cp] = x_ref[pl.ds(9, Lext - 16), :]

        def conv_rows(w_ref, lo, rows):
            # conv outputs for flattened-grid indices [lo, lo+rows):
            # 3 MXU matmuls (K = 3*Cp), accumulator seeded by the first one.
            acc = jnp.dot(pk_ref[pl.ds(pad0 - Wpp + lo, rows), :], w_ref[0],
                          preferred_element_type=jnp.float32)
            acc = acc + jnp.dot(pk_ref[pl.ds(pad0 + lo, rows), :], w_ref[1],
                                preferred_element_type=jnp.float32)
            acc = acc + jnp.dot(pk_ref[pl.ds(pad0 + Wpp + lo, rows), :], w_ref[2],
                                preferred_element_type=jnp.float32)
            return acc

        bvec = b_ref[...]

        # conv1 (BN scale folded) + bias + ReLU, zeroed outside the true image
        # interior with a single vmul against the resident mask.
        y1 = jnp.maximum(conv_rows(w1_ref, 0, L) + bvec[0:1, :], 0.0) * m_ref[...]
        y1b = y1.astype(jnp.bfloat16)

        # stage K-packed y1 taps directly into the three column groups
        # (row offsets +1 / 0 / -1); all positions conv2 needs for interior
        # outputs are covered, everything else is cropped by the wrapper.
        pk_ref[pl.ds(pad0 + 1, L), 0:Cp] = y1b
        pk_ref[pl.ds(pad0, L), Cp:2 * Cp] = y1b
        pk_ref[pl.ds(pad0 - 1, L), 2 * Cp:3 * Cp] = y1b

        # conv2 + bias + identity residual + ReLU, only over the H stored
        # row bands (the two all-pad bands are neither computed nor written).
        y2 = conv_rows(w2_ref, Wpp, M2) + bvec[1:2, :]
        res = x_ref[pl.ds(pad0 + Wpp, M2), :].astype(jnp.float32)
        o_ref[...] = jnp.maximum(y2 + res, 0.0).astype(o_ref.dtype)

    out_flat = pl.pallas_call(
        kernel,
        out_shape=jax.ShapeDtypeStruct((N, M2, Cp), jnp.float32),
        grid_spec=pltpu.PrefetchScalarGridSpec(
            num_scalar_prefetch=0,
            grid=(N,),
            in_specs=[
                pl.BlockSpec((None, Lext, Cp), lambda n: (n, 0, 0)),
                pl.BlockSpec((3, 3 * Cp, Cp), lambda n: (0, 0, 0)),
                pl.BlockSpec((3, 3 * Cp, Cp), lambda n: (0, 0, 0)),
                pl.BlockSpec((2, Cp), lambda n: (0, 0)),
                pl.BlockSpec((L, Cp), lambda n: (0, 0)),
            ],
            out_specs=pl.BlockSpec((None, M2, Cp), lambda n: (n, 0, 0)),
            scratch_shapes=[pltpu.VMEM((Lext, 3 * Cp), jnp.bfloat16)],
        ),
        compiler_params=pltpu.CompilerParams(
            dimension_semantics=("parallel",),     # 2 TCs split the batch
            vmem_limit_bytes=48 * 1024 * 1024),
    )(x_ext, w1_k, w2_k, bias, mask)

    # crop width/channel padding, return NCHW f32 (module output layout)
    out = out_flat.reshape(N, H, Wpp, Cp)[:, :, 1:W + 1, :C]
    return jnp.transpose(out, (0, 3, 1, 2))


def _conv_ref(x, w):
    return lax.conv_general_dilated(
        x, w, (1, 1), [(1, 1), (1, 1)],
        dimension_numbers=('NCHW', 'OIHW', 'NCHW'),
        preferred_element_type=jnp.float32)


def _reference_f32(x, w1, w2, s1, b1, s2, b2):
    """Pure-f32 eval-mode BasicBlock (matches the PyTorch module)."""
    def bn(z, s, b):
        return z * s[None, :, None, None] + b[None, :, None, None]
    out = jnp.maximum(bn(_conv_ref(x, w1), s1, b1), 0.0)
    out = bn(_conv_ref(out, w2), s2, b2)
    return jnp.maximum(out + x, 0.0)


def _reference_bf16(x, w1, w2, s1, b1, s2, b2):
    """Reference mirroring the kernel's bf16 quantization points
    (bf16 inputs / folded weights / intermediate, f32 accumulation)."""
    f32 = jnp.float32
    q = lambda a: a.astype(jnp.bfloat16).astype(f32)
    xb = q(x)
    w1f = q(w1 * s1[:, None, None, None])
    w2f = q(w2 * s2[:, None, None, None])
    y1 = q(jnp.maximum(_conv_ref(xb, w1f) + b1[None, :, None, None], 0.0))
    y2 = _conv_ref(y1, w2f) + b2[None, :, None, None]
    return jnp.maximum(y2 + xb, 0.0)


if __name__ == "__main__":
    N, C, H, W = 2, 4, 16, 16   # inplanes = planes = 4, stride = 1
    key = jax.random.PRNGKey(0)
    ks = jax.random.split(key, 11)

    x = jax.random.normal(ks[0], (N, C, H, W), jnp.float32)

    fan = C * 9
    w1 = jax.random.normal(ks[1], (C, C, 3, 3), jnp.float32) / math.sqrt(fan)
    w2 = jax.random.normal(ks[2], (C, C, 3, 3), jnp.float32) / math.sqrt(fan)

    gamma1 = 1.0 + 0.1 * jax.random.normal(ks[3], (C,), jnp.float32)
    beta1 = 0.1 * jax.random.normal(ks[4], (C,), jnp.float32)
    mean1 = 0.1 * jax.random.normal(ks[5], (C,), jnp.float32)
    var1 = 0.5 + jnp.abs(jax.random.normal(ks[6], (C,), jnp.float32))

    gamma2 = 1.0 + 0.1 * jax.random.normal(ks[7], (C,), jnp.float32)
    beta2 = 0.1 * jax.random.normal(ks[8], (C,), jnp.float32)
    mean2 = 0.1 * jax.random.normal(ks[9], (C,), jnp.float32)
    var2 = 0.5 + jnp.abs(jax.random.normal(ks[10], (C,), jnp.float32))

    # fold eval-mode BN into per-channel scale / bias
    s1 = gamma1 / jnp.sqrt(var1 + BN_EPS)
    b1 = beta1 - mean1 * s1
    s2 = gamma2 / jnp.sqrt(var2 + BN_EPS)
    b2 = beta2 - mean2 * s2

    out = jax.block_until_ready(basic_block_forward(x, w1, w2, s1, b1, s2, b2))
    assert out.shape == (N, C, H, W)

    # tight check vs a reference mirroring the kernel's bf16 rounding points
    ref_bf16 = jax.block_until_ready(_reference_bf16(x, w1, w2, s1, b1, s2, b2))
    err_bf16 = float(jnp.max(jnp.abs(out - ref_bf16)))
    if err_bf16 > 2e-3:
        raise RuntimeError(f"mismatch vs bf16-mirrored reference: {err_bf16}")

    # loose sanity check vs the pure-f32 PyTorch-equivalent block
    # (gap is only the deliberate bf16 input/weight quantization)
    ref_f32 = jax.block_until_ready(_reference_f32(x, w1, w2, s1, b1, s2, b2))
    err_f32 = float(jnp.max(jnp.abs(out - ref_f32)))
    if err_f32 > 2e-1:
        raise RuntimeError(f"mismatch vs f32 reference: {err_f32}")

    print("KERNEL_OK")
</pallas_src>

<mosaic_0001>
module attributes {stable_mosaic.version = 11 : i64} {
  func.func @kernel(%arg0: i32, %arg1: memref<1x656x128xbf16, #tpu.memory_space<vmem>>, %arg2: memref<3x384x128xbf16, #tpu.memory_space<vmem>>, %arg3: memref<3x384x128xbf16, #tpu.memory_space<vmem>>, %arg4: memref<2x128xf32, #tpu.memory_space<vmem>>, %arg5: memref<576x128xf32, #tpu.memory_space<vmem>>, %arg6: memref<1x512x128xf32, #tpu.memory_space<vmem>>, %arg7: memref<656x384xbf16, #tpu.memory_space<vmem>>) attributes {dimension_semantics = [#tpu.dimension_semantics<parallel>], iteration_bounds = array<i64: 2>, scalar_prefetch = 0 : i64, scratch_operands = 1 : i64, tpu.core_type = #tpu.core_type<tc>, window_params = [{transform_indices = @transform_0, window_bounds = array<i64: 1, 656, 128>}, {pipeline_mode = #tpu.pipeline_mode<synchronous>, transform_indices = @transform_1, window_bounds = array<i64: 3, 384, 128>}, {pipeline_mode = #tpu.pipeline_mode<synchronous>, transform_indices = @transform_2, window_bounds = array<i64: 3, 384, 128>}, {pipeline_mode = #tpu.pipeline_mode<synchronous>, transform_indices = @transform_3, window_bounds = array<i64: 2, 128>}, {pipeline_mode = #tpu.pipeline_mode<synchronous>, transform_indices = @transform_4, window_bounds = array<i64: 576, 128>}, {transform_indices = @transform_5, window_bounds = array<i64: 1, 512, 128>}]} {
    %c0 = arith.constant 0 : index
    %c0_0 = arith.constant 0 : index
    %c0_1 = arith.constant 0 : index
    %0 = vector.load %arg1[%c0, %c0_0, %c0_1] : memref<1x656x128xbf16, #tpu.memory_space<vmem>>, vector<1x656x128xbf16>
    %1 = vector.shape_cast %0 : vector<1x656x128xbf16> to vector<656x128xbf16>
    %c0_2 = arith.constant 0 : index
    %c128 = arith.constant 128 : index
    %2 = vector.load %arg7[%c0_2, %c128] : memref<656x384xbf16, #tpu.memory_space<vmem>>, vector<656x128xbf16>
    tpu.vector_store %arg7[%c0_2, %c128], %1 {strides = array<i32>} : memref<656x384xbf16, #tpu.memory_space<vmem>>, vector<656x128xbf16>,
    %c0_3 = arith.constant 0 : index
    %c7 = arith.constant 7 : index
    %c0_4 = arith.constant 0 : index
    %3 = vector.load %arg1[%c0_3, %c7, %c0_4] : memref<1x656x128xbf16, #tpu.memory_space<vmem>>, vector<1x640x128xbf16>
    %4 = vector.shape_cast %3 : vector<1x640x128xbf16> to vector<640x128xbf16>
    %c8 = arith.constant 8 : index
    %c0_5 = arith.constant 0 : index
    %5 = vector.load %arg7[%c8, %c0_5] : memref<656x384xbf16, #tpu.memory_space<vmem>>, vector<640x128xbf16>
    tpu.vector_store %arg7[%c8, %c0_5], %4 {strides = array<i32>} : memref<656x384xbf16, #tpu.memory_space<vmem>>, vector<640x128xbf16>,
    %c0_6 = arith.constant 0 : index
    %c9 = arith.constant 9 : index
    %c0_7 = arith.constant 0 : index
    %6 = vector.load %arg1[%c0_6, %c9, %c0_7] : memref<1x656x128xbf16, #tpu.memory_space<vmem>>, vector<1x640x128xbf16>
    %7 = vector.shape_cast %6 : vector<1x640x128xbf16> to vector<640x128xbf16>
    %c8_8 = arith.constant 8 : index
    %c256 = arith.constant 256 : index
    %8 = vector.load %arg7[%c8_8, %c256] : memref<656x384xbf16, #tpu.memory_space<vmem>>, vector<640x128xbf16>
    tpu.vector_store %arg7[%c8_8, %c256], %7 {strides = array<i32>} : memref<656x384xbf16, #tpu.memory_space<vmem>>, vector<640x128xbf16>,
    %c0_9 = arith.constant 0 : index
    %c0_10 = arith.constant 0 : index
    %9 = vector.load %arg4[%c0_9, %c0_10] : memref<2x128xf32, #tpu.memory_space<vmem>>, vector<2x128xf32>
    %c8_11 = arith.constant 8 : index
    %c0_12 = arith.constant 0 : index
    %10 = vector.load %arg7[%c8_11, %c0_12] : memref<656x384xbf16, #tpu.memory_space<vmem>>, vector<576x384xbf16>
    %c0_13 = arith.constant 0 : index
    %c0_14 = arith.constant 0 : index
    %c0_15 = arith.constant 0 : index
    %11 = vector.load %arg2[%c0_13, %c0_14, %c0_15] : memref<3x384x128xbf16, #tpu.memory_space<vmem>>, vector<1x384x128xbf16>
    %12 = vector.shape_cast %11 : vector<1x384x128xbf16> to vector<384x128xbf16>
    %cst = arith.constant dense<0.000000e+00> : vector<576x128xf32>
    %13 = tpu.matmul %10, %12, %cst {dimension_numbers = #tpu.dot_dimension_numbers<[1], [0], [0], [1], [0, 0, 1, 1], [], []>} : vector<576x384xbf16>, vector<384x128xbf16>, vector<576x128xf32> -> vector<576x128xf32>
    %c40 = arith.constant 40 : index
    %c0_16 = arith.constant 0 : index
    %14 = vector.load %arg7[%c40, %c0_16] : memref<656x384xbf16, #tpu.memory_space<vmem>>, vector<576x384xbf16>
    %c1 = arith.constant 1 : index
    %c0_17 = arith.constant 0 : index
    %c0_18 = arith.constant 0 : index
    %15 = vector.load %arg2[%c1, %c0_17, %c0_18] : memref<3x384x128xbf16, #tpu.memory_space<vmem>>, vector<1x384x128xbf16>
    %16 = vector.shape_cast %15 : vector<1x384x128xbf16> to vector<384x128xbf16>
    %cst_19 = arith.constant dense<0.000000e+00> : vector<576x128xf32>
    %17 = tpu.matmul %14, %16, %cst_19 {dimension_numbers = #tpu.dot_dimension_numbers<[1], [0], [0], [1], [0, 0, 1, 1], [], []>} : vector<576x384xbf16>, vector<384x128xbf16>, vector<576x128xf32> -> vector<576x128xf32>
    %18 = arith.addf %13, %17 : vector<576x128xf32>
    %c72 = arith.constant 72 : index
    %c0_20 = arith.constant 0 : index
    %19 = vector.load %arg7[%c72, %c0_20] : memref<656x384xbf16, #tpu.memory_space<vmem>>, vector<576x384xbf16>
    %c2 = arith.constant 2 : index
    %c0_21 = arith.constant 0 : index
    %c0_22 = arith.constant 0 : index
    %20 = vector.load %arg2[%c2, %c0_21, %c0_22] : memref<3x384x128xbf16, #tpu.memory_space<vmem>>, vector<1x384x128xbf16>
    %21 = vector.shape_cast %20 : vector<1x384x128xbf16> to vector<384x128xbf16>
    %cst_23 = arith.constant dense<0.000000e+00> : vector<576x128xf32>
    %22 = tpu.matmul %19, %21, %cst_23 {dimension_numbers = #tpu.dot_dimension_numbers<[1], [0], [0], [1], [0, 0, 1, 1], [], []>} : vector<576x384xbf16>, vector<384x128xbf16>, vector<576x128xf32> -> vector<576x128xf32>
    %23 = arith.addf %18, %22 : vector<576x128xf32>
    %24 = vector.extract_strided_slice %9 {offsets = [0, 0], sizes = [1, 128], strides = [1, 1]} : vector<2x128xf32> to vector<1x128xf32>
    %25 = vector.broadcast %24 : vector<1x128xf32> to vector<576x128xf32>
    %26 = arith.addf %23, %25 : vector<576x128xf32>
    %cst_24 = arith.constant 0.000000e+00 : f32
    %27 = vector.broadcast %cst_24 : f32 to vector<576x128xf32>
    %28 = arith.maximumf %26, %27 : vector<576x128xf32>
    %c0_25 = arith.constant 0 : index
    %c0_26 = arith.constant 0 : index
    %29 = vector.load %arg5[%c0_25, %c0_26] : memref<576x128xf32, #tpu.memory_space<vmem>>, vector<576x128xf32>
    %30 = arith.mulf %28, %29 : vector<576x128xf32>
    %31 = arith.truncf %30 : vector<576x128xf32> to vector<576x128xbf16>
    %c41 = arith.constant 41 : index
    %c0_27 = arith.constant 0 : index
    %32 = vector.load %arg7[%c41, %c0_27] : memref<656x384xbf16, #tpu.memory_space<vmem>>, vector<576x128xbf16>
    tpu.vector_store %arg7[%c41, %c0_27], %31 {strides = array<i32>} : memref<656x384xbf16, #tpu.memory_space<vmem>>, vector<576x128xbf16>,
    %c40_28 = arith.constant 40 : index
    %c128_29 = arith.constant 128 : index
    %33 = vector.load %arg7[%c40_28, %c128_29] : memref<656x384xbf16, #tpu.memory_space<vmem>>, vector<576x128xbf16>
    tpu.vector_store %arg7[%c40_28, %c128_29], %31 {strides = array<i32>} : memref<656x384xbf16, #tpu.memory_space<vmem>>, vector<576x128xbf16>,
    %c39 = arith.constant 39 : index
    %c256_30 = arith.constant 256 : index
    %34 = vector.load %arg7[%c39, %c256_30] : memref<656x384xbf16, #tpu.memory_space<vmem>>, vector<576x128xbf16>
    tpu.vector_store %arg7[%c39, %c256_30], %31 {strides = array<i32>} : memref<656x384xbf16, #tpu.memory_space<vmem>>, vector<576x128xbf16>,
    %c40_31 = arith.constant 40 : index
    %c0_32 = arith.constant 0 : index
    %35 = vector.load %arg7[%c40_31, %c0_32] : memref<656x384xbf16, #tpu.memory_space<vmem>>, vector<512x384xbf16>
    %c0_33 = arith.constant 0 : index
    %c0_34 = arith.constant 0 : index
    %c0_35 = arith.constant 0 : index
    %36 = vector.load %arg3[%c0_33, %c0_34, %c0_35] : memref<3x384x128xbf16, #tpu.memory_space<vmem>>, vector<1x384x128xbf16>
    %37 = vector.shape_cast %36 : vector<1x384x128xbf16> to vector<384x128xbf16>
    %cst_36 = arith.constant dense<0.000000e+00> : vector<512x128xf32>
    %38 = tpu.matmul %35, %37, %cst_36 {dimension_numbers = #tpu.dot_dimension_numbers<[1], [0], [0], [1], [0, 0, 1, 1], [], []>} : vector<512x384xbf16>, vector<384x128xbf16>, vector<512x128xf32> -> vector<512x128xf32>
    %c72_37 = arith.constant 72 : index
    %c0_38 = arith.constant 0 : index
    %39 = vector.load %arg7[%c72_37, %c0_38] : memref<656x384xbf16, #tpu.memory_space<vmem>>, vector<512x384xbf16>
    %c1_39 = arith.constant 1 : index
    %c0_40 = arith.constant 0 : index
    %c0_41 = arith.constant 0 : index
    %40 = vector.load %arg3[%c1_39, %c0_40, %c0_41] : memref<3x384x128xbf16, #tpu.memory_space<vmem>>, vector<1x384x128xbf16>
    %41 = vector.shape_cast %40 : vector<1x384x128xbf16> to vector<384x128xbf16>
    %cst_42 = arith.constant dense<0.000000e+00> : vector<512x128xf32>
    %42 = tpu.matmul %39, %41, %cst_42 {dimension_numbers = #tpu.dot_dimension_numbers<[1], [0], [0], [1], [0, 0, 1, 1], [], []>} : vector<512x384xbf16>, vector<384x128xbf16>, vector<512x128xf32> -> vector<512x128xf32>
    %43 = arith.addf %38, %42 : vector<512x128xf32>
    %c104 = arith.constant 104 : index
    %c0_43 = arith.constant 0 : index
    %44 = vector.load %arg7[%c104, %c0_43] : memref<656x384xbf16, #tpu.memory_space<vmem>>, vector<512x384xbf16>
    %c2_44 = arith.constant 2 : index
    %c0_45 = arith.constant 0 : index
    %c0_46 = arith.constant 0 : index
    %45 = vector.load %arg3[%c2_44, %c0_45, %c0_46] : memref<3x384x128xbf16, #tpu.memory_space<vmem>>, vector<1x384x128xbf16>
    %46 = vector.shape_cast %45 : vector<1x384x128xbf16> to vector<384x128xbf16>
    %cst_47 = arith.constant dense<0.000000e+00> : vector<512x128xf32>
    %47 = tpu.matmul %44, %46, %cst_47 {dimension_numbers = #tpu.dot_dimension_numbers<[1], [0], [0], [1], [0, 0, 1, 1], [], []>} : vector<512x384xbf16>, vector<384x128xbf16>, vector<512x128xf32> -> vector<512x128xf32>
    %48 = arith.addf %43, %47 : vector<512x128xf32>
    %49 = vector.extract_strided_slice %9 {offsets = [1, 0], sizes = [1, 128], strides = [1, 1]} : vector<2x128xf32> to vector<1x128xf32>
    %50 = vector.broadcast %49 : vector<1x128xf32> to vector<512x128xf32>
    %51 = arith.addf %48, %50 : vector<512x128xf32>
    %c0_48 = arith.constant 0 : index
    %c72_49 = arith.constant 72 : index
    %c0_50 = arith.constant 0 : index
    %52 = vector.load %arg1[%c0_48, %c72_49, %c0_50] : memref<1x656x128xbf16, #tpu.memory_space<vmem>>, vector<1x512x128xbf16>
    %53 = vector.shape_cast %52 : vector<1x512x128xbf16> to vector<512x128xbf16>
    %54 = arith.extf %53 : vector<512x128xbf16> to vector<512x128xf32>
    %55 = arith.addf %51, %54 : vector<512x128xf32>
    %cst_51 = arith.constant 0.000000e+00 : f32
    %56 = vector.broadcast %cst_51 : f32 to vector<512x128xf32>
    %57 = arith.maximumf %55, %56 : vector<512x128xf32>
    %c0_52 = arith.constant 0 : index
    %c0_53 = arith.constant 0 : index
    %c0_54 = arith.constant 0 : index
    %58 = vector.load %arg6[%c0_52, %c0_53, %c0_54] : memref<1x512x128xf32, #tpu.memory_space<vmem>>, vector<1x512x128xf32>
    %59 = vector.shape_cast %58 : vector<1x512x128xf32> to vector<512x128xf32>
    %60 = vector.shape_cast %57 : vector<512x128xf32> to vector<1x512x128xf32>
    tpu.vector_store %arg6[%c0_52, %c0_53, %c0_54], %60 {strides = array<i32>} : memref<1x512x128xf32, #tpu.memory_space<vmem>>, vector<1x512x128xf32>,
    return
  }
  func.func @transform_0(%arg0: i32) -> (i32, i32, i32) {
    %c0_i32 = arith.constant 0 : i32
    %c0_i32_0 = arith.constant 0 : i32
    %c0_i32_1 = arith.constant 0 : i32
    return %arg0, %c0_i32, %c0_i32_0 : i32, i32, i32
  }
  func.func @transform_1(%arg0: i32) -> (i32, i32, i32) {
    %c0_i32 = arith.constant 0 : i32
    %c0_i32_0 = arith.constant 0 : i32
    %c0_i32_1 = arith.constant 0 : i32
    %c0_i32_2 = arith.constant 0 : i32
    return %c0_i32, %c0_i32_0, %c0_i32_1 : i32, i32, i32
  }
  func.func @transform_2(%arg0: i32) -> (i32, i32, i32) {
    %c0_i32 = arith.constant 0 : i32
    %c0_i32_0 = arith.constant 0 : i32
    %c0_i32_1 = arith.constant 0 : i32
    %c0_i32_2 = arith.constant 0 : i32
    return %c0_i32, %c0_i32_0, %c0_i32_1 : i32, i32, i32
  }
  func.func @transform_3(%arg0: i32) -> (i32, i32) {
    %c0_i32 = arith.constant 0 : i32
    %c0_i32_0 = arith.constant 0 : i32
    %c0_i32_1 = arith.constant 0 : i32
    return %c0_i32, %c0_i32_0 : i32, i32
  }
  func.func @transform_4(%arg0: i32) -> (i32, i32) {
    %c0_i32 = arith.constant 0 : i32
    %c0_i32_0 = arith.constant 0 : i32
    %c0_i32_1 = arith.constant 0 : i32
    return %c0_i32, %c0_i32_0 : i32, i32
  }
  func.func @transform_5(%arg0: i32) -> (i32, i32, i32) {
    %c0_i32 = arith.constant 0 : i32
    %c0_i32_0 = arith.constant 0 : i32
    %c0_i32_1 = arith.constant 0 : i32
    return %arg0, %c0_i32, %c0_i32_0 : i32, i32, i32
  }
}

</mosaic_0001>

<bundles_post_ra>
// kernel: tpu_custom_call.1
= control target key start
LH: loop header
LB: loop body
LE: loop exit
PB: predicated region body
PF: predicated region fallthrough
CT: control target
= control target key end

     0   :  { %10 = vsyncpa [#allocation4], 0  ;;  %s19573_s0 = inlined_call_operand.hbm [shape: bf16[2,656,128], index: 0, kind: input, shape index: {}]   ;;  %s19574_s1 = inlined_call_operand.hbm [shape: bf16[3,384,128], index: 1, kind: input, shape index: {}]   ;;  %s19575_s2 = inlined_call_operand.hbm [shape: bf16[3,384,128], index: 2, kind: input, shape index: {}]   ;;  %s19576_s3 = inlined_call_operand.vmem [shape: f32[2,128], index: 3, kind: input, shape index: {}]   ;;  %s19577_s4 = inlined_call_operand.hbm [shape: f32[576,128], index: 4, kind: input, shape index: {}]   ;;  %s19578_s5 = inlined_call_operand.hbm [shape: f32[2,512,128], index: 5, kind: output, shape index: {}]  }
   0x1   :  { %12 = vsyncpa [#allocation4 + $0x1], 0 }
   0x2   :  { %13 = vsyncpa [#allocation7], 0 }
   0x3   :  { %14 = vsyncpa [#allocation10], 0 }
   0x4   :  { %15 = vsyncpa [#allocation5], 0 }
   0x5   :  { %17 = vsyncpa [#allocation5 + $0x1], 0  ;;  %s15523_s18 = smov 0   ;;  %s15525_s19 = smov 0  }
   0x6   :  { %s15527_s20 = smov 0   ;;  %s15529_s21 = smov 0  }
   0x7 LB: > { %s15544_s22 = sadd.s32 4294967295, %s15479_s21   ;;  %s12692_s23 = sadd.s32 4294967294, %s15479_s21   ;;  %s15479_s21 = sphi %s15529_s21, %s20130_s21   ;;  %s15475_s20 = sphi %s15527_s20, %s20129_s20   ;;  %s15471_s19 = sphi %s15525_s19, %s20128_s19   ;;  %s15467_s18 = sphi %s15523_s18, %s20127_s18  }
   0x8   : > { %p43_p0 = scmp.ne.s32.totalorder %s15471_s19, %s15467_s18  ;;  %p19579_p1 = scmp.eq.s32.totalorder %s15544_s22, 0 }
   0x9   : > { %p151_p2 = scmp.eq.s32.totalorder %s15544_s22, 1  ;;  %p157_p3 = scmp.eq.s32.totalorder %s12692_s23, 1 }
   0xa   : > { %p15553_p4 = por %p19579_p1, %p43_p0  ;;  %p12693_p5 = scmp.ge.s32.totalorder %s15479_s21, 1 }
   0xb   : > { %p15558_p6 = por %p157_p3, %p43_p0  ;;  %p164_p7 = scmp.lt.s32.totalorder %s15479_s21, 3 }
   0xc   : > { %s19594_s24 = scalar_select %p15553_p4, 1, 0 }
   0xd   : > { %s19595_s25 = scalar_select %p15558_p6, 1, 0 }
   0xe   : > { %p15563_p8 = pnand %p12693_p5, %p164_p7  ;;  %s15481_s27 = smov [#allocation6]  }
   0xf   : > { %s176_s28 = sshll.u32 %s15481_s27, 4  ;;  %s15482_s30 = smov [#allocation8]   ;;  %s177_s28 = int_to_ptr.vmem [resolvable:$true] %s176_s28 }
  0x10   : > { %s19596_s26 = scalar_select %p15563_p8, 1, 0 }
  0x11   : > { %p14349_p9 = pneg %p15563_p8  ;;  %s189_s6 = sshll.u32 %s15482_s30, 4  ;;  %s190_s6 = int_to_ptr.vmem [resolvable:$true] %s189_s6 }
  0x12   : > { %s15483_s7 = smov [#allocation9]   ;;  %s15312_s9 = scalar_lea.vmem %s177_s28, 9216 }
  0x13   : > { %p15572_p11 = pnand %p14349_p9, %p19579_p1  ;;  %s205_s8 = sshll.u32 %s15483_s7, 4  ;;  %s206_s8 = int_to_ptr.vmem [resolvable:$true] %s205_s8 }
  0x14   : > { %p15313_p13 = scmp.ne.s32.totalorder %s177_s28, %s15312_s9  ;;  %p15320_p5 = scmp.lt.s32.totalorder %s177_s28, %s177_s28 }
  0x15   : > { %p15303_p12 = pneg %p15572_p11  ;;  %p15321_p7 = scmp.lt.s32.totalorder %s15312_s9, %s15312_s9 }
  0x17   : > { %p15315_p0 = pnand %p15313_p13, %p15303_p12  ;;  %p15322_p9 = por %p15321_p7, %p15320_p5 }
  0x19   : > { %p15316_p3 = pneg %p15315_p0 }
  0x1b   : > { %p15323_p10 = pnand %p15322_p9, %p15316_p3 }
  0x1d   : > { %15326 = shalt.err (!%p15323_p10)
}
  0x1e   : > { %s19580_s10 = smov 64   ;;  %s15485_s11 = smov 4  }
  0x1f   : > { %14352 = dma.hbm_to_vmem [thread:$0]  (!%p15572_p11), %s19574_s1, 9216, %s177_s28, [#allocation7], %s19580_s10, %s19580_s10, %s15485_s11  }
  0x20   : > { %s15338_s14 = scalar_lea.vmem %s190_s6, 9216  ;;  %p15346_p3 = scmp.lt.s32.totalorder %s190_s6, %s190_s6 }
  0x21   : > { %p15339_p13 = scmp.ne.s32.totalorder %s190_s6, %s15338_s14  ;;  %p15347_p10 = scmp.lt.s32.totalorder %s15338_s14, %s15338_s14 }
  0x23   : > { %p15341_p0 = pnand %p15339_p13, %p15303_p12  ;;  %p15348_p7 = por %p15347_p10, %p15346_p3 }
  0x25   : > { %p15342_p5 = pneg %p15341_p0 }
  0x27   : > { %p15349_p9 = pnand %p15348_p7, %p15342_p5 }
  0x29   : > { %15352 = shalt.err (!%p15349_p9)
}
  0x2a   : > { %14355 = dma.hbm_to_vmem [thread:$0]  (!%p15572_p11), %s19575_s2, 9216, %s190_s6, [#allocation7], %s19580_s10, %s19580_s10, %s15485_s11  }
  0x2b   : > { %s15364_s17 = scalar_lea.vmem %s206_s8, 9216  ;;  %p15372_p3 = scmp.lt.s32.totalorder %s206_s8, %s206_s8 }
  0x2c   : > { %p15365_p1 = scmp.ne.s32.totalorder %s206_s8, %s15364_s17  ;;  %p15373_p5 = scmp.lt.s32.totalorder %s15364_s17, %s15364_s17 }
  0x2e   : > { %p15367_p13 = pnand %p15365_p1, %p15303_p12  ;;  %p15374_p10 = por %p15373_p5, %p15372_p3 }
  0x30   : > { %p15368_p0 = pneg %p15367_p13 }
  0x32   : > { %p15375_p7 = pnand %p15374_p10, %p15368_p0 }
  0x34   : > { %15378 = shalt.err (!%p15375_p7)
}
  0x35   : > { %s15486_s23 = smov 128   ;;  %s15487_s27 = smov 8  }
  0x36   : > { %14358 = dma.hbm_to_vmem [thread:$0]  (!%p15572_p11), %s19577_s4, 9216, %s206_s8, [#allocation10], %s15486_s23, %s15486_s23, %s15487_s27  }
  0x37   : > { %s15609_s6 = sadd.s32 1, %s15479_s21   ;;  %s30_s9 = sadd.s32 1, %s15475_s20 }
  0x38   : > { %s27_s7 = ssub.s32 %s15479_s21, %s15609_s6  ;;  %p37_p12 = scmp.ne.s32.totalorder %s15475_s20, %s15471_s19 }
  0x39   : > { %p28_p1 = scmp.eq.s32.totalorder %s27_s7, 0  ;;  %p38_p9 = scmp.eq.s32.totalorder %s15479_s21, 0 }
  0x3a   : > { %p14370_p13 = scmp.lt.s32.totalorder %s15479_s21, 2  ;;  %p15623_p3 = por %p151_p2, %p37_p12 }
  0x3b   : > { %s15619_s12 = scalar_select %p28_p1, %s15475_s20, %s30_s9  }
  0x3c   : > { %p39_p0 = por %p38_p9, %p37_p12  ;;  %s219_s29 = sand.u32 1, %s15475_s20  }
  0x3d   : > { %s19598_s13 = scalar_select %p15623_p3, 1, 0 }
  0x3e   : > { %s14331_s14 = smul.u32 5248, %s15479_s21  ;;  %p15629_p11 = pnand %p14370_p13, %p39_p0 }
  0x3f   : > { %s14330_s8 = smul.u32 328, %s219_s29  ;;  %s15640_s30 = scalar_lea.sflag [#allocation4], %s219_s29 }
  0x40   : > { %s15636_s23 = scalar_lea.hbm %s19573_s0, %s14331_s14  ;;  %p15381_p5 = pneg %p15629_p11 }
  0x41   : > { %s223_s27 = scalar_lea.vmem [#allocation3], %s14330_s8  ;;  %s15379_s7 = scalar_lea.hbm %s15636_s23, 5248 }
  0x42   : > { %s230_s28 = sshll.u32 %s223_s27, 4  ;;  %p15380_p2 = scmp.ne.s32.totalorder %s15636_s23, %s15379_s7  ;;  %s15638_s28 = int_to_ptr.vmem [resolvable:$true] %s230_s28 }
  0x43   : > { %s15384_s14 = scalar_lea.hbm %s19573_s0, 10496  ;;  %p15385_p1 = scmp.lt.s32.totalorder %s15636_s23, %s19573_s0 }
  0x44   : > { %p15382_p10 = pnand %p15381_p5, %p15380_p2  ;;  %p15386_p12 = scmp.lt.s32.totalorder %s15384_s14, %s15379_s7 }
  0x46   : > { %p15383_p7 = pneg %p15382_p10  ;;  %p15387_p9 = por %p15386_p12, %p15385_p1 }
  0x48   : > { %p15388_p13 = pnand %p15387_p9, %p15383_p7 }
  0x4a   : > { %15391 = shalt.err (!%p15388_p13)
}
  0x4b   : > { %s15392_s29 = scalar_lea.vmem %s15638_s28, 5248  ;;  %s15488_s8 = smov [#allocation3]  }
  0x4c   : > { %p15393_p0 = scmp.ne.s32.totalorder %s15638_s28, %s15392_s29  ;;  %s15397_s27 = sshll.u32 %s15488_s8, 4  ;;  %s15398_s27 = int_to_ptr.vmem [resolvable:$false] %s15397_s27 }
  0x4d   : > { %s15399_s9 = scalar_lea.vmem %s15398_s27, 10496  ;;  %p15400_p10 = scmp.lt.s32.totalorder %s15638_s28, %s15398_s27 }
  0x4e   : > { %p15395_p6 = pnand %p15393_p0, %p15381_p5  ;;  %p15401_p3 = scmp.lt.s32.totalorder %s15399_s9, %s15392_s29 }
  0x50   : > { %p15396_p2 = pneg %p15395_p6  ;;  %p15402_p4 = por %p15401_p3, %p15400_p10 }
  0x52   : > { %p15403_p8 = pnand %p15402_p4, %p15396_p2 }
  0x54   : > { %15406 = shalt.err (!%p15403_p8)
}
  0x55   : > { %s19600_s10 = smov 64   ;;  %p19601_p6 = scmp.ne.s32.totalorder %s19596_s26, 0 }
  0x56   : > { %14362 = dma.hbm_to_vmem [thread:$0]  (!%p15629_p11), %s15636_s23, 5248, %s15638_s28, %s15640_s30, %s19600_s10, %s19600_s10, %s15485_s11  }
  0x57   : > { %242 = sbr.rel (%p19601_p6) target bundleno = 1779 (0x6f3), region = 40 }
  0x5c   : > { %s15667_s7 = sand.u32 1, %s15471_s19   ;;  %p19602_p4 = scmp.ne.s32.totalorder %s19594_s24, 0 }
  0x5d   : > { %s14332_s16 = smul.u32 328, %s15667_s7  ;;  %s245_s14 = scalar_lea.sflag [#allocation4], %s15667_s7 }
  0x5f   : > { %s15671_s17 = scalar_lea.vmem [#allocation3], %s14332_s16 }
  0x60   : > { %15450 = dma.done.wait (%p19602_p4), %s245_s14, 5248  }
  0x61   : > { %15452 = vsyncadd (%p19602_p4), %s245_s14, 4294962048  ;;  %p19603_p8 = scmp.eq.s32.totalorder %s15544_s22, 0 }
  0x63   : > { %15454 = dma.done.wait (%p19603_p8), [#allocation7], 18432   ;;  %p19604_p3 = pmov %p19603_p8 }
  0x65   : > { %15456 = vsyncadd (%p19604_p3), [#allocation7], 4294948864  ;;  %p19605_p11 = pmov %p19604_p3 }
  0x66   : > { %p19606_p5 = pmov %p19604_p3 }
  0x67   : > { %15458 = dma.done.wait (%p19605_p11), [#allocation10], 9216  }
  0x68   : > { %15460 = vsyncadd (%p19606_p5), [#allocation10], 4294958080  ;;  %v19584_v0 = vmov 0   ;;  %v14417_v1 = vld [vmem:[#allocation6 + $0xf8] sm:$0xff]   ;;  %v14419_v3 = vld [vmem:[#allocation6 + $0xf0] sm:$0xff]   ;;  %v19607_v41 = vmov 0 }
  0x69   : > { %3438 = vmatprep.subr.bf16.mxu0 %v19584_v0  ;;  %v14418_v2 = vld [vmem:[#allocation6 + $0x178] sm:$0xff]   ;;  %v14420_v4 = vld [vmem:[#allocation6 + $0x170] sm:$0xff]   ;;  %v14422_v5 = vld [vmem:[#allocation6 + $0x168] sm:$0xff]   ;;  %vm1501_vm0 = vsmask.f32 3328  ;;  %vm8411_vm6 = vcmask 1043459  }
  0x6a   : > { %3439 = vmatpush1.bf16.msra.mxu0 %v14417_v1  ;;  %13826 = vmatprep.subr.bf16.mxu1 %v14418_v2  ;;  %v14421_v6 = vld [vmem:[#allocation6 + $0xe8] sm:$0xff]   ;;  %v14424_v7 = vld [vmem:[#allocation6 + $0x160] sm:$0xff]   ;;  %vm1502_vm1 = vsmask.f32 7440  ;;  %v14426_v9 = vld [vmem:[#allocation6 + $0x158] sm:$0xff]   ;;  %vm7753_vm8 = vcmask 1043456  }
  0x6b   : > { %3440 = vmatprep.subr.bf16.mxu0 %v19584_v0  ;;  %13827 = vmatpush3.bf16.msra.mxu1 %v14418_v2  ;;  %v14423_v8 = vld [vmem:[#allocation6 + $0xe0] sm:$0xff]   ;;  %v14425_v10 = vld [vmem:[#allocation6 + $0xd8] sm:$0xff]   ;;  %v14428_v11 = vld [vmem:[#allocation6 + $0x150] sm:$0xff]   ;;  %vm533_vm3 = vsmask.f32 256  ;;  %vm7830_vm12 = vcmask 1040384  }
  0x6c   : > { %13828 = vmatprep.subr.bf16.mxu1 %v14420_v4  ;;  %v1423_v12 = vld [vmem:[%s15671_s17 + $0x10] sm:$0xf]  ;;  %v14427_v13 = vld [vmem:[#allocation6 + $0xd0] sm:$0xff]   ;;  %v1424_v14 = vld [vmem:[%s15671_s17 + $0x14] sm:$0xf]  ;;  %s12703_s23 = sshll.u32 %s15667_s7, 9 }
  0x6d   : > { %v1425_v15 = vld [vmem:[%s15671_s17 + $0x18] sm:$0xf]  ;;  %v1426_v16 = vld [vmem:[%s15671_s17 + $0x1c] sm:$0xf]  ;;  %v1534_v17 = vshll.u32 %v1423_v12, 16  ;;  %v1538_v18 = vshrl.u32 %v1423_v12, 16  ;;  %vm15702_vm2 = vmor %vm1501_vm0, %vm1502_vm1 }
  0x6e   : > { %3441 = vmatpush1.bf16.msra.mxu0 %v14419_v3  ;;  %v1544_v19 = vshll.u32 %v1424_v14, 16  ;;  %v1548_v20 = vshrl.u32 %v1424_v14, 16  ;;  %v1554_v21 = vshll.u32 %v1425_v15, 16  ;;  %v1558_v22 = vshrl.u32 %v1425_v15, 16  ;;  %v14430_v25 = vld [vmem:[#allocation6 + $0x148] sm:$0xff]   ;;  %v14432_v56 = vld [vmem:[#allocation6 + $0x140] sm:$0xff]   ;;  %vm7831_vm13 = vmand %vm7830_vm12, %vm533_vm3 }
  0x6f   : > { %3442 = vmatprep.subr.bf16.mxu0 %v19584_v0  ;;  %13829 = vmatpush3.bf16.msra.mxu1 %v14420_v4  ;;  %v1564_v23 = vshll.u32 %v1426_v16, 16  ;;  %v1568_v24 = vshrl.u32 %v1426_v16, 16  ;;  %v15695_v26 = vrot.slane %v1534_v17, 5  ;;  %v1540_v27 = vrot.slane %v1538_v18, 4  ;;  %v14429_v30 = vld [vmem:[#allocation6 + $0xc8] sm:$0xff]   ;;  %v14431_v62 = vld [vmem:[#allocation6 + $0xc0] sm:$0xff]   ;;  %vm18545_vm14 = vmand %vm7753_vm8, %vm1501_vm0 }
  0x70   : > { %13830 = vmatprep.subr.bf16.mxu1 %v14422_v5  ;;  %v1546_v28 = vrot.slane %v1544_v19, 5  ;;  %v1550_v29 = vrot.slane %v1548_v20, 4  ;;  %v1556_v31 = vrot.slane %v1554_v21, 5  ;;  %v1560_v32 = vrot.slane %v1558_v22, 4  ;;  %v1427_v35 = vld [vmem:[%s15671_s17 + $0x20] sm:$0xf] }
  0x71   : > { %v1566_v33 = vrot.slane %v1564_v23, 5  ;;  %v1570_v34 = vrot.slane %v1568_v24, 4  ;;  %v1541_v36 = vor.u32 %v1540_v27, %v15695_v26  ;;  %v1428_v38 = vld [vmem:[%s15671_s17 + $0x24] sm:$0xf]  ;;  %v1574_v39 = vshll.u32 %v1427_v35, 16  ;;  %s19096_s28 = scalar_lea.vmem [#allocation11], %s12703_s23 }
  0x72   : > { %3443 = vmatpush1.bf16.msra.mxu0 %v14421_v6  ;;  %v1551_v37 = vor.u32 %v1550_v29, %v1546_v28  ;;  %v1578_v40 = vshrl.u32 %v1427_v35, 16  ;;  %v19608_v41 = vsel %vm15702_vm2, 4294967295, %v19607_v41  ;;  %v1561_v42 = vor.u32 %v1560_v32, %v1556_v31  ;;  %v1429_v46 = vld [vmem:[%s15671_s17 + $0x28] sm:$0xf]  ;;  %v1430_v51 = vld [vmem:[%s15671_s17 + $0x2c] sm:$0xf] }
  0x73   : > { %3444 = vmatprep.subr.bf16.mxu0 %v19584_v0  ;;  %13831 = vmatpush3.bf16.msra.mxu1 %v14422_v5  ;;  %19609 = vst [vmem:[#allocation16_spill] sm:$0xff] %v19608_v41  ;;  %v1571_v43 = vor.u32 %v1570_v34, %v1566_v33  ;;  %v1584_v44 = vshll.u32 %v1428_v38, 16  ;;  %v1588_v45 = vshrl.u32 %v1428_v38, 16  ;;  %v1542_v47 = vrot.slane %v1541_v36, 4  ;;  %v1431_v61 = vld [vmem:[%s15671_s17 + $0x30] sm:$0xf] }
  0x74   : > { %13832 = vmatprep.subr.bf16.mxu1 %v14424_v7  ;;  %v1552_v48 = vrot.slane %v1551_v37, 4  ;;  %v1576_v49 = vrot.slane %v1574_v39, 5  ;;  %v1580_v50 = vrot.slane %v1578_v40, 4  ;;  %v1562_v52 = vrot.slane %v1561_v42, 4  ;;  %v1432_v4 = vld [vmem:[%s15671_s17 + $0x34] sm:$0xf] }
  0x75   : > { %v1572_v53 = vrot.slane %v1571_v43, 4  ;;  %v1586_v54 = vrot.slane %v1584_v44, 5  ;;  %v1590_v55 = vrot.slane %v1588_v45, 4  ;;  %v1547_v57 = vsel %vm15702_vm2, %v1542_v47, %v1546_v28  ;;  %v14434_v14 = vld [vmem:[#allocation6 + $0x138] sm:$0xff]   ;;  %v1434_v19 = vld [vmem:[%s15671_s17 + $0x3c] sm:$0xf] }
  0x76   : > { %3445 = vmatpush1.bf16.msra.mxu0 %v14423_v8  ;;  %v1557_v58 = vsel %vm15702_vm2, %v1552_v48, %v1556_v31  ;;  %v1581_v59 = vor.u32 %v1580_v50, %v1576_v49  ;;  %v1594_v60 = vshll.u32 %v1429_v46, 16  ;;  %v1567_v63 = vsel %vm15702_vm2, %v1562_v52, %v1566_v33  ;;  %2391 = vst [vmem:[#allocation2 + $0x38] sm:$0xf] %v1547_v57  ;;  %v1435_v29 = vld [vmem:[%s15671_s17 + $0x40] sm:$0xf]  ;;  %s13418_s30 = sshll.u32 %s15544_s22, 13 }
  0x77   : > { %3446 = vmatprep.subr.bf16.mxu0 %v19584_v0  ;;  %13833 = vmatpush3.bf16.msra.mxu1 %v14424_v7  ;;  %2392 = vst [vmem:[#allocation2 + $0x44] sm:$0xf] %v1557_v58  ;;  %v1577_v1 = vsel %vm15702_vm2, %v1572_v53, %v1576_v49  ;;  %v1591_v2 = vor.u32 %v1590_v55, %v1586_v54  ;;  %v1598_v3 = vshrl.u32 %v1429_v46, 16  ;;  %2393 = vst [vmem:[#allocation2 + $0x50] sm:$0xf] %v1567_v63  ;;  %v14446_v43 = vld [vmem:[#allocation6 + $0x38] sm:$0xff]   ;;  %s19526_s9 = scalar_lea.hbm %s19578_s5, %s13418_s30 }
  0x78   : > { %13834 = vmatprep.subr.bf16.mxu1 %v14426_v9  ;;  %v1582_v5 = vrot.slane %v1581_v59, 4  ;;  %2394 = vst [vmem:[#allocation2 + $0x5c] sm:$0xf] %v1577_v1  ;;  %v1596_v6 = vrot.slane %v1594_v60, 5  ;;  %v1604_v7 = vshll.u32 %v1430_v51, 16  ;;  %v1608_v8 = vshrl.u32 %v1430_v51, 16 }
  0x79   : > { %v1618_v12 = vshrl.u32 %v1431_v61, 16  ;;  %v1624_v18 = vshll.u32 %v1432_v4, 16  ;;  %v1628_v27 = vshrl.u32 %v1432_v4, 16  ;;  %v1644_v34 = vshll.u32 %v1434_v19, 16  ;;  %v1436_v35 = vld [vmem:[%s15671_s17 + $0x44] sm:$0xf] }
  0x7a   : > { %3447 = vmatpush1.bf16.msra.mxu0 %v14425_v10  ;;  %v1600_v10 = vrot.slane %v1598_v3, 4  ;;  %v1587_v15 = vsel %vm15702_vm2, %v1582_v5, %v1586_v54  ;;  %v1606_v16 = vrot.slane %v1604_v7, 5  ;;  %v1610_v17 = vrot.slane %v1608_v8, 4  ;;  %v1437_v52 = vld [vmem:[%s15671_s17 + $0x48] sm:$0xf]  ;;  %v14438_v58 = vld [vmem:[#allocation6 + $0x128] sm:$0xff]  }
  0x7b   : > { %3448 = vmatprep.subr.bf16.mxu0 %v19584_v0  ;;  %13835 = vmatpush3.bf16.msra.mxu1 %v14426_v9  ;;  %v1592_v9 = vrot.slane %v1591_v2, 4  ;;  %2395 = vst [vmem:[#allocation2 + $0x68] sm:$0xf] %v1587_v15  ;;  %v1620_v23 = vrot.slane %v1618_v12, 4  ;;  %v1630_v37 = vrot.slane %v1628_v27, 4  ;;  %v1648_v39 = vshrl.u32 %v1434_v19, 16 }
  0x7c   : > { %13836 = vmatprep.subr.bf16.mxu1 %v14428_v11  ;;  %v1601_v21 = vor.u32 %v1600_v10, %v1596_v6  ;;  %v1611_v24 = vor.u32 %v1610_v17, %v1606_v16  ;;  %v1646_v48 = vrot.slane %v1644_v34, 5  ;;  %v1654_v50 = vshll.u32 %v1435_v29, 16  ;;  %v1438_v3 = vld [vmem:[%s15671_s17 + $0x4c] sm:$0xf]  ;;  %v14462_v27 = vld [vmem:[#allocation6 + $0x28] sm:$0xff]   ;;  %s12590_s29 = sshll.u32 %s19096_s28, 4  ;;  %s19528_s29 = int_to_ptr.vmem [resolvable:$true] %s12590_s29 }
  0x7d   : > { %v1597_v20 = vsel %vm15702_vm2, %v1592_v9, %v1596_v6  ;;  %v1650_v49 = vrot.slane %v1648_v39, 4  ;;  %v1658_v51 = vshrl.u32 %v1435_v29, 16  ;;  %v1664_v57 = vshll.u32 %v1436_v35, 16  ;;  %v14440_v5 = vld [vmem:[#allocation6 + $0x120] sm:$0xff]   ;;  %v14633_v41 = vld [vmem:[#allocation6 + $0x1d8] sm:$0xff]   ;;  %s12577_s22 = scalar_lea.sflag [#allocation5], %s15667_s7 }
  0x7e   : > { %3449 = vmatpush1.bf16.msra.mxu0 %v14427_v13  ;;  %v1433_v13 = vld [vmem:[%s15671_s17 + $0x38] sm:$0xf]  ;;  %2396 = vst [vmem:[#allocation2 + $0x74] sm:$0xf] %v1597_v20  ;;  %v1602_v31 = vrot.slane %v1601_v21, 4  ;;  %v1612_v36 = vrot.slane %v1611_v24, 4 }
  0x7f   : > { %3450 = vmatprep.subr.bf16.mxu0 %v19584_v0  ;;  %13837 = vmatpush3.bf16.msra.mxu1 %v14428_v11  ;;  %v1614_v11 = vshll.u32 %v1431_v61, 16  ;;  %v1634_v28 = vshll.u32 %v1433_v13, 16  ;;  %v1638_v33 = vshrl.u32 %v1433_v13, 16  ;;  %v14433_v40 = vld [vmem:[#allocation2 + $0x44] ss:$12 sps:$4 sm:$0xff]   ;;  %v1651_v59 = vor.u32 %v1650_v49, %v1646_v48  ;;  %v14468_v39 = vld [vmem:[#allocation6 + $0x20] sm:$0xff]  }
  0x80   : > { %13838 = vmatprep.subr.bf16.mxu1 %v14430_v25  ;;  %v1607_v42 = vsel %vm15702_vm2, %v1602_v31, %v1606_v16  ;;  %13842 = vmatprep.mubr.bf16.mxu1 %v14433_v40  ;;  %v1656_v60 = vrot.slane %v1654_v50, 5  ;;  %v1660_v61 = vrot.slane %v1658_v51, 4  ;;  %v1666_v2 = vrot.slane %v1664_v57, 5  ;;  %v1440_v29 = vld [vmem:[%s15671_s17 + $0x54] sm:$0xf]  ;;  %v14442_v31 = vld [vmem:[#allocation6 + $0x118] sm:$0xff]  }
  0x81   : > { %v1616_v22 = vrot.slane %v1614_v11, 5  ;;  %v1636_v38 = vrot.slane %v1634_v28, 5  ;;  %2397 = vst [vmem:[#allocation2 + $0x80] sm:$0xf] %v1607_v42  ;;  %v1640_v47 = vrot.slane %v1638_v33, 4  ;;  %v1674_v4 = vshll.u32 %v1437_v52, 16 }
  0x82   : > { %3451 = vmatpush1.bf16.msra.mxu0 %v14429_v30  ;;  %v14436_v30 = vld [vmem:[#allocation6 + $0x130] sm:$0xff]   ;;  %v1652_v6 = vrot.slane %v1651_v59, 4  ;;  %v1661_v7 = vor.u32 %v1660_v61, %v1656_v60  ;;  %v1678_v9 = vshrl.u32 %v1437_v52, 16  ;;  %v1684_v12 = vshll.u32 %v1438_v3, 16  ;;  %v456_v52 = vld [vmem:[%s15671_s17 + $0x10] sm:$0xf] }
  0x83   : > { %3452 = vmatprep.subr.bf16.mxu0 %v19584_v0  ;;  %13839 = vmatpush3.bf16.msra.mxu1 %v14430_v25  ;;  %v1626_v25 = vrot.slane %v1624_v18, 5  ;;  %v1621_v32 = vor.u32 %v1620_v23, %v1616_v22  ;;  %v1617_v44 = vsel %vm15702_vm2, %v1612_v36, %v1616_v22  ;;  %v14435_v53 = vld [vmem:[#allocation2 + $0x5c] ss:$12 sps:$4 sm:$0xff]   ;;  %v1676_v11 = vrot.slane %v1674_v4, 5  ;;  %v294_v51 = vld [vmem:[%s15671_s17 + $0x18] sm:$0xf] }
  0x84   : > { %13840 = vmatprep.subr.bf16.mxu1 %v14432_v56  ;;  %2398 = vst [vmem:[#allocation2 + $0x8c] sm:$0xf] %v1617_v44  ;;  %v1688_v13 = vshrl.u32 %v1438_v3, 16  ;;  %v1657_v16 = vsel %vm15702_vm2, %v1652_v6, %v1656_v60  ;;  %v1662_v17 = vrot.slane %v1661_v7, 4  ;;  %v1680_v19 = vrot.slane %v1678_v9, 4  ;;  %v14444_v40 = vld [vmem:[#allocation6 + $0x110] sm:$0xff]  }
  0x85   : > { %v1622_v45 = vrot.slane %v1621_v32, 4  ;;  %v1631_v46 = vor.u32 %v1630_v37, %v1626_v25  ;;  %2402 = vst [vmem:[#allocation2 + $0xbc] sm:$0xf] %v1657_v16  ;;  %v1686_v20 = vrot.slane %v1684_v12, 5  ;;  %vm534_vm4 = vsmask.f32 4368 }
  0x86   : > { %3453 = vmatpush1.bf16.msra.mxu0 %v14431_v62  ;;  %v1668_v62 = vshrl.u32 %v1436_v35, 16  ;;  %v1690_v21 = vrot.slane %v1688_v13, 4  ;;  %v1667_v22 = vsel %vm15702_vm2, %v1662_v17, %v1666_v2  ;;  %v1681_v24 = vor.u32 %v1680_v19, %v1676_v11  ;;  %376 = vst [vmem:[#allocation2 + $0x4c] sm:$0xf] %v294_v51  ;;  %v14474_v57 = vld [vmem:[#allocation6 + $0x18] sm:$0xff]   ;;  %v14447_v59 = vld [vmem:[#allocation6 + $0x108] sm:$0xff]   ;;  %vm15777_vm5 = vmor %vm533_vm3, %vm534_vm4 }
  0x87   : > { %3454 = vmatprep.subr.bf16.mxu0 %v19584_v0  ;;  %13841 = vmatpush3.bf16.msra.mxu1 %v14432_v56  ;;  %v1627_v54 = vsel %vm15702_vm2, %v1622_v45, %v1626_v25  ;;  %v1632_v55 = vrot.slane %v1631_v46, 4  ;;  %v1641_v56 = vor.u32 %v1640_v47, %v1636_v38  ;;  %v1439_v25 = vld [vmem:[%s15671_s17 + $0x50] sm:$0xf]  ;;  %2403 = vst [vmem:[#allocation2 + $0xc8] sm:$0xf] %v1667_v22  ;;  %v1704_v37 = vshll.u32 %v1440_v29, 16 }
  0x88   : > { %4256 = vmatprep.subr.bf16.mxu1 %v19584_v0  ;;  %2399 = vst [vmem:[#allocation2 + $0x98] sm:$0xf] %v1627_v54  ;;  %v1670_v8 = vrot.slane %v1668_v62, 4  ;;  %v14437_v15 = vld [vmem:[#allocation2 + $0x74] ss:$12 sps:$4 sm:$0xff]   ;;  %v1682_v33 = vrot.slane %v1681_v24, 4 }
  0x89   : > { %v1637_v63 = vsel %vm15702_vm2, %v1632_v55, %v1636_v38  ;;  %v1642_v1 = vrot.slane %v1641_v56, 4  ;;  %v1694_v34 = vshll.u32 %v1439_v25, 16  ;;  %v1698_v35 = vshrl.u32 %v1439_v25, 16  ;;  %v293_v45 = vld [vmem:[%s15671_s17 + $0x14] sm:$0xf]  ;;  %v14481_v22 = vld [vmem:[#allocation6 + $0x10] sm:$0xff]  }
  0x8a   : > { %3455 = vmatpush2.bf16.msra.mxu0 %v14434_v14  ;;  %13843 = vmatmul.mubr.bf16.vlgmr.msra.gmra.mxu1 %v14435_v53  ;;  %2400 = vst [vmem:[#allocation2 + $0xa4] sm:$0xf] %v1637_v63  ;;  %v14456_v14 = vld [vmem:[#allocation6 + $0x30] sm:$0xff]   ;;  %v1671_v18 = vor.u32 %v1670_v8, %v1666_v2  ;;  %v1708_v38 = vshrl.u32 %v1440_v29, 16  ;;  %v1687_v42 = vsel %vm15702_vm2, %v1682_v33, %v1686_v20  ;;  %v1706_v47 = vrot.slane %v1704_v37, 5  ;;  %v14487_v37 = vld [vmem:[#allocation6 + $0x8] sm:$0xff]  }
  0x8b   : > { %3456 = vmatprep.subr.bf16.mxu0 %v19584_v0  ;;  %4257 = vmatpush1.bf16.msra.mxu1 %v14446_v43  ;;  %v1647_v10 = vsel %vm15702_vm2, %v1642_v1, %v1646_v48  ;;  %v1696_v43 = vrot.slane %v1694_v34, 5  ;;  %v1700_v44 = vrot.slane %v1698_v35, 4  ;;  %2405 = vst [vmem:[#allocation2 + $0xe0] sm:$0xf] %v1687_v42  ;;  %375 = vst [vmem:[#allocation2 + $0x40] sm:$0xf] %v293_v45 }
  0x8c   : > { %4258 = vmatprep.subr.bf16.mxu1 %v19584_v0  ;;  %2401 = vst [vmem:[#allocation2 + $0xb0] sm:$0xf] %v1647_v10  ;;  %13846 = vmatprep.mubr.bf16.mxu1 %v14437_v15  ;;  %v1672_v23 = vrot.slane %v1671_v18, 4  ;;  %v1710_v48 = vrot.slane %v1708_v38, 4  ;;  %v457_v53 = vld [vmem:[%s15671_s17 + $0x14] sm:$0xf] }
  0x8d   : > { %v1701_v50 = vor.u32 %v1700_v44, %v1696_v43  ;;  %v458_v54 = vld [vmem:[%s15671_s17 + $0x18] sm:$0xf]  ;;  %v569_v55 = vshrl.u32 %v456_v52, 16  ;;  %v578_v61 = vshrl.u32 %v457_v53, 16  ;;  %v581_v63 = vshll.u32 %v457_v53, 16  ;;  %s15407_s10 = scalar_lea.vmem %s19528_s29, 8192 }
  0x8e   : > { %3457 = vmatpush2.bf16.msra.mxu0 %v14436_v30  ;;  %v1691_v30 = vor.u32 %v1690_v21, %v1686_v20  ;;  %v1677_v32 = vsel %vm15702_vm2, %v1672_v23, %v1676_v11  ;;  %v1711_v56 = vor.u32 %v1710_v48, %v1706_v47  ;;  %v587_v1 = vshrl.u32 %v458_v54, 16  ;;  %v1441_v3 = vld [vmem:[%s15671_s17 + $0x58] sm:$0xf]  ;;  %v1442_v6 = vld [vmem:[%s15671_s17 + $0x5c] sm:$0xf]  ;;  %p15408_p7 = scmp.ne.s32.totalorder %s19528_s29, %s15407_s10  ;;  %p20124_p1 = scmp.ne.s32.totalorder %s19598_s13, 0 }
  0x8f   : > { %3458 = vmatprep.subr.bf16.mxu0 %v19584_v0  ;;  %4259 = vmatpush1.bf16.msra.mxu1 %v14456_v14  ;;  %v14439_v28 = vld [vmem:[#allocation2 + $0x8c] ss:$12 sps:$4 sm:$0xff]   ;;  %2404 = vst [vmem:[#allocation2 + $0xd4] sm:$0xf] %v1677_v32  ;;  %v1702_v60 = vrot.slane %v1701_v50, 4  ;;  %v15767_v62 = vrot.slane %v569_v55, 7 }
  0x90   : > { %4260 = vmatprep.subr.bf16.mxu1 %v19584_v0  ;;  %v1692_v36 = vrot.slane %v1691_v30, 4  ;;  %v590_v2 = vshll.u32 %v458_v54, 16  ;;  %v1712_v7 = vrot.slane %v1711_v56, 4  ;;  %v19610_v8 = vmov 0  ;;  %v14449_v14 = vld [vmem:[#allocation6 + $0x100] sm:$0xff]   ;;  %p15409_p12 = pnand %p15408_p7, %p20124_p1  ;;  %s15490_s16 = smov [#allocation11]  }
  0x91   : > { %v1707_v4 = vsel %vm15702_vm2, %v1702_v60, %v1706_v47  ;;  %v19611_v8 = vsel %vm15777_vm5, 4294967295, %v19610_v8  ;;  %v576_v9 = vrot.slane %v15767_v62, 4  ;;  %v15782_v10 = vrot.slane %v587_v1, 7  ;;  %v1443_v25 = vld [vmem:[%s15671_s17 + $0x60] sm:$0xf]  ;;  %s15411_s14 = sshll.u32 %s15490_s16, 4  ;;  %s15412_s14 = int_to_ptr.vmem [resolvable:$false] %s15411_s14 }
  0x92   : > { %3459 = vmatpush2.bf16.msra.mxu0 %v14438_v58  ;;  %13847 = vmatmul.mubr.bf16.gmra.mxu1 %v14439_v28  ;;  %v1697_v49 = vsel %vm15702_vm2, %v1692_v36, %v1696_v43  ;;  %v14443_v58 = vld [vmem:[#allocation2 + $0xbc] ss:$12 sps:$4 sm:$0xff]   ;;  %2407 = vst [vmem:[#allocation2 + $0xf8] sm:$0xf] %v1707_v4  ;;  %19612 = vst [vmem:[#allocation17_spill] sm:$0xff] %v19611_v8  ;;  %v1714_v11 = vshll.u32 %v1441_v3, 16  ;;  %p15410_p9 = pneg %p15409_p12  ;;  %p15414_p13 = scmp.lt.s32.totalorder %s19528_s29, %s15412_s14 }
  0x93   : > { %3460 = vmatprep.subr.bf16.mxu0 %v19584_v0  ;;  %4261 = vmatpush1.bf16.msra.mxu1 %v14462_v27  ;;  %v14441_v46 = vld [vmem:[#allocation2 + $0xa4] ss:$12 sps:$4 sm:$0xff]   ;;  %2406 = vst [vmem:[#allocation2 + $0xec] sm:$0xf] %v1697_v49  ;;  %v1718_v12 = vshrl.u32 %v1441_v3, 16  ;;  %v1724_v17 = vshll.u32 %v1442_v6, 16  ;;  %v592_v18 = vor.u32 %v590_v2, %v15782_v10 }
  0x94   : > { %4262 = vmatprep.subr.bf16.mxu1 %v19584_v0  ;;  %13850 = vmatprep.mubr.bf16.mxu1 %v14441_v46  ;;  %v1716_v19 = vrot.slane %v1714_v11, 5  ;;  %v1728_v21 = vshrl.u32 %v1442_v6, 16  ;;  %v594_v27 = vrot.slane %v15782_v10, 4  ;;  %v1444_v32 = vld [vmem:[%s15671_s17 + $0x64] sm:$0xf]  ;;  %v1734_v34 = vshll.u32 %v1443_v25, 16 }
  0x95   : > { %v1720_v20 = vrot.slane %v1718_v12, 4  ;;  %v1726_v24 = vrot.slane %v1724_v17, 5  ;;  %v1738_v35 = vshrl.u32 %v1443_v25, 16  ;;  %v1744_v36 = vshll.u32 %v1444_v32, 16  ;;  %v295_v42 = vld [vmem:[%s15671_s17 + $0x1c] sm:$0xf] }
  0x96   : > { %3461 = vmatpush2.bf16.msra.mxu0 %v14440_v5  ;;  %v580_v5 = vrot.slane %v578_v61, 7  ;;  %v14445_v13 = vld [vmem:[#allocation2 + $0xd4] ss:$12 sps:$4 sm:$0xff]   ;;  %v1717_v29 = vsel %vm15702_vm2, %v1712_v7, %v1716_v19  ;;  %v1730_v33 = vrot.slane %v1728_v21, 4  ;;  %v1736_v45 = vrot.slane %v1734_v34, 5  ;;  %v14511_v34 = vld [vmem:[#allocation6 + $0x70] sm:$0xff]  }
  0x97   : > { %3462 = vmatprep.subr.bf16.mxu0 %v19584_v0  ;;  %4263 = vmatpush1.bf16.msra.mxu1 %v14468_v39  ;;  %v1721_v30 = vor.u32 %v1720_v20, %v1716_v19  ;;  %2408 = vst [vmem:[#allocation2 + $0x104] sm:$0xf] %v1717_v29  ;;  %v296_v43 = vld [vmem:[%s15671_s17 + $0x20] sm:$0xf]  ;;  %v1740_v46 = vrot.slane %v1738_v35, 4  ;;  %v1746_v49 = vrot.slane %v1744_v36, 5 }
  0x98   : > { %4264 = vmatprep.subr.bf16.mxu1 %v19584_v0  ;;  %v583_v15 = vor.u32 %v581_v63, %v580_v5  ;;  %v585_v16 = vrot.slane %v580_v5, 4  ;;  %v1731_v39 = vor.u32 %v1730_v33, %v1726_v24  ;;  %377 = vst [vmem:[#allocation2 + $0x58] sm:$0xf] %v295_v42  ;;  %378 = vst [vmem:[#allocation2 + $0x64] sm:$0xf] %v296_v43  ;;  %v14495_v63 = vld [vmem:[#allocation6] sm:$0xff]  }
  0x99   : > { %v1722_v38 = vrot.slane %v1721_v30, 4  ;;  %v459_v50 = vld [vmem:[%s15671_s17 + $0x1c] sm:$0xf]  ;;  %v460_v51 = vld [vmem:[%s15671_s17 + $0x20] sm:$0xf]  ;;  %v1741_v52 = vor.u32 %v1740_v46, %v1736_v45 }
  0x9a   : > { %3463 = vmatpush2.bf16.msra.mxu0 %v14442_v31  ;;  %13851 = vmatmul.mubr.bf16.gmra.mxu1 %v14443_v58  ;;  %v584_v23 = vsel %vm15777_vm5, %v576_v9, %v583_v15  ;;  %v593_v28 = vsel %vm15777_vm5, %v585_v16, %v592_v18  ;;  %v15795_v31 = vld [vmem:[#allocation6 + $0xb8] sm:$0xff]   ;;  %v14448_v44 = vld [vmem:[#allocation2 + $0xec] ss:$12 sps:$4 sm:$0xff]   ;;  %v1732_v48 = vrot.slane %v1731_v39, 4  ;;  %v596_v53 = vshrl.u32 %v459_v50, 16  ;;  %v14509_v29 = vld [vmem:[#allocation6 + $0xa8] sm:$0xff]  }
  0x9b   : > { %3464 = vmatprep.subr.bf16.mxu0 %v19584_v0  ;;  %4265 = vmatpush1.bf16.msra.mxu1 %v14474_v57  ;;  %1344 = vst [vmem:[#allocation2 + $0x3c] sm:$0xf] %v584_v23  ;;  %1345 = vst [vmem:[#allocation2 + $0x48] sm:$0xf] %v593_v28  ;;  %v1727_v47 = vsel %vm15702_vm2, %v1722_v38, %v1726_v24  ;;  %v599_v54 = vshll.u32 %v459_v50, 16  ;;  %v605_v55 = vshrl.u32 %v460_v51, 16 }
  0x9c   : > { %4266 = vmatprep.subr.bf16.mxu1 %v19584_v0  ;;  %13854 = vmatprep.mubr.bf16.mxu1 %v14445_v13  ;;  %2409 = vst [vmem:[#allocation2 + $0x110] sm:$0xf] %v1727_v47  ;;  %v1445_v56 = vld [vmem:[%s15671_s17 + $0x68] sm:$0xf]  ;;  %v1737_v57 = vsel %vm15702_vm2, %v1732_v48, %v1736_v45  ;;  %v608_v58 = vshll.u32 %v460_v51, 16  ;;  %v1742_v1 = vrot.slane %v1741_v52, 4 }
  0x9d   : > { %v1754_v61 = vshll.u32 %v1445_v56, 16  ;;  %2410 = vst [vmem:[#allocation2 + $0x11c] sm:$0xf] %v1737_v57  ;;  %v598_v2 = vrot.slane %v596_v53, 7  ;;  %v15810_v3 = vrot.slane %v605_v55, 7  ;;  %v1758_v4 = vshrl.u32 %v1445_v56, 16 }
  0x9e   : > { %3465 = vmatpush2.bf16.msra.mxu0 %v14444_v40  ;;  %v1748_v40 = vshrl.u32 %v1444_v32, 16  ;;  %v14480_v5 = vld [vmem:[#allocation6 + $0xb0] sm:$0xff]   ;;  %v14450_v6 = vld [vmem:[#allocation2 + $0x40] ss:$12 sps:$4 sm:$0xff]   ;;  %v1747_v12 = vsel %vm15702_vm2, %v1742_v1, %v1746_v49  ;;  %v1447_v16 = vld [vmem:[%s15671_s17 + $0x70] sm:$0xf] }
  0x9f   : > { %3466 = vmatprep.subr.bf16.mxu0 %v19584_v0  ;;  %4267 = vmatpush1.bf16.msra.mxu1 %v14481_v22  ;;  %v1756_v11 = vrot.slane %v1754_v61, 5  ;;  %v601_v13 = vor.u32 %v599_v54, %v598_v2  ;;  %v610_v15 = vor.u32 %v608_v58, %v15810_v3  ;;  %v14503_v17 = vld [vmem:[#allocation6 + $0x78] sm:$0xff]   ;;  %2411 = vst [vmem:[#allocation2 + $0x128] sm:$0xf] %v1747_v12  ;;  %v1760_v19 = vrot.slane %v1758_v4, 4  ;;  %v14517_v1 = vld [vmem:[#allocation6 + $0x68] sm:$0xff]  }
  0xa0   : > { %4268 = vmatprep.subr.bf16.mxu1 %v19584_v0  ;;  %v1750_v60 = vrot.slane %v1748_v40, 4  ;;  %3470 = vmatprep.mubr.bf16.mxu0 %v14450_v6  ;;  %v1448_v22 = vld [vmem:[%s15671_s17 + $0x74] sm:$0xf]  ;;  %v1774_v25 = vshll.u32 %v1447_v16, 16  ;;  %v1778_v28 = vshrl.u32 %v1447_v16, 16  ;;  %v612_v43 = vrot.slane %v15810_v3, 4 }
  0xa1   : > { %v602_v23 = vsel %vm15777_vm5, %v594_v27, %v601_v13  ;;  %v1761_v32 = vor.u32 %v1760_v19, %v1756_v11  ;;  %v1788_v38 = vshrl.u32 %v1448_v22, 16  ;;  %v297_v39 = vld [vmem:[%s15671_s17 + $0x24] sm:$0xf]  ;;  %v298_v42 = vld [vmem:[%s15671_s17 + $0x28] sm:$0xf] }
  0xa2   : > { %3467 = vmatpush2.bf16.msra.mxu0 %v14447_v59  ;;  %13855 = vmatmul.mubr.bf16.gmra.mxu1 %v14448_v44  ;;  %v1446_v59 = vld [vmem:[%s15671_s17 + $0x6c] sm:$0xf]  ;;  %v14452_v7 = vld [vmem:[#allocation2 + $0x3c] ss:$12 sps:$4 sm:$0xff]   ;;  %v1751_v9 = vor.u32 %v1750_v60, %v1746_v49  ;;  %1346 = vst [vmem:[#allocation2 + $0x54] sm:$0xf] %v602_v23 }
  0xa3   : > { %3468 = vmatprep.subr.bf16.mxu0 %v19584_v0  ;;  %4269 = vmatpush1.bf16.msra.mxu1 %v14487_v37  ;;  %v1764_v20 = vshll.u32 %v1446_v59, 16  ;;  %v1768_v21 = vshrl.u32 %v1446_v59, 16  ;;  %v14453_v30 = vld [vmem:[#allocation2 + $0x104] ss:$12 sps:$4 sm:$0xff]   ;;  %v1776_v35 = vrot.slane %v1774_v25, 5  ;;  %v1780_v36 = vrot.slane %v1778_v28, 4 }
  0xa4   : > { %4270 = vmatprep.subr.bf16.mxu1 %v19584_v0  ;;  %v1752_v18 = vrot.slane %v1751_v9, 4  ;;  %v1784_v37 = vshll.u32 %v1448_v22, 16  ;;  %13858 = vmatprep.mubr.bf16.mxu1 %v14453_v30  ;;  %379 = vst [vmem:[#allocation2 + $0x70] sm:$0xf] %v297_v39  ;;  %380 = vst [vmem:[#allocation2 + $0x7c] sm:$0xf] %v298_v42 }
  0xa5   : > { %v1766_v27 = vrot.slane %v1764_v20, 5  ;;  %v1770_v33 = vrot.slane %v1768_v21, 4  ;;  %v1781_v44 = vor.u32 %v1780_v36, %v1776_v35  ;;  %v461_v46 = vld [vmem:[%s15671_s17 + $0x24] sm:$0xf]  ;;  %v462_v47 = vld [vmem:[%s15671_s17 + $0x28] sm:$0xf] }
  0xa6   : > { %3469 = vmatpush2.bf16.msra.mxu0 %v14449_v14  ;;  %v603_v14 = vrot.slane %v598_v2, 4  ;;  %v1757_v10 = vsel %vm15702_vm2, %v1752_v18, %v1756_v11  ;;  %v1786_v45 = vrot.slane %v1784_v37, 5  ;;  %v1790_v48 = vrot.slane %v1788_v38, 4  ;;  %v1449_v53 = vld [vmem:[%s15671_s17 + $0x78] sm:$0xf] }
  0xa7   : > { %13914 = vmatprep.subr.bf16.mxu0 %v15795_v31  ;;  %4271 = vmatpush1.bf16.msra.mxu1 %v14495_v63  ;;  %2412 = vst [vmem:[#allocation2 + $0x134] sm:$0xf] %v1757_v10  ;;  %v1771_v40 = vor.u32 %v1770_v33, %v1766_v27  ;;  %v614_v51 = vshrl.u32 %v461_v46, 16  ;;  %v617_v52 = vshll.u32 %v461_v46, 16  ;;  %v14455_v54 = vld [vmem:[#allocation2 + $0x11c] ss:$12 sps:$4 sm:$0xff]  }
  0xa8   : > { %v611_v24 = vsel %vm15777_vm5, %v603_v14, %v610_v15  ;;  %4272 = vmatprep.subr.bf16.mxu1 %v19584_v0  ;;  %v1782_v55 = vrot.slane %v1781_v44, 4  ;;  %v623_v56 = vshrl.u32 %v462_v47, 16  ;;  %v1791_v57 = vor.u32 %v1790_v48, %v1786_v45  ;;  %v1450_v61 = vld [vmem:[%s15671_s17 + $0x7c] sm:$0xf]  ;;  %v14457_v2 = vld [vmem:[#allocation2 + $0x58] ss:$12 sps:$4 sm:$0xff]  }
  0xa9   : > { %3471 = vmatmul.mubr.bf16.vlgmr.msra.gmra.mxu0 %v14452_v7  ;;  %1347 = vst [vmem:[#allocation2 + $0x60] sm:$0xf] %v611_v24  ;;  %v1772_v50 = vrot.slane %v1771_v40, 4  ;;  %v616_v59 = vrot.slane %v614_v51, 7  ;;  %v626_v60 = vshll.u32 %v462_v47, 16  ;;  %v1794_v63 = vshll.u32 %v1449_v53, 16 }
  0xaa   : > { %13915 = vmatpush3.bf16.msra.mxu0 %v15795_v31  ;;  %v1762_v31 = vrot.slane %v1761_v32, 4  ;;  %13859 = vmatmul.mubr.bf16.gmra.mxu1 %v14455_v54  ;;  %v1787_v3 = vsel %vm15702_vm2, %v1782_v55, %v1786_v45  ;;  %v15842_v4 = vrot.slane %v623_v56, 7  ;;  %v1798_v13 = vshrl.u32 %v1449_v53, 16  ;;  %v1451_v16 = vld [vmem:[%s15671_s17 + $0x80] sm:$0xf] }
  0xab   : > { %13916 = vmatprep.subr.bf16.mxu0 %v14480_v5  ;;  %4273 = vmatpush2.bf16.msra.mxu1 %v14503_v17  ;;  %v1777_v58 = vsel %vm15702_vm2, %v1772_v50, %v1776_v35  ;;  %2415 = vst [vmem:[#allocation2 + $0x158] sm:$0xf] %v1787_v3  ;;  %v619_v7 = vor.u32 %v617_v52, %v616_v59  ;;  %v621_v9 = vrot.slane %v616_v59, 4  ;;  %v1796_v11 = vrot.slane %v1794_v63, 5  ;;  %v14523_v17 = vld [vmem:[#allocation6 + $0x60] sm:$0xff]  }
  0xac   : > { %4274 = vmatprep.subr.bf16.mxu1 %v19584_v0  ;;  %v1767_v49 = vsel %vm15702_vm2, %v1762_v31, %v1766_v27  ;;  %2414 = vst [vmem:[#allocation2 + $0x14c] sm:$0xf] %v1777_v58  ;;  %3478 = vmatprep.mubr.bf16.mxu0 %v14457_v2  ;;  %v628_v12 = vor.u32 %v626_v60, %v15842_v4  ;;  %v1804_v14 = vshll.u32 %v1450_v61, 16  ;;  %v1808_v15 = vshrl.u32 %v1450_v61, 16  ;;  %v1452_v20 = vld [vmem:[%s15671_s17 + $0x84] sm:$0xf] }
  0xad   : > { %2413 = vst [vmem:[#allocation2 + $0x140] sm:$0xf] %v1767_v49  ;;  %v620_v18 = vsel %vm15777_vm5, %v612_v43, %v619_v7  ;;  %v1814_v21 = vshll.u32 %v1451_v16, 16  ;;  %v1818_v22 = vshrl.u32 %v1451_v16, 16  ;;  %v1800_v24 = vrot.slane %v1798_v13, 4  ;;  %v14530_v16 = vld [vmem:[#allocation6 + $0x50] sm:$0xff]  }
  0xae   : > { %13917 = vmatpush3.bf16.msra.mxu0 %v14480_v5  ;;  %v1792_v5 = vrot.slane %v1791_v57, 4  ;;  %v629_v23 = vsel %vm15777_vm5, %v621_v9, %v628_v12  ;;  %1348 = vst [vmem:[#allocation2 + $0x6c] sm:$0xf] %v620_v18  ;;  %v1806_v25 = vrot.slane %v1804_v14, 5  ;;  %v1810_v28 = vrot.slane %v1808_v15, 4  ;;  %v14529_v9 = vld [vmem:[#allocation6 + $0x58] sm:$0xff]  }
  0xaf   : > { %13918 = vmatprep.subr.bf16.mxu0 %v14509_v29  ;;  %4275 = vmatpush2.bf16.msra.mxu1 %v14511_v34  ;;  %1349 = vst [vmem:[#allocation2 + $0x78] sm:$0xf] %v629_v23  ;;  %v1816_v30 = vrot.slane %v1814_v21, 5  ;;  %v1820_v10 = vrot.slane %v1818_v22, 4  ;;  %v1801_v32 = vor.u32 %v1800_v24, %v1796_v11  ;;  %v1824_v33 = vshll.u32 %v1452_v20, 16 }
  0xb0   : > { %4276 = vmatprep.subr.bf16.mxu1 %v19584_v0  ;;  %v14459_v6 = vld [vmem:[#allocation2 + $0x54] ss:$12 sps:$4 sm:$0xff]   ;;  %v1797_v19 = vsel %vm15702_vm2, %v1792_v5, %v1796_v11  ;;  %v1811_v27 = vor.u32 %v1810_v28, %v1806_v25  ;;  %v1828_v34 = vshrl.u32 %v1452_v20, 16  ;;  %v299_v35 = vld [vmem:[%s15671_s17 + $0x2c] sm:$0xf]  ;;  %v630_v45 = vrot.slane %v15842_v4, 4 }
  0xb1   : > { %3479 = vmatmul.mubr.bf16.gmra.mxu0 %v14459_v6  ;;  %2416 = vst [vmem:[#allocation2 + $0x164] sm:$0xf] %v1797_v19  ;;  %v300_v36 = vld [vmem:[%s15671_s17 + $0x30] sm:$0xf]  ;;  %v1821_v37 = vor.u32 %v1820_v10, %v1816_v30  ;;  %381 = vst [vmem:[#allocation2 + $0x88] sm:$0xf] %v299_v35 }
  0xb2   : > { %13919 = vmatpush3.bf16.msra.mxu0 %v14509_v29  ;;  %382 = vst [vmem:[#allocation2 + $0x94] sm:$0xf] %v300_v36  ;;  %v463_v38 = vld [vmem:[%s15671_s17 + $0x2c] sm:$0xf]  ;;  %v464_v39 = vld [vmem:[%s15671_s17 + $0x30] sm:$0xf] }
  0xb3   : > { %4277 = vmatpush2.bf16.msra.mxu1 %v14517_v1  ;;  %v14461_v31 = vld [vmem:[#allocation2 + $0x14c] ss:$12 sps:$4 sm:$0xff]   ;;  %v1802_v40 = vrot.slane %v1801_v32, 4  ;;  %v1812_v42 = vrot.slane %v1811_v27, 4  ;;  %v1822_v43 = vrot.slane %v1821_v37, 4  ;;  %v1826_v44 = vrot.slane %v1824_v33, 5 }
  0xb4   : > { %4278 = vmatprep.subr.bf16.mxu1 %v19584_v0  ;;  %v14460_v29 = vld [vmem:[#allocation2 + $0x134] ss:$12 sps:$4 sm:$0xff]   ;;  %v632_v46 = vshrl.u32 %v463_v38, 16  ;;  %v635_v50 = vshll.u32 %v463_v38, 16  ;;  %v641_v51 = vshrl.u32 %v464_v39, 16  ;;  %v644_v56 = vshll.u32 %v464_v39, 16 }
  0xb5   : > { %13862 = vmatprep.mubr.bf16.mxu1 %v14460_v29  ;;  %v1453_v47 = vld [vmem:[%s15671_s17 + $0x88] sm:$0xf]  ;;  %v1807_v48 = vsel %vm15702_vm2, %v1802_v40, %v1806_v25  ;;  %v1817_v49 = vsel %vm15702_vm2, %v1812_v42, %v1816_v30  ;;  %v1454_v52 = vld [vmem:[%s15671_s17 + $0x8c] sm:$0xf]  ;;  %v1455_v53 = vld [vmem:[%s15671_s17 + $0x90] sm:$0xf]  ;;  %v1827_v54 = vsel %vm15702_vm2, %v1822_v43, %v1826_v44 }
  0xb6   : > { %13863 = vmatmul.mubr.bf16.gmra.mxu1 %v14461_v31  ;;  %2417 = vst [vmem:[#allocation2 + $0x170] sm:$0xf] %v1807_v48  ;;  %2418 = vst [vmem:[#allocation2 + $0x17c] sm:$0xf] %v1817_v49  ;;  %v634_v55 = vrot.slane %v632_v46, 7  ;;  %v1830_v57 = vrot.slane %v1828_v34, 4 }
  0xb7   : > { %4279 = vmatpush2.bf16.msra.mxu1 %v14523_v17  ;;  %v14463_v58 = vld [vmem:[#allocation2 + $0x70] ss:$12 sps:$4 sm:$0xff]   ;;  %v14465_v59 = vld [vmem:[#allocation2 + $0x6c] ss:$12 sps:$4 sm:$0xff]   ;;  %2419 = vst [vmem:[#allocation2 + $0x188] sm:$0xf] %v1827_v54 }
  0xb8   : > { %4280 = vmatprep.subr.bf16.mxu1 %v19584_v0  ;;  %v15870_v60 = vrot.slane %v641_v51, 7  ;;  %v637_v61 = vor.u32 %v635_v50, %v634_v55  ;;  %v639_v63 = vrot.slane %v634_v55, 4  ;;  %v1831_v1 = vor.u32 %v1830_v57, %v1826_v44  ;;  %v1456_v3 = vld [vmem:[%s15671_s17 + $0x94] sm:$0xf]  ;;  %3486 = vmatprep.mubr.bf16.mxu0 %v14463_v58  ;;  %v302_v21 = vld [vmem:[%s15671_s17 + $0x38] sm:$0xf] }
  0xb9   : > { %v1834_v2 = vshll.u32 %v1453_v47, 16  ;;  %v1838_v5 = vshrl.u32 %v1453_v47, 16  ;;  %v1844_v6 = vshll.u32 %v1454_v52, 16  ;;  %v1848_v7 = vshrl.u32 %v1454_v52, 16  ;;  %3487 = vmatmul.mubr.bf16.gmra.mxu0 %v14465_v59  ;;  %v301_v15 = vld [vmem:[%s15671_s17 + $0x34] sm:$0xf] }
  0xba   : > { %v646_v4 = vor.u32 %v644_v56, %v15870_v60  ;;  %v638_v11 = vsel %vm15777_vm5, %v630_v45, %v637_v61  ;;  %v1832_v12 = vrot.slane %v1831_v1, 4  ;;  %v1854_v14 = vshll.u32 %v1455_v53, 16  ;;  %383 = vst [vmem:[#allocation2 + $0xa0] sm:$0xf] %v301_v15  ;;  %384 = vst [vmem:[#allocation2 + $0xac] sm:$0xf] %v302_v21 }
  0xbb   : > { %v1836_v13 = vrot.slane %v1834_v2, 5  ;;  %1350 = vst [vmem:[#allocation2 + $0x84] sm:$0xf] %v638_v11  ;;  %v1840_v18 = vrot.slane %v1838_v5, 4  ;;  %v1846_v19 = vrot.slane %v1844_v6, 5  ;;  %v1850_v20 = vrot.slane %v1848_v7, 4  ;;  %4281 = vmatpush2.bf16.msra.mxu1 %v14529_v9 }
  0xbc   : > { %v647_v17 = vsel %vm15777_vm5, %v639_v63, %v646_v4  ;;  %v1856_v23 = vrot.slane %v1854_v14, 5  ;;  %v1858_v24 = vshrl.u32 %v1455_v53, 16  ;;  %v1864_v25 = vshll.u32 %v1456_v3, 16  ;;  %v465_v28 = vld [vmem:[%s15671_s17 + $0x34] sm:$0xf]  ;;  %4282 = vmatprep.subr.bf16.mxu1 %v19584_v0 }
  0xbd   : > { %1351 = vst [vmem:[#allocation2 + $0x90] sm:$0xf] %v647_v17  ;;  %v1837_v22 = vsel %vm15702_vm2, %v1832_v12, %v1836_v13  ;;  %v14466_v29 = vld [vmem:[#allocation2 + $0x164] ss:$12 sps:$4 sm:$0xff]   ;;  %v1841_v30 = vor.u32 %v1840_v18, %v1836_v13  ;;  %v1851_v10 = vor.u32 %v1850_v20, %v1846_v19  ;;  %v1868_v36 = vshrl.u32 %v1456_v3, 16  ;;  %v14537_v55 = vld [vmem:[#allocation6 + $0xa0] sm:$0xff]  }
  0xbe   : > { %2420 = vst [vmem:[#allocation2 + $0x194] sm:$0xf] %v1837_v22  ;;  %v14467_v32 = vld [vmem:[#allocation2 + $0x17c] ss:$12 sps:$4 sm:$0xff]   ;;  %v1860_v27 = vrot.slane %v1858_v24, 4  ;;  %v1866_v33 = vrot.slane %v1864_v25, 5  ;;  %13866 = vmatprep.mubr.bf16.mxu1 %v14466_v29  ;;  %13920 = vmatprep.subr.bf16.mxu0 %v14537_v55 }
  0xbf   : > { %v1842_v34 = vrot.slane %v1841_v30, 4  ;;  %v1852_v35 = vrot.slane %v1851_v10, 4  ;;  %v466_v37 = vld [vmem:[%s15671_s17 + $0x38] sm:$0xf]  ;;  %v648_v38 = vrot.slane %v15870_v60, 4  ;;  %4283 = vmatpush2.bf16.msra.mxu1 %v14530_v16  ;;  %v650_v31 = vshrl.u32 %v465_v28, 16  ;;  %13921 = vmatpush3.bf16.msra.mxu0 %v14537_v55 }
  0xc0   : > { %13867 = vmatmul.mubr.bf16.gmra.mxu1 %v14467_v32  ;;  %v1861_v39 = vor.u32 %v1860_v27, %v1856_v23  ;;  %v653_v40 = vshll.u32 %v465_v28, 16  ;;  %v659_v42 = vshrl.u32 %v466_v37, 16  ;;  %v1457_v43 = vld [vmem:[%s15671_s17 + $0x98] sm:$0xf]  ;;  %4284 = vmatprep.subr.bf16.mxu1 %v19584_v0  ;;  %v662_v47 = vshll.u32 %v466_v37, 16  ;;  %v14538_v3 = vld [vmem:[#allocation6 + $0x40] sm:$0xff]  }
  0xc1   : > { %v14536_v44 = vld [vmem:[#allocation6 + $0x48] sm:$0xff]   ;;  %v1847_v45 = vsel %vm15702_vm2, %v1842_v34, %v1846_v19  ;;  %v1857_v46 = vsel %vm15702_vm2, %v1852_v35, %v1856_v23  ;;  %v1870_v49 = vrot.slane %v1868_v36, 4  ;;  %v1459_v50 = vld [vmem:[%s15671_s17 + $0xa0] sm:$0xf]  ;;  %v652_v52 = vrot.slane %v650_v31, 7 }
  0xc2   : > { %v1458_v48 = vld [vmem:[%s15671_s17 + $0x9c] sm:$0xf]  ;;  %2421 = vst [vmem:[#allocation2 + $0x1a0] sm:$0xf] %v1847_v45  ;;  %v1862_v51 = vrot.slane %v1861_v39, 4  ;;  %v15894_v53 = vrot.slane %v659_v42, 7 }
  0xc3   : > { %2422 = vst [vmem:[#allocation2 + $0x1ac] sm:$0xf] %v1857_v46  ;;  %v1874_v54 = vshll.u32 %v1457_v43, 16  ;;  %v14469_v56 = vld [vmem:[#allocation2 + $0x88] ss:$12 sps:$4 sm:$0xff]   ;;  %v1871_v58 = vor.u32 %v1870_v49, %v1866_v33  ;;  %v1878_v59 = vshrl.u32 %v1457_v43, 16  ;;  %4285 = vmatpush2.bf16.msra.mxu1 %v14536_v44  ;;  %v655_v61 = vor.u32 %v653_v40, %v652_v52 }
  0xc4   : > { %v14471_v57 = vld [vmem:[#allocation2 + $0x84] ss:$12 sps:$4 sm:$0xff]   ;;  %v1867_v60 = vsel %vm15702_vm2, %v1862_v51, %v1866_v33  ;;  %v657_v63 = vrot.slane %v652_v52, 4  ;;  %v664_v1 = vor.u32 %v662_v47, %v15894_v53  ;;  %4286 = vmatprep.subr.bf16.mxu1 %v19584_v0  ;;  %3494 = vmatprep.mubr.bf16.mxu0 %v14469_v56  ;;  %v1884_v7 = vshll.u32 %v1458_v48, 16  ;;  %v303_v18 = vld [vmem:[%s15671_s17 + $0x3c] sm:$0xf] }
  0xc5   : > { %v1460_v2 = vld [vmem:[%s15671_s17 + $0xa4] sm:$0xf]  ;;  %2423 = vst [vmem:[#allocation2 + $0x1b8] sm:$0xf] %v1867_v60  ;;  %v1872_v4 = vrot.slane %v1871_v58, 4  ;;  %v1876_v5 = vrot.slane %v1874_v54, 5  ;;  %3495 = vmatmul.mubr.bf16.gmra.mxu0 %v14471_v57  ;;  %v656_v9 = vsel %vm15777_vm5, %v648_v38, %v655_v61 }
  0xc6   : > { %v1880_v6 = vrot.slane %v1878_v59, 4  ;;  %v665_v11 = vsel %vm15777_vm5, %v657_v63, %v664_v1  ;;  %v1888_v12 = vshrl.u32 %v1458_v48, 16  ;;  %v1894_v13 = vshll.u32 %v1459_v50, 16  ;;  %1352 = vst [vmem:[#allocation2 + $0x9c] sm:$0xf] %v656_v9 }
  0xc7   : > { %1353 = vst [vmem:[#allocation2 + $0xa8] sm:$0xf] %v665_v11  ;;  %v1877_v14 = vsel %vm15702_vm2, %v1872_v4, %v1876_v5  ;;  %v1886_v16 = vrot.slane %v1884_v7, 5  ;;  %v1898_v17 = vshrl.u32 %v1459_v50, 16  ;;  %4287 = vmatpush2.bf16.msra.mxu1 %v14538_v3  ;;  %v1904_v21 = vshll.u32 %v1460_v2, 16 }
  0xc8   : > { %v1881_v15 = vor.u32 %v1880_v6, %v1876_v5  ;;  %2424 = vst [vmem:[#allocation2 + $0x1c4] sm:$0xf] %v1877_v14  ;;  %v1890_v19 = vrot.slane %v1888_v12, 4  ;;  %v1896_v20 = vrot.slane %v1894_v13, 5  ;;  %v1908_v22 = vshrl.u32 %v1460_v2, 16  ;;  %5811 = vmatprep.subr.bf16.mxu1 %v19584_v0 }
  0xc9   : > { %v304_v23 = vld [vmem:[%s15671_s17 + $0x40] sm:$0xf]  ;;  %385 = vst [vmem:[#allocation2 + $0xb8] sm:$0xf] %v303_v18  ;;  %v1900_v29 = vrot.slane %v1898_v17, 4  ;;  %v1906_v30 = vrot.slane %v1904_v21, 5 }
  0xca   : > { %v14472_v24 = vld [vmem:[#allocation2 + $0x194] ss:$12 sps:$4 sm:$0xff]   ;;  %386 = vst [vmem:[#allocation2 + $0xc4] sm:$0xf] %v304_v23  ;;  %v1882_v25 = vrot.slane %v1881_v15, 4  ;;  %v1891_v28 = vor.u32 %v1890_v19, %v1886_v16  ;;  %v666_v27 = vrot.slane %v15894_v53, 4 }
  0xcb   : > { %v467_v10 = vld [vmem:[%s15671_s17 + $0x3c] sm:$0xf]  ;;  %13870 = vmatprep.mubr.bf16.mxu1 %v14472_v24  ;;  %v468_v32 = vld [vmem:[%s15671_s17 + $0x40] sm:$0xf]  ;;  %v1910_v35 = vrot.slane %v1908_v22, 4  ;;  %v1901_v39 = vor.u32 %v1900_v29, %v1896_v20 }
  0xcc   : > { %v668_v33 = vshrl.u32 %v467_v10, 16  ;;  %v671_v34 = vshll.u32 %v467_v10, 16  ;;  %v14473_v36 = vld [vmem:[#allocation2 + $0x1ac] ss:$12 sps:$4 sm:$0xff]   ;;  %v1887_v37 = vsel %vm15702_vm2, %v1882_v25, %v1886_v16  ;;  %v1892_v38 = vrot.slane %v1891_v28, 4 }
  0xcd   : > { %v677_v31 = vshrl.u32 %v468_v32, 16  ;;  %2425 = vst [vmem:[#allocation2 + $0x1d0] sm:$0xf] %v1887_v37  ;;  %v680_v42 = vshll.u32 %v468_v32, 16  ;;  %v1461_v43 = vld [vmem:[%s15671_s17 + $0xa8] sm:$0xf]  ;;  %v1911_v45 = vor.u32 %v1910_v35, %v1906_v30  ;;  %13871 = vmatmul.mubr.bf16.gmra.mxu1 %v14473_v36 }
  0xce   : > { %v670_v40 = vrot.slane %v668_v33, 7  ;;  %v1462_v44 = vld [vmem:[%s15671_s17 + $0xac] sm:$0xf]  ;;  %v1897_v47 = vsel %vm15702_vm2, %v1892_v38, %v1896_v20  ;;  %v1902_v48 = vrot.slane %v1901_v39, 4  ;;  %v14477_v50 = vld [vmem:[#allocation2 + $0x9c] ss:$12 sps:$4 sm:$0xff]  }
  0xcf   : > { %v14475_v46 = vld [vmem:[#allocation2 + $0xa0] ss:$12 sps:$4 sm:$0xff]   ;;  %v15919_v49 = vrot.slane %v677_v31, 7  ;;  %2426 = vst [vmem:[#allocation2 + $0x1dc] sm:$0xf] %v1897_v47  ;;  %v1912_v53 = vrot.slane %v1911_v45, 4 }
  0xd0   : > { %v673_v51 = vor.u32 %v671_v34, %v670_v40  ;;  %v675_v52 = vrot.slane %v670_v40, 4  ;;  %3502 = vmatprep.mubr.bf16.mxu0 %v14475_v46  ;;  %v1907_v54 = vsel %vm15702_vm2, %v1902_v48, %v1906_v30  ;;  %v1914_v56 = vshll.u32 %v1461_v43, 16  ;;  %v1463_v58 = vld [vmem:[%s15671_s17 + $0xb0] sm:$0xf]  ;;  %v1464_v59 = vld [vmem:[%s15671_s17 + $0xb4] sm:$0xf] }
  0xd1   : > { %v682_v55 = vor.u32 %v680_v42, %v15919_v49  ;;  %v1918_v57 = vshrl.u32 %v1461_v43, 16  ;;  %3503 = vmatmul.mubr.bf16.gmra.mxu0 %v14477_v50  ;;  %2427 = vst [vmem:[#allocation2 + $0x1e8] sm:$0xf] %v1907_v54  ;;  %v1924_v61 = vshll.u32 %v1462_v44, 16  ;;  %v1928_v63 = vshrl.u32 %v1462_v44, 16 }
  0xd2   : > { %v674_v60 = vsel %vm15777_vm5, %v666_v27, %v673_v51  ;;  %v1934_v1 = vshll.u32 %v1463_v58, 16  ;;  %v1916_v3 = vrot.slane %v1914_v56, 5  ;;  %v1938_v5 = vshrl.u32 %v1463_v58, 16  ;;  %v305_v12 = vld [vmem:[%s15671_s17 + $0x44] sm:$0xf] }
  0xd3   : > { %v683_v2 = vsel %vm15777_vm5, %v675_v52, %v682_v55  ;;  %1354 = vst [vmem:[#allocation2 + $0xb4] sm:$0xf] %v674_v60  ;;  %v1920_v4 = vrot.slane %v1918_v57, 4  ;;  %v1926_v6 = vrot.slane %v1924_v61, 5  ;;  %v1930_v7 = vrot.slane %v1928_v63, 4 }
  0xd4   : > { %1355 = vst [vmem:[#allocation2 + $0xc0] sm:$0xf] %v683_v2  ;;  %v1936_v9 = vrot.slane %v1934_v1, 5  ;;  %v1944_v11 = vshll.u32 %v1464_v59, 16  ;;  %v14478_v13 = vld [vmem:[#allocation2 + $0x1c4] ss:$12 sps:$4 sm:$0xff]   ;;  %v1917_v14 = vsel %vm15702_vm2, %v1912_v53, %v1916_v3 }
  0xd5   : > { %v1921_v15 = vor.u32 %v1920_v4, %v1916_v3  ;;  %v1940_v16 = vrot.slane %v1938_v5, 4  ;;  %v1948_v17 = vshrl.u32 %v1464_v59, 16  ;;  %387 = vst [vmem:[#allocation2 + $0xd0] sm:$0xf] %v305_v12  ;;  %2428 = vst [vmem:[#allocation2 + $0x1f4] sm:$0xf] %v1917_v14  ;;  %v1931_v18 = vor.u32 %v1930_v7, %v1926_v6  ;;  %13874 = vmatprep.mubr.bf16.mxu1 %v14478_v13 }
  0xd6   : > { %v1946_v19 = vrot.slane %v1944_v11, 5  ;;  %v306_v20 = vld [vmem:[%s15671_s17 + $0x48] sm:$0xf]  ;;  %v469_v21 = vld [vmem:[%s15671_s17 + $0x44] sm:$0xf]  ;;  %v684_v22 = vrot.slane %v15919_v49, 4 }
  0xd7   : > { %v1922_v23 = vrot.slane %v1921_v15, 4  ;;  %v1941_v24 = vor.u32 %v1940_v16, %v1936_v9  ;;  %388 = vst [vmem:[#allocation2 + $0xdc] sm:$0xf] %v306_v20  ;;  %v470_v25 = vld [vmem:[%s15671_s17 + $0x48] sm:$0xf]  ;;  %v686_v28 = vshrl.u32 %v469_v21, 16 }
  0xd8   : > { %v1932_v29 = vrot.slane %v1931_v18, 4  ;;  %v689_v30 = vshll.u32 %v469_v21, 16  ;;  %v695_v10 = vshrl.u32 %v470_v25, 16  ;;  %v698_v32 = vshll.u32 %v470_v25, 16  ;;  %v1465_v27 = vld [vmem:[%s15671_s17 + $0xb8] sm:$0xf] }
  0xd9   : > { %v14479_v33 = vld [vmem:[#allocation2 + $0x1dc] ss:$12 sps:$4 sm:$0xff]   ;;  %v1927_v34 = vsel %vm15702_vm2, %v1922_v23, %v1926_v6  ;;  %v1942_v35 = vrot.slane %v1941_v24, 4  ;;  %v688_v36 = vrot.slane %v686_v28, 7  ;;  %v1950_v31 = vrot.slane %v1948_v17, 4 }
  0xda   : > { %2429 = vst [vmem:[#allocation2 + $0x200] sm:$0xf] %v1927_v34  ;;  %v1937_v37 = vsel %vm15702_vm2, %v1932_v29, %v1936_v9  ;;  %v15942_v38 = vrot.slane %v695_v10, 7  ;;  %v1466_v39 = vld [vmem:[%s15671_s17 + $0xbc] sm:$0xf]  ;;  %v1954_v40 = vshll.u32 %v1465_v27, 16  ;;  %13875 = vmatmul.mubr.bf16.gmra.mxu1 %v14479_v33 }
  0xdb   : > { %v14482_v42 = vld [vmem:[#allocation2 + $0xb8] ss:$12 sps:$4 sm:$0xff]   ;;  %v14484_v43 = vld [vmem:[#allocation2 + $0xb4] ss:$12 sps:$4 sm:$0xff]   ;;  %v1947_v44 = vsel %vm15702_vm2, %v1942_v35, %v1946_v19  ;;  %2430 = vst [vmem:[#allocation2 + $0x20c] sm:$0xf] %v1937_v37  ;;  %v691_v45 = vor.u32 %v689_v30, %v688_v36  ;;  %v1951_v48 = vor.u32 %v1950_v31, %v1946_v19 }
  0xdc   : > { %v693_v46 = vrot.slane %v688_v36, 4  ;;  %2431 = vst [vmem:[#allocation2 + $0x218] sm:$0xf] %v1947_v44  ;;  %v700_v47 = vor.u32 %v698_v32, %v15942_v38  ;;  %v1956_v49 = vrot.slane %v1954_v40, 5  ;;  %v1958_v50 = vshrl.u32 %v1465_v27, 16  ;;  %3510 = vmatprep.mubr.bf16.mxu0 %v14482_v42 }
  0xdd   : > { %v1467_v51 = vld [vmem:[%s15671_s17 + $0xc0] sm:$0xf]  ;;  %v1468_v52 = vld [vmem:[%s15671_s17 + $0xc4] sm:$0xf]  ;;  %v692_v53 = vsel %vm15777_vm5, %v684_v22, %v691_v45  ;;  %v1964_v54 = vshll.u32 %v1466_v39, 16  ;;  %v1968_v55 = vshrl.u32 %v1466_v39, 16  ;;  %3511 = vmatmul.mubr.bf16.gmra.mxu0 %v14484_v43 }
  0xde   : > { %v1974_v56 = vshll.u32 %v1467_v51, 16  ;;  %v701_v57 = vsel %vm15777_vm5, %v693_v46, %v700_v47  ;;  %1356 = vst [vmem:[#allocation2 + $0xcc] sm:$0xf] %v692_v53  ;;  %v1952_v58 = vrot.slane %v1951_v48, 4  ;;  %v1960_v59 = vrot.slane %v1958_v50, 4 }
  0xdf   : > { %v1978_v60 = vshrl.u32 %v1467_v51, 16  ;;  %v307_v61 = vld [vmem:[%s15671_s17 + $0x4c] sm:$0xf]  ;;  %1357 = vst [vmem:[#allocation2 + $0xd8] sm:$0xf] %v701_v57  ;;  %v1966_v63 = vrot.slane %v1964_v54, 5 }
  0xe0   : > { %v1970_v1 = vrot.slane %v1968_v55, 4  ;;  %v1976_v2 = vrot.slane %v1974_v56, 5  ;;  %v1984_v3 = vshll.u32 %v1468_v52, 16  ;;  %v308_v4 = vld [vmem:[%s15671_s17 + $0x50] sm:$0xf]  ;;  %v1957_v5 = vsel %vm15702_vm2, %v1952_v58, %v1956_v49 }
  0xe1   : > { %389 = vst [vmem:[#allocation2 + $0xe8] sm:$0xf] %v307_v61  ;;  %v1961_v6 = vor.u32 %v1960_v59, %v1956_v49  ;;  %v1980_v7 = vrot.slane %v1978_v60, 4  ;;  %v1988_v9 = vshrl.u32 %v1468_v52, 16  ;;  %390 = vst [vmem:[#allocation2 + $0xf4] sm:$0xf] %v308_v4 }
  0xe2   : > { %v471_v11 = vld [vmem:[%s15671_s17 + $0x4c] sm:$0xf]  ;;  %v472_v12 = vld [vmem:[%s15671_s17 + $0x50] sm:$0xf]  ;;  %v14485_v13 = vld [vmem:[#allocation2 + $0x1f4] ss:$12 sps:$4 sm:$0xff]   ;;  %v1971_v14 = vor.u32 %v1970_v1, %v1966_v63 }
  0xe3   : > { %2432 = vst [vmem:[#allocation2 + $0x224] sm:$0xf] %v1957_v5  ;;  %v1986_v15 = vrot.slane %v1984_v3, 5  ;;  %v702_v16 = vrot.slane %v15942_v38, 4  ;;  %v1962_v17 = vrot.slane %v1961_v6, 4  ;;  %v1981_v18 = vor.u32 %v1980_v7, %v1976_v2  ;;  %13878 = vmatprep.mubr.bf16.mxu1 %v14485_v13 }
  0xe4   : > { %v704_v19 = vshrl.u32 %v471_v11, 16  ;;  %v707_v20 = vshll.u32 %v471_v11, 16  ;;  %v14486_v21 = vld [vmem:[#allocation2 + $0x20c] ss:$12 sps:$4 sm:$0xff]   ;;  %v1972_v22 = vrot.slane %v1971_v14, 4  ;;  %v713_v23 = vshrl.u32 %v472_v12, 16 }
  0xe5   : > { %v1967_v24 = vsel %vm15702_vm2, %v1962_v17, %v1966_v63  ;;  %v1982_v25 = vrot.slane %v1981_v18, 4  ;;  %v716_v29 = vshll.u32 %v472_v12, 16  ;;  %13879 = vmatmul.mubr.bf16.gmra.mxu1 %v14486_v21  ;;  %v1469_v32 = vld [vmem:[%s15671_s17 + $0xc8] sm:$0xf]  ;;  %v14488_v27 = vld [vmem:[#allocation2 + $0xd0] ss:$12 sps:$4 sm:$0xff]  }
  0xe6   : > { %v706_v28 = vrot.slane %v704_v19, 7  ;;  %2433 = vst [vmem:[#allocation2 + $0x230] sm:$0xf] %v1967_v24  ;;  %v1977_v30 = vsel %vm15702_vm2, %v1972_v22, %v1976_v2  ;;  %v15965_v10 = vrot.slane %v713_v23, 7  ;;  %v14490_v33 = vld [vmem:[#allocation2 + $0xcc] ss:$12 sps:$4 sm:$0xff]   ;;  %3518 = vmatprep.mubr.bf16.mxu0 %v14488_v27 }
  0xe7   : > { %v1987_v34 = vsel %vm15702_vm2, %v1982_v25, %v1986_v15  ;;  %2434 = vst [vmem:[#allocation2 + $0x23c] sm:$0xf] %v1977_v30  ;;  %v1470_v38 = vld [vmem:[%s15671_s17 + $0xcc] sm:$0xf]  ;;  %v1990_v39 = vrot.slane %v1988_v9, 4  ;;  %v1994_v31 = vshll.u32 %v1469_v32, 16  ;;  %3519 = vmatmul.mubr.bf16.gmra.mxu0 %v14490_v33 }
  0xe8   : > { %v709_v35 = vor.u32 %v707_v20, %v706_v28  ;;  %v711_v36 = vrot.slane %v706_v28, 4  ;;  %2435 = vst [vmem:[#allocation2 + $0x248] sm:$0xf] %v1987_v34  ;;  %v718_v37 = vor.u32 %v716_v29, %v15965_v10  ;;  %v1998_v40 = vshrl.u32 %v1469_v32, 16  ;;  %v1471_v45 = vld [vmem:[%s15671_s17 + $0xd0] sm:$0xf] }
  0xe9   : > { %v2004_v43 = vshll.u32 %v1470_v38, 16  ;;  %v2008_v44 = vshrl.u32 %v1470_v38, 16  ;;  %v1991_v47 = vor.u32 %v1990_v39, %v1986_v15  ;;  %v1996_v48 = vrot.slane %v1994_v31, 5  ;;  %v1472_v50 = vld [vmem:[%s15671_s17 + $0xd4] sm:$0xf]  ;;  %v14561_v63 = vld [vmem:[#allocation6 + $0x98] sm:$0xff]  }
  0xea   : > { %v710_v42 = vsel %vm15777_vm5, %v702_v16, %v709_v35  ;;  %v719_v46 = vsel %vm15777_vm5, %v711_v36, %v718_v37  ;;  %v2000_v49 = vrot.slane %v1998_v40, 4  ;;  %v309_v51 = vld [vmem:[%s15671_s17 + $0x54] sm:$0xf]  ;;  %v2014_v54 = vshll.u32 %v1471_v45, 16  ;;  %v310_v56 = vld [vmem:[%s15671_s17 + $0x58] sm:$0xf]  ;;  %13922 = vmatprep.subr.bf16.mxu0 %v14561_v63 }
  0xeb   : > { %1358 = vst [vmem:[#allocation2 + $0xe4] sm:$0xf] %v710_v42  ;;  %1359 = vst [vmem:[#allocation2 + $0xf0] sm:$0xf] %v719_v46  ;;  %v2006_v52 = vrot.slane %v2004_v43, 5  ;;  %v2010_v53 = vrot.slane %v2008_v44, 4  ;;  %13923 = vmatpush3.bf16.msra.mxu0 %v14561_v63 }
  0xec   : > { %v2018_v55 = vshrl.u32 %v1471_v45, 16  ;;  %391 = vst [vmem:[#allocation2 + $0x100] sm:$0xf] %v309_v51  ;;  %v1992_v57 = vrot.slane %v1991_v47, 4  ;;  %v2001_v58 = vor.u32 %v2000_v49, %v1996_v48  ;;  %v2024_v59 = vshll.u32 %v1472_v50, 16 }
  0xed   : > { %v2028_v60 = vshrl.u32 %v1472_v50, 16  ;;  %392 = vst [vmem:[#allocation2 + $0x10c] sm:$0xf] %v310_v56  ;;  %v473_v61 = vld [vmem:[%s15671_s17 + $0x54] sm:$0xf]  ;;  %v2011_v2 = vor.u32 %v2010_v53, %v2006_v52  ;;  %v2016_v3 = vrot.slane %v2014_v54, 5 }
  0xee   : > { %v14491_v1 = vld [vmem:[#allocation2 + $0x224] ss:$12 sps:$4 sm:$0xff]   ;;  %v2020_v4 = vrot.slane %v2018_v55, 4  ;;  %v1997_v5 = vsel %vm15702_vm2, %v1992_v57, %v1996_v48  ;;  %v2002_v6 = vrot.slane %v2001_v58, 4  ;;  %v2026_v7 = vrot.slane %v2024_v59, 5 }
  0xef   : > { %v474_v9 = vld [vmem:[%s15671_s17 + $0x58] sm:$0xf]  ;;  %13882 = vmatprep.mubr.bf16.mxu1 %v14491_v1  ;;  %v14492_v11 = vld [vmem:[#allocation2 + $0x23c] ss:$12 sps:$4 sm:$0xff]   ;;  %2436 = vst [vmem:[#allocation2 + $0x254] sm:$0xf] %v1997_v5 }
  0xf0   : > { %v2012_v12 = vrot.slane %v2011_v2, 4  ;;  %v2021_v13 = vor.u32 %v2020_v4, %v2016_v3  ;;  %v720_v14 = vrot.slane %v15965_v10, 4  ;;  %v2007_v15 = vsel %vm15702_vm2, %v2002_v6, %v2006_v52  ;;  %v1473_v19 = vld [vmem:[%s15671_s17 + $0xd8] sm:$0xf]  ;;  %13883 = vmatmul.mubr.bf16.gmra.mxu1 %v14492_v11  ;;  %v1474_v23 = vld [vmem:[%s15671_s17 + $0xdc] sm:$0xf] }
  0xf1   : > { %v722_v16 = vshrl.u32 %v473_v61, 16  ;;  %v725_v17 = vshll.u32 %v473_v61, 16  ;;  %v731_v18 = vshrl.u32 %v474_v9, 16  ;;  %2437 = vst [vmem:[#allocation2 + $0x260] sm:$0xf] %v2007_v15  ;;  %v734_v22 = vshll.u32 %v474_v9, 16 }
  0xf2   : > { %v2017_v20 = vsel %vm15702_vm2, %v2012_v12, %v2016_v3  ;;  %v2022_v21 = vrot.slane %v2021_v13, 4  ;;  %v2030_v24 = vrot.slane %v2028_v60, 4  ;;  %v14493_v25 = vld [vmem:[#allocation2 + $0xe8] ss:$12 sps:$4 sm:$0xff]   ;;  %v14496_v28 = vld [vmem:[#allocation2 + $0xe4] ss:$12 sps:$4 sm:$0xff]  }
  0xf3   : > { %2438 = vst [vmem:[#allocation2 + $0x26c] sm:$0xf] %v2017_v20  ;;  %v724_v29 = vrot.slane %v722_v16, 7  ;;  %v15993_v10 = vrot.slane %v731_v18, 7  ;;  %v2034_v27 = vshll.u32 %v1473_v19, 16  ;;  %3526 = vmatprep.mubr.bf16.mxu0 %v14493_v25  ;;  %v2038_v35 = vshrl.u32 %v1473_v19, 16 }
  0xf4   : > { %v2027_v30 = vsel %vm15702_vm2, %v2022_v21, %v2026_v7  ;;  %v2031_v32 = vor.u32 %v2030_v24, %v2026_v7  ;;  %v2044_v36 = vshll.u32 %v1474_v23, 16  ;;  %v1475_v37 = vld [vmem:[%s15671_s17 + $0xe0] sm:$0xf]  ;;  %3527 = vmatmul.mubr.bf16.gmra.mxu0 %v14496_v28  ;;  %v2048_v40 = vshrl.u32 %v1474_v23, 16  ;;  %v1476_v42 = vld [vmem:[%s15671_s17 + $0xe4] sm:$0xf] }
  0xf5   : > { %2439 = vst [vmem:[#allocation2 + $0x278] sm:$0xf] %v2027_v30  ;;  %v727_v33 = vor.u32 %v725_v17, %v724_v29  ;;  %v729_v34 = vrot.slane %v724_v29, 4  ;;  %v736_v38 = vor.u32 %v734_v22, %v15993_v10  ;;  %v2036_v31 = vrot.slane %v2034_v27, 5  ;;  %v311_v51 = vld [vmem:[%s15671_s17 + $0x5c] sm:$0xf] }
  0xf6   : > { %v2032_v39 = vrot.slane %v2031_v32, 4  ;;  %v2040_v44 = vrot.slane %v2038_v35, 4  ;;  %v2046_v45 = vrot.slane %v2044_v36, 5  ;;  %v2054_v46 = vshll.u32 %v1475_v37, 16  ;;  %v312_v52 = vld [vmem:[%s15671_s17 + $0x60] sm:$0xf] }
  0xf7   : > { %v728_v43 = vsel %vm15777_vm5, %v720_v14, %v727_v33  ;;  %v737_v47 = vsel %vm15777_vm5, %v729_v34, %v736_v38  ;;  %v2050_v49 = vrot.slane %v2048_v40, 4  ;;  %v2058_v50 = vshrl.u32 %v1475_v37, 16  ;;  %393 = vst [vmem:[#allocation2 + $0x118] sm:$0xf] %v311_v51  ;;  %394 = vst [vmem:[#allocation2 + $0x124] sm:$0xf] %v312_v52 }
  0xf8   : > { %1360 = vst [vmem:[#allocation2 + $0xfc] sm:$0xf] %v728_v43  ;;  %v2037_v48 = vsel %vm15702_vm2, %v2032_v39, %v2036_v31  ;;  %v14497_v53 = vld [vmem:[#allocation2 + $0x254] ss:$12 sps:$4 sm:$0xff]   ;;  %1361 = vst [vmem:[#allocation2 + $0x108] sm:$0xf] %v737_v47  ;;  %v2041_v54 = vor.u32 %v2040_v44, %v2036_v31 }
  0xf9   : > { %2440 = vst [vmem:[#allocation2 + $0x284] sm:$0xf] %v2037_v48  ;;  %v2056_v55 = vrot.slane %v2054_v46, 5  ;;  %v2064_v56 = vshll.u32 %v1476_v42, 16  ;;  %v2051_v57 = vor.u32 %v2050_v49, %v2046_v45  ;;  %v2060_v58 = vrot.slane %v2058_v50, 4  ;;  %13886 = vmatprep.mubr.bf16.mxu1 %v14497_v53 }
  0xfa   : > { %v2068_v59 = vshrl.u32 %v1476_v42, 16  ;;  %v475_v60 = vld [vmem:[%s15671_s17 + $0x5c] sm:$0xf]  ;;  %v2042_v61 = vrot.slane %v2041_v54, 4  ;;  %v476_v1 = vld [vmem:[%s15671_s17 + $0x60] sm:$0xf] }
  0xfb   : > { %v2066_v63 = vrot.slane %v2064_v56, 5  ;;  %v738_v2 = vrot.slane %v15993_v10, 4  ;;  %v740_v3 = vshrl.u32 %v475_v60, 16  ;;  %v2052_v5 = vrot.slane %v2051_v57, 4  ;;  %v1477_v14 = vld [vmem:[%s15671_s17 + $0xe8] sm:$0xf] }
  0xfc   : > { %v14498_v4 = vld [vmem:[#allocation2 + $0x26c] ss:$12 sps:$4 sm:$0xff]   ;;  %v2061_v6 = vor.u32 %v2060_v58, %v2056_v55  ;;  %v743_v7 = vshll.u32 %v475_v60, 16  ;;  %v2047_v9 = vsel %vm15702_vm2, %v2042_v61, %v2046_v45  ;;  %v749_v12 = vshrl.u32 %v476_v1, 16  ;;  %v1479_v36 = vld [vmem:[%s15671_s17 + $0xf0] sm:$0xf] }
  0xfd   : > { %v742_v11 = vrot.slane %v740_v3, 7  ;;  %v752_v13 = vshll.u32 %v476_v1, 16  ;;  %13887 = vmatmul.mubr.bf16.gmra.mxu1 %v14498_v4  ;;  %2441 = vst [vmem:[#allocation2 + $0x290] sm:$0xf] %v2047_v9  ;;  %v2057_v15 = vsel %vm15702_vm2, %v2052_v5, %v2056_v55  ;;  %v1478_v17 = vld [vmem:[%s15671_s17 + $0xec] sm:$0xf] }
  0xfe   : > { %v2062_v16 = vrot.slane %v2061_v6, 4  ;;  %v2070_v18 = vrot.slane %v2068_v59, 4  ;;  %v2074_v19 = vshll.u32 %v1477_v14, 16  ;;  %2442 = vst [vmem:[#allocation2 + $0x29c] sm:$0xf] %v2057_v15  ;;  %v16015_v22 = vrot.slane %v749_v12, 7 }
  0xff   : > { %v745_v20 = vor.u32 %v743_v7, %v742_v11  ;;  %v747_v21 = vrot.slane %v742_v11, 4  ;;  %v2078_v23 = vshrl.u32 %v1477_v14, 16  ;;  %v14499_v24 = vld [vmem:[#allocation2 + $0x100] ss:$12 sps:$4 sm:$0xff]   ;;  %v14501_v25 = vld [vmem:[#allocation2 + $0xfc] ss:$12 sps:$4 sm:$0xff]  }
 0x100   : > { %v2067_v28 = vsel %vm15702_vm2, %v2062_v16, %v2066_v63  ;;  %v2071_v29 = vor.u32 %v2070_v18, %v2066_v63  ;;  %v2076_v30 = vrot.slane %v2074_v19, 5  ;;  %v754_v32 = vor.u32 %v752_v13, %v16015_v22  ;;  %3534 = vmatprep.mubr.bf16.mxu0 %v14499_v24  ;;  %v1480_v37 = vld [vmem:[%s15671_s17 + $0xf4] sm:$0xf]  ;;  %v313_v46 = vld [vmem:[%s15671_s17 + $0x64] sm:$0xf] }
 0x101   : > { %2443 = vst [vmem:[#allocation2 + $0x2a8] sm:$0xf] %v2067_v28  ;;  %v746_v10 = vsel %vm15777_vm5, %v738_v2, %v745_v20  ;;  %v2080_v27 = vrot.slane %v2078_v23, 4  ;;  %v2084_v33 = vshll.u32 %v1478_v17, 16  ;;  %v2088_v35 = vshrl.u32 %v1478_v17, 16  ;;  %3535 = vmatmul.mubr.bf16.gmra.mxu0 %v14501_v25 }
 0x102   : > { %1362 = vst [vmem:[#allocation2 + $0x114] sm:$0xf] %v746_v10  ;;  %v2072_v34 = vrot.slane %v2071_v29, 4  ;;  %v755_v38 = vsel %vm15777_vm5, %v747_v21, %v754_v32  ;;  %v2094_v40 = vshll.u32 %v1479_v36, 16  ;;  %v2098_v44 = vshrl.u32 %v1479_v36, 16 }
 0x103   : > { %v2081_v39 = vor.u32 %v2080_v27, %v2076_v30  ;;  %v2086_v31 = vrot.slane %v2084_v33, 5  ;;  %1363 = vst [vmem:[#allocation2 + $0x120] sm:$0xf] %v755_v38  ;;  %v2090_v43 = vrot.slane %v2088_v35, 4  ;;  %v2104_v45 = vshll.u32 %v1480_v37, 16 }
 0x104   : > { %v2077_v42 = vsel %vm15702_vm2, %v2072_v34, %v2076_v30  ;;  %v14502_v47 = vld [vmem:[#allocation2 + $0x284] ss:$12 sps:$4 sm:$0xff]   ;;  %v2096_v49 = vrot.slane %v2094_v40, 5  ;;  %395 = vst [vmem:[#allocation2 + $0x130] sm:$0xf] %v313_v46  ;;  %v2100_v51 = vrot.slane %v2098_v44, 4 }
 0x105   : > { %v2082_v48 = vrot.slane %v2081_v39, 4  ;;  %2444 = vst [vmem:[#allocation2 + $0x2b4] sm:$0xf] %v2077_v42  ;;  %v2091_v50 = vor.u32 %v2090_v43, %v2086_v31  ;;  %v2106_v52 = vrot.slane %v2104_v45, 5  ;;  %v2108_v53 = vshrl.u32 %v1480_v37, 16  ;;  %13890 = vmatprep.mubr.bf16.mxu1 %v14502_v47  ;;  %v14576_v43 = vld [vmem:[#allocation6 + $0x90] sm:$0xff]  }
 0x106   : > { %v314_v55 = vld [vmem:[%s15671_s17 + $0x68] sm:$0xf]  ;;  %v477_v56 = vld [vmem:[%s15671_s17 + $0x64] sm:$0xf]  ;;  %v2101_v60 = vor.u32 %v2100_v51, %v2096_v49  ;;  %v756_v61 = vrot.slane %v16015_v22, 4  ;;  %13924 = vmatprep.subr.bf16.mxu0 %v14576_v43 }
 0x107   : > { %v2087_v54 = vsel %vm15702_vm2, %v2082_v48, %v2086_v31  ;;  %v478_v57 = vld [vmem:[%s15671_s17 + $0x68] sm:$0xf]  ;;  %v2092_v59 = vrot.slane %v2091_v50, 4  ;;  %396 = vst [vmem:[#allocation2 + $0x13c] sm:$0xf] %v314_v55  ;;  %v758_v63 = vshrl.u32 %v477_v56, 16  ;;  %13925 = vmatpush3.bf16.msra.mxu0 %v14576_v43 }
 0x108   : > { %v14504_v58 = vld [vmem:[#allocation2 + $0x29c] ss:$12 sps:$4 sm:$0xff]   ;;  %2445 = vst [vmem:[#allocation2 + $0x2c0] sm:$0xf] %v2087_v54  ;;  %v761_v1 = vshll.u32 %v477_v56, 16  ;;  %v767_v2 = vshrl.u32 %v478_v57, 16 }
 0x109   : > { %v770_v3 = vshll.u32 %v478_v57, 16  ;;  %13891 = vmatmul.mubr.bf16.gmra.mxu1 %v14504_v58  ;;  %v2097_v4 = vsel %vm15702_vm2, %v2092_v59, %v2096_v49  ;;  %v2102_v5 = vrot.slane %v2101_v60, 4  ;;  %v1481_v6 = vld [vmem:[%s15671_s17 + $0xf8] sm:$0xf]  ;;  %v1482_v7 = vld [vmem:[%s15671_s17 + $0xfc] sm:$0xf] }
 0x10a   : > { %v2110_v9 = vrot.slane %v2108_v53, 4  ;;  %v14505_v11 = vld [vmem:[#allocation2 + $0x118] ss:$12 sps:$4 sm:$0xff]   ;;  %v14507_v12 = vld [vmem:[#allocation2 + $0x114] ss:$12 sps:$4 sm:$0xff]   ;;  %v760_v13 = vrot.slane %v758_v63, 7 }
 0x10b   : > { %2446 = vst [vmem:[#allocation2 + $0x2cc] sm:$0xf] %v2097_v4  ;;  %v2107_v14 = vsel %vm15702_vm2, %v2102_v5, %v2106_v52  ;;  %v16041_v15 = vrot.slane %v767_v2, 7  ;;  %v2114_v17 = vshll.u32 %v1481_v6, 16  ;;  %v1483_v18 = vld [vmem:[%s15671_s17 + $0x100] sm:$0xf]  ;;  %3542 = vmatprep.mubr.bf16.mxu0 %v14505_v11 }
 0x10c   : > { %v2111_v16 = vor.u32 %v2110_v9, %v2106_v52  ;;  %2447 = vst [vmem:[#allocation2 + $0x2d8] sm:$0xf] %v2107_v14  ;;  %v763_v19 = vor.u32 %v761_v1, %v760_v13  ;;  %v765_v20 = vrot.slane %v760_v13, 4  ;;  %v2118_v21 = vshrl.u32 %v1481_v6, 16  ;;  %v1484_v23 = vld [vmem:[%s15671_s17 + $0x104] sm:$0xf]  ;;  %3543 = vmatmul.mubr.bf16.gmra.mxu0 %v14507_v12 }
 0x10d   : > { %v2124_v22 = vshll.u32 %v1482_v7, 16  ;;  %v772_v24 = vor.u32 %v770_v3, %v16041_v15  ;;  %v2116_v28 = vrot.slane %v2114_v17, 5  ;;  %v2128_v29 = vshrl.u32 %v1482_v7, 16  ;;  %v315_v37 = vld [vmem:[%s15671_s17 + $0x6c] sm:$0xf] }
 0x10e   : > { %v2112_v25 = vrot.slane %v2111_v16, 4  ;;  %v764_v10 = vsel %vm15777_vm5, %v756_v61, %v763_v19  ;;  %v2120_v32 = vrot.slane %v2118_v21, 4  ;;  %v2134_v36 = vshll.u32 %v1483_v18, 16  ;;  %v316_v42 = vld [vmem:[%s15671_s17 + $0x70] sm:$0xf] }
 0x10f   : > { %v14508_v30 = vld [vmem:[#allocation2 + $0x2b4] ss:$12 sps:$4 sm:$0xff]   ;;  %v2126_v27 = vrot.slane %v2124_v22, 5  ;;  %v773_v33 = vsel %vm15777_vm5, %v765_v20, %v772_v24  ;;  %1364 = vst [vmem:[#allocation2 + $0x12c] sm:$0xf] %v764_v10  ;;  %v2130_v35 = vrot.slane %v2128_v29, 4 }
 0x110   : > { %v2117_v34 = vsel %vm15702_vm2, %v2112_v25, %v2116_v28  ;;  %13894 = vmatprep.mubr.bf16.mxu1 %v14508_v30  ;;  %1365 = vst [vmem:[#allocation2 + $0x138] sm:$0xf] %v773_v33  ;;  %v2121_v38 = vor.u32 %v2120_v32, %v2116_v28  ;;  %v2138_v39 = vshrl.u32 %v1483_v18, 16  ;;  %v2144_v31 = vshll.u32 %v1484_v23, 16  ;;  %397 = vst [vmem:[#allocation2 + $0x148] sm:$0xf] %v315_v37 }
 0x111   : > { %2448 = vst [vmem:[#allocation2 + $0x2e4] sm:$0xf] %v2117_v34  ;;  %v2148_v40 = vshrl.u32 %v1484_v23, 16  ;;  %v2131_v44 = vor.u32 %v2130_v35, %v2126_v27  ;;  %v2136_v45 = vrot.slane %v2134_v36, 5  ;;  %398 = vst [vmem:[#allocation2 + $0x154] sm:$0xf] %v316_v42 }
 0x112   : > { %v479_v46 = vld [vmem:[%s15671_s17 + $0x6c] sm:$0xf]  ;;  %v774_v47 = vrot.slane %v16041_v15, 4  ;;  %v2122_v48 = vrot.slane %v2121_v38, 4  ;;  %v2140_v49 = vrot.slane %v2138_v39, 4  ;;  %v2146_v50 = vrot.slane %v2144_v31, 5 }
 0x113   : > { %v480_v51 = vld [vmem:[%s15671_s17 + $0x70] sm:$0xf]  ;;  %v776_v52 = vshrl.u32 %v479_v46, 16  ;;  %v14510_v53 = vld [vmem:[#allocation2 + $0x2cc] ss:$12 sps:$4 sm:$0xff]   ;;  %v2132_v54 = vrot.slane %v2131_v44, 4 }
 0x114   : > { %v779_v55 = vshll.u32 %v479_v46, 16  ;;  %v2127_v56 = vsel %vm15702_vm2, %v2122_v48, %v2126_v27  ;;  %v2141_v57 = vor.u32 %v2140_v49, %v2136_v45  ;;  %v785_v59 = vshrl.u32 %v480_v51, 16  ;;  %v1485_v60 = vld [vmem:[%s15671_s17 + $0x108] sm:$0xf]  ;;  %v1486_v61 = vld [vmem:[%s15671_s17 + $0x10c] sm:$0xf]  ;;  %13895 = vmatmul.mubr.bf16.gmra.mxu1 %v14510_v53 }
 0x115   : > { %v778_v58 = vrot.slane %v776_v52, 7  ;;  %2449 = vst [vmem:[#allocation2 + $0x2f0] sm:$0xf] %v2127_v56  ;;  %v2137_v63 = vsel %vm15702_vm2, %v2132_v54, %v2136_v45  ;;  %v788_v1 = vshll.u32 %v480_v51, 16  ;;  %v2150_v2 = vrot.slane %v2148_v40, 4 }
 0x116   : > { %v2154_v3 = vshll.u32 %v1485_v60, 16  ;;  %v1487_v4 = vld [vmem:[%s15671_s17 + $0x110] sm:$0xf]  ;;  %v2142_v5 = vrot.slane %v2141_v57, 4  ;;  %2450 = vst [vmem:[#allocation2 + $0x2fc] sm:$0xf] %v2137_v63 }
 0x117   : > { %v781_v6 = vor.u32 %v779_v55, %v778_v58  ;;  %v783_v7 = vrot.slane %v778_v58, 4  ;;  %v16064_v9 = vrot.slane %v785_v59, 7  ;;  %v1488_v11 = vld [vmem:[%s15671_s17 + $0x114] sm:$0xf]  ;;  %v14512_v12 = vld [vmem:[#allocation2 + $0x130] ss:$12 sps:$4 sm:$0xff]   ;;  %v2151_v14 = vor.u32 %v2150_v2, %v2146_v50 }
 0x118   : > { %v14514_v13 = vld [vmem:[#allocation2 + $0x12c] ss:$12 sps:$4 sm:$0xff]   ;;  %v2156_v15 = vrot.slane %v2154_v3, 5  ;;  %v2147_v16 = vsel %vm15702_vm2, %v2142_v5, %v2146_v50  ;;  %v2158_v19 = vshrl.u32 %v1485_v60, 16  ;;  %3550 = vmatprep.mubr.bf16.mxu0 %v14512_v12  ;;  %v2164_v21 = vshll.u32 %v1486_v61, 16 }
 0x119   : > { %v782_v17 = vsel %vm15777_vm5, %v774_v47, %v781_v6  ;;  %v790_v18 = vor.u32 %v788_v1, %v16064_v9  ;;  %2451 = vst [vmem:[#allocation2 + $0x308] sm:$0xf] %v2147_v16  ;;  %v2152_v20 = vrot.slane %v2151_v14, 4  ;;  %v2168_v22 = vshrl.u32 %v1486_v61, 16  ;;  %3551 = vmatmul.mubr.bf16.gmra.mxu0 %v14514_v13  ;;  %v317_v30 = vld [vmem:[%s15671_s17 + $0x74] sm:$0xf] }
 0x11a   : > { %1366 = vst [vmem:[#allocation2 + $0x144] sm:$0xf] %v782_v17  ;;  %v2174_v23 = vshll.u32 %v1487_v4, 16  ;;  %v2160_v25 = vrot.slane %v2158_v19, 4  ;;  %v2178_v28 = vshrl.u32 %v1487_v4, 16  ;;  %v2184_v29 = vshll.u32 %v1488_v11, 16 }
 0x11b   : > { %v791_v24 = vsel %vm15777_vm5, %v783_v7, %v790_v18  ;;  %v2157_v10 = vsel %vm15702_vm2, %v2152_v20, %v2156_v15  ;;  %v2166_v32 = vrot.slane %v2164_v21, 5  ;;  %v2170_v27 = vrot.slane %v2168_v22, 4  ;;  %v318_v34 = vld [vmem:[%s15671_s17 + $0x78] sm:$0xf]  ;;  %399 = vst [vmem:[#allocation2 + $0x160] sm:$0xf] %v317_v30 }
 0x11c   : > { %1367 = vst [vmem:[#allocation2 + $0x150] sm:$0xf] %v791_v24  ;;  %v2176_v33 = vrot.slane %v2174_v23, 5  ;;  %v14515_v35 = vld [vmem:[#allocation2 + $0x2e4] ss:$12 sps:$4 sm:$0xff]   ;;  %v2161_v36 = vor.u32 %v2160_v25, %v2156_v15  ;;  %v2180_v37 = vrot.slane %v2178_v28, 4 }
 0x11d   : > { %2452 = vst [vmem:[#allocation2 + $0x314] sm:$0xf] %v2157_v10  ;;  %v2186_v38 = vrot.slane %v2184_v29, 5  ;;  %400 = vst [vmem:[#allocation2 + $0x16c] sm:$0xf] %v318_v34  ;;  %v2171_v39 = vor.u32 %v2170_v27, %v2166_v32  ;;  %v2188_v31 = vshrl.u32 %v1488_v11, 16  ;;  %13898 = vmatprep.mubr.bf16.mxu1 %v14515_v35 }
 0x11e   : > { %v481_v40 = vld [vmem:[%s15671_s17 + $0x74] sm:$0xf]  ;;  %v792_v42 = vrot.slane %v16064_v9, 4  ;;  %v2162_v43 = vrot.slane %v2161_v36, 4  ;;  %v2181_v44 = vor.u32 %v2180_v37, %v2176_v33  ;;  %v482_v45 = vld [vmem:[%s15671_s17 + $0x78] sm:$0xf] }
 0x11f   : > { %v794_v46 = vshrl.u32 %v481_v40, 16  ;;  %v797_v47 = vshll.u32 %v481_v40, 16  ;;  %v2172_v48 = vrot.slane %v2171_v39, 4  ;;  %v803_v49 = vshrl.u32 %v482_v45, 16  ;;  %v1489_v51 = vld [vmem:[%s15671_s17 + $0x118] sm:$0xf] }
 0x120   : > { %v806_v50 = vshll.u32 %v482_v45, 16  ;;  %v2190_v52 = vrot.slane %v2188_v31, 4  ;;  %v14516_v53 = vld [vmem:[#allocation2 + $0x2fc] ss:$12 sps:$4 sm:$0xff]   ;;  %v2167_v54 = vsel %vm15702_vm2, %v2162_v43, %v2166_v32  ;;  %v2182_v55 = vrot.slane %v2181_v44, 4 }
 0x121   : > { %2453 = vst [vmem:[#allocation2 + $0x320] sm:$0xf] %v2167_v54  ;;  %v2177_v56 = vsel %vm15702_vm2, %v2172_v48, %v2176_v33  ;;  %v796_v57 = vrot.slane %v794_v46, 7  ;;  %v16086_v58 = vrot.slane %v803_v49, 7  ;;  %v1490_v59 = vld [vmem:[%s15671_s17 + $0x11c] sm:$0xf]  ;;  %13899 = vmatmul.mubr.bf16.gmra.mxu1 %v14516_v53 }
 0x122   : > { %v2191_v60 = vor.u32 %v2190_v52, %v2186_v38  ;;  %v1491_v61 = vld [vmem:[%s15671_s17 + $0x120] sm:$0xf]  ;;  %v14518_v63 = vld [vmem:[#allocation2 + $0x148] ss:$12 sps:$4 sm:$0xff]   ;;  %v2187_v2 = vsel %vm15702_vm2, %v2182_v55, %v2186_v38  ;;  %2454 = vst [vmem:[#allocation2 + $0x32c] sm:$0xf] %v2177_v56 }
 0x123   : > { %v14520_v1 = vld [vmem:[#allocation2 + $0x144] ss:$12 sps:$4 sm:$0xff]   ;;  %v2194_v3 = vshll.u32 %v1489_v51, 16  ;;  %2455 = vst [vmem:[#allocation2 + $0x338] sm:$0xf] %v2187_v2  ;;  %v799_v4 = vor.u32 %v797_v47, %v796_v57  ;;  %v801_v5 = vrot.slane %v796_v57, 4  ;;  %v808_v6 = vor.u32 %v806_v50, %v16086_v58  ;;  %3558 = vmatprep.mubr.bf16.mxu0 %v14518_v63 }
 0x124   : > { %v2192_v7 = vrot.slane %v2191_v60, 4  ;;  %v1492_v9 = vld [vmem:[%s15671_s17 + $0x124] sm:$0xf]  ;;  %v2198_v12 = vshrl.u32 %v1489_v51, 16  ;;  %v2204_v13 = vshll.u32 %v1490_v59, 16  ;;  %v2208_v14 = vshrl.u32 %v1490_v59, 16  ;;  %3559 = vmatmul.mubr.bf16.gmra.mxu0 %v14520_v1 }
 0x125   : > { %v2196_v11 = vrot.slane %v2194_v3, 5  ;;  %v800_v15 = vsel %vm15777_vm5, %v792_v42, %v799_v4  ;;  %v809_v16 = vsel %vm15777_vm5, %v801_v5, %v808_v6  ;;  %v2214_v17 = vshll.u32 %v1491_v61, 16  ;;  %v319_v29 = vld [vmem:[%s15671_s17 + $0x7c] sm:$0xf]  ;;  %v320_v27 = vld [vmem:[%s15671_s17 + $0x80] sm:$0xf] }
 0x126   : > { %v2218_v18 = vshrl.u32 %v1491_v61, 16  ;;  %1368 = vst [vmem:[#allocation2 + $0x15c] sm:$0xf] %v800_v15  ;;  %1369 = vst [vmem:[#allocation2 + $0x168] sm:$0xf] %v809_v16  ;;  %v2200_v20 = vrot.slane %v2198_v12, 4 }
 0x127   : > { %v2197_v19 = vsel %vm15702_vm2, %v2192_v7, %v2196_v11  ;;  %v2206_v21 = vrot.slane %v2204_v13, 5  ;;  %v2210_v22 = vrot.slane %v2208_v14, 4  ;;  %v2216_v23 = vrot.slane %v2214_v17, 5  ;;  %401 = vst [vmem:[#allocation2 + $0x178] sm:$0xf] %v319_v29 }
 0x128   : > { %2456 = vst [vmem:[#allocation2 + $0x344] sm:$0xf] %v2197_v19  ;;  %v2220_v24 = vrot.slane %v2218_v18, 4  ;;  %v2224_v25 = vshll.u32 %v1492_v9, 16  ;;  %v2228_v28 = vshrl.u32 %v1492_v9, 16  ;;  %v2201_v10 = vor.u32 %v2200_v20, %v2196_v11 }
 0x129   : > { %v14521_v30 = vld [vmem:[#allocation2 + $0x314] ss:$12 sps:$4 sm:$0xff]   ;;  %v2211_v32 = vor.u32 %v2210_v22, %v2206_v21  ;;  %402 = vst [vmem:[#allocation2 + $0x184] sm:$0xf] %v320_v27  ;;  %v810_v36 = vrot.slane %v16086_v58, 4 }
 0x12a   : > { %v2221_v33 = vor.u32 %v2220_v24, %v2216_v23  ;;  %v2226_v34 = vrot.slane %v2224_v25, 5  ;;  %v483_v35 = vld [vmem:[%s15671_s17 + $0x7c] sm:$0xf]  ;;  %13902 = vmatprep.mubr.bf16.mxu1 %v14521_v30  ;;  %v14522_v37 = vld [vmem:[#allocation2 + $0x32c] ss:$12 sps:$4 sm:$0xff]   ;;  %v2202_v38 = vrot.slane %v2201_v10, 4 }
 0x12b   : > { %v2212_v39 = vrot.slane %v2211_v32, 4  ;;  %v484_v40 = vld [vmem:[%s15671_s17 + $0x80] sm:$0xf]  ;;  %v812_v42 = vshrl.u32 %v483_v35, 16  ;;  %v815_v43 = vshll.u32 %v483_v35, 16  ;;  %v2230_v44 = vrot.slane %v2228_v28, 4  ;;  %13903 = vmatmul.mubr.bf16.gmra.mxu1 %v14522_v37 }
 0x12c   : > { %v2222_v31 = vrot.slane %v2221_v33, 4  ;;  %v2207_v45 = vsel %vm15702_vm2, %v2202_v38, %v2206_v21  ;;  %v821_v47 = vshrl.u32 %v484_v40, 16  ;;  %v824_v48 = vshll.u32 %v484_v40, 16  ;;  %v1493_v49 = vld [vmem:[%s15671_s17 + $0x128] sm:$0xf] }
 0x12d   : > { %v2217_v46 = vsel %vm15702_vm2, %v2212_v39, %v2216_v23  ;;  %v1494_v50 = vld [vmem:[%s15671_s17 + $0x12c] sm:$0xf]  ;;  %2457 = vst [vmem:[#allocation2 + $0x350] sm:$0xf] %v2207_v45  ;;  %v814_v53 = vrot.slane %v812_v42, 7  ;;  %v2231_v54 = vor.u32 %v2230_v44, %v2226_v34  ;;  %v2234_v55 = vshll.u32 %v1493_v49, 16 }
 0x12e   : > { %v14524_v51 = vld [vmem:[#allocation2 + $0x160] ss:$12 sps:$4 sm:$0xff]   ;;  %v2227_v52 = vsel %vm15702_vm2, %v2222_v31, %v2226_v34  ;;  %2458 = vst [vmem:[#allocation2 + $0x35c] sm:$0xf] %v2217_v46  ;;  %v14526_v56 = vld [vmem:[#allocation2 + $0x15c] ss:$12 sps:$4 sm:$0xff]  }
 0x12f   : > { %2459 = vst [vmem:[#allocation2 + $0x368] sm:$0xf] %v2227_v52  ;;  %v16113_v57 = vrot.slane %v821_v47, 7  ;;  %v2238_v58 = vshrl.u32 %v1493_v49, 16  ;;  %3566 = vmatprep.mubr.bf16.mxu0 %v14524_v51  ;;  %v817_v59 = vor.u32 %v815_v43, %v814_v53  ;;  %v819_v60 = vrot.slane %v814_v53, 4  ;;  %v14594_v44 = vld [vmem:[#allocation6 + $0x88] sm:$0xff]  }
 0x130   : > { %v2232_v61 = vrot.slane %v2231_v54, 4  ;;  %v2236_v63 = vrot.slane %v2234_v55, 5  ;;  %v1495_v1 = vld [vmem:[%s15671_s17 + $0x130] sm:$0xf]  ;;  %3567 = vmatmul.mubr.bf16.gmra.mxu0 %v14526_v56  ;;  %v2244_v4 = vshll.u32 %v1494_v50, 16  ;;  %v2248_v5 = vshrl.u32 %v1494_v50, 16  ;;  %13926 = vmatprep.subr.bf16.mxu0 %v14594_v44 }
 0x131   : > { %v826_v2 = vor.u32 %v824_v48, %v16113_v57  ;;  %v2240_v3 = vrot.slane %v2238_v58, 4  ;;  %v1496_v6 = vld [vmem:[%s15671_s17 + $0x134] sm:$0xf]  ;;  %v818_v7 = vsel %vm15777_vm5, %v810_v36, %v817_v59  ;;  %v2254_v11 = vshll.u32 %v1495_v1, 16  ;;  %v321_v29 = vld [vmem:[%s15671_s17 + $0x84] sm:$0xf]  ;;  %13927 = vmatpush3.bf16.msra.mxu0 %v14594_v44 }
 0x132   : > { %v2237_v9 = vsel %vm15702_vm2, %v2232_v61, %v2236_v63  ;;  %v2258_v12 = vshrl.u32 %v1495_v1, 16  ;;  %1370 = vst [vmem:[#allocation2 + $0x174] sm:$0xf] %v818_v7  ;;  %v2246_v15 = vrot.slane %v2244_v4, 5  ;;  %v2250_v16 = vrot.slane %v2248_v5, 4 }
 0x133   : > { %v827_v13 = vsel %vm15777_vm5, %v819_v60, %v826_v2  ;;  %v2241_v14 = vor.u32 %v2240_v3, %v2236_v63  ;;  %2460 = vst [vmem:[#allocation2 + $0x374] sm:$0xf] %v2237_v9  ;;  %v2256_v17 = vrot.slane %v2254_v11, 5  ;;  %v2264_v19 = vshll.u32 %v1496_v6, 16  ;;  %v322_v27 = vld [vmem:[%s15671_s17 + $0x88] sm:$0xf] }
 0x134   : > { %1371 = vst [vmem:[#allocation2 + $0x180] sm:$0xf] %v827_v13  ;;  %v2260_v18 = vrot.slane %v2258_v12, 4  ;;  %v14527_v20 = vld [vmem:[#allocation2 + $0x344] ss:$12 sps:$4 sm:$0xff]   ;;  %v2251_v21 = vor.u32 %v2250_v16, %v2246_v15  ;;  %v828_v30 = vrot.slane %v16113_v57, 4 }
 0x135   : > { %v2242_v23 = vrot.slane %v2241_v14, 4  ;;  %v16124_v25 = vrot.slane %v2264_v19, 5  ;;  %13906 = vmatprep.mubr.bf16.mxu1 %v14527_v20  ;;  %403 = vst [vmem:[#allocation2 + $0x190] sm:$0xf] %v321_v29  ;;  %v485_v33 = vld [vmem:[%s15671_s17 + $0x84] sm:$0xf] }
 0x136   : > { %v14528_v22 = vld [vmem:[#allocation2 + $0x35c] ss:$12 sps:$4 sm:$0xff]   ;;  %v2261_v24 = vor.u32 %v2260_v18, %v2256_v17  ;;  %v2252_v28 = vrot.slane %v2251_v21, 4  ;;  %404 = vst [vmem:[#allocation2 + $0x19c] sm:$0xf] %v322_v27  ;;  %v830_v38 = vshrl.u32 %v485_v33, 16 }
 0x137   : > { %19613 = vst [vmem:[#allocation18_spill] sm:$0xff] %v16124_v25  ;;  %13907 = vmatmul.mubr.bf16.gmra.mxu1 %v14528_v22  ;;  %v2247_v10 = vsel %vm15702_vm2, %v2242_v23, %v2246_v15  ;;  %v16133_v34 = vld [vmem:[%s15671_s17 + $0x10] sm:$0xf]  ;;  %v486_v37 = vld [vmem:[%s15671_s17 + $0x88] sm:$0xf]  ;;  %v833_v39 = vshll.u32 %v485_v33, 16 }
 0x138   : > { %v2262_v32 = vrot.slane %v2261_v24, 4  ;;  %v572_v35 = vshll.u32 %v16133_v34, 16  ;;  %2461 = vst [vmem:[#allocation2 + $0x380] sm:$0xf] %v2247_v10  ;;  %v2257_v36 = vsel %vm15702_vm2, %v2252_v28, %v2256_v17  ;;  %v289_v31 = vld [vmem:[%s15671_s17 + $0x4] sm:$0xf] }
 0x139   : > { %2462 = vst [vmem:[#allocation2 + $0x38c] sm:$0xf] %v2257_v36  ;;  %v839_v42 = vshrl.u32 %v486_v37, 16  ;;  %v842_v43 = vshll.u32 %v486_v37, 16  ;;  %371 = vst [vmem:[#allocation2 + $0x10] sm:$0xf] %v289_v31 }
 0x13a   : > { %v2267_v40 = vsel %vm15702_vm2, %v2262_v32, %v16124_v25  ;;  %v14531_v45 = vld [vmem:[#allocation2 + $0x178] ss:$12 sps:$4 sm:$0xff]   ;;  %v832_v47 = vrot.slane %v830_v38, 7  ;;  %v290_v49 = vld [vmem:[%s15671_s17 + $0x8] sm:$0xf]  ;;  %v574_v38 = vor.u32 %v572_v35, %v15767_v62 }
 0x13b   : > { %v14533_v46 = vld [vmem:[#allocation2 + $0x174] ss:$12 sps:$4 sm:$0xff]   ;;  %2463 = vst [vmem:[#allocation2 + $0x398] sm:$0xf] %v2267_v40  ;;  %v16143_v48 = vrot.slane %v839_v42, 7  ;;  %3574 = vmatprep.mubr.bf16.mxu0 %v14531_v45 }
 0x13c   : > { %v452_v50 = vld [vmem:[%s15671_s17] sm:$0x8]  ;;  %v835_v51 = vor.u32 %v833_v39, %v832_v47  ;;  %v837_v52 = vrot.slane %v832_v47, 4  ;;  %372 = vst [vmem:[#allocation2 + $0x1c] sm:$0xf] %v290_v49  ;;  %3575 = vmatmul.mubr.bf16.gmra.mxu0 %v14533_v46 }
 0x13d   : > { %v453_v53 = vld [vmem:[%s15671_s17 + $0x4] sm:$0xf]  ;;  %v454_v54 = vld [vmem:[%s15671_s17 + $0x8] sm:$0xf]  ;;  %v537_v55 = vshrl.u32 %v452_v50, 16  ;;  %v844_v56 = vor.u32 %v842_v43, %v16143_v48  ;;  %v846_v11 = vrot.slane %v16143_v48, 4 }
 0x13e   : > { %v542_v57 = vshrl.u32 %v453_v53, 16  ;;  %v545_v58 = vshll.u32 %v453_v53, 16  ;;  %v551_v59 = vshrl.u32 %v454_v54, 16  ;;  %v323_v60 = vld [vmem:[%s15671_s17 + $0x8c] sm:$0xf]  ;;  %v836_v61 = vsel %vm15777_vm5, %v828_v30, %v835_v51 }
 0x13f   : > { %v12704_v63 = vrot.slane %v537_v55, 11  ;;  %v554_v1 = vshll.u32 %v454_v54, 16  ;;  %v324_v2 = vld [vmem:[%s15671_s17 + $0x90] sm:$0xf]  ;;  %405 = vst [vmem:[#allocation2 + $0x1a8] sm:$0xf] %v323_v60  ;;  %v845_v5 = vsel %vm15777_vm5, %v837_v52, %v844_v56 }
 0x140   : > { %v487_v3 = vld [vmem:[%s15671_s17 + $0x8c] sm:$0xf]  ;;  %v14534_v4 = vld [vmem:[#allocation2 + $0x374] ss:$12 sps:$4 sm:$0xff]   ;;  %1372 = vst [vmem:[#allocation2 + $0x18c] sm:$0xf] %v836_v61 }
 0x141   : > { %v544_v6 = vrot.slane %v542_v57, 7  ;;  %v16157_v7 = vrot.slane %v551_v59, 7  ;;  %406 = vst [vmem:[#allocation2 + $0x1b4] sm:$0xf] %v324_v2  ;;  %1373 = vst [vmem:[#allocation2 + $0x198] sm:$0xf] %v845_v5  ;;  %13910 = vmatprep.mubr.bf16.mxu1 %v14534_v4 }
 0x142   : > { %v488_v9 = vld [vmem:[%s15671_s17 + $0x90] sm:$0xf]  ;;  %v848_v12 = vshrl.u32 %v487_v3, 16  ;;  %v14535_v13 = vld [vmem:[#allocation2 + $0x38c] ss:$12 sps:$4 sm:$0xff]   ;;  %v851_v17 = vshll.u32 %v487_v3, 16 }
 0x143   : > { %v547_v14 = vor.u32 %v545_v58, %v544_v6  ;;  %v549_v15 = vrot.slane %v544_v6, 4  ;;  %v556_v16 = vor.u32 %v554_v1, %v16157_v7  ;;  %v857_v19 = vshrl.u32 %v488_v9, 16  ;;  %v291_v21 = vld [vmem:[%s15671_s17 + $0xc] sm:$0xf]  ;;  %13911 = vmatmul.mubr.bf16.gmra.mxu1 %v14535_v13  ;;  %v292_v28 = vld [vmem:[%s15671_s17 + $0x10] sm:$0xf] }
 0x144   : > { %v850_v18 = vrot.slane %v848_v12, 7  ;;  %v860_v20 = vshll.u32 %v488_v9, 16  ;;  %v558_v22 = vrot.slane %v16157_v7, 4  ;;  %373 = vst [vmem:[#allocation2 + $0x28] sm:$0xf] %v291_v21  ;;  %v14557_v1 = vld [vmem:[#allocation6 + $0x1b8] sm:$0xff]  }
 0x145   : > { %v548_v23 = vsel %vm15777_vm5, %v12704_v63, %v547_v14  ;;  %v557_v24 = vsel %vm15777_vm5, %v549_v15, %v556_v16  ;;  %v455_v29 = vld [vmem:[%s15671_s17 + $0xc] sm:$0xf]  ;;  %v325_v30 = vld [vmem:[%s15671_s17 + $0x94] sm:$0xf]  ;;  %v859_v27 = vrot.slane %v857_v19, 7 }
 0x146   : > { %1340 = vst [vmem:[#allocation2 + $0xc] sm:$0xf] %v548_v23  ;;  %1341 = vst [vmem:[#allocation2 + $0x18] sm:$0xf] %v557_v24  ;;  %v853_v10 = vor.u32 %v851_v17, %v850_v18  ;;  %v855_v32 = vrot.slane %v850_v18, 4  ;;  %v560_v33 = vshrl.u32 %v455_v29, 16 }
 0x147   : > { %374 = vst [vmem:[#allocation2 + $0x34] sm:$0xf] %v292_v28  ;;  %v326_v36 = vld [vmem:[%s15671_s17 + $0x98] sm:$0xf]  ;;  %407 = vst [vmem:[#allocation2 + $0x1c0] sm:$0xf] %v325_v30  ;;  %v862_v42 = vor.u32 %v860_v20, %v859_v27 }
 0x148   : > { %v563_v37 = vshll.u32 %v455_v29, 16  ;;  %408 = vst [vmem:[#allocation2 + $0x1cc] sm:$0xf] %v326_v36  ;;  %v489_v39 = vld [vmem:[%s15671_s17 + $0x94] sm:$0xf]  ;;  %v854_v40 = vsel %vm15777_vm5, %v846_v11, %v853_v10  ;;  %v562_v43 = vrot.slane %v560_v33, 7 }
 0x149   : > { %v490_v31 = vld [vmem:[%s15671_s17 + $0x98] sm:$0xf]  ;;  %v864_v44 = vrot.slane %v859_v27, 4  ;;  %v327_v45 = vld [vmem:[%s15671_s17 + $0x9c] sm:$0xf]  ;;  %v866_v34 = vshrl.u32 %v489_v39, 16  ;;  %v863_v62 = vsel %vm15777_vm5, %v855_v32, %v862_v42 }
 0x14a   : > { %v16180_v46 = vpop.f32.mrf.mxu1  ;;  %v14539_v47 = vld [vmem:[#allocation2 + $0x190] ss:$12 sps:$4 sm:$0xff]   ;;  %v14541_v48 = vld [vmem:[#allocation2 + $0x18c] ss:$12 sps:$4 sm:$0xff]   ;;  %1374 = vst [vmem:[#allocation2 + $0x1a4] sm:$0xf] %v854_v40  ;;  %v565_v35 = vor.u32 %v563_v37, %v562_v43 }
 0x14b   : > { %409 = vst [vmem:[#allocation2 + $0x1d8] sm:$0xf] %v327_v45  ;;  %v567_v49 = vrot.slane %v562_v43, 4  ;;  %v869_v50 = vshll.u32 %v489_v39, 16  ;;  %v328_v51 = vld [vmem:[%s15671_s17 + $0xa0] sm:$0xf]  ;;  %3582 = vmatprep.mubr.bf16.mxu0 %v14539_v47 }
 0x14c   : > { %v491_v52 = vld [vmem:[%s15671_s17 + $0x9c] sm:$0xf]  ;;  %v16186_v53 = vpop.f32.mrf.mxu1  ;;  %1375 = vst [vmem:[#allocation2 + $0x1b0] sm:$0xf] %v863_v62  ;;  %v868_v54 = vrot.slane %v866_v34, 7  ;;  %v875_v55 = vshrl.u32 %v490_v31, 16  ;;  %3583 = vmatmul.mubr.bf16.gmra.mxu0 %v14541_v48  ;;  %v566_v59 = vsel %vm15777_vm5, %v558_v22, %v565_v35 }
 0x14d   : > { %v878_v56 = vshll.u32 %v490_v31, 16  ;;  %410 = vst [vmem:[#allocation2 + $0x1e4] sm:$0xf] %v328_v51  ;;  %v492_v57 = vld [vmem:[%s15671_s17 + $0xa0] sm:$0xf]  ;;  %v884_v58 = vshrl.u32 %v491_v52, 16  ;;  %v575_v60 = vsel %vm15777_vm5, %v567_v49, %v574_v38 }
 0x14e   : > { %v887_v61 = vshll.u32 %v491_v52, 16  ;;  %v893_v63 = vshrl.u32 %v492_v57, 16  ;;  %v16193_v2 = vpop.f32.mrf.mxu1  ;;  %v14542_v3 = vld [vmem:[#allocation2 + $0xc] ss:$12 sps:$4 sm:$0xff]   ;;  %1342 = vst [vmem:[#allocation2 + $0x24] sm:$0xf] %v566_v59  ;;  %v871_v4 = vor.u32 %v869_v50, %v868_v54 }
 0x14f   : > { %1343 = vst [vmem:[#allocation2 + $0x30] sm:$0xf] %v575_v60  ;;  %v873_v5 = vrot.slane %v868_v54, 4  ;;  %v877_v6 = vrot.slane %v875_v55, 7  ;;  %v14544_v7 = vld [vmem:[#allocation2 + $0x10] ss:$12 sps:$4 sm:$0xff]  }
 0x150   : > { %v886_v9 = vrot.slane %v884_v58, 7  ;;  %v895_v11 = vrot.slane %v893_v63, 7  ;;  %v896_v12 = vshll.u32 %v492_v57, 16  ;;  %v16195_v13 = vpop.f32.mrf.mxu1  ;;  %v872_v14 = vsel %vm15777_vm5, %v864_v44, %v871_v4  ;;  %v329_v17 = vld [vmem:[%s15671_s17 + $0xa4] sm:$0xf]  ;;  %4288 = vmatprep.mubr.bf16.mxu1 %v14544_v7  ;;  %v14572_v45 = vld [vmem:[#allocation6 + $0x1a8] sm:$0xff]  }
 0x151   : > { %v880_v15 = vor.u32 %v878_v56, %v877_v6  ;;  %v882_v16 = vrot.slane %v877_v6, 4  ;;  %v330_v18 = vld [vmem:[%s15671_s17 + $0xa8] sm:$0xf]  ;;  %1376 = vst [vmem:[#allocation2 + $0x1bc] sm:$0xf] %v872_v14  ;;  %4289 = vmatmul.mubr.bf16.vlgmr.msra.gmra.mxu1 %v14542_v3  ;;  %v14565_v32 = vld [vmem:[#allocation6 + $0x1b0] sm:$0xff]  }
 0x152   : > { %v889_v19 = vor.u32 %v887_v61, %v886_v9  ;;  %v891_v20 = vrot.slane %v886_v9, 4  ;;  %v898_v21 = vor.u32 %v896_v12, %v895_v11  ;;  %411 = vst [vmem:[#allocation2 + $0x1f0] sm:$0xf] %v329_v17  ;;  %412 = vst [vmem:[#allocation2 + $0x1fc] sm:$0xf] %v330_v18  ;;  %v16203_v24 = vpop.f32.mrf.mxu1  ;;  %v900_v29 = vrot.slane %v895_v11, 4  ;;  %5812 = vmatpush1.bf16.msra.mxu1 %v14557_v1 }
 0x153   : > { %v493_v22 = vld [vmem:[%s15671_s17 + $0xa4] sm:$0xf]  ;;  %v494_v23 = vld [vmem:[%s15671_s17 + $0xa8] sm:$0xf]  ;;  %v881_v28 = vsel %vm15777_vm5, %v873_v5, %v880_v15  ;;  %v331_v42 = vld [vmem:[%s15671_s17 + $0xac] sm:$0xf]  ;;  %5813 = vmatprep.subr.bf16.mxu1 %v19584_v0 }
 0x154   : > { %v902_v30 = vshrl.u32 %v493_v22, 16  ;;  %v905_v10 = vshll.u32 %v493_v22, 16  ;;  %v14545_v27 = vld [vmem:[#allocation2 + $0x1a8] ss:$12 sps:$4 sm:$0xff]   ;;  %v14547_v33 = vld [vmem:[#allocation2 + $0x1a4] ss:$12 sps:$4 sm:$0xff]   ;;  %v890_v36 = vsel %vm15777_vm5, %v882_v16, %v889_v19  ;;  %v899_v37 = vsel %vm15777_vm5, %v891_v20, %v898_v21  ;;  %v16211_v39 = vpop.f32.mrf.mxu1 }
 0x155   : > { %1377 = vst [vmem:[#allocation2 + $0x1c8] sm:$0xf] %v881_v28  ;;  %v911_v38 = vshrl.u32 %v494_v23, 16  ;;  %1378 = vst [vmem:[#allocation2 + $0x1d4] sm:$0xf] %v890_v36  ;;  %v914_v40 = vshll.u32 %v494_v23, 16  ;;  %3590 = vmatprep.mubr.bf16.mxu0 %v14545_v27 }
 0x156   : > { %1379 = vst [vmem:[#allocation2 + $0x1e0] sm:$0xf] %v899_v37  ;;  %v904_v31 = vrot.slane %v902_v30, 7  ;;  %v14548_v43 = vld [vmem:[#allocation2 + $0x28] ss:$12 sps:$4 sm:$0xff]   ;;  %v16215_v47 = vpop.f32.mrf.mxu1  ;;  %3591 = vmatmul.mubr.bf16.gmra.mxu0 %v14547_v33  ;;  %5814 = vmatpush1.bf16.msra.mxu1 %v14565_v32  ;;  %v14590_v22 = vld [vmem:[#allocation6 + $0x198] sm:$0xff]  }
 0x157   : > { %v913_v44 = vrot.slane %v911_v38, 7  ;;  %413 = vst [vmem:[#allocation2 + $0x208] sm:$0xf] %v331_v42  ;;  %v14550_v48 = vld [vmem:[#allocation2 + $0x24] ss:$12 sps:$4 sm:$0xff]   ;;  %4296 = vmatprep.mubr.bf16.mxu1 %v14548_v43  ;;  %5815 = vmatprep.subr.bf16.mxu1 %v19584_v0  ;;  %v14580_v1 = vld [vmem:[#allocation6 + $0x1a0] sm:$0xff]  }
 0x158   : > { %v907_v34 = vor.u32 %v905_v10, %v904_v31  ;;  %v909_v62 = vrot.slane %v904_v31, 4  ;;  %v332_v35 = vld [vmem:[%s15671_s17 + $0xb0] sm:$0xf]  ;;  %v495_v50 = vld [vmem:[%s15671_s17 + $0xac] sm:$0xf]  ;;  %v16220_v54 = vpop.f32.mrf.mxu1 }
 0x159   : > { %v916_v49 = vor.u32 %v914_v40, %v913_v44  ;;  %414 = vst [vmem:[#allocation2 + $0x214] sm:$0xf] %v332_v35  ;;  %v496_v51 = vld [vmem:[%s15671_s17 + $0xb0] sm:$0xf]  ;;  %v918_v52 = vrot.slane %v913_v44, 4  ;;  %v920_v56 = vshrl.u32 %v495_v50, 16  ;;  %4297 = vmatmul.mubr.bf16.gmra.mxu1 %v14550_v48 }
 0x15a   : > { %v908_v55 = vsel %vm15777_vm5, %v900_v29, %v907_v34  ;;  %v923_v57 = vshll.u32 %v495_v50, 16  ;;  %v929_v58 = vshrl.u32 %v496_v51, 16  ;;  %v932_v60 = vshll.u32 %v496_v51, 16  ;;  %v333_v61 = vld [vmem:[%s15671_s17 + $0xb4] sm:$0xf]  ;;  %v16228_v63 = vpop.f32.mrf.mxu1  ;;  %5816 = vmatpush1.bf16.msra.mxu1 %v14572_v45  ;;  %v14598_v50 = vld [vmem:[#allocation6 + $0x190] sm:$0xff]  }
 0x15b   : > { %v917_v59 = vsel %vm15777_vm5, %v909_v62, %v916_v49  ;;  %1380 = vst [vmem:[#allocation2 + $0x1ec] sm:$0xf] %v908_v55  ;;  %v14551_v3 = vld [vmem:[#allocation2 + $0x1c0] ss:$12 sps:$4 sm:$0xff]   ;;  %v922_v5 = vrot.slane %v920_v56, 7  ;;  %5817 = vmatprep.subr.bf16.mxu1 %v19584_v0 }
 0x15c   : > { %v14553_v4 = vld [vmem:[#allocation2 + $0x1bc] ss:$12 sps:$4 sm:$0xff]   ;;  %1381 = vst [vmem:[#allocation2 + $0x1f8] sm:$0xf] %v917_v59  ;;  %415 = vst [vmem:[#allocation2 + $0x220] sm:$0xf] %v333_v61  ;;  %v16230_v11 = vpop.f32.mrf.mxu1  ;;  %3598 = vmatprep.mubr.bf16.mxu0 %v14551_v3 }
 0x15d   : > { %v15122_v6 = vld [vmem:[#allocation2 + $0x40] ss:$12 sps:$4 sm:$0xff]   ;;  %v14554_v7 = vld [vmem:[#allocation2 + $0x1d8] ss:$12 sps:$4 sm:$0xff]   ;;  %v931_v9 = vrot.slane %v929_v58, 7  ;;  %v925_v12 = vor.u32 %v923_v57, %v922_v5  ;;  %v927_v14 = vrot.slane %v922_v5, 4 }
 0x15e   : > { %4304 = vmatprep.mubr.bf16.mxu1 %v15122_v6  ;;  %v334_v15 = vld [vmem:[%s15671_s17 + $0xb8] sm:$0xf]  ;;  %v14609_v16 = vld [vmem:[#allocation6 + $0x80] sm:$0xff]   ;;  %v16236_v21 = vpop.f32.mrf.mxu1  ;;  %3599 = vmatmul.mubr.bf16.gmra.mxu0 %v14553_v4  ;;  %v335_v10 = vld [vmem:[%s15671_s17 + $0xbc] sm:$0xf] }
 0x15f   : > { %v934_v17 = vor.u32 %v932_v60, %v931_v9  ;;  %416 = vst [vmem:[#allocation2 + $0x22c] sm:$0xf] %v334_v15  ;;  %v497_v18 = vld [vmem:[%s15671_s17 + $0xb4] sm:$0xf]  ;;  %v498_v19 = vld [vmem:[%s15671_s17 + $0xb8] sm:$0xf]  ;;  %v926_v23 = vsel %vm15777_vm5, %v918_v52, %v925_v12  ;;  %13928 = vmatprep.subr.bf16.mxu0 %v14609_v16  ;;  %3606 = vmatprep.mubr.bf16.mxu0 %v14554_v7 }
 0x160   : > { %v936_v20 = vrot.slane %v931_v9, 4  ;;  %v938_v28 = vshrl.u32 %v497_v18, 16  ;;  %v941_v29 = vshll.u32 %v497_v18, 16  ;;  %v947_v30 = vshrl.u32 %v498_v19, 16  ;;  %1382 = vst [vmem:[#allocation2 + $0x204] sm:$0xf] %v926_v23  ;;  %v16245_v37 = vpop.f32.mrf.mxu1  ;;  %5818 = vmatpush1.bf16.msra.mxu1 %v14580_v1  ;;  %13929 = vmatpush3.bf16.msra.mxu0 %v14609_v16 }
 0x161   : > { %v935_v32 = vsel %vm15777_vm5, %v927_v14, %v934_v17  ;;  %v950_v27 = vshll.u32 %v498_v19, 16  ;;  %v336_v33 = vld [vmem:[%s15671_s17 + $0xc0] sm:$0xf]  ;;  %417 = vst [vmem:[#allocation2 + $0x238] sm:$0xf] %v335_v10  ;;  %5819 = vmatprep.subr.bf16.mxu1 %v19584_v0  ;;  %v14605_v19 = vld [vmem:[#allocation6 + $0x188] sm:$0xff]  }
 0x162   : > { %v499_v36 = vld [vmem:[%s15671_s17 + $0xbc] sm:$0xf]  ;;  %1383 = vst [vmem:[#allocation2 + $0x210] sm:$0xf] %v935_v32  ;;  %v940_v38 = vrot.slane %v938_v28, 7  ;;  %v949_v31 = vrot.slane %v947_v30, 7  ;;  %v16249_v49 = vpop.f32.mrf.mxu1 }
 0x163   : > { %418 = vst [vmem:[#allocation2 + $0x244] sm:$0xf] %v336_v33  ;;  %v500_v40 = vld [vmem:[%s15671_s17 + $0xc0] sm:$0xf]  ;;  %v956_v42 = vshrl.u32 %v499_v36, 16  ;;  %v959_v45 = vshll.u32 %v499_v36, 16 }
 0x164   : > { %v14556_v43 = vld [vmem:[#allocation2 + $0x1d4] ss:$12 sps:$4 sm:$0xff]   ;;  %v14558_v44 = vld [vmem:[#allocation2 + $0x1f0] ss:$12 sps:$4 sm:$0xff]   ;;  %v943_v34 = vor.u32 %v941_v29, %v940_v38  ;;  %v945_v62 = vrot.slane %v940_v38, 4  ;;  %v952_v35 = vor.u32 %v950_v27, %v949_v31  ;;  %v954_v52 = vrot.slane %v949_v31, 4  ;;  %5820 = vmatpush1.bf16.msra.mxu1 %v14590_v22  ;;  %v16259_v4 = vpop.f32.mrf.mxu1 }
 0x165   : > { %v15123_v48 = vld [vmem:[#allocation2 + $0x3c] ss:$12 sps:$4 sm:$0xff]   ;;  %v15124_v51 = vld [vmem:[#allocation2 + $0x58] ss:$12 sps:$4 sm:$0xff]   ;;  %v958_v55 = vrot.slane %v956_v42, 7  ;;  %v965_v56 = vshrl.u32 %v500_v40, 16  ;;  %5821 = vmatprep.subr.bf16.mxu1 %v19584_v0 }
 0x166   : > { %4305 = vmatmul.mubr.bf16.gmra.mxu1 %v15123_v48  ;;  %v968_v57 = vshll.u32 %v500_v40, 16  ;;  %v337_v58 = vld [vmem:[%s15671_s17 + $0xc4] sm:$0xf]  ;;  %v944_v59 = vsel %vm15777_vm5, %v936_v20, %v943_v34  ;;  %v953_v60 = vsel %vm15777_vm5, %v945_v62, %v952_v35  ;;  %v338_v61 = vld [vmem:[%s15671_s17 + $0xc8] sm:$0xf]  ;;  %3607 = vmatmul.mubr.bf16.gmra.mxu0 %v14556_v43  ;;  %v16268_v30 = vpop.f32.mrf.mxu1 }
 0x167   : > { %4312 = vmatprep.mubr.bf16.mxu1 %v15124_v51  ;;  %419 = vst [vmem:[#allocation2 + $0x250] sm:$0xf] %v337_v58  ;;  %v501_v1 = vld [vmem:[%s15671_s17 + $0xc4] sm:$0xf]  ;;  %v502_v3 = vld [vmem:[%s15671_s17 + $0xc8] sm:$0xf]  ;;  %v961_v5 = vor.u32 %v959_v45, %v958_v55  ;;  %3614 = vmatprep.mubr.bf16.mxu0 %v14558_v44 }
 0x168   : > { %1384 = vst [vmem:[#allocation2 + $0x21c] sm:$0xf] %v944_v59  ;;  %1385 = vst [vmem:[#allocation2 + $0x228] sm:$0xf] %v953_v60  ;;  %v963_v6 = vrot.slane %v958_v55, 4  ;;  %v967_v7 = vrot.slane %v965_v56, 7  ;;  %5822 = vmatpush1.bf16.msra.mxu1 %v14598_v50  ;;  %v16285_v56 = vpop.f32.mrf.mxu1 }
 0x169   : > { %420 = vst [vmem:[#allocation2 + $0x25c] sm:$0xf] %v338_v61  ;;  %v974_v9 = vshrl.u32 %v501_v1, 16  ;;  %v977_v12 = vshll.u32 %v501_v1, 16  ;;  %v983_v14 = vshrl.u32 %v502_v3, 16  ;;  %v986_v15 = vshll.u32 %v502_v3, 16  ;;  %v3472_v10 = vpop.f32.mrf.mxu0  ;;  %5823 = vmatprep.subr.bf16.mxu1 %v19584_v0 }
 0x16a   : > { %v962_v16 = vsel %vm15777_vm5, %v954_v52, %v961_v5  ;;  %v970_v17 = vor.u32 %v968_v57, %v967_v7  ;;  %v972_v18 = vrot.slane %v967_v7, 4  ;;  %v14560_v20 = vld [vmem:[#allocation2 + $0x1ec] ss:$12 sps:$4 sm:$0xff]   ;;  %v340_v29 = vld [vmem:[%s15671_s17 + $0xd0] sm:$0xf]  ;;  %v16276_v38 = vadd.f32 %v16186_v53, %v3472_v10 }
 0x16b   : > { %1386 = vst [vmem:[#allocation2 + $0x234] sm:$0xf] %v962_v16  ;;  %v976_v22 = vrot.slane %v974_v9, 7  ;;  %v16264_v23 = vrot.slane %v983_v14, 7  ;;  %v339_v28 = vld [vmem:[%s15671_s17 + $0xcc] sm:$0xf]  ;;  %v3474_v45 = vpop.f32.mrf.mxu0 }
 0x16c   : > { %v14562_v32 = vld [vmem:[#allocation2 + $0x208] ss:$12 sps:$4 sm:$0xff]   ;;  %v971_v27 = vsel %vm15777_vm5, %v963_v6, %v970_v17  ;;  %421 = vst [vmem:[#allocation2 + $0x268] sm:$0xf] %v339_v28  ;;  %422 = vst [vmem:[#allocation2 + $0x274] sm:$0xf] %v340_v29  ;;  %5824 = vmatpush1.bf16.msra.mxu1 %v14605_v19 }
 0x16d   : > { %v503_v33 = vld [vmem:[%s15671_s17 + $0xcc] sm:$0xf]  ;;  %v504_v36 = vld [vmem:[%s15671_s17 + $0xd0] sm:$0xf]  ;;  %v15125_v31 = vld [vmem:[#allocation2 + $0x54] ss:$12 sps:$4 sm:$0xff]   ;;  %v979_v40 = vor.u32 %v977_v12, %v976_v22  ;;  %v988_v43 = vor.u32 %v986_v15, %v16264_v23  ;;  %v16287_v57 = vpop.f32.mrf.mxu0  ;;  %5825 = vmatprep.subr.bf16.mxu1 %v19584_v0 }
 0x16e   : > { %4313 = vmatmul.mubr.bf16.gmra.mxu1 %v15125_v31  ;;  %1387 = vst [vmem:[#allocation2 + $0x240] sm:$0xf] %v971_v27  ;;  %v981_v42 = vrot.slane %v976_v22, 4  ;;  %v341_v44 = vld [vmem:[%s15671_s17 + $0xd4] sm:$0xf]  ;;  %v992_v62 = vshrl.u32 %v503_v33, 16  ;;  %3615 = vmatmul.mubr.bf16.gmra.mxu0 %v14560_v20  ;;  %v16295_v22 = vpop.f32.mrf.mxu1 }
 0x16f   : > { %v14613_v48 = vld [vmem:[#allocation6 + $0x180] sm:$0xff]   ;;  %v15126_v34 = vld [vmem:[#allocation2 + $0x70] ss:$12 sps:$4 sm:$0xff]   ;;  %v995_v35 = vshll.u32 %v503_v33, 16  ;;  %v1001_v50 = vshrl.u32 %v504_v36, 16  ;;  %v1004_v51 = vshll.u32 %v504_v36, 16  ;;  %v980_v52 = vsel %vm15777_vm5, %v972_v18, %v979_v40  ;;  %v3477_v6 = vpop.f32.mrf.mxu0  ;;  %3622 = vmatprep.mubr.bf16.mxu0 %v14562_v32 }
 0x170   : > { %4320 = vmatprep.mubr.bf16.mxu1 %v15126_v34  ;;  %v342_v53 = vld [vmem:[%s15671_s17 + $0xd8] sm:$0xf]  ;;  %423 = vst [vmem:[#allocation2 + $0x280] sm:$0xf] %v341_v44  ;;  %v989_v55 = vsel %vm15777_vm5, %v981_v42, %v988_v43  ;;  %1388 = vst [vmem:[#allocation2 + $0x24c] sm:$0xf] %v980_v52  ;;  %5826 = vmatpush1.bf16.msra.mxu1 %v14613_v48  ;;  %v16303_v40 = vpop.f32.mrf.mxu1 }
 0x171   : > { %424 = vst [vmem:[#allocation2 + $0x28c] sm:$0xf] %v342_v53  ;;  %1389 = vst [vmem:[#allocation2 + $0x258] sm:$0xf] %v989_v55  ;;  %v990_v58 = vrot.slane %v16264_v23, 4  ;;  %v994_v59 = vrot.slane %v992_v62, 7  ;;  %5827 = vmatprep.subr.bf16.mxu1 %v19584_v0  ;;  %v3480_v62 = vpop.f32.mrf.mxu0 }
 0x172   : > { %v1003_v60 = vrot.slane %v1001_v50, 7  ;;  %v505_v61 = vld [vmem:[%s15671_s17 + $0xd4] sm:$0xf]  ;;  %v506_v1 = vld [vmem:[%s15671_s17 + $0xd8] sm:$0xf]  ;;  %v16309_v53 = vpop.f32.mrf.mxu1  ;;  %v16312_v55 = vadd.f32 %v16180_v46, %v3480_v62 }
 0x173   : > { %v1010_v3 = vshrl.u32 %v505_v61, 16  ;;  %v1013_v5 = vshll.u32 %v505_v61, 16  ;;  %v343_v7 = vld [vmem:[%s15671_s17 + $0xdc] sm:$0xf]  ;;  %v997_v9 = vor.u32 %v995_v35, %v994_v59  ;;  %v999_v12 = vrot.slane %v994_v59, 4  ;;  %v3482_v61 = vpop.f32.mrf.mxu0 }
 0x174   : > { %v1006_v14 = vor.u32 %v1004_v51, %v1003_v60  ;;  %v1008_v15 = vrot.slane %v1003_v60, 4  ;;  %v344_v16 = vld [vmem:[%s15671_s17 + $0xe0] sm:$0xf]  ;;  %425 = vst [vmem:[#allocation2 + $0x298] sm:$0xf] %v343_v7  ;;  %v1019_v18 = vshrl.u32 %v506_v1, 16 }
 0x175   : > { %v1012_v17 = vrot.slane %v1010_v3, 7  ;;  %v1022_v19 = vshll.u32 %v506_v1, 16  ;;  %426 = vst [vmem:[#allocation2 + $0x2a4] sm:$0xf] %v344_v16  ;;  %v507_v20 = vld [vmem:[%s15671_s17 + $0xdc] sm:$0xf]  ;;  %v998_v29 = vsel %vm15777_vm5, %v990_v58, %v997_v9 }
 0x176   : > { %v14564_v23 = vld [vmem:[#allocation2 + $0x204] ss:$12 sps:$4 sm:$0xff]   ;;  %v14566_v28 = vld [vmem:[#allocation2 + $0x220] ss:$12 sps:$4 sm:$0xff]   ;;  %v1007_v10 = vsel %vm15777_vm5, %v999_v12, %v1006_v14  ;;  %v1028_v32 = vshrl.u32 %v507_v20, 16  ;;  %v1021_v31 = vrot.slane %v1019_v18, 7  ;;  %v3483_v12 = vpop.f32.mrf.mxu0 }
 0x177   : > { %v15127_v27 = vld [vmem:[#allocation2 + $0x6c] ss:$12 sps:$4 sm:$0xff]   ;;  %1390 = vst [vmem:[#allocation2 + $0x264] sm:$0xf] %v998_v29  ;;  %1391 = vst [vmem:[#allocation2 + $0x270] sm:$0xf] %v1007_v10  ;;  %v1015_v33 = vor.u32 %v1013_v5, %v1012_v17  ;;  %3623 = vmatmul.mubr.bf16.gmra.mxu0 %v14564_v23  ;;  %v16317_v5 = vpop.f32.mrf.mxu1  ;;  %v16325_v16 = vadd.f32 %v16193_v2, %v3483_v12 }
 0x178   : > { %4321 = vmatmul.mubr.bf16.gmra.mxu1 %v15127_v27  ;;  %v1017_v36 = vrot.slane %v1012_v17, 4  ;;  %v508_v42 = vld [vmem:[%s15671_s17 + $0xe0] sm:$0xf]  ;;  %v1031_v43 = vshll.u32 %v507_v20, 16  ;;  %v15128_v44 = vld [vmem:[#allocation2 + $0x88] ss:$12 sps:$4 sm:$0xff]   ;;  %v1024_v51 = vor.u32 %v1022_v19, %v1021_v31  ;;  %3630 = vmatprep.mubr.bf16.mxu0 %v14566_v28  ;;  %v3485_v10 = vpop.f32.mrf.mxu0 }
 0x179   : > { %4328 = vmatprep.mubr.bf16.mxu1 %v15128_v44  ;;  %v1030_v45 = vrot.slane %v1028_v32, 7  ;;  %v1037_v48 = vshrl.u32 %v508_v42, 16  ;;  %v1040_v34 = vshll.u32 %v508_v42, 16  ;;  %v345_v35 = vld [vmem:[%s15671_s17 + $0xe4] sm:$0xf]  ;;  %v1016_v50 = vsel %vm15777_vm5, %v1008_v15, %v1015_v33 }
 0x17a   : > { %v1026_v52 = vrot.slane %v1021_v31, 4  ;;  %427 = vst [vmem:[#allocation2 + $0x2b0] sm:$0xf] %v345_v35  ;;  %1392 = vst [vmem:[#allocation2 + $0x27c] sm:$0xf] %v1016_v50  ;;  %v1025_v3 = vsel %vm15777_vm5, %v1017_v36, %v1024_v51  ;;  %v14623_v23 = vld [vmem:[#allocation6 + $0x1f8] sm:$0xff]   ;;  %v16330_v36 = vpop.f32.mrf.mxu1 }
 0x17b   : > { %v1033_v58 = vor.u32 %v1031_v43, %v1030_v45  ;;  %v1035_v59 = vrot.slane %v1030_v45, 4  ;;  %v1039_v60 = vrot.slane %v1037_v48, 7  ;;  %v346_v1 = vld [vmem:[%s15671_s17 + $0xe8] sm:$0xf]  ;;  %v509_v6 = vld [vmem:[%s15671_s17 + $0xe4] sm:$0xf]  ;;  %5828 = vmatpush2.bf16.msra.mxu1 %v14623_v23 }
 0x17c   : > { %428 = vst [vmem:[#allocation2 + $0x2bc] sm:$0xf] %v346_v1  ;;  %v510_v7 = vld [vmem:[%s15671_s17 + $0xe8] sm:$0xf]  ;;  %1393 = vst [vmem:[#allocation2 + $0x288] sm:$0xf] %v1025_v3  ;;  %v16334_v35 = vpop.f32.mrf.mxu1  ;;  %5829 = vmatprep.subr.bf16.mxu1 %v19584_v0 }
 0x17d   : > { %v1034_v46 = vsel %vm15777_vm5, %v1026_v52, %v1033_v58  ;;  %v1042_v9 = vor.u32 %v1040_v34, %v1039_v60  ;;  %v1046_v14 = vshrl.u32 %v509_v6, 16  ;;  %v347_v15 = vld [vmem:[%s15671_s17 + $0xec] sm:$0xf]  ;;  %v1049_v17 = vshll.u32 %v509_v6, 16  ;;  %v348_v20 = vld [vmem:[%s15671_s17 + $0xf0] sm:$0xf] }
 0x17e   : > { %1394 = vst [vmem:[#allocation2 + $0x294] sm:$0xf] %v1034_v46  ;;  %v1055_v18 = vshrl.u32 %v510_v7, 16  ;;  %v1058_v19 = vshll.u32 %v510_v7, 16  ;;  %429 = vst [vmem:[#allocation2 + $0x2c8] sm:$0xf] %v347_v15  ;;  %v16340_v1 = vpop.f32.mrf.mxu1  ;;  %v3488_v7 = vpop.f32.mrf.mxu0 }
 0x17f   : > { %v14568_v28 = vld [vmem:[#allocation2 + $0x21c] ss:$12 sps:$4 sm:$0xff]   ;;  %v1043_v29 = vsel %vm15777_vm5, %v1035_v59, %v1042_v9  ;;  %v1044_v32 = vrot.slane %v1039_v60, 4  ;;  %v1048_v27 = vrot.slane %v1046_v14, 7  ;;  %430 = vst [vmem:[#allocation2 + $0x2d4] sm:$0xf] %v348_v20 }
 0x180   : > { %v15129_v33 = vld [vmem:[#allocation2 + $0x84] ss:$12 sps:$4 sm:$0xff]   ;;  %1395 = vst [vmem:[#allocation2 + $0x2a0] sm:$0xf] %v1043_v29  ;;  %19614 = vst [vmem:[#allocation19_spill] sm:$0xff] %v16330_v36  ;;  %v1057_v31 = vrot.slane %v1055_v18, 7  ;;  %3631 = vmatmul.mubr.bf16.gmra.mxu0 %v14568_v28  ;;  %v16350_v28 = vpop.f32.mrf.mxu1  ;;  %v3490_v29 = vpop.f32.mrf.mxu0 }
 0x181   : > { %4329 = vmatmul.mubr.bf16.gmra.mxu1 %v15129_v33  ;;  %v14569_v2 = vld [vmem:[#allocation2 + $0x238] ss:$12 sps:$4 sm:$0xff]   ;;  %v15130_v43 = vld [vmem:[#allocation2 + $0xa0] ss:$12 sps:$4 sm:$0xff]   ;;  %v1051_v44 = vor.u32 %v1049_v17, %v1048_v27  ;;  %v1053_v45 = vrot.slane %v1048_v27, 4  ;;  %19615 = vst [vmem:[#allocation20_spill] sm:$0xff] %v16340_v1  ;;  %v16347_v17 = vadd.f32 %v16211_v39, %v3488_v7 }
 0x182   : > { %v511_v42 = vld [vmem:[%s15671_s17 + $0xec] sm:$0xf]  ;;  %4336 = vmatprep.mubr.bf16.mxu1 %v15130_v43  ;;  %v512_v48 = vld [vmem:[%s15671_s17 + $0xf0] sm:$0xf]  ;;  %v1060_v50 = vor.u32 %v1058_v19, %v1057_v31  ;;  %v1062_v51 = vrot.slane %v1057_v31, 4  ;;  %3638 = vmatprep.mubr.bf16.mxu0 %v14569_v2  ;;  %19616 = vst [vmem:[#allocation21_spill] sm:$0xff] %v16350_v28 }
 0x183   : > { %v1064_v34 = vshrl.u32 %v511_v42, 16  ;;  %v1067_v62 = vshll.u32 %v511_v42, 16  ;;  %v1073_v52 = vshrl.u32 %v512_v48, 16  ;;  %v1076_v58 = vshll.u32 %v512_v48, 16  ;;  %v349_v61 = vld [vmem:[%s15671_s17 + $0xf4] sm:$0xf] }
 0x184   : > { %v1052_v59 = vsel %vm15777_vm5, %v1044_v32, %v1051_v44  ;;  %v1061_v3 = vsel %vm15777_vm5, %v1053_v45, %v1060_v50  ;;  %431 = vst [vmem:[#allocation2 + $0x2e0] sm:$0xf] %v349_v61  ;;  %v350_v12 = vld [vmem:[%s15671_s17 + $0xf8] sm:$0xf]  ;;  %v513_v14 = vld [vmem:[%s15671_s17 + $0xf4] sm:$0xf]  ;;  %v16356_v45 = vpop.f32.mrf.mxu0 }
 0x185   : > { %v1066_v60 = vrot.slane %v1064_v34, 7  ;;  %1396 = vst [vmem:[#allocation2 + $0x2ac] sm:$0xf] %v1052_v59  ;;  %v1075_v6 = vrot.slane %v1073_v52, 7  ;;  %1397 = vst [vmem:[#allocation2 + $0x2b8] sm:$0xf] %v1061_v3 }
 0x186   : > { %v14571_v15 = vld [vmem:[#allocation2 + $0x234] ss:$12 sps:$4 sm:$0xff]   ;;  %432 = vst [vmem:[#allocation2 + $0x2ec] sm:$0xf] %v350_v12  ;;  %v514_v19 = vld [vmem:[%s15671_s17 + $0xf8] sm:$0xf]  ;;  %v3493_v61 = vpop.f32.mrf.mxu0 }
 0x187   : > { %v1069_v46 = vor.u32 %v1067_v62, %v1066_v60  ;;  %v1071_v9 = vrot.slane %v1066_v60, 4  ;;  %v1078_v18 = vor.u32 %v1076_v58, %v1075_v6  ;;  %v1082_v20 = vshrl.u32 %v513_v14, 16  ;;  %v14573_v23 = vld [vmem:[#allocation2 + $0x250] ss:$12 sps:$4 sm:$0xff]   ;;  %v14626_v43 = vld [vmem:[#allocation6 + $0x238] sm:$0xff]   ;;  %v16363_v60 = vpop.f32.mrf.mxu1 }
 0x188   : > { %v1080_v32 = vrot.slane %v1075_v6, 4  ;;  %v1085_v27 = vshll.u32 %v513_v14, 16  ;;  %v15131_v33 = vld [vmem:[#allocation2 + $0x9c] ss:$12 sps:$4 sm:$0xff]   ;;  %v1091_v31 = vshrl.u32 %v514_v19, 16  ;;  %v1094_v42 = vshll.u32 %v514_v19, 16  ;;  %14002 = vmatprep.subr.bf16.mxu0 %v14626_v43  ;;  %3639 = vmatmul.mubr.bf16.gmra.mxu0 %v14571_v15 }
 0x189   : > { %v1070_v10 = vsel %vm15777_vm5, %v1062_v51, %v1069_v46  ;;  %4337 = vmatmul.mubr.bf16.gmra.mxu1 %v15131_v33  ;;  %v1079_v39 = vsel %vm15777_vm5, %v1071_v9, %v1078_v18  ;;  %v1084_v2 = vrot.slane %v1082_v20, 7  ;;  %v15132_v44 = vld [vmem:[#allocation2 + $0xb8] ss:$12 sps:$4 sm:$0xff]   ;;  %v351_v48 = vld [vmem:[%s15671_s17 + $0xfc] sm:$0xf]  ;;  %19617 = vst [vmem:[#allocation22_spill] sm:$0xff] %v16363_v60  ;;  %3646 = vmatprep.mubr.bf16.mxu0 %v14573_v23  ;;  %v16367_v18 = vpop.f32.mrf.mxu1 }
 0x18a   : > { %1398 = vst [vmem:[#allocation2 + $0x2c4] sm:$0xf] %v1070_v10  ;;  %4344 = vmatprep.mubr.bf16.mxu1 %v15132_v44  ;;  %1399 = vst [vmem:[#allocation2 + $0x2d0] sm:$0xf] %v1079_v39  ;;  %v352_v34 = vld [vmem:[%s15671_s17 + $0x100] sm:$0xf] }
 0x18b   : > { %v515_v62 = vld [vmem:[%s15671_s17 + $0xfc] sm:$0xf]  ;;  %v1087_v50 = vor.u32 %v1085_v27, %v1084_v2  ;;  %v1089_v51 = vrot.slane %v1084_v2, 4  ;;  %v1093_v52 = vrot.slane %v1091_v31, 7  ;;  %433 = vst [vmem:[#allocation2 + $0x2f8] sm:$0xf] %v351_v48 }
 0x18c   : > { %434 = vst [vmem:[#allocation2 + $0x304] sm:$0xf] %v352_v34  ;;  %v516_v58 = vld [vmem:[%s15671_s17 + $0x100] sm:$0xf]  ;;  %v353_v59 = vld [vmem:[%s15671_s17 + $0x104] sm:$0xf] }
 0x18d   : > { %v1100_v3 = vshrl.u32 %v515_v62, 16  ;;  %v1103_v6 = vshll.u32 %v515_v62, 16  ;;  %v1109_v7 = vshrl.u32 %v516_v58, 16  ;;  %v1112_v46 = vshll.u32 %v516_v58, 16  ;;  %435 = vst [vmem:[#allocation2 + $0x310] sm:$0xf] %v353_v59  ;;  %v16374_v62 = vpop.f32.mrf.mxu1 }
 0x18e   : > { %v1088_v9 = vsel %vm15777_vm5, %v1080_v32, %v1087_v50  ;;  %v1096_v12 = vor.u32 %v1094_v42, %v1093_v52  ;;  %v1098_v14 = vrot.slane %v1093_v52, 4  ;;  %19618 = vst [vmem:[#allocation23_spill] sm:$0xff] %v16367_v18  ;;  %v354_v29 = vld [vmem:[%s15671_s17 + $0x108] sm:$0xf]  ;;  %v517_v10 = vld [vmem:[%s15671_s17 + $0x104] sm:$0xf]  ;;  %v3496_v50 = vpop.f32.mrf.mxu0 }
 0x18f   : > { %1400 = vst [vmem:[#allocation2 + $0x2dc] sm:$0xf] %v1088_v9  ;;  %v1102_v19 = vrot.slane %v1100_v3, 7  ;;  %v1111_v20 = vrot.slane %v1109_v7, 7  ;;  %v14575_v27 = vld [vmem:[#allocation2 + $0x24c] ss:$12 sps:$4 sm:$0xff]  }
 0x190   : > { %v1097_v33 = vsel %vm15777_vm5, %v1089_v51, %v1096_v12  ;;  %436 = vst [vmem:[#allocation2 + $0x31c] sm:$0xf] %v354_v29  ;;  %v518_v39 = vld [vmem:[%s15671_s17 + $0x108] sm:$0xf]  ;;  %v1118_v15 = vshrl.u32 %v517_v10, 16  ;;  %v1121_v2 = vshll.u32 %v517_v10, 16  ;;  %3647 = vmatmul.mubr.bf16.gmra.mxu0 %v14575_v27 }
 0x191   : > { %1401 = vst [vmem:[#allocation2 + $0x2e8] sm:$0xf] %v1097_v33  ;;  %v1105_v32 = vor.u32 %v1103_v6, %v1102_v19  ;;  %v1107_v31 = vrot.slane %v1102_v19, 4  ;;  %v1114_v23 = vor.u32 %v1112_v46, %v1111_v20  ;;  %v15133_v42 = vld [vmem:[#allocation2 + $0xb4] ss:$12 sps:$4 sm:$0xff]   ;;  %v1116_v44 = vrot.slane %v1111_v20, 4  ;;  %v3498_v19 = vpop.f32.mrf.mxu0 }
 0x192   : > { %4345 = vmatmul.mubr.bf16.gmra.mxu1 %v15133_v42  ;;  %v14577_v43 = vld [vmem:[#allocation2 + $0x268] ss:$12 sps:$4 sm:$0xff]   ;;  %v1120_v48 = vrot.slane %v1118_v15, 7  ;;  %v15134_v34 = vld [vmem:[#allocation2 + $0xd0] ss:$12 sps:$4 sm:$0xff]   ;;  %19619 = vst [vmem:[#allocation24_spill] sm:$0xff] %v16374_v62  ;;  %v16383_v6 = vadd.f32 %v16203_v24, %v3496_v50 }
 0x193   : > { %4352 = vmatprep.mubr.bf16.mxu1 %v15134_v34  ;;  %v1106_v51 = vsel %vm15777_vm5, %v1098_v14, %v1105_v32  ;;  %v1115_v52 = vsel %vm15777_vm5, %v1107_v31, %v1114_v23  ;;  %v1127_v58 = vshrl.u32 %v518_v39, 16  ;;  %v1130_v59 = vshll.u32 %v518_v39, 16  ;;  %v355_v61 = vld [vmem:[%s15671_s17 + $0x10c] sm:$0xf]  ;;  %v356_v3 = vld [vmem:[%s15671_s17 + $0x110] sm:$0xf]  ;;  %3654 = vmatprep.mubr.bf16.mxu0 %v14577_v43  ;;  %v3499_v32 = vpop.f32.mrf.mxu0 }
 0x194   : > { %1402 = vst [vmem:[#allocation2 + $0x2f4] sm:$0xf] %v1106_v51  ;;  %1403 = vst [vmem:[#allocation2 + $0x300] sm:$0xf] %v1115_v52  ;;  %v1123_v7 = vor.u32 %v1121_v2, %v1120_v48  ;;  %v1125_v46 = vrot.slane %v1120_v48, 4  ;;  %v14627_v14 = vld [vmem:[#allocation6 + $0x1f0] sm:$0xff]   ;;  %v16390_v2 = vpop.f32.mrf.mxu1 }
 0x195   : > { %437 = vst [vmem:[#allocation2 + $0x328] sm:$0xf] %v355_v61  ;;  %438 = vst [vmem:[#allocation2 + $0x334] sm:$0xf] %v356_v3  ;;  %v519_v9 = vld [vmem:[%s15671_s17 + $0x10c] sm:$0xf]  ;;  %5830 = vmatpush2.bf16.msra.mxu1 %v14627_v14  ;;  %v3501_v43 = vpop.f32.mrf.mxu0 }
 0x196   : > { %v520_v12 = vld [vmem:[%s15671_s17 + $0x110] sm:$0xf]  ;;  %v1129_v20 = vrot.slane %v1127_v58, 7  ;;  %v1136_v29 = vshrl.u32 %v519_v9, 16  ;;  %v1139_v10 = vshll.u32 %v519_v9, 16  ;;  %v1124_v24 = vsel %vm15777_vm5, %v1116_v44, %v1123_v7  ;;  %19620 = vst [vmem:[#allocation25_spill] sm:$0xff] %v16390_v2  ;;  %5831 = vmatprep.subr.bf16.mxu1 %v19584_v0  ;;  %v16401_v19 = vpop.f32.mrf.mxu1 }
 0x197   : > { %v1145_v33 = vshrl.u32 %v520_v12, 16  ;;  %v1148_v39 = vshll.u32 %v520_v12, 16  ;;  %v357_v15 = vld [vmem:[%s15671_s17 + $0x114] sm:$0xf]  ;;  %1404 = vst [vmem:[#allocation2 + $0x30c] sm:$0xf] %v1124_v24  ;;  %v16395_v44 = vadd.f32 %v16215_v47, %v3499_v32 }
 0x198   : > { %v1132_v31 = vor.u32 %v1130_v59, %v1129_v20  ;;  %v1134_v23 = vrot.slane %v1129_v20, 4  ;;  %v1138_v42 = vrot.slane %v1136_v29, 7  ;;  %v358_v34 = vld [vmem:[%s15671_s17 + $0x118] sm:$0xf]  ;;  %439 = vst [vmem:[#allocation2 + $0x340] sm:$0xf] %v357_v15 }
 0x199   : > { %v1147_v48 = vrot.slane %v1145_v33, 7  ;;  %v14579_v27 = vld [vmem:[#allocation2 + $0x264] ss:$12 sps:$4 sm:$0xff]   ;;  %440 = vst [vmem:[#allocation2 + $0x34c] sm:$0xf] %v358_v34  ;;  %19621 = vst [vmem:[#allocation26_spill] sm:$0xff] %v16401_v19 }
 0x19a   : > { %v1133_v50 = vsel %vm15777_vm5, %v1125_v46, %v1132_v31  ;;  %v1141_v51 = vor.u32 %v1139_v10, %v1138_v42  ;;  %v1143_v52 = vrot.slane %v1138_v42, 4  ;;  %v521_v59 = vld [vmem:[%s15671_s17 + $0x114] sm:$0xf]  ;;  %v522_v61 = vld [vmem:[%s15671_s17 + $0x118] sm:$0xf]  ;;  %3655 = vmatmul.mubr.bf16.gmra.mxu0 %v14579_v27  ;;  %v3504_v42 = vpop.f32.mrf.mxu0 }
 0x19b   : > { %v1150_v58 = vor.u32 %v1148_v39, %v1147_v48  ;;  %v15135_v3 = vld [vmem:[#allocation2 + $0xcc] ss:$12 sps:$4 sm:$0xff]   ;;  %1405 = vst [vmem:[#allocation2 + $0x318] sm:$0xf] %v1133_v50  ;;  %v1154_v7 = vshrl.u32 %v521_v59, 16  ;;  %v1157_v9 = vshll.u32 %v521_v59, 16  ;;  %v16407_v39 = vpop.f32.mrf.mxu1 }
 0x19c   : > { %4353 = vmatmul.mubr.bf16.gmra.mxu1 %v15135_v3  ;;  %v1163_v12 = vshrl.u32 %v522_v61, 16  ;;  %v15136_v47 = vld [vmem:[#allocation2 + $0xe8] ss:$12 sps:$4 sm:$0xff]   ;;  %v14581_v14 = vld [vmem:[#allocation2 + $0x280] ss:$12 sps:$4 sm:$0xff]   ;;  %v1142_v46 = vsel %vm15777_vm5, %v1134_v23, %v1141_v51  ;;  %v1166_v29 = vshll.u32 %v522_v61, 16  ;;  %v16416_v51 = vadd.f32 %v16230_v11, %v3504_v42  ;;  %v3506_v27 = vpop.f32.mrf.mxu0 }
 0x19d   : > { %4360 = vmatprep.mubr.bf16.mxu1 %v15136_v47  ;;  %v1151_v20 = vsel %vm15777_vm5, %v1143_v52, %v1150_v58  ;;  %1406 = vst [vmem:[#allocation2 + $0x324] sm:$0xf] %v1142_v46  ;;  %v1152_v10 = vrot.slane %v1147_v48, 4  ;;  %v1156_v33 = vrot.slane %v1154_v7, 7  ;;  %19622 = vst [vmem:[#allocation27_spill] sm:$0xff] %v16407_v39  ;;  %3662 = vmatprep.mubr.bf16.mxu0 %v14581_v14  ;;  %v16413_v48 = vpop.f32.mrf.mxu1 }
 0x19e   : > { %1407 = vst [vmem:[#allocation2 + $0x330] sm:$0xf] %v1151_v20  ;;  %v1165_v24 = vrot.slane %v1163_v12, 7  ;;  %v359_v15 = vld [vmem:[%s15671_s17 + $0x11c] sm:$0xf]  ;;  %19623 = vst [vmem:[#allocation28_spill] sm:$0xff] %v16413_v48 }
 0x19f   : > { %v360_v32 = vld [vmem:[%s15671_s17 + $0x120] sm:$0xf]  ;;  %v523_v31 = vld [vmem:[%s15671_s17 + $0x11c] sm:$0xf]  ;;  %v1159_v34 = vor.u32 %v1157_v9, %v1156_v33  ;;  %v1161_v23 = vrot.slane %v1156_v33, 4 }
 0x1a0   : > { %v1168_v43 = vor.u32 %v1166_v29, %v1165_v24  ;;  %441 = vst [vmem:[#allocation2 + $0x358] sm:$0xf] %v359_v15  ;;  %442 = vst [vmem:[#allocation2 + $0x364] sm:$0xf] %v360_v32  ;;  %v524_v50 = vld [vmem:[%s15671_s17 + $0x120] sm:$0xf]  ;;  %v16425_v29 = vpop.f32.mrf.mxu0 }
 0x1a1   : > { %v1172_v52 = vshrl.u32 %v523_v31, 16  ;;  %v1175_v58 = vshll.u32 %v523_v31, 16  ;;  %v1181_v59 = vshrl.u32 %v524_v50, 16  ;;  %v361_v61 = vld [vmem:[%s15671_s17 + $0x124] sm:$0xf]  ;;  %v1160_v3 = vsel %vm15777_vm5, %v1152_v10, %v1159_v34  ;;  %v16428_v34 = vpop.f32.mrf.mxu1 }
 0x1a2   : > { %v1169_v7 = vsel %vm15777_vm5, %v1161_v23, %v1168_v43  ;;  %v1184_v9 = vshll.u32 %v524_v50, 16  ;;  %v362_v12 = vld [vmem:[%s15671_s17 + $0x128] sm:$0xf]  ;;  %443 = vst [vmem:[#allocation2 + $0x370] sm:$0xf] %v361_v61  ;;  %v1170_v11 = vrot.slane %v1165_v24, 4  ;;  %v3509_v50 = vpop.f32.mrf.mxu0 }
 0x1a3   : > { %v525_v47 = vld [vmem:[%s15671_s17 + $0x124] sm:$0xf]  ;;  %1408 = vst [vmem:[#allocation2 + $0x33c] sm:$0xf] %v1160_v3  ;;  %1409 = vst [vmem:[#allocation2 + $0x348] sm:$0xf] %v1169_v7 }
 0x1a4   : > { %v14583_v14 = vld [vmem:[#allocation2 + $0x27c] ss:$12 sps:$4 sm:$0xff]   ;;  %v1174_v46 = vrot.slane %v1172_v52, 7  ;;  %444 = vst [vmem:[#allocation2 + $0x37c] sm:$0xf] %v362_v12  ;;  %v1183_v33 = vrot.slane %v1181_v59, 7 }
 0x1a5   : > { %v15137_v20 = vld [vmem:[#allocation2 + $0xe4] ss:$12 sps:$4 sm:$0xff]   ;;  %v526_v10 = vld [vmem:[%s15671_s17 + $0x128] sm:$0xf]  ;;  %v1190_v15 = vshrl.u32 %v525_v47, 16  ;;  %v1193_v32 = vshll.u32 %v525_v47, 16  ;;  %3663 = vmatmul.mubr.bf16.gmra.mxu0 %v14583_v14 }
 0x1a6   : > { %4361 = vmatmul.mubr.bf16.gmra.mxu1 %v15137_v20  ;;  %v15138_v31 = vld [vmem:[#allocation2 + $0x100] ss:$12 sps:$4 sm:$0xff]   ;;  %v14584_v42 = vld [vmem:[#allocation2 + $0x298] ss:$12 sps:$4 sm:$0xff]   ;;  %19624 = vst [vmem:[#allocation29_spill] sm:$0xff] %v16428_v34  ;;  %v1177_v23 = vor.u32 %v1175_v58, %v1174_v46  ;;  %v1179_v43 = vrot.slane %v1174_v46, 4  ;;  %v1186_v52 = vor.u32 %v1184_v9, %v1183_v33 }
 0x1a7   : > { %4368 = vmatprep.mubr.bf16.mxu1 %v15138_v31  ;;  %v1199_v24 = vshrl.u32 %v526_v10, 16  ;;  %v1188_v61 = vrot.slane %v1183_v33, 4  ;;  %v1192_v27 = vrot.slane %v1190_v15, 7  ;;  %v1202_v59 = vshll.u32 %v526_v10, 16  ;;  %v14629_v3 = vld [vmem:[#allocation6 + $0x1e8] sm:$0xff]   ;;  %3670 = vmatprep.mubr.bf16.mxu0 %v14584_v42  ;;  %v16438_v10 = vpop.f32.mrf.mxu1 }
 0x1a8   : > { %v1178_v7 = vsel %vm15777_vm5, %v1170_v11, %v1177_v23  ;;  %v363_v47 = vld [vmem:[%s15671_s17 + $0x12c] sm:$0xf]  ;;  %v364_v20 = vld [vmem:[%s15671_s17 + $0x130] sm:$0xf]  ;;  %v1187_v58 = vsel %vm15777_vm5, %v1179_v43, %v1186_v52  ;;  %5832 = vmatpush2.bf16.msra.mxu1 %v14629_v3  ;;  %19625 = vst [vmem:[#allocation30_spill] sm:$0xff] %v16438_v10 }
 0x1a9   : > { %v1201_v12 = vrot.slane %v1199_v24, 7  ;;  %1410 = vst [vmem:[#allocation2 + $0x354] sm:$0xf] %v1178_v7  ;;  %v1195_v46 = vor.u32 %v1193_v32, %v1192_v27  ;;  %v1197_v31 = vrot.slane %v1192_v27, 4  ;;  %445 = vst [vmem:[#allocation2 + $0x388] sm:$0xf] %v363_v47  ;;  %5833 = vmatprep.subr.bf16.mxu1 %v19584_v0  ;;  %v16443_v52 = vpop.f32.mrf.mxu1  ;;  %v16447_v7 = vpop.f32.mrf.mxu0 }
 0x1aa   : > { %446 = vst [vmem:[#allocation2 + $0x394] sm:$0xf] %v364_v20  ;;  %v527_v9 = vld [vmem:[%s15671_s17 + $0x12c] sm:$0xf]  ;;  %v528_v33 = vld [vmem:[%s15671_s17 + $0x130] sm:$0xf] }
 0x1ab   : > { %1411 = vst [vmem:[#allocation2 + $0x360] sm:$0xf] %v1187_v58  ;;  %v1204_v11 = vor.u32 %v1202_v59, %v1201_v12  ;;  %v1208_v15 = vshrl.u32 %v527_v9, 16  ;;  %v1211_v23 = vshll.u32 %v527_v9, 16  ;;  %v14586_v14 = vld [vmem:[#allocation2 + $0x294] ss:$12 sps:$4 sm:$0xff]   ;;  %v1196_v32 = vsel %vm15777_vm5, %v1188_v61, %v1195_v46  ;;  %v16453_v46 = vpop.f32.mrf.mxu1 }
 0x1ac   : > { %v1217_v43 = vshrl.u32 %v528_v33, 16  ;;  %v1220_v24 = vshll.u32 %v528_v33, 16  ;;  %v14587_v50 = vld [vmem:[#allocation2 + $0x2b0] ss:$12 sps:$4 sm:$0xff]   ;;  %19626 = vst [vmem:[#allocation31_spill] sm:$0xff] %v16443_v52  ;;  %v1206_v27 = vrot.slane %v1201_v12, 4 }
 0x1ad   : > { %v1205_v42 = vsel %vm15777_vm5, %v1197_v31, %v1204_v11  ;;  %1412 = vst [vmem:[#allocation2 + $0x36c] sm:$0xf] %v1196_v32  ;;  %v1210_v59 = vrot.slane %v1208_v15, 7  ;;  %v15139_v3 = vld [vmem:[#allocation2 + $0xfc] ss:$12 sps:$4 sm:$0xff]   ;;  %19628 = vst [vmem:[#allocation33_spill] sm:$0xff] %v16453_v46  ;;  %v3514_v32 = vpop.f32.mrf.mxu0  ;;  %v16457_v25 = vpop.f32.mrf.mxu1  ;;  %3671 = vmatmul.mubr.bf16.gmra.mxu0 %v14586_v14 }
 0x1ae   : > { %4369 = vmatmul.mubr.bf16.gmra.mxu1 %v15139_v3  ;;  %1413 = vst [vmem:[#allocation2 + $0x378] sm:$0xf] %v1205_v42  ;;  %v16449_v47 = vrot.slane %v1217_v43, 7  ;;  %v1420_v61 = vld [vmem:[%s15671_s17 + $0x4] sm:$0xf]  ;;  %19629 = vst [vmem:[#allocation34_spill] sm:$0xff] %v16457_v25  ;;  %3678 = vmatprep.mubr.bf16.mxu0 %v14587_v50 }
 0x1af   : > { %v1421_v20 = vld [vmem:[%s15671_s17 + $0x8] sm:$0xf]  ;;  %v15140_v58 = vld [vmem:[#allocation2 + $0x118] ss:$12 sps:$4 sm:$0xff]   ;;  %v1213_v9 = vor.u32 %v1211_v23, %v1210_v59  ;;  %v1215_v33 = vrot.slane %v1210_v59, 4  ;;  %v1505_v11 = vshrl.u32 %v1420_v61, 16  ;;  %v16461_v46 = vpop.f32.mrf.mxu0  ;;  %v16469_v14 = vpop.f32.mrf.mxu1 }
 0x1b0   : > { %19627 = vst [vmem:[#allocation32_spill] sm:$0xff] %v16449_v47  ;;  %4376 = vmatprep.mubr.bf16.mxu1 %v15140_v58  ;;  %v1422_v31 = vld [vmem:[%s15671_s17 + $0xc] sm:$0xf]  ;;  %v1222_v12 = vor.u32 %v1220_v24, %v16449_v47  ;;  %v1508_v15 = vshll.u32 %v1420_v61, 16  ;;  %v1514_v3 = vshll.u32 %v1421_v20, 16  ;;  %v1518_v0 = vshrl.u32 %v1421_v20, 16 }
 0x1b1   : > { %v1214_v43 = vsel %vm15777_vm5, %v1206_v27, %v1213_v9  ;;  %v1507_v42 = vrot.slane %v1505_v11, 4  ;;  %v1524_v10 = vshll.u32 %v1422_v31, 16  ;;  %v1528_v58 = vshrl.u32 %v1422_v31, 16  ;;  %v3517_v32 = vpop.f32.mrf.mxu0  ;;  %v16465_v27 = vld [vmem:[#allocation2 + $0x2ac] ss:$12 sps:$4 sm:$0xff]   ;;  %19630 = vst [vmem:[#allocation35_spill] sm:$0xff] %v16469_v14  ;;  %v16471_v50 = vpop.f32.mrf.mxu1 }
 0x1b2   : > { %v1223_v23 = vsel %vm15777_vm5, %v1215_v33, %v1222_v12  ;;  %1414 = vst [vmem:[#allocation2 + $0x384] sm:$0xf] %v1214_v43  ;;  %v1510_v59 = vrot.slane %v1508_v15, 5  ;;  %v1516_v24 = vrot.slane %v1514_v3, 5  ;;  %v1520_v61 = vrot.slane %v1518_v0, 4  ;;  %19631 = vst [vmem:[#allocation36_spill] sm:$0xff] %v16471_v50 }
 0x1b3   : > { %1415 = vst [vmem:[#allocation2 + $0x390] sm:$0xf] %v1223_v23  ;;  %v1526_v20 = vrot.slane %v1524_v10, 5  ;;  %v1530_v25 = vrot.slane %v1528_v58, 4  ;;  %v16467_v9 = vld [vmem:[#allocation2 + $0x2c8] ss:$12 sps:$4 sm:$0xff]   ;;  %v16475_v43 = vpop.f32.mrf.mxu1 }
 0x1b4   : > { %v1511_v47 = vor.u32 %v1510_v59, %v1507_v42  ;;  %v1521_v31 = vor.u32 %v1520_v61, %v1516_v24  ;;  %v15141_v11 = vld [vmem:[#allocation2 + $0x114] ss:$12 sps:$4 sm:$0xff]   ;;  %v15142_v15 = vld [vmem:[#allocation2 + $0x130] ss:$12 sps:$4 sm:$0xff]   ;;  %19632 = vst [vmem:[#allocation37_spill] sm:$0xff] %v16475_v43  ;;  %v16477_v42 = vpop.f32.mrf.mxu0  ;;  %v14631_v23 = vld [vmem:[#allocation6 + $0x1e0] sm:$0xff]  }
 0x1b5   : > { %v1531_v12 = vor.u32 %v1530_v25, %v1526_v20  ;;  %3679 = vmatmul.mubr.bf16.gmra.mxu0 %v16465_v27  ;;  %v16486_v59 = vld [vmem:[#allocation2 + $0x2c4] ss:$12 sps:$4 sm:$0xff]   ;;  %v16490_v61 = vld [vmem:[#allocation2 + $0x2e0] ss:$12 sps:$4 sm:$0xff]   ;;  %5834 = vmatpush2.bf16.msra.mxu1 %v14631_v23  ;;  %vm8412_vm7 = vsmask.f32 7950 }
 0x1b6   : > { %4377 = vmatmul.mubr.bf16.gmra.mxu1 %v15141_v11  ;;  %v1512_v33 = vrot.slane %v1511_v47, 4  ;;  %v1522_v0 = vrot.slane %v1521_v31, 4  ;;  %3686 = vmatprep.mubr.bf16.mxu0 %v16467_v9  ;;  %v3522_v47 = vpop.f32.mrf.mxu0  ;;  %v15143_v32 = vld [vmem:[#allocation2 + $0x12c] ss:$12 sps:$4 sm:$0xff]   ;;  %v19634_v31 = vmov 0   ;;  %vm17360_vm10 = vmand %vm8411_vm6, %vm8412_vm7 }
 0x1b7   : > { %4384 = vmatprep.mubr.bf16.mxu1 %v15142_v15  ;;  %v1532_v3 = vrot.slane %v1531_v12, 4  ;;  %5835 = vmatprep.subr.bf16.mxu1 %v19634_v31  ;;  %v16501_v15 = vld [vmem:[#allocation2 + $0x2dc] ss:$12 sps:$4 sm:$0xff]   ;;  %v15146_v47 = vld [vmem:[#allocation2 + $0x160] ss:$12 sps:$4 sm:$0xff]  }
 0x1b8   : > { %v1517_v10 = vsel %vm15702_vm2, %v1512_v33, %v1516_v24  ;;  %v1527_v58 = vsel %vm15702_vm2, %v1522_v0, %v1526_v20  ;;  %v16488_v24 = vpop.f32.mrf.mxu1  ;;  %v16492_v20 = vpop.f32.mrf.mxu0  ;;  %v16550_v50 = vld [vmem:[#allocation2 + $0x340] ss:$12 sps:$4 sm:$0xff]   ;;  %vm7754_vm9 = vsmask.f32 7938 }
 0x1b9   : > { %2388 = vst [vmem:[#allocation2 + $0x14] sm:$0xf] %v1517_v10  ;;  %v1537_v25 = vsel %vm15702_vm2, %v1532_v3, %v15695_v26  ;;  %2389 = vst [vmem:[#allocation2 + $0x20] sm:$0xf] %v1527_v58  ;;  %v15144_v26 = vld [vmem:[#allocation2 + $0x148] ss:$12 sps:$4 sm:$0xff]   ;;  %5836 = vmatpush2.bf16.msra.mxu1 %v14633_v41 }
 0x1ba   : > { %2390 = vst [vmem:[#allocation2 + $0x2c] sm:$0xf] %v1537_v25  ;;  %19633 = vst [vmem:[#allocation38_spill] sm:$0xff] %v16488_v24  ;;  %v3525_v11 = vpop.f32.mrf.mxu0  ;;  %v16495_v33 = vpop.f32.mrf.mxu1  ;;  %v16507_v3 = vld [vmem:[#allocation2 + $0x2f8] ss:$12 sps:$4 sm:$0xff]   ;;  %5837 = vmatprep.subr.bf16.mxu1 %v19634_v31 }
 0x1bb   : > { %19635 = vst [vmem:[#allocation39_spill] sm:$0xff] %v16495_v33  ;;  %v15145_v58 = vld [vmem:[#allocation2 + $0x144] ss:$12 sps:$4 sm:$0xff]   ;;  %v16515_v11 = vld [vmem:[#allocation2 + $0x2f4] ss:$12 sps:$4 sm:$0xff]   ;;  %vm17366_vm11 = vmand %vm7753_vm8, %vm7754_vm9 }
 0x1bc   : > { %v16498_v12 = vpop.f32.mrf.mxu1  ;;  %v16505_v10 = vpop.f32.mrf.mxu0  ;;  %v15149_v41 = vld [vmem:[#allocation2 + $0x174] ss:$12 sps:$4 sm:$0xff]   ;;  %v14619_v18 = vld [vmem:[#allocation2 + $0x36c] ss:$12 sps:$4 sm:$0xff]  }
 0x1bd   : > { %3687 = vmatmul.mubr.bf16.gmra.mxu0 %v16486_v59  ;;  %19636 = vst [vmem:[#allocation40_spill] sm:$0xff] %v16498_v12  ;;  %v16573_v39 = vld [vmem:[#allocation2 + $0x354] ss:$12 sps:$4 sm:$0xff]  }
 0x1be   : > { %4385 = vmatmul.mubr.bf16.gmra.mxu1 %v15143_v32  ;;  %3694 = vmatprep.mubr.bf16.mxu0 %v16490_v61  ;;  %v16503_v0 = vpop.f32.mrf.mxu1  ;;  %v3530_v25 = vpop.f32.mrf.mxu0  ;;  %19650 = vst [vmem:[#allocation54_spill] sm:$0xff] %v16573_v39  ;;  %v15157_v36 = vld [vmem:[#allocation2 + $0x1d4] ss:$12 sps:$4 sm:$0xff]  }
 0x1bf   : > { %4392 = vmatprep.mubr.bf16.mxu1 %v15144_v26  ;;  %19637 = vst [vmem:[#allocation41_spill] sm:$0xff] %v16503_v0  ;;  %v16519_v0 = vld [vmem:[#allocation2 + $0x310] ss:$12 sps:$4 sm:$0xff]  }
 0x1c0   : > { %v16509_v23 = vpop.f32.mrf.mxu1  ;;  %v16511_v32 = vpop.f32.mrf.mxu0 }
 0x1c1   : > { %19638 = vst [vmem:[#allocation42_spill] sm:$0xff] %v16509_v23  ;;  %v16530_v23 = vld [vmem:[#allocation2 + $0x30c] ss:$12 sps:$4 sm:$0xff]  }
 0x1c2   : > { %v3533_v26 = vpop.f32.mrf.mxu0  ;;  %v16517_v8 = vpop.f32.mrf.mxu1 }
 0x1c3   : > { %19639 = vst [vmem:[#allocation43_spill] sm:$0xff] %v16517_v8 }
 0x1c4   : > { %v16521_v25 = vpop.f32.mrf.mxu1  ;;  %v16526_v26 = vpop.f32.mrf.mxu0 }
 0x1c5   : > { %3695 = vmatmul.mubr.bf16.gmra.mxu0 %v16501_v15  ;;  %19640 = vst [vmem:[#allocation44_spill] sm:$0xff] %v16521_v25 }
 0x1c6   : > { %4393 = vmatmul.mubr.bf16.gmra.mxu1 %v15145_v58  ;;  %3702 = vmatprep.mubr.bf16.mxu0 %v16507_v3  ;;  %v15147_v58 = vld [vmem:[#allocation2 + $0x15c] ss:$12 sps:$4 sm:$0xff]   ;;  %v16523_v33 = vpop.f32.mrf.mxu1  ;;  %v3538_v8 = vpop.f32.mrf.mxu0 }
 0x1c7   : > { %4400 = vmatprep.mubr.bf16.mxu1 %v15146_v47  ;;  %v15148_v47 = vld [vmem:[#allocation2 + $0x178] ss:$12 sps:$4 sm:$0xff]   ;;  %19641 = vst [vmem:[#allocation45_spill] sm:$0xff] %v16523_v33 }
 0x1c8   : > { %v16532_v12 = vpop.f32.mrf.mxu1  ;;  %v16536_v25 = vpop.f32.mrf.mxu0  ;;  %v16544_v8 = vld [vmem:[#allocation2 + $0x324] ss:$12 sps:$4 sm:$0xff]  }
 0x1c9   : > { %19642 = vst [vmem:[#allocation46_spill] sm:$0xff] %v16532_v12 }
 0x1ca   : > { %v3541_v33 = vpop.f32.mrf.mxu0  ;;  %v16538_v43 = vpop.f32.mrf.mxu1 }
 0x1cb   : > { %19643 = vst [vmem:[#allocation47_spill] sm:$0xff] %v16538_v43  ;;  %v15152_v33 = vld [vmem:[#allocation2 + $0x1a8] ss:$12 sps:$4 sm:$0xff]   ;;  %v14635_v43 = vld [vmem:[#allocation6 + $0x1d0] sm:$0xff]  }
 0x1cc   : > { %v16541_v14 = vpop.f32.mrf.mxu1  ;;  %v16548_v24 = vpop.f32.mrf.mxu0  ;;  %5838 = vmatpush2.bf16.msra.mxu1 %v14635_v43 }
 0x1cd   : > { %3703 = vmatmul.mubr.bf16.gmra.mxu0 %v16515_v11  ;;  %19644 = vst [vmem:[#allocation48_spill] sm:$0xff] %v16541_v14  ;;  %5839 = vmatprep.subr.bf16.mxu1 %v19634_v31 }
 0x1ce   : > { %4401 = vmatmul.mubr.bf16.gmra.mxu1 %v15147_v58  ;;  %3710 = vmatprep.mubr.bf16.mxu0 %v16519_v0  ;;  %v16534_v58 = vld [vmem:[#allocation2 + $0x328] ss:$12 sps:$4 sm:$0xff]   ;;  %v16546_v12 = vpop.f32.mrf.mxu1 }
 0x1cf   : > { %4408 = vmatprep.mubr.bf16.mxu1 %v15148_v47  ;;  %v15150_v47 = vld [vmem:[#allocation2 + $0x190] ss:$12 sps:$4 sm:$0xff]   ;;  %19645 = vst [vmem:[#allocation49_spill] sm:$0xff] %v16546_v12 }
 0x1d0   : > { %v16552_v52 = vpop.f32.mrf.mxu1  ;;  %v16559_v12 = vld [vmem:[#allocation2 + $0x33c] ss:$12 sps:$4 sm:$0xff]  }
 0x1d1   : > { %19646 = vst [vmem:[#allocation50_spill] sm:$0xff] %v16552_v52  ;;  %v16565_v52 = vld [vmem:[#allocation2 + $0x358] ss:$12 sps:$4 sm:$0xff]  }
 0x1d4   : > { %v16561_v19 = vpop.f32.mrf.mxu1 }
 0x1d5   : > { %3711 = vmatmul.mubr.bf16.gmra.mxu0 %v16530_v23  ;;  %19647 = vst [vmem:[#allocation51_spill] sm:$0xff] %v16561_v19  ;;  %v14617_v19 = vld [vmem:[#allocation2 + $0x370] ss:$12 sps:$4 sm:$0xff]  }
 0x1d6   : > { %4409 = vmatmul.mubr.bf16.gmra.mxu1 %v15149_v41  ;;  %3718 = vmatprep.mubr.bf16.mxu0 %v16534_v58  ;;  %v15151_v41 = vld [vmem:[#allocation2 + $0x18c] ss:$12 sps:$4 sm:$0xff]  }
 0x1d7   : > { %4416 = vmatprep.mubr.bf16.mxu1 %v15150_v47  ;;  %v3546_v47 = vpop.f32.mrf.mxu0 }
 0x1d8   : > { %v16563_v47 = vpop.f32.mrf.mxu1 }
 0x1d9   : > { %v16554_v48 = vpop.f32.mrf.mxu0  ;;  %19648 = vst [vmem:[#allocation52_spill] sm:$0xff] %v16563_v47  ;;  %v15155_v47 = vld [vmem:[#allocation2 + $0x1bc] ss:$12 sps:$4 sm:$0xff]  }
 0x1da   : > { %v16567_v43 = vpop.f32.mrf.mxu1 }
 0x1db   : > { %v3549_v14 = vpop.f32.mrf.mxu0  ;;  %19649 = vst [vmem:[#allocation53_spill] sm:$0xff] %v16567_v43  ;;  %v14637_v43 = vld [vmem:[#allocation6 + $0x1c8] sm:$0xff]  }
 0x1dc   : > { %v16575_v62 = vpop.f32.mrf.mxu1  ;;  %5840 = vmatpush2.bf16.msra.mxu1 %v14637_v43 }
 0x1dd   : > { %3719 = vmatmul.mubr.bf16.gmra.mxu0 %v16544_v8  ;;  %v16569_v34 = vpop.f32.mrf.mxu0  ;;  %19651 = vst [vmem:[#allocation55_spill] sm:$0xff] %v16575_v62  ;;  %5841 = vmatprep.subr.bf16.mxu1 %v19634_v31 }
 0x1de   : > { %4417 = vmatmul.mubr.bf16.gmra.mxu1 %v15151_v41  ;;  %3726 = vmatprep.mubr.bf16.mxu0 %v16550_v50  ;;  %v15153_v41 = vld [vmem:[#allocation2 + $0x1a4] ss:$12 sps:$4 sm:$0xff]  }
 0x1df   : > { %4424 = vmatprep.mubr.bf16.mxu1 %v15152_v33  ;;  %v15154_v33 = vld [vmem:[#allocation2 + $0x1c0] ss:$12 sps:$4 sm:$0xff]   ;;  %v3554_v14 = vpop.f32.mrf.mxu0 }
 0x1e1   : > { %v16579_v2 = vpop.f32.mrf.mxu1 }
 0x1e2   : > { %19653 = vst [vmem:[#allocation57_spill] sm:$0xff] %v16579_v2 }
 0x1e3   : > { %v16582_v14 = vpop.f32.mrf.mxu1 }
 0x1e4   : > { %19654 = vst [vmem:[#allocation58_spill] sm:$0xff] %v16582_v14 }
 0x1e5   : > { %3727 = vmatmul.mubr.bf16.gmra.mxu0 %v16559_v12  ;;  %v16587_v1 = vpop.f32.mrf.mxu1 }
 0x1e6   : > { %4425 = vmatmul.mubr.bf16.gmra.mxu1 %v15153_v41  ;;  %3734 = vmatprep.mubr.bf16.mxu0 %v16565_v52  ;;  %v16577_v41 = vpop.f32.mrf.mxu0  ;;  %19656 = vst [vmem:[#allocation60_spill] sm:$0xff] %v16587_v1  ;;  %v14624_v1 = vld [vmem:[#allocation2 + $0x14] ss:$12 sps:$4 sm:$0xff]  }
 0x1e7   : > { %4432 = vmatprep.mubr.bf16.mxu1 %v15154_v33  ;;  %19652 = vst [vmem:[#allocation56_spill] sm:$0xff] %v16577_v41  ;;  %v15156_v33 = vld [vmem:[#allocation2 + $0x1d8] ss:$12 sps:$4 sm:$0xff]   ;;  %v16589_v2 = vpop.f32.mrf.mxu1 }
 0x1e8   : > { %v3557_v60 = vpop.f32.mrf.mxu0  ;;  %19657 = vst [vmem:[#allocation61_spill] sm:$0xff] %v16589_v2  ;;  %v15159_v41 = vld [vmem:[#allocation2 + $0x1ec] ss:$12 sps:$4 sm:$0xff]  }
 0x1ea   : > { %v16585_v62 = vpop.f32.mrf.mxu0 }
 0x1eb   : > { %19655 = vst [vmem:[#allocation59_spill] sm:$0xff] %v16585_v62  ;;  %v16593_v14 = vpop.f32.mrf.mxu1  ;;  %v14622_v62 = vld [vmem:[#allocation2 + $0x384] ss:$12 sps:$4 sm:$0xff]  }
 0x1ec   : > { %v3562_v60 = vpop.f32.mrf.mxu0  ;;  %19659 = vst [vmem:[#allocation63_spill] sm:$0xff] %v16593_v14  ;;  %v15161_v14 = vld [vmem:[#allocation2 + $0x204] ss:$12 sps:$4 sm:$0xff]  }
 0x1ed   : > { %3735 = vmatmul.mubr.bf16.gmra.mxu0 %v16573_v39  ;;  %v16595_v28 = vpop.f32.mrf.mxu1 }
 0x1ee   : > { %4433 = vmatmul.mubr.bf16.gmra.mxu1 %v15155_v47  ;;  %3742 = vmatprep.mubr.bf16.mxu0 %v14617_v19  ;;  %v14620_v47 = vld [vmem:[#allocation2 + $0x388] ss:$12 sps:$4 sm:$0xff]   ;;  %v16591_v39 = vpop.f32.mrf.mxu0  ;;  %19660 = vst [vmem:[#allocation64_spill] sm:$0xff] %v16595_v28 }
 0x1ef   : > { %4440 = vmatprep.mubr.bf16.mxu1 %v15156_v33  ;;  %v15158_v33 = vld [vmem:[#allocation2 + $0x1f0] ss:$12 sps:$4 sm:$0xff]   ;;  %19658 = vst [vmem:[#allocation62_spill] sm:$0xff] %v16591_v39  ;;  %v14639_v19 = vld [vmem:[#allocation6 + $0x1c0] sm:$0xff]   ;;  %v16597_v60 = vpop.f32.mrf.mxu1 }
 0x1f0   : > { %v3565_v43 = vpop.f32.mrf.mxu0  ;;  %5842 = vmatpush2.bf16.msra.mxu1 %v14639_v19  ;;  %19661 = vst [vmem:[#allocation65_spill] sm:$0xff] %v16597_v60  ;;  %v14625_v19 = vld [vmem:[#allocation2 + $0x2c] ss:$12 sps:$4 sm:$0xff]  }
 0x1f1   : > { %v15162_v39 = vld [vmem:[#allocation2 + $0x220] ss:$12 sps:$4 sm:$0xff]  }
 0x1f5   : > { %3743 = vmatmul.mubr.bf16.gmra.mxu0 %v14619_v18  ;;  %v16601_v18 = vpop.f32.mrf.mxu1 }
 0x1f6   : > { %4441 = vmatmul.mubr.bf16.gmra.mxu1 %v15157_v36  ;;  %3750 = vmatprep.mubr.bf16.mxu0 %v14620_v47  ;;  %v15160_v36 = vld [vmem:[#allocation2 + $0x208] ss:$12 sps:$4 sm:$0xff]   ;;  %19663 = vst [vmem:[#allocation67_spill] sm:$0xff] %v16601_v18 }
 0x1f7   : > { %4448 = vmatprep.mubr.bf16.mxu1 %v15158_v33  ;;  %v16599_v33 = vpop.f32.mrf.mxu0  ;;  %v16605_v28 = vpop.f32.mrf.mxu1  ;;  %v15165_v18 = vld [vmem:[#allocation2 + $0x21c] ss:$12 sps:$4 sm:$0xff]  }
 0x1f8   : > { %19662 = vst [vmem:[#allocation66_spill] sm:$0xff] %v16599_v33  ;;  %19665 = vst [vmem:[#allocation69_spill] sm:$0xff] %v16605_v28 }
 0x1f9   : > { %v3570_v2 = vpop.f32.mrf.mxu0 }
 0x1fa   : > { %v15164_v2 = vld [vmem:[#allocation2 + $0x44] ss:$12 sps:$4 sm:$0xff]  }
 0x1fb   : > { %v16603_v47 = vpop.f32.mrf.mxu0 }
 0x1fc   : > { %19664 = vst [vmem:[#allocation68_spill] sm:$0xff] %v16603_v47  ;;  %v14632_v47 = vld [vmem:[#allocation6 + $0x220] sm:$0xff]  }
 0x1fd   : > { %3751 = vmatmul.mubr.bf16.gmra.mxu0 %v14622_v62  ;;  %v3573_v43 = vpop.f32.mrf.mxu0  ;;  %v15163_v62 = vld [vmem:[#allocation6 + $0x238] sm:$0xff]  }
 0x1fe   : > { %4449 = vmatmul.mubr.bf16.gmra.mxu1 %v15159_v41  ;;  %13930 = vmatprep.mubr.bf16.mxu0 %v14624_v1  ;;  %v14628_v41 = vld [vmem:[#allocation6 + $0x230] sm:$0xff]   ;;  %v14630_v43 = vld [vmem:[#allocation6 + $0x228] sm:$0xff]  }
 0x1ff   : > { %4456 = vmatprep.mubr.bf16.mxu1 %v15160_v36  ;;  %v16607_v36 = vpop.f32.mrf.mxu1  ;;  %v16611_v1 = vpop.f32.mrf.mxu0 }
 0x200   : > { %19666 = vst [vmem:[#allocation70_spill] sm:$0xff] %v16607_v36  ;;  %19668 = vst [vmem:[#allocation72_spill] sm:$0xff] %v16611_v1  ;;  %v15168_v36 = vld [vmem:[#allocation2 + $0x74] ss:$12 sps:$4 sm:$0xff]  }
 0x201   : > { %v16609_v60 = vpop.f32.mrf.mxu1  ;;  %v3578_v28 = vpop.f32.mrf.mxu0 }
 0x202   : > { %19667 = vst [vmem:[#allocation71_spill] sm:$0xff] %v16609_v60  ;;  %v15167_v60 = vld [vmem:[#allocation2 + $0x5c] ss:$12 sps:$4 sm:$0xff]   ;;  %v15169_v28 = vld [vmem:[#allocation2 + $0x234] ss:$12 sps:$4 sm:$0xff]  }
 0x205   : > { %13931 = vmatmul.mubr.bf16.vlgmr.msra.gmra.mxu0 %v14625_v19  ;;  %v16615_v19 = vpop.f32.mrf.mxu0 }
 0x206   : > { %4457 = vmatmul.mubr.bf16.gmra.mxu1 %v15161_v14  ;;  %14003 = vmatpush3.bf16.msra.mxu0 %v15163_v62  ;;  %v16613_v14 = vpop.f32.mrf.mxu1  ;;  %19670 = vst [vmem:[#allocation74_spill] sm:$0xff] %v16615_v19  ;;  %v15173_v19 = vld [vmem:[#allocation2 + $0x24c] ss:$12 sps:$4 sm:$0xff]  }
 0x207   : > { %4464 = vmatprep.mubr.bf16.mxu1 %v15162_v39  ;;  %13934 = vmatprep.mubr.bf16.mxu0 %v15164_v2  ;;  %19669 = vst [vmem:[#allocation73_spill] sm:$0xff] %v16613_v14  ;;  %v15166_v39 = vld [vmem:[#allocation2 + $0x238] ss:$12 sps:$4 sm:$0xff]   ;;  %v3581_v2 = vpop.f32.mrf.mxu0 }
 0x208   : > { %14004 = vmatprep.subr.bf16.mxu0 %v14628_v41  ;;  %v16617_v62 = vpop.f32.mrf.mxu1  ;;  %v15171_v2 = vld [vmem:[#allocation2 + $0x8c] ss:$12 sps:$4 sm:$0xff]  }
 0x209   : > { %19671 = vst [vmem:[#allocation75_spill] sm:$0xff] %v16617_v62 }
 0x20a   : > { %14005 = vmatpush3.bf16.msra.mxu0 %v14628_v41  ;;  %v16619_v1 = vpop.f32.mrf.mxu1  ;;  %v15170_v41 = vld [vmem:[#allocation2 + $0x250] ss:$12 sps:$4 sm:$0xff]  }
 0x20b   : > { %14006 = vmatprep.subr.bf16.mxu0 %v14630_v43  ;;  %19672 = vst [vmem:[#allocation76_spill] sm:$0xff] %v16619_v1  ;;  %v14638_v1 = vld [vmem:[#allocation6 + $0x208] sm:$0xff]  }
 0x20c   : > { %v16621_v14 = vpop.f32.mrf.mxu1 }
 0x20d   : > { %13935 = vmatmul.mubr.bf16.gmra.mxu0 %v15167_v60  ;;  %19673 = vst [vmem:[#allocation77_spill] sm:$0xff] %v16621_v14  ;;  %v16623_v60 = vpop.f32.mrf.mxu0 }
 0x20e   : > { %4465 = vmatmul.mubr.bf16.gmra.mxu1 %v15165_v18  ;;  %13938 = vmatprep.mubr.bf16.mxu0 %v15168_v36  ;;  %v14634_v18 = vld [vmem:[#allocation6 + $0x218] sm:$0xff]   ;;  %19674 = vst [vmem:[#allocation78_spill] sm:$0xff] %v16623_v60  ;;  %v16625_v62 = vpop.f32.mrf.mxu1  ;;  %v15174_v60 = vld [vmem:[#allocation2 + $0x268] ss:$12 sps:$4 sm:$0xff]  }
 0x20f   : > { %4472 = vmatprep.mubr.bf16.mxu1 %v15166_v39  ;;  %14007 = vmatpush3.bf16.msra.mxu0 %v14630_v43  ;;  %v14636_v39 = vld [vmem:[#allocation6 + $0x210] sm:$0xff]   ;;  %19675 = vst [vmem:[#allocation79_spill] sm:$0xff] %v16625_v62  ;;  %v3586_v36 = vpop.f32.mrf.mxu0  ;;  %v15172_v43 = vld [vmem:[#allocation2 + $0xa4] ss:$12 sps:$4 sm:$0xff]  }
 0x210   : > { %14008 = vmatprep.subr.bf16.mxu0 %v14632_v47 }
 0x211   : > { %v4290_v14 = vpop.f32.mrf.mxu1 }
 0x213   : > { %14009 = vmatpush3.bf16.msra.mxu0 %v14632_v47  ;;  %v16630_v47 = vadd.f32 %v4290_v14, %v16276_v38  ;;  %v4292_v62 = vpop.f32.mrf.mxu1 }
 0x214   : > { %14010 = vmatprep.subr.bf16.mxu0 %v14634_v18  ;;  %v15177_v62 = vld [vmem:[#allocation2 + $0x264] ss:$12 sps:$4 sm:$0xff]  }
 0x215   : > { %13939 = vmatmul.mubr.bf16.gmra.mxu0 %v15171_v2  ;;  %v14646_v2 = vld [vmem:[#allocation6 + $0x200] sm:$0xff]   ;;  %v4293_v36 = vpop.f32.mrf.mxu1 }
 0x216   : > { %4473 = vmatmul.mubr.bf16.gmra.mxu1 %v15169_v28  ;;  %13942 = vmatprep.mubr.bf16.mxu0 %v15172_v43  ;;  %v16627_v28 = vpop.f32.mrf.mxu0 }
 0x217   : > { %4480 = vmatprep.mubr.bf16.mxu1 %v15170_v41  ;;  %14011 = vmatpush3.bf16.msra.mxu0 %v14634_v18  ;;  %19676 = vst [vmem:[#allocation80_spill] sm:$0xff] %v16627_v28  ;;  %v3797_v18 = vadd.f32 %v16195_v13, %v16287_v57  ;;  %v15175_v28 = vld [vmem:[#allocation2 + $0xbc] ss:$12 sps:$4 sm:$0xff]   ;;  %v4295_v38 = vpop.f32.mrf.mxu1  ;;  %v15178_v57 = vld [vmem:[#allocation2 + $0x280] ss:$12 sps:$4 sm:$0xff]  }
 0x218   : > { %14012 = vmatprep.subr.bf16.mxu0 %v14636_v39  ;;  %v3589_v41 = vpop.f32.mrf.mxu0  ;;  %v15180_v38 = vld [vmem:[#allocation2 + $0x104] ss:$12 sps:$4 sm:$0xff]  }
 0x219   : > { %v16636_v33 = vadd.f32 %v4293_v36, %v3797_v18  ;;  %v15179_v36 = vld [vmem:[#allocation2 + $0xec] ss:$12 sps:$4 sm:$0xff]  }
 0x21a   : > { %v16634_v43 = vpop.f32.mrf.mxu0 }
 0x21b   : > { %14013 = vmatpush3.bf16.msra.mxu0 %v14636_v39  ;;  %19677 = vst [vmem:[#allocation81_spill] sm:$0xff] %v16636_v33  ;;  %v4298_v39 = vpop.f32.mrf.mxu1 }
 0x21c   : > { %14014 = vmatprep.subr.bf16.mxu0 %v14638_v1  ;;  %v3594_v14 = vpop.f32.mrf.mxu0  ;;  %v16641_v13 = vadd.f32 %v4298_v39, %v16312_v55 }
 0x21d   : > { %13943 = vmatmul.mubr.bf16.gmra.mxu0 %v15175_v28  ;;  %v4300_v28 = vpop.f32.mrf.mxu1 }
 0x21e   : > { %4481 = vmatmul.mubr.bf16.gmra.mxu1 %v15173_v19  ;;  %v15176_v19 = vld [vmem:[#allocation2 + $0xd4] ss:$12 sps:$4 sm:$0xff]   ;;  %v15182_v28 = vld [vmem:[#allocation2 + $0x298] ss:$12 sps:$4 sm:$0xff]  }
 0x21f   : > { %4488 = vmatprep.mubr.bf16.mxu1 %v15174_v60  ;;  %13946 = vmatprep.mubr.bf16.mxu0 %v15176_v19  ;;  %v16638_v60 = vpop.f32.mrf.mxu0  ;;  %v4301_v18 = vpop.f32.mrf.mxu1 }
 0x220   : > { %14015 = vmatpush3.bf16.msra.mxu0 %v14638_v1  ;;  %v16647_v19 = vadd.f32 %v4301_v18, %v16325_v16  ;;  %v3813_v16 = vadd.f32 %v16220_v54, %v16356_v45  ;;  %v15186_v54 = vld [vmem:[#allocation2 + $0x2b0] ss:$12 sps:$4 sm:$0xff]  }
 0x221   : > { %14016 = vmatprep.subr.bf16.mxu0 %v14646_v2  ;;  %v3597_v41 = vpop.f32.mrf.mxu0  ;;  %v4303_v14 = vpop.f32.mrf.mxu1 }
 0x222   : > { %19678 = vst [vmem:[#allocation82_spill] sm:$0xff] %v16647_v19 }
 0x223   : > { %v16644_v1 = vpop.f32.mrf.mxu0 }
 0x224   : > { %14017 = vmatpush3.bf16.msra.mxu0 %v14646_v2 }
 0x225   : > { %9381 = vmatprep.subr.bf16.mxu0 %v19634_v31  ;;  %13947 = vmatmul.mubr.bf16.gmra.mxu0 %v15179_v36  ;;  %v3602_v55 = vpop.f32.mrf.mxu0 }
 0x226   : > { %4489 = vmatmul.mubr.bf16.gmra.mxu1 %v15177_v62  ;;  %13950 = vmatprep.mubr.bf16.mxu0 %v15180_v38  ;;  %v4306_v39 = vpop.f32.mrf.mxu1  ;;  %v15181_v62 = vld [vmem:[#allocation2 + $0x27c] ss:$12 sps:$4 sm:$0xff]   ;;  %v15184_v55 = vld [vmem:[#allocation2 + $0x134] ss:$12 sps:$4 sm:$0xff]  }
 0x227   : > { %4496 = vmatprep.mubr.bf16.mxu1 %v15178_v57  ;;  %v16649_v2 = vpop.f32.mrf.mxu0  ;;  %v16652_v57 = vadd.f32 %v4306_v39, %v16347_v17  ;;  %v15183_v38 = vld [vmem:[#allocation2 + $0x11c] ss:$12 sps:$4 sm:$0xff]   ;;  %v15185_v39 = vld [vmem:[#allocation2 + $0x294] ss:$12 sps:$4 sm:$0xff]  }
 0x228   : > { %v4308_v41 = vpop.f32.mrf.mxu1 }
 0x229   : > { %19679 = vst [vmem:[#allocation83_spill] sm:$0xff] %v16652_v57  ;;  %v3605_v33 = vpop.f32.mrf.mxu0 }
 0x22a   : > { %v4309_v18 = vpop.f32.mrf.mxu1 }
 0x22b   : > { %v16656_v36 = vpop.f32.mrf.mxu0  ;;  %v16658_v14 = vadd.f32 %v4309_v18, %v3813_v16  ;;  %v15187_v16 = vld [vmem:[#allocation2 + $0x14c] ss:$12 sps:$4 sm:$0xff]  }
 0x22d   : > { %13951 = vmatmul.mubr.bf16.gmra.mxu0 %v15183_v38  ;;  %v3610_v19 = vpop.f32.mrf.mxu0 }
 0x22e   : > { %4497 = vmatmul.mubr.bf16.gmra.mxu1 %v15181_v62  ;;  %13954 = vmatprep.mubr.bf16.mxu0 %v15184_v55  ;;  %v4311_v62 = vpop.f32.mrf.mxu1  ;;  %v15188_v19 = vld [vmem:[#allocation2 + $0x164] ss:$12 sps:$4 sm:$0xff]  }
 0x22f   : > { %4504 = vmatprep.mubr.bf16.mxu1 %v15182_v28  ;;  %v16660_v28 = vpop.f32.mrf.mxu0 }
 0x230   : > { %v4314_v17 = vpop.f32.mrf.mxu1 }
 0x231   : > { %v16663_v33 = vadd.f32 %v4314_v17, %v16383_v6  ;;  %v3613_v41 = vpop.f32.mrf.mxu0 }
 0x232   : > { %v4316_v45 = vpop.f32.mrf.mxu1 }
 0x233   : > { %v16665_v38 = vpop.f32.mrf.mxu0 }
 0x234   : > { %v4317_v57 = vpop.f32.mrf.mxu1 }
 0x235   : > { %13955 = vmatmul.mubr.bf16.gmra.mxu0 %v15187_v16  ;;  %v16668_v18 = vadd.f32 %v4317_v57, %v16395_v44  ;;  %v3618_v62 = vpop.f32.mrf.mxu0  ;;  %v3829_v44 = vadd.f32 %v16245_v37, %v16425_v29  ;;  %v15189_v16 = vld [vmem:[#allocation2 + $0x17c] ss:$12 sps:$4 sm:$0xff]  }
 0x236   : > { %4505 = vmatmul.mubr.bf16.gmra.mxu1 %v15185_v39  ;;  %13958 = vmatprep.mubr.bf16.mxu0 %v15188_v19  ;;  %v4319_v55 = vpop.f32.mrf.mxu1 }
 0x237   : > { %4512 = vmatprep.mubr.bf16.mxu1 %v15186_v54  ;;  %v16671_v6 = vpop.f32.mrf.mxu0 }
 0x238   : > { %v4322_v39 = vpop.f32.mrf.mxu1 }
 0x239   : > { %v16674_v17 = vadd.f32 %v4322_v39, %v16416_v51  ;;  %v3621_v45 = vpop.f32.mrf.mxu0  ;;  %v3834_v51 = vadd.f32 %v16228_v63, %v16447_v7  ;;  %v15192_v7 = vld [vmem:[#allocation2 + $0x1c4] ss:$12 sps:$4 sm:$0xff]  }
 0x23a   : > { %v4324_v54 = vpop.f32.mrf.mxu1  ;;  %v3837_v45 = vadd.f32 %v16236_v21, %v16461_v46 }
 0x23b   : > { %v16679_v41 = vpop.f32.mrf.mxu0 }
 0x23c   : > { %v4325_v57 = vpop.f32.mrf.mxu1 }
 0x23d   : > { %13959 = vmatmul.mubr.bf16.gmra.mxu0 %v15189_v16  ;;  %v16681_v19 = vadd.f32 %v4325_v57, %v3829_v44  ;;  %v3626_v62 = vpop.f32.mrf.mxu0  ;;  %v15191_v16 = vld [vmem:[#allocation2 + $0x1ac] ss:$12 sps:$4 sm:$0xff]  }
 0x23e   : > { %4513 = vmatmul.mubr.bf16.gmra.mxu1 %v16465_v27  ;;  %v15190_v27 = vld [vmem:[#allocation2 + $0x194] ss:$12 sps:$4 sm:$0xff]   ;;  %v4327_v55 = vpop.f32.mrf.mxu1 }
 0x23f   : > { %4520 = vmatprep.mubr.bf16.mxu1 %v16467_v9  ;;  %13962 = vmatprep.mubr.bf16.mxu0 %v15190_v27  ;;  %v16686_v39 = vpop.f32.mrf.mxu0  ;;  %v3842_v55 = vadd.f32 %v16259_v4, %v16477_v42  ;;  %v15194_v42 = vld [vmem:[#allocation2 + $0x1f4] ss:$12 sps:$4 sm:$0xff]  }
 0x241   : > { %v4330_v9 = vpop.f32.mrf.mxu1  ;;  %v3629_v54 = vpop.f32.mrf.mxu0 }
 0x242   : > { %v16688_v37 = vadd.f32 %v4330_v9, %v3834_v51  ;;  %v3845_v9 = vadd.f32 %v16285_v56, %v16492_v20 }
 0x243   : > { %v4332_v29 = vpop.f32.mrf.mxu1  ;;  %v16693_v57 = vpop.f32.mrf.mxu0 }
 0x245   : > { %v4333_v44 = vpop.f32.mrf.mxu1  ;;  %13963 = vmatmul.mubr.bf16.gmra.mxu0 %v15191_v16  ;;  %v3634_v27 = vpop.f32.mrf.mxu0  ;;  %v3850_v16 = vadd.f32 %v16249_v49, %v16505_v10  ;;  %v15196_v10 = vld [vmem:[#allocation2 + $0x224] ss:$12 sps:$4 sm:$0xff]  }
 0x246   : > { %4521 = vmatmul.mubr.bf16.gmra.mxu1 %v16486_v59  ;;  %v16695_v63 = vadd.f32 %v4333_v44, %v3837_v45  ;;  %13966 = vmatprep.mubr.bf16.mxu0 %v15192_v7  ;;  %v15193_v45 = vld [vmem:[#allocation2 + $0x1dc] ss:$12 sps:$4 sm:$0xff]   ;;  %v3853_v27 = vadd.f32 %v16268_v30, %v16511_v32 }
 0x247   : > { %4528 = vmatprep.mubr.bf16.mxu1 %v16490_v61  ;;  %v4335_v59 = vpop.f32.mrf.mxu1  ;;  %v16700_v62 = vpop.f32.mrf.mxu0 }
 0x249   : > { %v4338_v61 = vpop.f32.mrf.mxu1  ;;  %v3637_v51 = vpop.f32.mrf.mxu0 }
 0x24a   : > { %v16702_v21 = vadd.f32 %v4338_v61, %v3842_v55 }
 0x24b   : > { %v4340_v46 = vpop.f32.mrf.mxu1  ;;  %v16707_v54 = vpop.f32.mrf.mxu0 }
 0x24c   : > { %v15195_v46 = vld [vmem:[#allocation2 + $0x20c] ss:$12 sps:$4 sm:$0xff]  }
 0x24d   : > { %v4341_v29 = vpop.f32.mrf.mxu1  ;;  %13967 = vmatmul.mubr.bf16.gmra.mxu0 %v15193_v45  ;;  %v3642_v44 = vpop.f32.mrf.mxu0 }
 0x24e   : > { %4529 = vmatmul.mubr.bf16.gmra.mxu1 %v16501_v15  ;;  %v16709_v4 = vadd.f32 %v4341_v29, %v3845_v9  ;;  %13970 = vmatprep.mubr.bf16.mxu0 %v15194_v42  ;;  %v3858_v9 = vadd.f32 %v16303_v40, %v16526_v26  ;;  %v3861_v42 = vadd.f32 %v16317_v5, %v16536_v25  ;;  %v15198_v26 = vld [vmem:[#allocation2 + $0x254] ss:$12 sps:$4 sm:$0xff]  }
 0x24f   : > { %4536 = vmatprep.mubr.bf16.mxu1 %v16507_v3  ;;  %v4343_v15 = vpop.f32.mrf.mxu1  ;;  %v16714_v7 = vpop.f32.mrf.mxu0 }
 0x251   : > { %v3645_v59 = vpop.f32.mrf.mxu0 }
 0x252   : > { %v4346_v3 = vpop.f32.mrf.mxu1 }
 0x253   : > { %v16716_v56 = vadd.f32 %v4346_v3, %v3850_v16  ;;  %v16721_v61 = vpop.f32.mrf.mxu0  ;;  %v15197_v16 = vld [vmem:[#allocation2 + $0x23c] ss:$12 sps:$4 sm:$0xff]  }
 0x254   : > { %v4348_v20 = vpop.f32.mrf.mxu1 }
 0x255   : > { %13971 = vmatmul.mubr.bf16.gmra.mxu0 %v15195_v46  ;;  %v3650_v51 = vpop.f32.mrf.mxu0  ;;  %v3866_v20 = vadd.f32 %v16295_v22, %v16548_v24  ;;  %v3869_v46 = vadd.f32 %v16309_v53, %v16554_v48  ;;  %v15200_v24 = vld [vmem:[#allocation2 + $0x284] ss:$12 sps:$4 sm:$0xff]  }
 0x256   : > { %4537 = vmatmul.mubr.bf16.gmra.mxu1 %v16515_v11  ;;  %v4349_v55 = vpop.f32.mrf.mxu1  ;;  %13974 = vmatprep.mubr.bf16.mxu0 %v15196_v10  ;;  %v15199_v51 = vld [vmem:[#allocation2 + $0x26c] ss:$12 sps:$4 sm:$0xff]  }
 0x257   : > { %4544 = vmatprep.mubr.bf16.mxu1 %v16519_v0  ;;  %v16723_v49 = vadd.f32 %v4349_v55, %v3853_v27  ;;  %v16728_v29 = vpop.f32.mrf.mxu0  ;;  %v14697_v55 = vld [vmem:[#allocation8 + $0x178] sm:$0xff]  }
 0x258   : > { %v4351_v11 = vpop.f32.mrf.mxu1  ;;  %14090 = vmatprep.subr.bf16.mxu1 %v14697_v55 }
 0x259   : > { %v3653_v45 = vpop.f32.mrf.mxu0 }
 0x25b   : > { %v16735_v44 = vpop.f32.mrf.mxu0 }
 0x25c   : > { %v4354_v0 = vpop.f32.mrf.mxu1 }
 0x25d   : > { %v16730_v30 = vadd.f32 %v4354_v0, %v3858_v9  ;;  %13975 = vmatmul.mubr.bf16.gmra.mxu0 %v15197_v16  ;;  %v3658_v3 = vpop.f32.mrf.mxu0 }
 0x25e   : > { %4545 = vmatmul.mubr.bf16.gmra.mxu1 %v16530_v23  ;;  %v4356_v32 = vpop.f32.mrf.mxu1  ;;  %13978 = vmatprep.mubr.bf16.mxu0 %v15198_v26  ;;  %v15201_v3 = vld [vmem:[#allocation2 + $0x29c] ss:$12 sps:$4 sm:$0xff]  }
 0x25f   : > { %4552 = vmatprep.mubr.bf16.mxu1 %v16534_v58  ;;  %v16742_v59 = vpop.f32.mrf.mxu0 }
 0x260   : > { %v4357_v15 = vpop.f32.mrf.mxu1 }
 0x261   : > { %v16737_v40 = vadd.f32 %v4357_v15, %v3861_v42  ;;  %v3661_v27 = vpop.f32.mrf.mxu0  ;;  %v19680_v42 = vld [vmem:[#allocation56_spill] sm:$0xff]  ;;  %v19681_v15 = vld [vmem:[#allocation21_spill] sm:$0xff] }
 0x262   : > { %v4359_v23 = vpop.f32.mrf.mxu1  ;;  %v3877_v16 = vadd.f32 %v19681_v15, %v19680_v42  ;;  %v19684_v27 = vld [vmem:[#allocation19_spill] sm:$0xff]  ;;  %v15203_v15 = vld [vmem:[#allocation2 + $0x2cc] ss:$12 sps:$4 sm:$0xff]  }
 0x265   : > { %v16749_v11 = vpop.f32.mrf.mxu0  ;;  %13979 = vmatmul.mubr.bf16.gmra.mxu0 %v15199_v51 }
 0x266   : > { %v4362_v58 = vpop.f32.mrf.mxu1  ;;  %4553 = vmatmul.mubr.bf16.gmra.mxu1 %v16544_v8  ;;  %13982 = vmatprep.mubr.bf16.mxu0 %v15200_v24 }
 0x267   : > { %v16744_v5 = vadd.f32 %v4362_v58, %v3866_v20  ;;  %4560 = vmatprep.mubr.bf16.mxu1 %v16550_v50  ;;  %v3666_v9 = vpop.f32.mrf.mxu0  ;;  %v3874_v50 = vadd.f32 %v16334_v35, %v16569_v34  ;;  %v15202_v34 = vld [vmem:[#allocation2 + $0x2b4] ss:$12 sps:$4 sm:$0xff]  }
 0x268   : > { %v4364_v25 = vpop.f32.mrf.mxu1 }
 0x269   : > { %v16756_v32 = vpop.f32.mrf.mxu0  ;;  %v19683_v25 = vld [vmem:[#allocation59_spill] sm:$0xff] }
 0x26a   : > { %v4365_v10 = vpop.f32.mrf.mxu1 }
 0x26b   : > { %v16751_v22 = vadd.f32 %v4365_v10, %v3869_v46  ;;  %v3669_v45 = vpop.f32.mrf.mxu0  ;;  %v19685_v10 = vld [vmem:[#allocation54_spill] sm:$0xff] }
 0x26c   : > { %v4367_v8 = vpop.f32.mrf.mxu1 }
 0x26d   : > { %v16763_v23 = vpop.f32.mrf.mxu0  ;;  %13983 = vmatmul.mubr.bf16.gmra.mxu0 %v15201_v3  ;;  %v15204_v3 = vld [vmem:[#allocation2 + $0x2e4] ss:$12 sps:$4 sm:$0xff]  }
 0x26e   : > { %v4370_v0 = vpop.f32.mrf.mxu1  ;;  %4561 = vmatmul.mubr.bf16.gmra.mxu1 %v16559_v12  ;;  %13986 = vmatprep.mubr.bf16.mxu0 %v15202_v34  ;;  %v14642_v12 = vld [vmem:[#allocation2 + $0x70] ss:$12 sps:$4 sm:$0xff]   ;;  %v14643_v34 = vld [vmem:[#allocation2 + $0x88] ss:$12 sps:$4 sm:$0xff]  }
 0x26f   : > { %v16758_v53 = vadd.f32 %v4370_v0, %v3874_v50  ;;  %4568 = vmatprep.mubr.bf16.mxu1 %v16565_v52  ;;  %v3674_v58 = vpop.f32.mrf.mxu0  ;;  %v3882_v52 = vadd.f32 %v19684_v27, %v19683_v25  ;;  %v19686_v50 = vld [vmem:[#allocation62_spill] sm:$0xff]  ;;  %v19687_v0 = vld [vmem:[#allocation20_spill] sm:$0xff] }
 0x270   : > { %v4372_v48 = vpop.f32.mrf.mxu1  ;;  %v19688_v25 = vld [vmem:[#allocation66_spill] sm:$0xff] }
 0x271   : > { %v16770_v51 = vpop.f32.mrf.mxu0  ;;  %v3885_v48 = vadd.f32 %v19687_v0, %v19686_v50  ;;  %v19691_v50 = vld [vmem:[#allocation68_spill] sm:$0xff]  ;;  %v19692_v0 = vld [vmem:[#allocation25_spill] sm:$0xff] }
 0x272   : > { %v4373_v26 = vpop.f32.mrf.mxu1 }
 0x273   : > { %v16765_v35 = vadd.f32 %v4373_v26, %v3877_v16  ;;  %v3677_v9 = vpop.f32.mrf.mxu0  ;;  %v14640_v16 = vld [vmem:[#allocation2 + $0x6c] ss:$12 sps:$4 sm:$0xff]  }
 0x274   : > { %v4375_v20 = vpop.f32.mrf.mxu1 }
 0x275   : > { %19682 = vst [vmem:[#allocation56_spill] sm:$0xff] %v16765_v35  ;;  %v16776_v42 = vpop.f32.mrf.mxu0  ;;  %13987 = vmatmul.mubr.bf16.gmra.mxu0 %v15203_v15 }
 0x276   : > { %v4378_v46 = vpop.f32.mrf.mxu1  ;;  %4569 = vmatmul.mubr.bf16.gmra.mxu1 %v19685_v10  ;;  %13990 = vmatprep.mubr.bf16.mxu0 %v15204_v3  ;;  %v15205_v3 = vld [vmem:[#allocation2 + $0x2fc] ss:$12 sps:$4 sm:$0xff]  }
 0x277   : > { %v16772_v24 = vadd.f32 %v4378_v46, %v3882_v52  ;;  %5843 = vmatprep.mubr.bf16.mxu1 %v14642_v12  ;;  %v3682_v58 = vpop.f32.mrf.mxu0  ;;  %v19689_v12 = vld [vmem:[#allocation23_spill] sm:$0xff] }
 0x278   : > { %v4380_v8 = vpop.f32.mrf.mxu1  ;;  %v3890_v27 = vadd.f32 %v19689_v12, %v19688_v25  ;;  %v14647_v25 = vld [vmem:[#allocation2 + $0xa0] ss:$12 sps:$4 sm:$0xff]  }
 0x279   : > { %v16782_v46 = vpop.f32.mrf.mxu0 }
 0x27a   : > { %v4381_v45 = vpop.f32.mrf.mxu1 }
 0x27b   : > { %v16778_v26 = vadd.f32 %v4381_v45, %v3885_v48  ;;  %v3685_v9 = vpop.f32.mrf.mxu0  ;;  %v3893_v48 = vadd.f32 %v19692_v0, %v19691_v50 }
 0x27c   : > { %v4383_v20 = vpop.f32.mrf.mxu1 }
 0x27d   : > { %v16788_v15 = vpop.f32.mrf.mxu0  ;;  %13991 = vmatmul.mubr.bf16.gmra.mxu0 %v15205_v3  ;;  %v14645_v20 = vld [vmem:[#allocation2 + $0x84] ss:$12 sps:$4 sm:$0xff]  }
 0x27e   : > { %v4386_v52 = vpop.f32.mrf.mxu1  ;;  %5844 = vmatmul.mubr.bf16.vlgmr.msra.gmra.mxu1 %v14640_v16  ;;  %v15206_v16 = vld [vmem:[#allocation2 + $0x314] ss:$12 sps:$4 sm:$0xff]  }
 0x27f   : > { %v16784_v10 = vadd.f32 %v4386_v52, %v3890_v27  ;;  %5851 = vmatprep.mubr.bf16.mxu1 %v14643_v34  ;;  %14091 = vmatpush3.bf16.msra.mxu1 %v14697_v55  ;;  %v3690_v27 = vpop.f32.mrf.mxu0  ;;  %v19694_v34 = vld [vmem:[#allocation72_spill] sm:$0xff]  ;;  %v19695_v55 = vld [vmem:[#allocation22_spill] sm:$0xff] }
 0x280   : > { %v4388_v8 = vpop.f32.mrf.mxu1  ;;  %13994 = vmatprep.mubr.bf16.mxu0 %v15206_v16  ;;  %v3898_v52 = vadd.f32 %v19695_v55, %v19694_v34  ;;  %v14649_v27 = vld [vmem:[#allocation2 + $0x9c] ss:$12 sps:$4 sm:$0xff]   ;;  %v15208_v34 = vld [vmem:[#allocation2 + $0x344] ss:$12 sps:$4 sm:$0xff]  }
 0x281   : > { %19690 = vst [vmem:[#allocation21_spill] sm:$0xff] %v16784_v10  ;;  %v16794_v9 = vpop.f32.mrf.mxu0  ;;  %v19698_v10 = vld [vmem:[#allocation74_spill] sm:$0xff] }
 0x282   : > { %v4389_v45 = vpop.f32.mrf.mxu1  ;;  %19696 = vst [vmem:[#allocation19_spill] sm:$0xff] %v16794_v9  ;;  %v15209_v9 = vld [vmem:[#allocation2 + $0x35c] ss:$12 sps:$4 sm:$0xff]  }
 0x283   : > { %v16790_v58 = vadd.f32 %v4389_v45, %v3893_v48  ;;  %v3693_v3 = vpop.f32.mrf.mxu0  ;;  %v19699_v48 = vld [vmem:[#allocation24_spill] sm:$0xff] }
 0x284   : > { %v4391_v12 = vpop.f32.mrf.mxu1  ;;  %v3901_v45 = vadd.f32 %v19699_v48, %v19698_v10 }
 0x285   : > { %19693 = vst [vmem:[#allocation59_spill] sm:$0xff] %v16790_v58  ;;  %v16800_v16 = vpop.f32.mrf.mxu0  ;;  %v15207_v12 = vld [vmem:[#allocation2 + $0x32c] ss:$12 sps:$4 sm:$0xff]  }
 0x286   : > { %v4394_v8 = vpop.f32.mrf.mxu1  ;;  %5852 = vmatmul.mubr.bf16.gmra.mxu1 %v14645_v20  ;;  %19700 = vst [vmem:[#allocation62_spill] sm:$0xff] %v16800_v16  ;;  %13995 = vmatmul.mubr.bf16.gmra.mxu0 %v15207_v12  ;;  %v14650_v20 = vld [vmem:[#allocation2 + $0xb8] ss:$12 sps:$4 sm:$0xff]   ;;  %v14653_v12 = vld [vmem:[#allocation2 + $0x74] ss:$12 sps:$4 sm:$0xff]  }
 0x287   : > { %v16796_v50 = vadd.f32 %v4394_v8, %v3898_v52  ;;  %5859 = vmatprep.mubr.bf16.mxu1 %v14647_v25  ;;  %13998 = vmatprep.mubr.bf16.mxu0 %v15208_v34  ;;  %v3698_v52 = vpop.f32.mrf.mxu0  ;;  %v14718_v8 = vld [vmem:[#allocation8 + $0x170] sm:$0xff]   ;;  %v19705_v34 = vld [vmem:[#allocation80_spill] sm:$0xff] }
 0x288   : > { %v4396_v0 = vpop.f32.mrf.mxu1  ;;  %v19702_v25 = vld [vmem:[#allocation78_spill] sm:$0xff]  ;;  %14092 = vmatprep.subr.bf16.mxu1 %v14718_v8 }
 0x289   : > { %19697 = vst [vmem:[#allocation54_spill] sm:$0xff] %v16796_v50  ;;  %v19703_v0 = vld [vmem:[#allocation27_spill] sm:$0xff]  ;;  %v16806_v10 = vpop.f32.mrf.mxu0  ;;  %14093 = vmatpush3.bf16.msra.mxu1 %v14718_v8 }
 0x28a   : > { %v4397_v58 = vpop.f32.mrf.mxu1  ;;  %v3906_v3 = vadd.f32 %v19703_v0, %v19702_v25  ;;  %v14652_v25 = vld [vmem:[#allocation2 + $0xb4] ss:$12 sps:$4 sm:$0xff]   ;;  %v14654_v0 = vld [vmem:[#allocation2 + $0xd0] ss:$12 sps:$4 sm:$0xff]  }
 0x28b   : > { %v16802_v35 = vadd.f32 %v4397_v58, %v3901_v45  ;;  %v3701_v45 = vpop.f32.mrf.mxu0 }
 0x28c   : > { %v4399_v55 = vpop.f32.mrf.mxu1 }
 0x28d   : > { %19701 = vst [vmem:[#allocation20_spill] sm:$0xff] %v16802_v35  ;;  %v19706_v35 = vld [vmem:[#allocation29_spill] sm:$0xff]  ;;  %v16812_v16 = vpop.f32.mrf.mxu0 }
 0x28e   : > { %v4402_v50 = vpop.f32.mrf.mxu1  ;;  %5860 = vmatmul.mubr.bf16.gmra.mxu1 %v14649_v27  ;;  %v3909_v55 = vadd.f32 %v19706_v35, %v19705_v34  ;;  %19707 = vst [vmem:[#allocation23_spill] sm:$0xff] %v16812_v16  ;;  %13999 = vmatmul.mubr.bf16.gmra.mxu0 %v15209_v9  ;;  %v14656_v35 = vld [vmem:[#allocation2 + $0x8c] ss:$12 sps:$4 sm:$0xff]   ;;  %v14707_v9 = vld [vmem:[#allocation8 + $0xf8] sm:$0xff]  }
 0x28f   : > { %v16808_v48 = vadd.f32 %v4402_v50, %v3906_v3  ;;  %5867 = vmatprep.mubr.bf16.mxu1 %v14650_v20  ;;  %14018 = vmatprep.mubr.bf16.mxu0 %v14653_v12  ;;  %v3706_v3 = vpop.f32.mrf.mxu0  ;;  %v19709_v20 = vld [vmem:[#allocation26_spill] sm:$0xff]  ;;  %v19710_v12 = vld [vmem:[#allocation28_spill] sm:$0xff] }
 0x290   : > { %v4404_v58 = vpop.f32.mrf.mxu1  ;;  %v3914_v8 = vadd.f32 %v19709_v20, %v16634_v43  ;;  %v14657_v43 = vld [vmem:[#allocation2 + $0xcc] ss:$12 sps:$4 sm:$0xff]  }
 0x291   : > { %19704 = vst [vmem:[#allocation66_spill] sm:$0xff] %v16808_v48  ;;  %v16818_v45 = vpop.f32.mrf.mxu0  ;;  %v14658_v48 = vld [vmem:[#allocation2 + $0xa4] ss:$12 sps:$4 sm:$0xff]  }
 0x292   : > { %v4405_v52 = vpop.f32.mrf.mxu1 }
 0x293   : > { %v16814_v27 = vadd.f32 %v4405_v52, %v3909_v55  ;;  %v3709_v55 = vpop.f32.mrf.mxu0  ;;  %v3917_v52 = vadd.f32 %v19710_v12, %v16638_v60  ;;  %v14661_v12 = vld [vmem:[#allocation2 + $0xbc] ss:$12 sps:$4 sm:$0xff]  }
 0x294   : > { %v4407_v50 = vpop.f32.mrf.mxu1 }
 0x295   : > { %19708 = vst [vmem:[#allocation68_spill] sm:$0xff] %v16814_v27  ;;  %v16824_v3 = vpop.f32.mrf.mxu0 }
 0x296   : > { %v4410_v58 = vpop.f32.mrf.mxu1  ;;  %5868 = vmatmul.mubr.bf16.gmra.mxu1 %v14652_v25  ;;  %19711 = vst [vmem:[#allocation25_spill] sm:$0xff] %v16824_v3  ;;  %14019 = vmatmul.mubr.bf16.vlgmr.msra.gmra.mxu0 %v14656_v35  ;;  %v14659_v25 = vld [vmem:[#allocation2 + $0xe8] ss:$12 sps:$4 sm:$0xff]  }
 0x297   : > { %v16820_v34 = vadd.f32 %v4410_v58, %v3914_v8  ;;  %5875 = vmatprep.mubr.bf16.mxu1 %v14654_v0  ;;  %14022 = vmatprep.mubr.bf16.mxu0 %v14658_v48  ;;  %v14712_v8 = vld [vmem:[#allocation8 + $0xf0] sm:$0xff]   ;;  %v3714_v0 = vpop.f32.mrf.mxu0  ;;  %v14721_v48 = vld [vmem:[#allocation8 + $0xe8] sm:$0xff]  }
 0x298   : > { %v4412_v16 = vpop.f32.mrf.mxu1  ;;  %9382 = vmatpush1.bf16.msra.mxu0 %v14707_v9 }
 0x299   : > { %9383 = vmatprep.subr.bf16.mxu0 %v19634_v31  ;;  %v19712_v16 = vld [vmem:[#allocation31_spill] sm:$0xff]  ;;  %v16831_v60 = vpop.f32.mrf.mxu0 }
 0x29a   : > { %v4413_v50 = vpop.f32.mrf.mxu1  ;;  %v3922_v55 = vadd.f32 %v19712_v16, %v16644_v1  ;;  %19713 = vst [vmem:[#allocation72_spill] sm:$0xff] %v16831_v60 }
 0x29b   : > { %v16826_v20 = vadd.f32 %v4413_v50, %v3917_v52  ;;  %v14663_v52 = vld [vmem:[#allocation2 + $0xd4] ss:$12 sps:$4 sm:$0xff]   ;;  %v3717_v50 = vpop.f32.mrf.mxu0 }
 0x29c   : > { %v4415_v58 = vpop.f32.mrf.mxu1  ;;  %9384 = vmatpush1.bf16.msra.mxu0 %v14712_v8 }
 0x29d   : > { %9385 = vmatprep.subr.bf16.mxu0 %v19634_v31  ;;  %v19714_v58 = vld [vmem:[#allocation34_spill] sm:$0xff]  ;;  %v16838_v1 = vpop.f32.mrf.mxu0 }
 0x29e   : > { %v4418_v27 = vpop.f32.mrf.mxu1  ;;  %5876 = vmatmul.mubr.bf16.gmra.mxu1 %v14657_v43  ;;  %v3925_v0 = vadd.f32 %v19714_v58, %v16649_v2  ;;  %14023 = vmatmul.mubr.bf16.gmra.mxu0 %v14661_v12  ;;  %v14662_v43 = vld [vmem:[#allocation2 + $0xe4] ss:$12 sps:$4 sm:$0xff]   ;;  %v14666_v58 = vld [vmem:[#allocation2 + $0xec] ss:$12 sps:$4 sm:$0xff]  }
 0x29f   : > { %v16833_v35 = vadd.f32 %v4418_v27, %v3922_v55  ;;  %5883 = vmatprep.mubr.bf16.mxu1 %v14659_v25  ;;  %14026 = vmatprep.mubr.bf16.mxu0 %v14663_v52  ;;  %v14664_v27 = vld [vmem:[#allocation2 + $0x100] ss:$12 sps:$4 sm:$0xff]   ;;  %v3722_v55 = vpop.f32.mrf.mxu0 }
 0x2a0   : > { %v4420_v9 = vpop.f32.mrf.mxu1  ;;  %9386 = vmatpush1.bf16.msra.mxu0 %v14721_v48  ;;  %v14726_v25 = vld [vmem:[#allocation8 + $0xe0] sm:$0xff]   ;;  %v14732_v52 = vld [vmem:[#allocation8 + $0xd8] sm:$0xff]  }
 0x2a1   : > { %9387 = vmatprep.subr.bf16.mxu0 %v19634_v31  ;;  %v19716_v9 = vld [vmem:[#allocation30_spill] sm:$0xff]  ;;  %v16845_v2 = vpop.f32.mrf.mxu0 }
 0x2a2   : > { %v4421_v3 = vpop.f32.mrf.mxu1  ;;  %v3930_v50 = vadd.f32 %v19716_v9, %v16656_v36  ;;  %19717 = vst [vmem:[#allocation74_spill] sm:$0xff] %v16845_v2 }
 0x2a3   : > { %v16840_v16 = vadd.f32 %v4421_v3, %v3925_v0  ;;  %v14668_v3 = vld [vmem:[#allocation2 + $0x104] ss:$12 sps:$4 sm:$0xff]   ;;  %v3725_v0 = vpop.f32.mrf.mxu0 }
 0x2a4   : > { %v4423_v8 = vpop.f32.mrf.mxu1  ;;  %9388 = vmatpush1.bf16.msra.mxu0 %v14726_v25 }
 0x2a5   : > { %19715 = vst [vmem:[#allocation22_spill] sm:$0xff] %v16840_v16  ;;  %9389 = vmatprep.subr.bf16.mxu0 %v19634_v31  ;;  %v19718_v8 = vld [vmem:[#allocation33_spill] sm:$0xff]  ;;  %v16852_v36 = vpop.f32.mrf.mxu0 }
 0x2a6   : > { %v4426_v60 = vpop.f32.mrf.mxu1  ;;  %5884 = vmatmul.mubr.bf16.gmra.mxu1 %v14662_v43  ;;  %v3933_v55 = vadd.f32 %v19718_v8, %v16660_v28  ;;  %19719 = vst [vmem:[#allocation24_spill] sm:$0xff] %v16852_v36  ;;  %14027 = vmatmul.mubr.bf16.gmra.mxu0 %v14666_v58  ;;  %v14667_v43 = vld [vmem:[#allocation2 + $0xfc] ss:$12 sps:$4 sm:$0xff]  }
 0x2a7   : > { %v16847_v12 = vadd.f32 %v4426_v60, %v3930_v50  ;;  %5891 = vmatprep.mubr.bf16.mxu1 %v14664_v27  ;;  %14030 = vmatprep.mubr.bf16.mxu0 %v14668_v3  ;;  %v14669_v60 = vld [vmem:[#allocation2 + $0x118] ss:$12 sps:$4 sm:$0xff]   ;;  %v3730_v50 = vpop.f32.mrf.mxu0  ;;  %v14671_v8 = vld [vmem:[#allocation2 + $0x11c] ss:$12 sps:$4 sm:$0xff]  }
 0x2a8   : > { %v4428_v48 = vpop.f32.mrf.mxu1  ;;  %9390 = vmatpush1.bf16.msra.mxu0 %v14732_v52  ;;  %v14736_v27 = vld [vmem:[#allocation8 + $0xd0] sm:$0xff]  }
 0x2a9   : > { %9391 = vmatprep.subr.bf16.mxu0 %v19634_v31  ;;  %v19720_v48 = vld [vmem:[#allocation36_spill] sm:$0xff]  ;;  %v16859_v28 = vpop.f32.mrf.mxu0  ;;  %v19721_v50 = vld [vmem:[#allocation38_spill] sm:$0xff] }
 0x2aa   : > { %v4429_v16 = vpop.f32.mrf.mxu1  ;;  %v3938_v0 = vadd.f32 %v19720_v48, %v16665_v38  ;;  %v3941_v36 = vadd.f32 %v19721_v50, %v16671_v6 }
 0x2ab   : > { %v16854_v9 = vadd.f32 %v4429_v16, %v3933_v55  ;;  %v14673_v16 = vld [vmem:[#allocation2 + $0x134] ss:$12 sps:$4 sm:$0xff]   ;;  %v3733_v52 = vpop.f32.mrf.mxu0 }
 0x2ac   : > { %v4431_v25 = vpop.f32.mrf.mxu1  ;;  %9392 = vmatpush1.bf16.msra.mxu0 %v14736_v27  ;;  %v14742_v55 = vld [vmem:[#allocation8 + $0x168] sm:$0xff]  }
 0x2ad   : > { %9393 = vmatprep.subr.bf16.mxu0 %v19634_v31  ;;  %v14743_v25 = vld [vmem:[#allocation8 + $0xc8] sm:$0xff]   ;;  %v16866_v48 = vpop.f32.mrf.mxu0  ;;  %14094 = vmatprep.subr.bf16.mxu1 %v14742_v55 }
 0x2ae   : > { %v4434_v2 = vpop.f32.mrf.mxu1  ;;  %5892 = vmatmul.mubr.bf16.gmra.mxu1 %v14667_v43  ;;  %19722 = vst [vmem:[#allocation78_spill] sm:$0xff] %v16866_v48  ;;  %14031 = vmatmul.mubr.bf16.gmra.mxu0 %v14671_v8  ;;  %v14672_v43 = vld [vmem:[#allocation2 + $0x114] ss:$12 sps:$4 sm:$0xff]   ;;  %v14676_v8 = vld [vmem:[#allocation2 + $0x14c] ss:$12 sps:$4 sm:$0xff]  }
 0x2af   : > { %v16861_v58 = vadd.f32 %v4434_v2, %v3938_v0  ;;  %5899 = vmatprep.mubr.bf16.mxu1 %v14669_v60  ;;  %14034 = vmatprep.mubr.bf16.mxu0 %v14673_v16  ;;  %v14674_v60 = vld [vmem:[#allocation2 + $0x130] ss:$12 sps:$4 sm:$0xff]   ;;  %v3738_v0 = vpop.f32.mrf.mxu0 }
 0x2b0   : > { %v4436_v3 = vpop.f32.mrf.mxu1  ;;  %9394 = vmatpush1.bf16.msra.mxu0 %v14743_v25  ;;  %14095 = vmatpush3.bf16.msra.mxu1 %v14742_v55  ;;  %v19726_v25 = vld [vmem:[#allocation37_spill] sm:$0xff] }
 0x2b1   : > { %9395 = vmatprep.subr.bf16.mxu0 %v19634_v31  ;;  %v19724_v3 = vld [vmem:[#allocation35_spill] sm:$0xff]  ;;  %v16873_v50 = vpop.f32.mrf.mxu0 }
 0x2b2   : > { %v4437_v38 = vpop.f32.mrf.mxu1  ;;  %v3946_v52 = vadd.f32 %v19724_v3, %v16679_v41  ;;  %19725 = vst [vmem:[#allocation80_spill] sm:$0xff] %v16873_v50  ;;  %v14747_v3 = vld [vmem:[#allocation8 + $0xc0] sm:$0xff]  }
 0x2b3   : > { %v16868_v2 = vadd.f32 %v4437_v38, %v3941_v36  ;;  %v14681_v36 = vld [vmem:[#allocation2 + $0x164] ss:$12 sps:$4 sm:$0xff]   ;;  %v3741_v38 = vpop.f32.mrf.mxu0 }
 0x2b4   : > { %v4439_v27 = vpop.f32.mrf.mxu1  ;;  %9396 = vmatpush1.bf16.msra.mxu0 %v14747_v3 }
 0x2b5   : > { %19723 = vst [vmem:[#allocation27_spill] sm:$0xff] %v16868_v2  ;;  %v3949_v27 = vadd.f32 %v19726_v25, %v16686_v39  ;;  %v16879_v0 = vpop.f32.mrf.mxu0  ;;  %v14677_v2 = vld [vmem:[#allocation2 + $0x12c] ss:$12 sps:$4 sm:$0xff]   ;;  %v14682_v39 = vld [vmem:[#allocation2 + $0x17c] ss:$12 sps:$4 sm:$0xff]   ;;  %9397 = vmatprep.subr.bf16.mxu0 %v19634_v31 }
 0x2b6   : > { %v4442_v6 = vpop.f32.mrf.mxu1  ;;  %5900 = vmatmul.mubr.bf16.gmra.mxu1 %v14672_v43  ;;  %19727 = vst [vmem:[#allocation29_spill] sm:$0xff] %v16879_v0  ;;  %14035 = vmatmul.mubr.bf16.gmra.mxu0 %v14676_v8  ;;  %v14678_v43 = vld [vmem:[#allocation2 + $0x148] ss:$12 sps:$4 sm:$0xff]  }
 0x2b7   : > { %v16875_v48 = vadd.f32 %v4442_v6, %v3946_v52  ;;  %5907 = vmatprep.mubr.bf16.mxu1 %v14674_v60  ;;  %14038 = vmatprep.mubr.bf16.mxu0 %v14681_v36  ;;  %v3746_v52 = vpop.f32.mrf.mxu0  ;;  %v19728_v60 = vld [vmem:[#allocation40_spill] sm:$0xff]  ;;  %v14689_v25 = vld [vmem:[#allocation2 + $0x194] ss:$12 sps:$4 sm:$0xff]  }
 0x2b8   : > { %v4444_v16 = vpop.f32.mrf.mxu1  ;;  %v3954_v6 = vadd.f32 %v19728_v60, %v16693_v57  ;;  %v14680_v57 = vld [vmem:[#allocation2 + $0x144] ss:$12 sps:$4 sm:$0xff]   ;;  %v14683_v60 = vld [vmem:[#allocation2 + $0x160] ss:$12 sps:$4 sm:$0xff]  }
 0x2b9   : > { %v16885_v38 = vpop.f32.mrf.mxu0 }
 0x2ba   : > { %v4445_v55 = vpop.f32.mrf.mxu1  ;;  %19729 = vst [vmem:[#allocation26_spill] sm:$0xff] %v16885_v38 }
 0x2bb   : > { %v16881_v41 = vadd.f32 %v4445_v55, %v3949_v27  ;;  %v3749_v36 = vpop.f32.mrf.mxu0 }
 0x2bc   : > { %v4447_v50 = vpop.f32.mrf.mxu1  ;;  %v14690_v36 = vld [vmem:[#allocation2 + $0x1ac] ss:$12 sps:$4 sm:$0xff]  }
 0x2bd   : > { %v19730_v50 = vld [vmem:[#allocation42_spill] sm:$0xff]  ;;  %v16892_v0 = vpop.f32.mrf.mxu0 }
 0x2be   : > { %v4450_v16 = vpop.f32.mrf.mxu1  ;;  %5908 = vmatmul.mubr.bf16.gmra.mxu1 %v14677_v2  ;;  %v3957_v55 = vadd.f32 %v19730_v50, %v16700_v62  ;;  %14039 = vmatmul.mubr.bf16.gmra.mxu0 %v14682_v39  ;;  %v14753_v2 = vld [vmem:[#allocation8 + $0x138] sm:$0xff]  }
 0x2bf   : > { %v16888_v8 = vadd.f32 %v4450_v16, %v3954_v6  ;;  %5915 = vmatprep.mubr.bf16.mxu1 %v14678_v43  ;;  %14042 = vmatprep.mubr.bf16.mxu0 %v14689_v25  ;;  %v3754_v6 = vpop.f32.mrf.mxu0  ;;  %v19732_v43 = vld [vmem:[#allocation39_spill] sm:$0xff] }
 0x2c0   : > { %v4452_v27 = vpop.f32.mrf.mxu1  ;;  %9398 = vmatpush2.bf16.msra.mxu0 %v14753_v2  ;;  %v3962_v16 = vadd.f32 %v19732_v43, %v16707_v54  ;;  %v14698_v39 = vld [vmem:[#allocation2 + $0x1c4] ss:$12 sps:$4 sm:$0xff]  }
 0x2c1   : > { %9399 = vmatprep.subr.bf16.mxu0 %v19634_v31  ;;  %v16899_v62 = vpop.f32.mrf.mxu0  ;;  %v14686_v43 = vld [vmem:[#allocation2 + $0x178] ss:$12 sps:$4 sm:$0xff]  }
 0x2c2   : > { %v4453_v52 = vpop.f32.mrf.mxu1  ;;  %19733 = vst [vmem:[#allocation31_spill] sm:$0xff] %v16899_v62 }
 0x2c3   : > { %v16894_v3 = vadd.f32 %v4453_v52, %v3957_v55  ;;  %v3757_v52 = vpop.f32.mrf.mxu0 }
 0x2c4   : > { %v4455_v38 = vpop.f32.mrf.mxu1 }
 0x2c5   : > { %19731 = vst [vmem:[#allocation28_spill] sm:$0xff] %v16894_v3  ;;  %v19734_v38 = vld [vmem:[#allocation41_spill] sm:$0xff]  ;;  %v13932_v6 = vpop.f32.mrf.mxu0  ;;  %v14685_v3 = vld [vmem:[#allocation2 + $0x15c] ss:$12 sps:$4 sm:$0xff]  }
 0x2c6   : > { %v4458_v27 = vpop.f32.mrf.mxu1  ;;  %5916 = vmatmul.mubr.bf16.gmra.mxu1 %v14680_v57  ;;  %v3965_v25 = vadd.f32 %v19734_v38, %v16714_v7  ;;  %14043 = vmatmul.mubr.bf16.gmra.mxu0 %v14690_v36  ;;  %v16908_v57 = vadd.f32 %v13932_v6, %v16641_v13  ;;  %v14699_v36 = vld [vmem:[#allocation2 + $0x1dc] ss:$12 sps:$4 sm:$0xff]  }
 0x2c7   : > { %v16901_v50 = vadd.f32 %v4458_v27, %v3962_v16  ;;  %5923 = vmatprep.mubr.bf16.mxu1 %v14683_v60  ;;  %14046 = vmatprep.mubr.bf16.mxu0 %v14698_v39  ;;  %v4611_v27 = vpop.f32.mrf.mxu0  ;;  %v14759_v60 = vld [vmem:[#allocation8 + $0x130] sm:$0xff]   ;;  %v14706_v39 = vld [vmem:[#allocation2 + $0x1f4] ss:$12 sps:$4 sm:$0xff]  }
 0x2c8   : > { %v4460_v55 = vpop.f32.mrf.mxu1  ;;  %v16913_v62 = vadd.f32 %v4611_v27, %v16630_v47  ;;  %9400 = vmatpush2.bf16.msra.mxu0 %v14759_v60  ;;  %v19737_v13 = vld [vmem:[#allocation82_spill] sm:$0xff]  ;;  %v19740_v27 = vld [vmem:[#allocation81_spill] sm:$0xff] }
 0x2c9   : > { %v19735_v55 = vld [vmem:[#allocation44_spill] sm:$0xff]  ;;  %v13933_v38 = vpop.f32.mrf.mxu0  ;;  %9401 = vmatprep.subr.bf16.mxu0 %v19634_v31  ;;  %v14688_v60 = vld [vmem:[#allocation2 + $0x174] ss:$12 sps:$4 sm:$0xff]  }
 0x2ca   : > { %v4461_v2 = vpop.f32.mrf.mxu1  ;;  %v3970_v52 = vadd.f32 %v19735_v55, %v16721_v61  ;;  %19736 = vst [vmem:[#allocation34_spill] sm:$0xff] %v16913_v62  ;;  %v19739_v61 = vld [vmem:[#allocation46_spill] sm:$0xff] }
 0x2cb   : > { %v16905_v54 = vadd.f32 %v4461_v2, %v3965_v25  ;;  %v16918_v2 = vadd.f32 %v13933_v38, %v19737_v13  ;;  %v3973_v47 = vadd.f32 %v19739_v61, %v16728_v29  ;;  %v19742_v29 = vld [vmem:[#allocation43_spill] sm:$0xff] }
 0x2cc   : > { %v4463_v16 = vpop.f32.mrf.mxu1  ;;  %v3978_v61 = vadd.f32 %v19742_v29, %v16735_v44  ;;  %v19744_v44 = vld [vmem:[#allocation45_spill] sm:$0xff] }
 0x2cd   : > { %19738 = vst [vmem:[#allocation30_spill] sm:$0xff] %v16918_v2  ;;  %v4614_v16 = vpop.f32.mrf.mxu0  ;;  %v14766_v2 = vld [vmem:[#allocation8 + $0x128] sm:$0xff]  }
 0x2ce   : > { %v4466_v7 = vpop.f32.mrf.mxu1  ;;  %5924 = vmatmul.mubr.bf16.gmra.mxu1 %v14685_v3  ;;  %v16924_v55 = vadd.f32 %v4614_v16, %v19740_v27  ;;  %14047 = vmatmul.mubr.bf16.gmra.mxu0 %v14699_v36  ;;  %v19743_v16 = vld [vmem:[#allocation83_spill] sm:$0xff] }
 0x2cf   : > { %v16915_v25 = vadd.f32 %v4466_v7, %v3970_v52  ;;  %5931 = vmatprep.mubr.bf16.mxu1 %v14686_v43  ;;  %v13936_v62 = vpop.f32.mrf.mxu0  ;;  %v14691_v43 = vld [vmem:[#allocation2 + $0x190] ss:$12 sps:$4 sm:$0xff]   ;;  %14050 = vmatprep.mubr.bf16.mxu0 %v14706_v39 }
 0x2d0   : > { %v4468_v6 = vpop.f32.mrf.mxu1  ;;  %19741 = vst [vmem:[#allocation33_spill] sm:$0xff] %v16924_v55  ;;  %v16929_v7 = vadd.f32 %v13936_v62, %v16663_v33  ;;  %v14716_v62 = vld [vmem:[#allocation2 + $0x224] ss:$12 sps:$4 sm:$0xff]   ;;  %9402 = vmatpush2.bf16.msra.mxu0 %v14766_v2  ;;  %v14694_v2 = vld [vmem:[#allocation2 + $0x1a8] ss:$12 sps:$4 sm:$0xff]  }
 0x2d1   : > { %v4627_v13 = vpop.f32.mrf.mxu0  ;;  %v14763_v6 = vld [vmem:[#allocation8 + $0x160] sm:$0xff]   ;;  %9403 = vmatprep.subr.bf16.mxu0 %v19634_v31 }
 0x2d2   : > { %v4469_v3 = vpop.f32.mrf.mxu1  ;;  %v16934_v27 = vadd.f32 %v4627_v13, %v19743_v16  ;;  %14096 = vmatprep.subr.bf16.mxu1 %v14763_v6  ;;  %v3981_v13 = vadd.f32 %v19744_v44, %v16742_v59  ;;  %v14717_v44 = vld [vmem:[#allocation2 + $0x23c] ss:$12 sps:$4 sm:$0xff]  }
 0x2d3   : > { %v16926_v52 = vadd.f32 %v4469_v3, %v3973_v47  ;;  %v13937_v36 = vpop.f32.mrf.mxu0  ;;  %v14708_v47 = vld [vmem:[#allocation2 + $0x20c] ss:$12 sps:$4 sm:$0xff]   ;;  %14097 = vmatpush3.bf16.msra.mxu1 %v14763_v6 }
 0x2d4   : > { %v4471_v38 = vpop.f32.mrf.mxu1  ;;  %v16939_v33 = vadd.f32 %v13937_v36, %v16668_v18  ;;  %v19745_v36 = vld [vmem:[#allocation48_spill] sm:$0xff] }
 0x2d5   : > { %v4630_v38 = vpop.f32.mrf.mxu0 }
 0x2d6   : > { %v4474_v55 = vpop.f32.mrf.mxu1  ;;  %5932 = vmatmul.mubr.bf16.gmra.mxu1 %v14688_v60  ;;  %v16945_v60 = vadd.f32 %v4630_v38, %v16658_v14  ;;  %14051 = vmatmul.mubr.bf16.gmra.mxu0 %v14708_v47 }
 0x2d7   : > { %v16936_v3 = vadd.f32 %v4474_v55, %v3978_v61  ;;  %5939 = vmatprep.mubr.bf16.mxu1 %v14691_v43  ;;  %v13940_v55 = vpop.f32.mrf.mxu0  ;;  %v14693_v61 = vld [vmem:[#allocation2 + $0x18c] ss:$12 sps:$4 sm:$0xff]   ;;  %14054 = vmatprep.mubr.bf16.mxu0 %v14716_v62 }
 0x2d8   : > { %v4476_v39 = vpop.f32.mrf.mxu1  ;;  %v16950_v43 = vadd.f32 %v13940_v55, %v16688_v37  ;;  %v14727_v37 = vld [vmem:[#allocation2 + $0x254] ss:$12 sps:$4 sm:$0xff]   ;;  %v19747_v55 = vld [vmem:[#allocation50_spill] sm:$0xff] }
 0x2d9   : > { %v4643_v16 = vpop.f32.mrf.mxu0  ;;  %v3986_v39 = vadd.f32 %v19745_v36, %v16749_v11 }
 0x2da   : > { %v4477_v29 = vpop.f32.mrf.mxu1  ;;  %v16955_v59 = vadd.f32 %v4643_v16, %v16674_v17 }
 0x2db   : > { %v16947_v18 = vadd.f32 %v4477_v29, %v3981_v13  ;;  %v13941_v38 = vpop.f32.mrf.mxu0 }
 0x2dc   : > { %v4479_v6 = vpop.f32.mrf.mxu1  ;;  %v16960_v13 = vadd.f32 %v13941_v38, %v16695_v63  ;;  %v14700_v63 = vld [vmem:[#allocation2 + $0x1c0] ss:$12 sps:$4 sm:$0xff]  }
 0x2dd   : > { %v4646_v29 = vpop.f32.mrf.mxu0  ;;  %v3989_v6 = vadd.f32 %v19747_v55, %v16756_v32  ;;  %v19750_v38 = vld [vmem:[#allocation47_spill] sm:$0xff]  ;;  %v14728_v55 = vld [vmem:[#allocation2 + $0x26c] ss:$12 sps:$4 sm:$0xff]  }
 0x2de   : > { %v4482_v14 = vpop.f32.mrf.mxu1  ;;  %5940 = vmatmul.mubr.bf16.gmra.mxu1 %v14693_v61  ;;  %19746 = vst [vmem:[#allocation36_spill] sm:$0xff] %v16960_v13  ;;  %v16965_v11 = vadd.f32 %v4646_v29, %v16681_v19  ;;  %v14696_v61 = vld [vmem:[#allocation2 + $0x1a4] ss:$12 sps:$4 sm:$0xff]   ;;  %14055 = vmatmul.mubr.bf16.gmra.mxu0 %v14717_v44 }
 0x2df   : > { %v16957_v47 = vadd.f32 %v4482_v14, %v3986_v39  ;;  %5947 = vmatprep.mubr.bf16.mxu1 %v14694_v2  ;;  %v13944_v16 = vpop.f32.mrf.mxu0  ;;  %14058 = vmatprep.mubr.bf16.mxu0 %v14727_v37 }
 0x2e0   : > { %v4484_v62 = vpop.f32.mrf.mxu1  ;;  %19748 = vst [vmem:[#allocation38_spill] sm:$0xff] %v16965_v11  ;;  %v16970_v39 = vadd.f32 %v13944_v16, %v16716_v56  ;;  %v14737_v56 = vld [vmem:[#allocation2 + $0x284] ss:$12 sps:$4 sm:$0xff]  }
 0x2e1   : > { %v4659_v14 = vpop.f32.mrf.mxu0  ;;  %v3994_v62 = vadd.f32 %v19750_v38, %v16763_v23  ;;  %v19753_v16 = vld [vmem:[#allocation49_spill] sm:$0xff] }
 0x2e2   : > { %v4485_v17 = vpop.f32.mrf.mxu1  ;;  %19749 = vst [vmem:[#allocation35_spill] sm:$0xff] %v16970_v39  ;;  %v16975_v32 = vadd.f32 %v4659_v14, %v16702_v21 }
 0x2e3   : > { %v16967_v36 = vadd.f32 %v4485_v17, %v3989_v6  ;;  %v13945_v29 = vpop.f32.mrf.mxu0 }
 0x2e4   : > { %v4487_v2 = vpop.f32.mrf.mxu1  ;;  %19751 = vst [vmem:[#allocation37_spill] sm:$0xff] %v16975_v32  ;;  %v16980_v6 = vadd.f32 %v13945_v29, %v16723_v49  ;;  %v14703_v49 = vld [vmem:[#allocation2 + $0x1d8] ss:$12 sps:$4 sm:$0xff]   ;;  %v19756_v29 = vld [vmem:[#allocation52_spill] sm:$0xff] }
 0x2e5   : > { %v4662_v17 = vpop.f32.mrf.mxu0  ;;  %v3997_v2 = vadd.f32 %v19753_v16, %v16770_v51 }
 0x2e6   : > { %v4490_v19 = vpop.f32.mrf.mxu1  ;;  %5948 = vmatmul.mubr.bf16.gmra.mxu1 %v14696_v61  ;;  %19752 = vst [vmem:[#allocation40_spill] sm:$0xff] %v16980_v6  ;;  %v16985_v23 = vadd.f32 %v4662_v17, %v16709_v4  ;;  %v14702_v61 = vld [vmem:[#allocation2 + $0x1bc] ss:$12 sps:$4 sm:$0xff]   ;;  %14059 = vmatmul.mubr.bf16.gmra.mxu0 %v14728_v55 }
 0x2e7   : > { %v16977_v44 = vadd.f32 %v4490_v19, %v3994_v62  ;;  %5955 = vmatprep.mubr.bf16.mxu1 %v14700_v63  ;;  %v13948_v14 = vpop.f32.mrf.mxu0  ;;  %14062 = vmatprep.mubr.bf16.mxu0 %v14737_v56  ;;  %v14773_v4 = vld [vmem:[#allocation8 + $0x120] sm:$0xff]   ;;  %v14748_v56 = vld [vmem:[#allocation2 + $0x2b4] ss:$12 sps:$4 sm:$0xff]  }
 0x2e8   : > { %v4492_v37 = vpop.f32.mrf.mxu1  ;;  %19754 = vst [vmem:[#allocation42_spill] sm:$0xff] %v16985_v23  ;;  %v16990_v62 = vadd.f32 %v13948_v14, %v16744_v5  ;;  %v14738_v55 = vld [vmem:[#allocation2 + $0x29c] ss:$12 sps:$4 sm:$0xff]   ;;  %9404 = vmatpush2.bf16.msra.mxu0 %v14773_v4 }
 0x2e9   : > { %v4675_v19 = vpop.f32.mrf.mxu0  ;;  %v4002_v37 = vadd.f32 %v19756_v29, %v16776_v42  ;;  %9405 = vmatprep.subr.bf16.mxu0 %v19634_v31  ;;  %v14705_v29 = vld [vmem:[#allocation2 + $0x1d4] ss:$12 sps:$4 sm:$0xff]  }
 0x2ea   : > { %v4493_v21 = vpop.f32.mrf.mxu1  ;;  %19755 = vst [vmem:[#allocation39_spill] sm:$0xff] %v16990_v62  ;;  %v16995_v51 = vadd.f32 %v4675_v19, %v16730_v30  ;;  %v19759_v30 = vld [vmem:[#allocation55_spill] sm:$0xff] }
 0x2eb   : > { %v16987_v38 = vadd.f32 %v4493_v21, %v3997_v2  ;;  %v13949_v16 = vpop.f32.mrf.mxu0  ;;  %v4005_v42 = vadd.f32 %v19759_v30, %v16782_v46  ;;  %v14749_v30 = vld [vmem:[#allocation2 + $0x2cc] ss:$12 sps:$4 sm:$0xff]  }
 0x2ec   : > { %v4495_v63 = vpop.f32.mrf.mxu1  ;;  %19757 = vst [vmem:[#allocation41_spill] sm:$0xff] %v16995_v51  ;;  %v17000_v5 = vadd.f32 %v13949_v16, %v16751_v22  ;;  %v19762_v16 = vld [vmem:[#allocation51_spill] sm:$0xff] }
 0x2ed   : > { %v4678_v14 = vpop.f32.mrf.mxu0 }
 0x2ee   : > { %v4498_v17 = vpop.f32.mrf.mxu1  ;;  %5956 = vmatmul.mubr.bf16.gmra.mxu1 %v14702_v61  ;;  %19758 = vst [vmem:[#allocation44_spill] sm:$0xff] %v17000_v5  ;;  %v17006_v63 = vadd.f32 %v4678_v14, %v16737_v40  ;;  %14063 = vmatmul.mubr.bf16.gmra.mxu0 %v14738_v55  ;;  %v15210_v5 = vld [vmem:[%s15671_s17 + $0x134] sm:$0xf] }
 0x2ef   : > { %v16997_v2 = vadd.f32 %v4498_v17, %v4002_v37  ;;  %5963 = vmatprep.mubr.bf16.mxu1 %v14703_v49  ;;  %v13952_v19 = vpop.f32.mrf.mxu0  ;;  %v14709_v49 = vld [vmem:[#allocation2 + $0x1f0] ss:$12 sps:$4 sm:$0xff]   ;;  %14066 = vmatprep.mubr.bf16.mxu0 %v14748_v56 }
 0x2f0   : > { %v4500_v21 = vpop.f32.mrf.mxu1  ;;  %19760 = vst [vmem:[#allocation82_spill] sm:$0xff] %v17006_v63  ;;  %v17011_v22 = vadd.f32 %v13952_v19, %v16772_v24  ;;  %v14757_v24 = vld [vmem:[#allocation2 + $0x2e4] ss:$12 sps:$4 sm:$0xff]  }
 0x2f1   : > { %v4691_v17 = vpop.f32.mrf.mxu0  ;;  %v4010_v21 = vadd.f32 %v19762_v16, %v16788_v15  ;;  %v19765_v19 = vld [vmem:[#allocation19_spill] sm:$0xff]  ;;  %v19767_v15 = vld [vmem:[#allocation56_spill] sm:$0xff] }
 0x2f2   : > { %v4501_v61 = vpop.f32.mrf.mxu1  ;;  %19761 = vst [vmem:[#allocation46_spill] sm:$0xff] %v17011_v22  ;;  %v17016_v46 = vadd.f32 %v4691_v17, %v16758_v53 }
 0x2f3   : > { %v17008_v37 = vadd.f32 %v4501_v61, %v4005_v42  ;;  %v13953_v14 = vpop.f32.mrf.mxu0 }
 0x2f4   : > { %v4503_v4 = vpop.f32.mrf.mxu1  ;;  %19763 = vst [vmem:[#allocation81_spill] sm:$0xff] %v17016_v46  ;;  %v17021_v42 = vadd.f32 %v13953_v14, %v16778_v26  ;;  %v14713_v26 = vld [vmem:[#allocation2 + $0x208] ss:$12 sps:$4 sm:$0xff]  }
 0x2f5   : > { %v4694_v61 = vpop.f32.mrf.mxu0  ;;  %v19766_v4 = vld [vmem:[#allocation53_spill] sm:$0xff] }
 0x2f6   : > { %v4506_v40 = vpop.f32.mrf.mxu1  ;;  %5964 = vmatmul.mubr.bf16.gmra.mxu1 %v14705_v29  ;;  %19764 = vst [vmem:[#allocation43_spill] sm:$0xff] %v17021_v42  ;;  %v4013_v22 = vadd.f32 %v19766_v4, %v19765_v19  ;;  %v17026_v16 = vadd.f32 %v4694_v61, %v19767_v15  ;;  %v14711_v29 = vld [vmem:[#allocation2 + $0x1ec] ss:$12 sps:$4 sm:$0xff]   ;;  %14067 = vmatmul.mubr.bf16.gmra.mxu0 %v14749_v30  ;;  %v19773_v4 = vld [vmem:[#allocation21_spill] sm:$0xff]  ;;  %v14758_v30 = vld [vmem:[#allocation2 + $0x2fc] ss:$12 sps:$4 sm:$0xff]  }
 0x2f7   : > { %v17018_v55 = vadd.f32 %v4506_v40, %v4010_v21  ;;  %5971 = vmatprep.mubr.bf16.mxu1 %v14709_v49  ;;  %v13956_v17 = vpop.f32.mrf.mxu0  ;;  %v19769_v21 = vld [vmem:[#allocation54_spill] sm:$0xff]  ;;  %14070 = vmatprep.mubr.bf16.mxu0 %v14757_v24  ;;  %v14768_v24 = vld [vmem:[#allocation2 + $0x314] ss:$12 sps:$4 sm:$0xff]  }
 0x2f8   : > { %v4508_v56 = vpop.f32.mrf.mxu1  ;;  %19768 = vst [vmem:[#allocation83_spill] sm:$0xff] %v17026_v16  ;;  %v17031_v40 = vadd.f32 %v13956_v17, %v19769_v21  ;;  %v19772_v42 = vld [vmem:[#allocation58_spill] sm:$0xff]  ;;  %v14777_v21 = vld [vmem:[#allocation8 + $0x118] sm:$0xff]  }
 0x2f9   : > { %v4707_v14 = vpop.f32.mrf.mxu0  ;;  %v19771_v56 = vld [vmem:[#allocation62_spill] sm:$0xff]  ;;  %9406 = vmatpush2.bf16.msra.mxu0 %v14777_v21 }
 0x2fa   : > { %v4509_v53 = vpop.f32.mrf.mxu1  ;;  %19770 = vst [vmem:[#allocation45_spill] sm:$0xff] %v17031_v40  ;;  %v4018_v19 = vadd.f32 %v19772_v42, %v19771_v56  ;;  %v17036_v61 = vadd.f32 %v4707_v14, %v19773_v4  ;;  %v2268_v42 = vshrl.u32 %v15210_v5, 16  ;;  %v19777_v14 = vld [vmem:[#allocation61_spill] sm:$0xff]  ;;  %9407 = vmatprep.subr.bf16.mxu0 %v19634_v31 }
 0x2fb   : > { %v17028_v46 = vadd.f32 %v4509_v53, %v4013_v22  ;;  %v13957_v16 = vpop.f32.mrf.mxu0  ;;  %v19775_v53 = vld [vmem:[#allocation20_spill] sm:$0xff]  ;;  %v4021_v56 = vadd.f32 %v19777_v14, %v16806_v10 }
 0x2fc   : > { %v4511_v49 = vpop.f32.mrf.mxu1  ;;  %19774 = vst [vmem:[#allocation48_spill] sm:$0xff] %v17036_v61  ;;  %v17041_v17 = vadd.f32 %v13957_v16, %v19775_v53  ;;  %v19781_v16 = vld [vmem:[#allocation57_spill] sm:$0xff]  ;;  %v14719_v61 = vld [vmem:[#allocation2 + $0x220] ss:$12 sps:$4 sm:$0xff]   ;;  %v2270_v6 = vrot.slane %v2268_v42, 4 }
 0x2fd   : > { %v4710_v40 = vpop.f32.mrf.mxu0 }
 0x2fe   : > { %v4514_v15 = vpop.f32.mrf.mxu1  ;;  %5972 = vmatmul.mubr.bf16.gmra.mxu1 %v14711_v29  ;;  %19776 = vst [vmem:[#allocation50_spill] sm:$0xff] %v17041_v17  ;;  %v19778_v29 = vld [vmem:[#allocation59_spill] sm:$0xff]  ;;  %14071 = vmatmul.mubr.bf16.gmra.mxu0 %v14758_v30  ;;  %v19783_v30 = vld [vmem:[#allocation66_spill] sm:$0xff] }
 0x2ff   : > { %v17038_v22 = vadd.f32 %v4514_v15, %v4018_v19  ;;  %5979 = vmatprep.mubr.bf16.mxu1 %v14713_v26  ;;  %v17047_v4 = vadd.f32 %v4710_v40, %v19778_v29  ;;  %v19780_v19 = vld [vmem:[#allocation23_spill] sm:$0xff]  ;;  %v13960_v53 = vpop.f32.mrf.mxu0  ;;  %14074 = vmatprep.mubr.bf16.mxu0 %v14768_v24  ;;  %v1498_v40 = vld [vmem:[%s15671_s17 + $0x13c] sm:$0xf] }
 0x300   : > { %v4516_v49 = vpop.f32.mrf.mxu1  ;;  %v4026_v15 = vadd.f32 %v19781_v16, %v19780_v19  ;;  %v14715_v17 = vld [vmem:[#allocation2 + $0x204] ss:$12 sps:$4 sm:$0xff]   ;;  %v17056_v10 = vadd.f32 %v13960_v53, %v16820_v34  ;;  %v1499_v29 = vld [vmem:[%s15671_s17 + $0x140] sm:$0xf]  ;;  %v2284_v16 = vshll.u32 %v1498_v40, 16  ;;  %v2288_v62 = vshrl.u32 %v1498_v40, 16 }
 0x301   : > { %19779 = vst [vmem:[#allocation47_spill] sm:$0xff] %v17047_v4  ;;  %v1497_v49 = vld [vmem:[%s15671_s17 + $0x138] sm:$0xf]  ;;  %v4723_v19 = vpop.f32.mrf.mxu0  ;;  %v2294_v63 = vshll.u32 %v1499_v29, 16  ;;  %v2298_v51 = vshrl.u32 %v1499_v29, 16 }
 0x302   : > { %v4517_v26 = vpop.f32.mrf.mxu1  ;;  %19782 = vst [vmem:[#allocation49_spill] sm:$0xff] %v17056_v10  ;;  %v2274_v14 = vshll.u32 %v1497_v49, 16  ;;  %v2278_v21 = vshrl.u32 %v1497_v49, 16  ;;  %v17061_v23 = vadd.f32 %v4723_v19, %v19783_v30  ;;  %v14769_v53 = vld [vmem:[#allocation2 + $0x32c] ss:$12 sps:$4 sm:$0xff]   ;;  %v2286_v10 = vrot.slane %v2284_v16, 5 }
 0x303   : > { %v17053_v5 = vadd.f32 %v4517_v26, %v4021_v56  ;;  %v13961_v24 = vpop.f32.mrf.mxu0  ;;  %v2290_v49 = vrot.slane %v2288_v62, 4  ;;  %v2296_v32 = vrot.slane %v2294_v63, 5  ;;  %v14778_v29 = vld [vmem:[#allocation2 + $0x344] ss:$12 sps:$4 sm:$0xff]   ;;  %v19786_v19 = vld [vmem:[#allocation18_spill] sm:$0xff]  ;;  %v19787_v62 = vld [vmem:[#allocation60_spill] sm:$0xff] }
 0x304   : > { %v4519_v4 = vpop.f32.mrf.mxu1  ;;  %19784 = vst [vmem:[#allocation52_spill] sm:$0xff] %v17061_v23  ;;  %v2276_v56 = vrot.slane %v2274_v14, 5  ;;  %v2280_v26 = vrot.slane %v2278_v21, 4  ;;  %v17066_v40 = vadd.f32 %v13961_v24, %v16826_v20  ;;  %v2271_v42 = vor.u32 %v2270_v6, %v19786_v19  ;;  %v1500_v30 = vld [vmem:[%s15671_s17 + $0x144] sm:$0x1]  ;;  %v19788_v63 = vld [vmem:[#allocation68_spill] sm:$0xff] }
 0x305   : > { %v2300_v4 = vrot.slane %v2298_v51, 4  ;;  %v4726_v23 = vpop.f32.mrf.mxu0  ;;  %v2291_v11 = vor.u32 %v2290_v49, %v2286_v10  ;;  %v2304_v16 = vshll.u32 %v1500_v30, 16  ;;  %v4029_v51 = vadd.f32 %v19787_v62, %v16818_v45 }
 0x306   : > { %v4522_v34 = vpop.f32.mrf.mxu1  ;;  %5980 = vmatmul.mubr.bf16.gmra.mxu1 %v14715_v17  ;;  %19785 = vst [vmem:[#allocation55_spill] sm:$0xff] %v17066_v40  ;;  %v2281_v14 = vor.u32 %v2280_v26, %v2276_v56  ;;  %v14783_v17 = vld [vmem:[#allocation8 + $0x110] sm:$0xff]   ;;  %v2272_v20 = vrot.slane %v2271_v42, 4  ;;  %14075 = vmatmul.mubr.bf16.gmra.mxu0 %v14769_v53  ;;  %v19790_v53 = vld [vmem:[#allocation25_spill] sm:$0xff] }
 0x307   : > { %v17063_v39 = vadd.f32 %v4522_v34, %v4026_v15  ;;  %5987 = vmatprep.mubr.bf16.mxu1 %v14719_v61  ;;  %v2301_v13 = vor.u32 %v2300_v4, %v2296_v32  ;;  %v17073_v15 = vadd.f32 %v4726_v23, %v19788_v63  ;;  %v13964_v24 = vpop.f32.mrf.mxu0  ;;  %v14722_v40 = vld [vmem:[#allocation2 + $0x21c] ss:$12 sps:$4 sm:$0xff]   ;;  %v2292_v6 = vrot.slane %v2291_v11, 4  ;;  %v14723_v4 = vld [vmem:[#allocation2 + $0x238] ss:$12 sps:$4 sm:$0xff]   ;;  %14078 = vmatprep.mubr.bf16.mxu0 %v14778_v29 }
 0x308   : > { %v4524_v21 = vpop.f32.mrf.mxu1  ;;  %v2282_v34 = vrot.slane %v2281_v14, 4  ;;  %v2306_v19 = vrot.slane %v2304_v16, 5  ;;  %v17078_v49 = vadd.f32 %v13964_v24, %v16847_v12  ;;  %9408 = vmatpush2.bf16.msra.mxu0 %v14783_v17  ;;  %v2277_v23 = vsel %vm15702_vm2, %v2272_v20, %v2276_v56  ;;  %v19791_v29 = vld [vmem:[#allocation64_spill] sm:$0xff] }
 0x309   : > { %v2302_v26 = vrot.slane %v2301_v13, 4  ;;  %v4739_v14 = vpop.f32.mrf.mxu0  ;;  %9409 = vmatprep.subr.bf16.mxu0 %v19634_v31  ;;  %2464 = vst [vmem:[#allocation2 + $0x3a4] sm:$0xf] %v2277_v23  ;;  %v2297_v13 = vsel %vm15702_vm2, %v2292_v6, %v2296_v32  ;;  %v4034_v30 = vadd.f32 %v19791_v29, %v19790_v53  ;;  %v14729_v23 = vld [vmem:[#allocation2 + $0x250] ss:$12 sps:$4 sm:$0xff]  }
 0x30a   : > { %v4525_v61 = vpop.f32.mrf.mxu1  ;;  %v2287_v11 = vsel %vm15702_vm2, %v2282_v34, %v2286_v10  ;;  %v17092_v17 = vadd.f32 %v4739_v14, %v16833_v35  ;;  %2466 = vst [vmem:[#allocation2 + $0x3bc] sm:$0xf] %v2297_v13  ;;  %v14779_v10 = vld [vmem:[#allocation2 + $0x35c] ss:$12 sps:$4 sm:$0xff]   ;;  %v19793_v35 = vld [vmem:[#allocation67_spill] sm:$0xff] }
 0x30b   : > { %v17075_v21 = vadd.f32 %v4525_v61, %v4029_v51  ;;  %v2307_v12 = vsel %vm15702_vm2, %v2302_v26, %v2306_v19  ;;  %2465 = vst [vmem:[#allocation2 + $0x3b0] sm:$0xf] %v2287_v11  ;;  %v13965_v16 = vpop.f32.mrf.mxu0  ;;  %v14784_v51 = vld [vmem:[#allocation2 + $0x374] ss:$12 sps:$4 sm:$0xff]   ;;  %v19792_v34 = vld [vmem:[#allocation72_spill] sm:$0xff] }
 0x30c   : > { %v4527_v42 = vpop.f32.mrf.mxu1  ;;  %2467 = vst [vmem:[#allocation2 + $0x3c8] sm:$0xf] %v2307_v12  ;;  %v17097_v32 = vadd.f32 %v13965_v16, %v16854_v9  ;;  %v4037_v61 = vadd.f32 %v19793_v35, %v19792_v34  ;;  %v14725_v26 = vld [vmem:[#allocation2 + $0x234] ss:$12 sps:$4 sm:$0xff]   ;;  %v14787_v53 = vld [vmem:[#allocation2 + $0x38c] ss:$12 sps:$4 sm:$0xff]  }
 0x30d   : > { %v17099_v20 = vpop.f32.mrf.mxu0  ;;  %v19794_v42 = vld [vmem:[#allocation63_spill] sm:$0xff]  ;;  %v14731_v35 = vld [vmem:[#allocation2 + $0x24c] ss:$12 sps:$4 sm:$0xff]  }
 0x30e   : > { %v4530_v56 = vpop.f32.mrf.mxu1  ;;  %5988 = vmatmul.mubr.bf16.gmra.mxu1 %v14722_v40  ;;  %14079 = vmatmul.mubr.bf16.gmra.mxu0 %v14779_v10  ;;  %v4042_v14 = vadd.f32 %v19794_v42, %v16838_v1  ;;  %v19795_v10 = vld [vmem:[#allocation74_spill] sm:$0xff]  ;;  %v19796_v1 = vld [vmem:[#allocation65_spill] sm:$0xff] }
 0x30f   : > { %v17094_v62 = vadd.f32 %v4530_v56, %v4034_v30  ;;  %5995 = vmatprep.mubr.bf16.mxu1 %v14723_v4  ;;  %v13968_v6 = vpop.f32.mrf.mxu0  ;;  %14082 = vmatprep.mubr.bf16.mxu0 %v14784_v51  ;;  %v14790_v51 = vld [vmem:[#allocation8 + $0x108] sm:$0xff]   ;;  %v19799_v42 = vld [vmem:[#allocation70_spill] sm:$0xff] }
 0x310   : > { %v4532_v63 = vpop.f32.mrf.mxu1  ;;  %v17106_v19 = vadd.f32 %v13968_v6, %v16875_v48  ;;  %9410 = vmatpush2.bf16.msra.mxu0 %v14790_v51 }
 0x311   : > { %v4755_v4 = vpop.f32.mrf.mxu0  ;;  %9411 = vmatprep.subr.bf16.mxu0 %v19634_v31 }
 0x312   : > { %v4533_v24 = vpop.f32.mrf.mxu1  ;;  %v17111_v11 = vadd.f32 %v4755_v4, %v16861_v58  ;;  %v14791_v48 = vld [vmem:[#allocation2 + $0x3a4] ss:$12 sps:$4 sm:$0xff]   ;;  %v4045_v58 = vadd.f32 %v19796_v1, %v19795_v10  ;;  %v19798_v4 = vld [vmem:[#allocation24_spill] sm:$0xff] }
 0x313   : > { %v17103_v40 = vadd.f32 %v4533_v24, %v4037_v61  ;;  %v13969_v12 = vpop.f32.mrf.mxu0  ;;  %v14733_v24 = vld [vmem:[#allocation2 + $0x268] ss:$12 sps:$4 sm:$0xff]  }
 0x314   : > { %v4535_v9 = vpop.f32.mrf.mxu1  ;;  %v17116_v30 = vadd.f32 %v13969_v12, %v16881_v41  ;;  %v14794_v10 = vld [vmem:[#allocation2 + $0x3bc] ss:$12 sps:$4 sm:$0xff]  }
 0x315   : > { %v17118_v16 = vpop.f32.mrf.mxu0  ;;  %v530_v9 = vld [vmem:[%s15671_s17 + $0x138] sm:$0xf] }
 0x316   : > { %v4538_v13 = vpop.f32.mrf.mxu1  ;;  %5996 = vmatmul.mubr.bf16.gmra.mxu1 %v14725_v26  ;;  %14083 = vmatmul.mubr.bf16.gmra.mxu0 %v14787_v53  ;;  %v1235_v53 = vshrl.u32 %v530_v9, 16 }
 0x317   : > { %v17113_v29 = vadd.f32 %v4538_v13, %v4042_v14  ;;  %6003 = vmatprep.mubr.bf16.mxu1 %v14729_v23  ;;  %v13972_v34 = vpop.f32.mrf.mxu0  ;;  %14086 = vmatprep.mubr.bf16.mxu0 %v14791_v48  ;;  %v529_v23 = vld [vmem:[%s15671_s17 + $0x134] sm:$0xf]  ;;  %v4050_v14 = vadd.f32 %v19799_v42, %v19798_v4 }
 0x318   : > { %v4540_v56 = vpop.f32.mrf.mxu1  ;;  %v17125_v41 = vadd.f32 %v13972_v34, %v16901_v50  ;;  %v1226_v12 = vshrl.u32 %v529_v23, 16  ;;  %v19802_v4 = vld [vmem:[#allocation73_spill] sm:$0xff]  ;;  %v19803_v42 = vld [vmem:[#allocation32_spill] sm:$0xff] }
 0x319   : > { %v4771_v26 = vpop.f32.mrf.mxu0 }
 0x31a   : > { %v4541_v63 = vpop.f32.mrf.mxu1  ;;  %19797 = vst [vmem:[#allocation51_spill] sm:$0xff] %v17125_v41  ;;  %v17133_v13 = vadd.f32 %v4771_v26, %v16888_v8  ;;  %v1228_v51 = vrot.slane %v1226_v12, 7  ;;  %v1237_v8 = vrot.slane %v1235_v53, 7  ;;  %v1238_v26 = vshll.u32 %v530_v9, 16 }
 0x31b   : > { %v17122_v61 = vadd.f32 %v4541_v63, %v4045_v58  ;;  %v13973_v50 = vpop.f32.mrf.mxu0  ;;  %v14796_v58 = vld [vmem:[#allocation8 + $0x100] sm:$0xff]   ;;  %v1229_v63 = vshll.u32 %v529_v23, 16 }
 0x31c   : > { %v4543_v6 = vpop.f32.mrf.mxu1  ;;  %19800 = vst [vmem:[#allocation19_spill] sm:$0xff] %v17133_v13  ;;  %v17138_v48 = vadd.f32 %v13973_v50, %v16905_v54  ;;  %9412 = vmatpush2.bf16.msra.mxu0 %v14796_v58  ;;  %v1233_v54 = vrot.slane %v1228_v51, 4  ;;  %v14739_v23 = vld [vmem:[#allocation2 + $0x280] ss:$12 sps:$4 sm:$0xff]   ;;  %v1240_v12 = vor.u32 %v1238_v26, %v1237_v8  ;;  %v366_v58 = vld [vmem:[%s15671_s17 + $0x138] sm:$0xf] }
 0x31d   : > { %v17140_v6 = vpop.f32.mrf.mxu0  ;;  %448 = vst [vmem:[#allocation2 + $0x3ac] sm:$0xf] %v366_v58  ;;  %v532_v26 = vld [vmem:[%s15671_s17 + $0x140] sm:$0xf] }
 0x31e   : > { %v4546_v56 = vpop.f32.mrf.mxu1  ;;  %6004 = vmatmul.mubr.bf16.gmra.mxu1 %v14731_v35  ;;  %19801 = vst [vmem:[#allocation53_spill] sm:$0xff] %v17138_v48  ;;  %v4053_v35 = vadd.f32 %v19802_v4, %v16859_v28  ;;  %v14735_v48 = vld [vmem:[#allocation2 + $0x264] ss:$12 sps:$4 sm:$0xff]   ;;  %14087 = vmatmul.mubr.bf16.gmra.mxu0 %v14794_v10  ;;  %v365_v28 = vld [vmem:[%s15671_s17 + $0x134] sm:$0xf]  ;;  %v1241_v41 = vsel %vm15777_vm5, %v1233_v54, %v1240_v12 }
 0x31f   : > { %v17135_v1 = vadd.f32 %v4546_v56, %v4050_v14  ;;  %6011 = vmatprep.mubr.bf16.mxu1 %v14733_v24  ;;  %v1224_v14 = vrot.slane %v19803_v42, 4  ;;  %v1231_v56 = vor.u32 %v1229_v63, %v1228_v51  ;;  %v13976_v24 = vpop.f32.mrf.mxu0  ;;  %447 = vst [vmem:[#allocation2 + $0x3a0] sm:$0xf] %v365_v28  ;;  %v531_v10 = vld [vmem:[%s15671_s17 + $0x13c] sm:$0xf]  ;;  %v15211_v4 = vld [vmem:[#allocation8 + $0x238] sm:$0xff]  }
 0x320   : > { %v4548_v34 = vpop.f32.mrf.mxu1  ;;  %v17148_v9 = vadd.f32 %v13976_v24, %v16936_v3  ;;  %1417 = vst [vmem:[#allocation2 + $0x3a8] sm:$0xf] %v1241_v41 }
 0x321   : > { %v14789_v34 = vld [vmem:[#allocation8 + $0x158] sm:$0xff]   ;;  %v1232_v63 = vsel %vm15777_vm5, %v1224_v14, %v1231_v56  ;;  %v4787_v42 = vpop.f32.mrf.mxu0  ;;  %v1253_v14 = vshrl.u32 %v532_v26, 16 }
 0x322   : > { %v4549_v50 = vpop.f32.mrf.mxu1  ;;  %19804 = vst [vmem:[#allocation56_spill] sm:$0xff] %v17148_v9  ;;  %1416 = vst [vmem:[#allocation2 + $0x39c] sm:$0xf] %v1232_v63  ;;  %v17161_v24 = vadd.f32 %v4787_v42, %v16915_v25  ;;  %14098 = vmatprep.subr.bf16.mxu1 %v14789_v34  ;;  %v1244_v9 = vshrl.u32 %v531_v10, 16  ;;  %v1247_v63 = vshll.u32 %v531_v10, 16  ;;  %v1256_v42 = vshll.u32 %v532_v26, 16 }
 0x323   : > { %v17145_v53 = vadd.f32 %v4549_v50, %v4053_v35  ;;  %v19806_v35 = vld [vmem:[#allocation78_spill] sm:$0xff]  ;;  %v19807_v50 = vld [vmem:[#allocation69_spill] sm:$0xff]  ;;  %v13977_v28 = vpop.f32.mrf.mxu0  ;;  %14099 = vmatpush3.bf16.msra.mxu1 %v14789_v34  ;;  %v1255_v41 = vrot.slane %v1253_v14, 7 }
 0x324   : > { %v4551_v51 = vpop.f32.mrf.mxu1  ;;  %v4058_v3 = vadd.f32 %v19807_v50, %v19806_v35  ;;  %19808 = vst [vmem:[#allocation54_spill] sm:$0xff] %v17161_v24  ;;  %v17166_v54 = vadd.f32 %v13977_v28, %v16947_v18  ;;  %v1246_v12 = vrot.slane %v1244_v9, 7  ;;  %v19810_v35 = vld [vmem:[#allocation80_spill] sm:$0xff]  ;;  %v19811_v50 = vld [vmem:[#allocation71_spill] sm:$0xff]  ;;  %v1242_v24 = vrot.slane %v1237_v8, 4 }
 0x325   : > { %v17168_v25 = vpop.f32.mrf.mxu0  ;;  %v14741_v28 = vld [vmem:[#allocation2 + $0x27c] ss:$12 sps:$4 sm:$0xff]   ;;  %v1258_v34 = vor.u32 %v1256_v42, %v1255_v41 }
 0x326   : > { %v4554_v56 = vpop.f32.mrf.mxu1  ;;  %6012 = vmatmul.mubr.bf16.gmra.mxu1 %v14735_v48  ;;  %19809 = vst [vmem:[#allocation62_spill] sm:$0xff] %v17166_v54  ;;  %v4061_v48 = vadd.f32 %v19811_v50, %v19810_v35  ;;  %v368_v54 = vld [vmem:[%s15671_s17 + $0x140] sm:$0xf] }
 0x327   : > { %v17163_v58 = vadd.f32 %v4554_v56, %v4058_v3  ;;  %6019 = vmatprep.mubr.bf16.mxu1 %v14739_v23  ;;  %v1249_v3 = vor.u32 %v1247_v63, %v1246_v12  ;;  %v1251_v56 = vrot.slane %v1246_v12, 4  ;;  %v13980_v18 = vpop.f32.mrf.mxu0  ;;  %v14744_v23 = vld [vmem:[#allocation2 + $0x298] ss:$12 sps:$4 sm:$0xff]   ;;  %450 = vst [vmem:[#allocation2 + $0x3c4] sm:$0xf] %v368_v54  ;;  %v19812_v12 = vld [vmem:[#allocation29_spill] sm:$0xff] }
 0x328   : > { %v4556_v51 = vpop.f32.mrf.mxu1  ;;  %v17175_v10 = vadd.f32 %v13980_v18, %v16977_v44  ;;  %v19813_v63 = vld [vmem:[#allocation76_spill] sm:$0xff]  ;;  %v19816_v18 = vld [vmem:[#allocation79_spill] sm:$0xff] }
 0x329   : > { %v367_v51 = vld [vmem:[%s15671_s17 + $0x13c] sm:$0xf]  ;;  %v1250_v26 = vsel %vm15777_vm5, %v1242_v24, %v1249_v3  ;;  %v4803_v35 = vpop.f32.mrf.mxu0  ;;  %v1259_v8 = vsel %vm15777_vm5, %v1251_v56, %v1258_v34 }
 0x32a   : > { %v4557_v13 = vpop.f32.mrf.mxu1  ;;  %449 = vst [vmem:[#allocation2 + $0x3b8] sm:$0xf] %v367_v51  ;;  %1418 = vst [vmem:[#allocation2 + $0x3b4] sm:$0xf] %v1250_v26  ;;  %v17186_v41 = vadd.f32 %v4803_v35, %v16957_v47  ;;  %v14810_v3 = vld [vmem:[#allocation8 + $0x150] sm:$0xff]  }
 0x32b   : > { %v17172_v9 = vadd.f32 %v4557_v13, %v4061_v48  ;;  %v4066_v13 = vadd.f32 %v19813_v63, %v19812_v12  ;;  %1419 = vst [vmem:[#allocation2 + $0x3c0] sm:$0xf] %v1259_v8  ;;  %v13981_v42 = vpop.f32.mrf.mxu0  ;;  %v19815_v56 = vld [vmem:[#allocation26_spill] sm:$0xff]  ;;  %v14746_v26 = vld [vmem:[#allocation2 + $0x294] ss:$12 sps:$4 sm:$0xff]   ;;  %14100 = vmatprep.subr.bf16.mxu1 %v14810_v3 }
 0x32c   : > { %v4559_v14 = vpop.f32.mrf.mxu1  ;;  %v17191_v24 = vadd.f32 %v13981_v42, %v16987_v38  ;;  %v4069_v34 = vadd.f32 %v19816_v18, %v19815_v56  ;;  %v14750_v35 = vld [vmem:[#allocation2 + $0x2b0] ss:$12 sps:$4 sm:$0xff]   ;;  %14101 = vmatpush3.bf16.msra.mxu1 %v14810_v3  ;;  %v19819_v8 = vld [vmem:[#allocation75_spill] sm:$0xff] }
 0x32d   : > { %v17193_v48 = vpop.f32.mrf.mxu0  ;;  %v4074_v12 = vadd.f32 %v19819_v8, %v16892_v0  ;;  %v19822_v18 = vld [vmem:[#allocation31_spill] sm:$0xff]  ;;  %v19823_v0 = vld [vmem:[#allocation77_spill] sm:$0xff] }
 0x32e   : > { %v4562_v44 = vpop.f32.mrf.mxu1  ;;  %6020 = vmatmul.mubr.bf16.gmra.mxu1 %v14741_v28  ;;  %19814 = vst [vmem:[#allocation58_spill] sm:$0xff] %v17191_v24 }
 0x32f   : > { %v17188_v50 = vadd.f32 %v4562_v44, %v4066_v13  ;;  %6027 = vmatprep.mubr.bf16.mxu1 %v14744_v23  ;;  %v13984_v47 = vpop.f32.mrf.mxu0  ;;  %v14817_v13 = vld [vmem:[#allocation8 + $0x148] sm:$0xff]  }
 0x330   : > { %v4564_v54 = vpop.f32.mrf.mxu1  ;;  %v17200_v28 = vadd.f32 %v13984_v47, %v17018_v55  ;;  %14102 = vmatprep.subr.bf16.mxu1 %v14817_v13  ;;  %v14752_v47 = vld [vmem:[#allocation2 + $0x2ac] ss:$12 sps:$4 sm:$0xff]  }
 0x331   : > { %v4819_v23 = vpop.f32.mrf.mxu0  ;;  %14103 = vmatpush3.bf16.msra.mxu1 %v14817_v13 }
 0x332   : > { %v4565_v51 = vpop.f32.mrf.mxu1  ;;  %19818 = vst [vmem:[#allocation20_spill] sm:$0xff] %v17200_v28  ;;  %v17205_v63 = vadd.f32 %v4819_v23, %v16997_v2  ;;  %v14754_v23 = vld [vmem:[#allocation2 + $0x2c8] ss:$12 sps:$4 sm:$0xff]  }
 0x333   : > { %v17197_v14 = vadd.f32 %v4565_v51, %v4069_v34  ;;  %v13985_v42 = vpop.f32.mrf.mxu0  ;;  %v4077_v34 = vadd.f32 %v19823_v0, %v19822_v18 }
 0x334   : > { %v4567_v38 = vpop.f32.mrf.mxu1  ;;  %19820 = vst [vmem:[#allocation61_spill] sm:$0xff] %v17205_v63  ;;  %v17210_v56 = vadd.f32 %v13985_v42, %v17028_v46 }
 0x335   : > { %19817 = vst [vmem:[#allocation21_spill] sm:$0xff] %v17197_v14  ;;  %v17212_v3 = vpop.f32.mrf.mxu0 }
 0x336   : > { %v4570_v44 = vpop.f32.mrf.mxu1  ;;  %6028 = vmatmul.mubr.bf16.gmra.mxu1 %v14746_v26  ;;  %19821 = vst [vmem:[#allocation59_spill] sm:$0xff] %v17210_v56 }
 0x337   : > { %v17207_v54 = vadd.f32 %v4570_v44, %v4074_v12  ;;  %6035 = vmatprep.mubr.bf16.mxu1 %v14750_v35  ;;  %v13988_v51 = vpop.f32.mrf.mxu0  ;;  %v14819_v12 = vld [vmem:[#allocation8 + $0x140] sm:$0xff]   ;;  %v17222_v44 = vld [vmem:[#allocation8 + $0xb8] sm:$0xff]  }
 0x338   : > { %v4572_v55 = vpop.f32.mrf.mxu1  ;;  %v17217_v26 = vadd.f32 %v13988_v51, %v17063_v39  ;;  %14104 = vmatprep.subr.bf16.mxu1 %v14819_v12  ;;  %14170 = vmatprep.subr.bf16.mxu0 %v17222_v44  ;;  %v14760_v51 = vld [vmem:[#allocation2 + $0x2e0] ss:$12 sps:$4 sm:$0xff]  }
 0x339   : > { %v4835_v46 = vpop.f32.mrf.mxu0  ;;  %14105 = vmatpush3.bf16.msra.mxu1 %v14819_v12 }
 0x33a   : > { %v4573_v2 = vpop.f32.mrf.mxu1  ;;  %19824 = vst [vmem:[#allocation23_spill] sm:$0xff] %v17217_v26  ;;  %v17220_v35 = vadd.f32 %v4835_v46, %v17038_v22  ;;  %10135 = vmatprep.subr.bf16.mxu1 %v19634_v31 }
 0x33b   : > { %v4574_v38 = vadd.f32 %v4573_v2, %v4077_v34  ;;  %v13989_v42 = vpop.f32.mrf.mxu0  ;;  %v14756_v34 = vld [vmem:[#allocation2 + $0x2c4] ss:$12 sps:$4 sm:$0xff]  }
 0x33c   : > { %v4575_v8 = vpop.f32.mrf.mxu1  ;;  %19825 = vst [vmem:[#allocation57_spill] sm:$0xff] %v17220_v35  ;;  %v17227_v55 = vadd.f32 %v13989_v42, %v17075_v21 }
 0x33d   : > { %v17230_v18 = vpop.f32.mrf.mxu0 }
 0x33e   : > { %v17224_v13 = vpop.f32.mrf.mxu1  ;;  %6036 = vmatmul.mubr.bf16.gmra.mxu1 %v14752_v47  ;;  %19826 = vst [vmem:[#allocation66_spill] sm:$0xff] %v17227_v55 }
 0x33f   : > { %6043 = vmatprep.mubr.bf16.mxu1 %v14754_v23  ;;  %v13992_v0 = vpop.f32.mrf.mxu0 }
 0x340   : > { %v5847_v39 = vpop.f32.mrf.mxu1  ;;  %v17236_v2 = vadd.f32 %v13992_v0, %v17113_v29  ;;  %v14762_v29 = vld [vmem:[#allocation2 + $0x2dc] ss:$12 sps:$4 sm:$0xff]  }
 0x341   : > { %v4851_v21 = vpop.f32.mrf.mxu0 }
 0x342   : > { %v17233_v22 = vpop.f32.mrf.mxu1  ;;  %19827 = vst [vmem:[#allocation18_spill] sm:$0xff] %v17236_v2  ;;  %v17239_v23 = vadd.f32 %v4851_v21, %v17094_v62 }
 0x343   : > { %v13993_v46 = vpop.f32.mrf.mxu0 }
 0x344   : > { %v5850_v47 = vpop.f32.mrf.mxu1  ;;  %19828 = vst [vmem:[#allocation60_spill] sm:$0xff] %v17239_v23  ;;  %v17242_v12 = vadd.f32 %v13993_v46, %v17122_v61  ;;  %v6525_v46 = vlaneseq }
 0x345   : > { %v17244_v39 = vpop.f32.mrf.mxu0  ;;  %v14764_v47 = vld [vmem:[#allocation2 + $0x2f8] ss:$12 sps:$4 sm:$0xff]  }
 0x346   : > { %v5853_v8 = vpop.f32.mrf.mxu1  ;;  %6044 = vmatmul.mubr.bf16.gmra.mxu1 %v14756_v34  ;;  %19829 = vst [vmem:[#allocation68_spill] sm:$0xff] %v17242_v12 }
 0x347   : > { %6051 = vmatprep.mubr.bf16.mxu1 %v14760_v51  ;;  %v13996_v55 = vpop.f32.mrf.mxu0 }
 0x348   : > { %v5855_v42 = vpop.f32.mrf.mxu1  ;;  %v17247_v0 = vadd.f32 %v13996_v55, %v17163_v58 }
 0x349   : > { %v4867_v62 = vpop.f32.mrf.mxu0 }
 0x34a   : > { %v5856_v14 = vpop.f32.mrf.mxu1  ;;  %19830 = vst [vmem:[#allocation16_spill] sm:$0xff] %v17247_v0  ;;  %v17250_v21 = vadd.f32 %v4867_v62, %v17135_v1  ;;  %v14770_v1 = vld [vmem:[#allocation2 + $0x310] ss:$12 sps:$4 sm:$0xff]   ;;  %v17264_v62 = vshrl.u32 %v6525_v46, 7 }
 0x34b   : > { %v13997_v61 = vpop.f32.mrf.mxu0 }
 0x34c   : > { %v5858_v2 = vpop.f32.mrf.mxu1  ;;  %19831 = vst [vmem:[#allocation25_spill] sm:$0xff] %v17250_v21  ;;  %v17255_v51 = vadd.f32 %v13997_v61, %v17172_v9  ;;  %19834 = vst [vmem:[#allocation67_spill] sm:$0xff] %v17264_v62 }
 0x34d   : > { %v17257_v12 = vpop.f32.mrf.mxu0  ;;  %v14767_v2 = vld [vmem:[#allocation2 + $0x2f4] ss:$12 sps:$4 sm:$0xff]  }
 0x34e   : > { %v17252_v34 = vpop.f32.mrf.mxu1  ;;  %6052 = vmatmul.mubr.bf16.gmra.mxu1 %v14762_v29  ;;  %19832 = vst [vmem:[#allocation64_spill] sm:$0xff] %v17255_v51  ;;  %v6527_v51 = vsub.s32 0, %v17264_v62 }
 0x34f   : > { %6059 = vmatprep.mubr.bf16.mxu1 %v14764_v47  ;;  %v14000_v55 = vpop.f32.mrf.mxu0 }
 0x350   : > { %v5863_v42 = vpop.f32.mrf.mxu1  ;;  %v17262_v0 = vadd.f32 %v14000_v55, %v17207_v54  ;;  %v2468_v54 = vld [vmem:[%s19576_s3] sm:$0x3] }
 0x351   : > { %v4883_v21 = vpop.f32.mrf.mxu0 }
 0x352   : > { %v17259_v58 = vpop.f32.mrf.mxu1  ;;  %19833 = vst [vmem:[#allocation72_spill] sm:$0xff] %v17262_v0  ;;  %v17267_v9 = vadd.f32 %v4883_v21, %v17188_v50  ;;  %v14772_v50 = vld [vmem:[#allocation2 + $0x30c] ss:$12 sps:$4 sm:$0xff]  }
 0x353   : > { %v14001_v61 = vpop.f32.mrf.mxu0 }
 0x354   : > { %v5866_v29 = vpop.f32.mrf.mxu1  ;;  %19835 = vst [vmem:[#allocation63_spill] sm:$0xff] %v17267_v9  ;;  %v17269_v42 = vadd.f32 %v14001_v61, %v4574_v38  ;;  %v19838_v9 = vld [vmem:[#allocation34_spill] sm:$0xff] }
 0x355   : > { %v17272_v26 = vpop.f32.mrf.mxu0  ;;  %v17279_v29 = vrot.slane %v2468_v54, %v6527_v51 }
 0x356   : > { %v5869_v47 = vpop.f32.mrf.mxu1  ;;  %6060 = vmatmul.mubr.bf16.gmra.mxu1 %v14767_v2  ;;  %19836 = vst [vmem:[#allocation74_spill] sm:$0xff] %v17269_v42  ;;  %19837 = vst [vmem:[#allocation65_spill] sm:$0xff] %v17272_v26  ;;  %v14774_v2 = vld [vmem:[#allocation2 + $0x328] ss:$12 sps:$4 sm:$0xff]  }
 0x357   : > { %6067 = vmatprep.mubr.bf16.mxu1 %v14770_v1  ;;  %v14020_v55 = vpop.f32.mrf.mxu0 }
 0x358   : > { %v5871_v23 = vpop.f32.mrf.mxu1  ;;  %v6175_v21 = vadd.f32 %v14020_v55, %v5853_v8  ;;  %v6675_v8 = vld [vmem:[#allocation9 + $0x10] sm:$0xff] }
 0x359   : > { %v6166_v61 = vpop.f32.mrf.mxu0 }
 0x35a   : > { %v17277_v46 = vpop.f32.mrf.mxu1  ;;  %v6455_v1 = vadd.f32 %v6175_v21, %v16908_v57  ;;  %v6167_v23 = vadd.f32 %v6166_v61, %v17224_v13  ;;  %v19839_v13 = vld [vmem:[#allocation30_spill] sm:$0xff] }
 0x35b   : > { %v14021_v42 = vpop.f32.mrf.mxu0 }
 0x35c   : > { %v5874_v38 = vpop.f32.mrf.mxu1  ;;  %v6531_v0 = vadd.f32 %v17279_v29, %v6455_v1  ;;  %v6453_v26 = vadd.f32 %v6167_v23, %v19838_v9  ;;  %v6178_v35 = vadd.f32 %v14021_v42, %v5856_v14  ;;  %v19841_v14 = vld [vmem:[#allocation27_spill] sm:$0xff]  ;;  %v19842_v42 = vld [vmem:[#allocation28_spill] sm:$0xff] }
 0x35d   : > { %v6169_v54 = vpop.f32.mrf.mxu0  ;;  %v19840_v38 = vld [vmem:[#allocation22_spill] sm:$0xff]  ;;  %v17296_v9 = vadd.f32 %v17118_v16, %v19841_v14  ;;  %v14776_v1 = vld [vmem:[#allocation2 + $0x324] ss:$12 sps:$4 sm:$0xff]  }
 0x35e   : > { %v17283_v62 = vpop.f32.mrf.mxu1  ;;  %6068 = vmatmul.mubr.bf16.gmra.mxu1 %v14772_v50  ;;  %v6603_v55 = vmax.f32 %v6531_v0, 0.0  ;;  %v6529_v57 = vadd.f32 %v17279_v29, %v6453_v26  ;;  %v6456_v21 = vadd.f32 %v6178_v35, %v19839_v13  ;;  %v6170_v50 = vadd.f32 %v6169_v54, %v17233_v22  ;;  %v6673_v0 = vld [vmem:[#allocation9] sm:$0xff]  ;;  %v19843_v54 = vld [vmem:[#allocation33_spill] sm:$0xff] }
 0x35f   : > { %6075 = vmatprep.mubr.bf16.mxu1 %v14774_v2  ;;  %v17292_v61 = vadd.f32 %v17099_v20, %v19840_v38  ;;  %v17300_v2 = vadd.f32 %v17140_v6, %v19842_v42  ;;  %v17304_v26 = vadd.f32 %v17168_v25, %v16926_v52  ;;  %v14024_v22 = vpop.f32.mrf.mxu0  ;;  %v14780_v13 = vld [vmem:[#allocation2 + $0x340] ss:$12 sps:$4 sm:$0xff]   ;;  %v17312_v6 = vadd.f32 %v17193_v48, %v16967_v36 }
 0x360   : > { %v5879_v51 = vpop.f32.mrf.mxu1  ;;  %v6747_v23 = vmul.f32 %v6675_v8, %v6603_v55  ;;  %v6601_v20 = vmax.f32 %v6529_v57, 0.0  ;;  %v6454_v16 = vadd.f32 %v6170_v50, %v19843_v54  ;;  %v17316_v52 = vadd.f32 %v17212_v3, %v17008_v37  ;;  %v6676_v38 = vld [vmem:[#allocation9 + $0x18] sm:$0xff] }
 0x361   : > { %v6532_v51 = vadd.f32 %v17279_v29, %v6456_v21  ;;  %v17320_v25 = vadd.f32 %v17230_v18, %v17053_v5  ;;  %v6191_v55 = vadd.f32 %v14024_v22, %v5869_v47  ;;  %v6182_v57 = vpop.f32.mrf.mxu0  ;;  %v17325_v36 = vadd.f32 %v17244_v39, %v17103_v40 }
 0x362   : > { %v17306_v35 = vpop.f32.mrf.mxu1  ;;  %19844 = vst [vmem:[#allocation24_spill] sm:$0xff] %v17316_v52  ;;  %v13348_v21 = vpack.c.bf16 %v6747_v23, %v6747_v23  ;;  %v6745_v14 = vmul.f32 %v6673_v0, %v6601_v20  ;;  %v6530_v42 = vadd.f32 %v17279_v29, %v6454_v16  ;;  %v17329_v37 = vadd.f32 %v17257_v12, %v17145_v53  ;;  %v6674_v20 = vld [vmem:[#allocation9 + $0x8] sm:$0xff] }
 0x363   : > { %19845 = vst [vmem:[#allocation70_spill] sm:$0xff] %v17320_v25  ;;  %v6604_v50 = vmax.f32 %v6532_v51, 0.0  ;;  %19846 = vst [vmem:[#allocation73_spill] sm:$0xff] %v17325_v36  ;;  %v6459_v5 = vadd.f32 %v6191_v55, %v16929_v7  ;;  %v6183_v3 = vadd.f32 %v6182_v57, %v17252_v34  ;;  %v14025_v18 = vpop.f32.mrf.mxu0 }
 0x364   : > { %v5882_v8 = vpop.f32.mrf.mxu1  ;;  %19847 = vst [vmem:[#allocation32_spill] sm:$0xff] %v17329_v37  ;;  %v7051_v47 = vshrl.u32 %v13348_v21, 16  ;;  %v7054_v0 = vshll.u32 %v13348_v21, 16  ;;  %7909 = vst [vmem:[#allocation2 + $0x58] sm:$0xf] %v13348_v21  ;;  %v13346_v22 = vpack.c.bf16 %v6745_v14, %v6745_v14  ;;  %v6602_v40 = vmax.f32 %v6530_v42, 0.0 }
 0x365   : > { %v6748_v23 = vmul.f32 %v6676_v38, %v6604_v50  ;;  %v17336_v39 = vadd.f32 %v17279_v29, %v6459_v5  ;;  %v17339_v53 = vadd.f32 %v6183_v3, %v16934_v27  ;;  %v17342_v12 = vadd.f32 %v14025_v18, %v17277_v46  ;;  %v17344_v34 = vpop.f32.mrf.mxu0  ;;  %v14782_v21 = vld [vmem:[#allocation2 + $0x33c] ss:$12 sps:$4 sm:$0xff]   ;;  %v8414_v3 = vld [vmem:[#allocation2 + $0x38] sm:$0x8] }
 0x366   : > { %v17332_v48 = vpop.f32.mrf.mxu1  ;;  %6076 = vmatmul.mubr.bf16.gmra.mxu1 %v14776_v1  ;;  %v7053_v1 = vrot.slane %v7051_v47, 7  ;;  %v17346_v51 = vrot.slane %v7054_v0, 5  ;;  %v7990_v54 = vrot.slane %v7051_v47, 4  ;;  %v7034_v16 = vshrl.u32 %v13346_v22, 16  ;;  %7907 = vst [vmem:[#allocation2 + $0x40] sm:$0xf] %v13346_v22 }
 0x367   : > { %6083 = vmatprep.mubr.bf16.mxu1 %v14780_v13  ;;  %v7037_v13 = vshll.u32 %v13346_v22, 16  ;;  %v13349_v38 = vpack.c.bf16 %v6748_v23, %v6748_v23  ;;  %v6746_v8 = vmul.f32 %v6674_v20, %v6602_v40  ;;  %v6607_v55 = vmax.f32 %v17336_v39, 0.0  ;;  %v17351_v27 = vpop.f32.mrf.mxu0  ;;  %v14785_v18 = vld [vmem:[#allocation2 + $0x358] ss:$12 sps:$4 sm:$0xff]  }
 0x368   : > { %v5887_v7 = vpop.f32.mrf.mxu1  ;;  %v17353_v46 = vor.u32 %v7054_v0, %v7053_v1  ;;  %v7058_v14 = vrot.slane %v7053_v1, 4  ;;  %v7991_v50 = vor.u32 %v7990_v54, %v17346_v51  ;;  %v17356_v42 = vrot.slane %v7034_v16, 7  ;;  %v7756_v0 = vld [vmem:[#allocation2 + $0x3c] sm:$0xf] }
 0x369   : > { %v7979_v22 = vrot.slane %v7037_v13, 5  ;;  %v7980_v23 = vrot.slane %v7034_v16, 4  ;;  %v7060_v20 = vshrl.u32 %v13349_v38, 16  ;;  %v7063_v40 = vshll.u32 %v13349_v38, 16  ;;  %7910 = vst [vmem:[#allocation2 + $0x64] sm:$0xf] %v13349_v38  ;;  %v17370_v7 = vpop.f32.mrf.mxu0 }
 0x36a   : > { %v17349_v57 = vpop.f32.mrf.mxu1  ;;  %v7992_v1 = vrot.slane %v7991_v50, 4  ;;  %v7039_v54 = vor.u32 %v7037_v13, %v17356_v42  ;;  %v7040_v37 = vrot.slane %v17356_v42, 4  ;;  %v13347_v36 = vpack.c.bf16 %v6746_v8, %v6746_v8  ;;  %v6679_v8 = vld [vmem:[#allocation9 + $0x30] sm:$0xff] }
 0x36b   : > { %v7981_v25 = vor.u32 %v7980_v23, %v7979_v22  ;;  %v8415_v56 = vsel %vm17360_vm10, %v7979_v22, %v8414_v3  ;;  %v17376_v28 = vrot.slane %v7060_v20, 7  ;;  %v7993_v52 = vrot.slane %v7063_v40, 5  ;;  %v17380_v38 = vpop.f32.mrf.mxu0 }
 0x36c   : > { %v5890_v39 = vpop.f32.mrf.mxu1  ;;  %v7757_v50 = vsel %vm17366_vm11, %v7039_v54, %v7756_v0  ;;  %8416 = vst [vmem:[#allocation2 + $0x38] sm:$0x8] %v8415_v56  ;;  %v7995_v13 = vrot.slane %v7060_v20, 4  ;;  %v7045_v42 = vshll.u32 %v13347_v36, 16  ;;  %7908 = vst [vmem:[#allocation2 + $0x4c] sm:$0xf] %v13347_v36 }
 0x36d   : > { %v7042_v39 = vshrl.u32 %v13347_v36, 16  ;;  %7758 = vst [vmem:[#allocation2 + $0x3c] sm:$0xf] %v7757_v50  ;;  %v7982_v5 = vrot.slane %v7981_v25, 4  ;;  %v7065_v3 = vor.u32 %v7063_v40, %v17376_v28  ;;  %v7067_v22 = vrot.slane %v17376_v28, 4  ;;  %v17388_v63 = vpop.f32.mrf.mxu0 }
 0x36e   : > { %v17378_v16 = vpop.f32.mrf.mxu1  ;;  %6084 = vmatmul.mubr.bf16.gmra.mxu1 %v14782_v21  ;;  %v7994_v21 = vsel %vm15702_vm2, %v7992_v1, %v7993_v52  ;;  %v7996_v47 = vor.u32 %v7995_v13, %v7993_v52  ;;  %v7983_v0 = vrot.slane %v7045_v42, 5  ;;  %v6533_v25 = vadd.f32 %v17279_v29, %v17339_v53  ;;  %v14788_v50 = vld [vmem:[#allocation2 + $0x354] ss:$12 sps:$4 sm:$0xff]   ;;  %v14799_v28 = vld [vmem:[#allocation2 + $0x384] ss:$12 sps:$4 sm:$0xff]  }
 0x36f   : > { %6091 = vmatprep.mubr.bf16.mxu1 %v14785_v18  ;;  %8419 = vst [vmem:[#allocation2 + $0x5c] sm:$0xf] %v7994_v21  ;;  %v7044_v56 = vrot.slane %v7042_v39, 7  ;;  %v7985_v20 = vrot.slane %v7042_v39, 4  ;;  %v7066_v36 = vsel %vm15777_vm5, %v7058_v14, %v7065_v3  ;;  %v6751_v18 = vmul.f32 %v6679_v8, %v6607_v55  ;;  %v17398_v1 = vpop.f32.mrf.mxu0  ;;  %v6677_v55 = vld [vmem:[#allocation9 + $0x20] sm:$0xff] }
 0x370   : > { %v5895_v23 = vpop.f32.mrf.mxu1  ;;  %v6460_v40 = vadd.f32 %v17342_v12, %v16939_v33  ;;  %7761 = vst [vmem:[#allocation2 + $0x60] sm:$0xf] %v7066_v36  ;;  %v17400_v52 = vrot.slane %v7996_v47, 4  ;;  %v7984_v14 = vsel %vm15702_vm2, %v7982_v5, %v7983_v0  ;;  %v14792_v8 = vld [vmem:[#allocation2 + $0x370] ss:$12 sps:$4 sm:$0xff]   ;;  %v6605_v21 = vmax.f32 %v6533_v25, 0.0 }
 0x371   : > { %v7047_v13 = vor.u32 %v7045_v42, %v7044_v56  ;;  %v7049_v39 = vrot.slane %v7044_v56, 4  ;;  %v7986_v3 = vor.u32 %v7985_v20, %v7983_v0  ;;  %8417 = vst [vmem:[#allocation2 + $0x44] sm:$0xf] %v7984_v14  ;;  %v13352_v53 = vpack.c.bf16 %v6751_v18, %v6751_v18  ;;  %v17414_v56 = vpop.f32.mrf.mxu0 }
 0x372   : > { %v17396_v54 = vpop.f32.mrf.mxu1  ;;  %v6536_v33 = vadd.f32 %v17279_v29, %v6460_v40  ;;  %v6186_v47 = vadd.f32 %v17344_v34, %v17259_v58  ;;  %v6207_v5 = vadd.f32 %v17351_v27, %v17332_v48  ;;  %v6749_v18 = vmul.f32 %v6677_v55, %v6605_v21 }
 0x373   : > { %v7048_v23 = vsel %vm15777_vm5, %v7040_v37, %v7047_v13  ;;  %v7057_v42 = vsel %vm15777_vm5, %v7049_v39, %v17353_v46  ;;  %v7987_v0 = vrot.slane %v7986_v3, 4  ;;  %v7087_v20 = vshrl.u32 %v13352_v53, 16  ;;  %7913 = vst [vmem:[#allocation2 + $0x88] sm:$0xf] %v13352_v53  ;;  %v6680_v37 = vld [vmem:[#allocation9 + $0x38] sm:$0xff] }
 0x374   : > { %v5898_v12 = vpop.f32.mrf.mxu1  ;;  %7759 = vst [vmem:[#allocation2 + $0x48] sm:$0xf] %v7048_v23  ;;  %7760 = vst [vmem:[#allocation2 + $0x54] sm:$0xf] %v7057_v42  ;;  %v7090_v36 = vshll.u32 %v13352_v53, 16  ;;  %v6608_v46 = vmax.f32 %v6536_v33, 0.0  ;;  %v6458_v40 = vadd.f32 %v6186_v47, %v16945_v60  ;;  %v6463_v58 = vadd.f32 %v6207_v5, %v16950_v43 }
 0x375   : > { %v6199_v48 = vadd.f32 %v17370_v7, %v17283_v62  ;;  %v7989_v34 = vsel %vm15702_vm2, %v7987_v0, %v17346_v51  ;;  %v17425_v27 = vrot.slane %v7087_v20, 7  ;;  %v8010_v39 = vrot.slane %v7087_v20, 4  ;;  %v6678_v43 = vld [vmem:[#allocation9 + $0x28] sm:$0xff]  ;;  %v17431_v62 = vpop.f32.mrf.mxu0  ;;  %v14795_v33 = vld [vmem:[#allocation2 + $0x36c] ss:$12 sps:$4 sm:$0xff]  }
 0x376   : > { %v17416_v25 = vpop.f32.mrf.mxu1  ;;  %6092 = vmatmul.mubr.bf16.gmra.mxu1 %v14788_v50  ;;  %v17427_v13 = vrot.slane %v7090_v36, 5  ;;  %8418 = vst [vmem:[#allocation2 + $0x50] sm:$0xf] %v7989_v34  ;;  %v13350_v50 = vpack.c.bf16 %v6749_v18, %v6749_v18  ;;  %v6752_v55 = vmul.f32 %v6680_v37, %v6608_v46  ;;  %v6534_v60 = vadd.f32 %v17279_v29, %v6458_v40  ;;  %v14797_v12 = vld [vmem:[#allocation2 + $0x388] ss:$12 sps:$4 sm:$0xff]   ;;  %v6683_v0 = vld [vmem:[#allocation9 + $0x50] sm:$0xff] }
 0x377   : > { %6099 = vmatprep.mubr.bf16.mxu1 %v14792_v8  ;;  %v6539_v3 = vadd.f32 %v17279_v29, %v6463_v58  ;;  %v17434_v7 = vor.u32 %v7090_v36, %v17425_v27  ;;  %v7094_v51 = vrot.slane %v17425_v27, 4  ;;  %v6461_v53 = vadd.f32 %v6199_v48, %v16955_v59  ;;  %v17446_v34 = vpop.f32.mrf.mxu0 }
 0x378   : > { %v5903_v14 = vpop.f32.mrf.mxu1  ;;  %v8011_v8 = vor.u32 %v8010_v39, %v17427_v13  ;;  %v7069_v23 = vshrl.u32 %v13350_v50, 16  ;;  %v7072_v42 = vshll.u32 %v13350_v50, 16  ;;  %7911 = vst [vmem:[#allocation2 + $0x70] sm:$0xf] %v13350_v50  ;;  %v13353_v47 = vpack.c.bf16 %v6752_v55, %v6752_v55  ;;  %v6681_v55 = vld [vmem:[#allocation9 + $0x40] sm:$0xff] }
 0x379   : > { %v6606_v5 = vmax.f32 %v6534_v60, 0.0  ;;  %v6611_v18 = vmax.f32 %v6539_v3, 0.0  ;;  %v6537_v36 = vadd.f32 %v17279_v29, %v6461_v53  ;;  %v6210_v37 = vadd.f32 %v17380_v38, %v17349_v57 }
 0x37a   : > { %v17439_v21 = vpop.f32.mrf.mxu1  ;;  %v8012_v20 = vrot.slane %v8011_v8, 4  ;;  %v17444_v40 = vrot.slane %v7069_v23, 7  ;;  %v7998_v59 = vrot.slane %v7072_v42, 5  ;;  %v8000_v58 = vrot.slane %v7069_v23, 4  ;;  %7914 = vst [vmem:[#allocation2 + $0x94] sm:$0xf] %v13353_v47 }
 0x37b   : > { %v7096_v48 = vshrl.u32 %v13353_v47, 16  ;;  %v7099_v27 = vshll.u32 %v13353_v47, 16  ;;  %v6750_v39 = vmul.f32 %v6678_v43, %v6606_v5  ;;  %v6755_v14 = vmul.f32 %v6683_v0, %v6611_v18  ;;  %v14954_v45 = vld [vmem:[#allocation2 + $0x3c] ss:$12 sps:$4 sm:$0xff]  }
 0x37c   : > { %v5906_v46 = vpop.f32.mrf.mxu1  ;;  %v6609_v50 = vmax.f32 %v6537_v36, 0.0  ;;  %v7074_v3 = vor.u32 %v7072_v42, %v17444_v40  ;;  %v7076_v57 = vrot.slane %v17444_v40, 4  ;;  %v7999_v38 = vsel %vm15702_vm2, %v17400_v52, %v7998_v59  ;;  %v17461_v36 = vpop.f32.mrf.mxu0 }
 0x37d   : > { %v8001_v8 = vor.u32 %v8000_v58, %v7998_v59  ;;  %8420 = vst [vmem:[#allocation2 + $0x68] sm:$0xf] %v7999_v38  ;;  %v17455_v53 = vrot.slane %v7096_v48, 7  ;;  %v8013_v43 = vrot.slane %v7099_v27, 5  ;;  %v8015_v23 = vrot.slane %v7096_v48, 4 }
 0x37e   : > { %v17448_v60 = vpop.f32.mrf.mxu1  ;;  %6100 = vmatmul.mubr.bf16.gmra.mxu1 %v14795_v33  ;;  %v13351_v47 = vpack.c.bf16 %v6750_v39, %v6750_v39  ;;  %v7075_v33 = vsel %vm15777_vm5, %v7067_v22, %v7074_v3  ;;  %v13356_v0 = vpack.c.bf16 %v6755_v14, %v6755_v14  ;;  %v6753_v18 = vmul.f32 %v6681_v55, %v6609_v50  ;;  %v14809_v14 = vld [vmem:[#allocation2 + $0x3a0] ss:$12 sps:$4 sm:$0xff]  }
 0x37f   : > { %6107 = vmatprep.mubr.bf16.mxu1 %v14797_v12  ;;  %v8002_v42 = vrot.slane %v8001_v8, 4  ;;  %7762 = vst [vmem:[#allocation2 + $0x6c] sm:$0xf] %v7075_v33  ;;  %v7101_v52 = vor.u32 %v7099_v27, %v17455_v53  ;;  %v7103_v12 = vrot.slane %v17455_v53, 4  ;;  %v8014_v46 = vsel %vm15702_vm2, %v8012_v20, %v8013_v43  ;;  %v19852_v3 = vld [vmem:[#allocation36_spill] sm:$0xff] }
 0x380   : > { %v5911_v5 = vpop.f32.mrf.mxu1  ;;  %v8016_v40 = vor.u32 %v8015_v23, %v8013_v43  ;;  %7912 = vst [vmem:[#allocation2 + $0x7c] sm:$0xf] %v13351_v47  ;;  %8423 = vst [vmem:[#allocation2 + $0x8c] sm:$0xf] %v8014_v46  ;;  %v7078_v22 = vshrl.u32 %v13351_v47, 16  ;;  %v7081_v58 = vshll.u32 %v13351_v47, 16  ;;  %v13354_v55 = vpack.c.bf16 %v6753_v18, %v6753_v18 }
 0x381   : > { %v7123_v48 = vshrl.u32 %v13356_v0, 16  ;;  %v7126_v39 = vshll.u32 %v13356_v0, 16  ;;  %7917 = vst [vmem:[#allocation2 + $0xb8] sm:$0xf] %v13356_v0  ;;  %v7102_v27 = vsel %vm15777_vm5, %v7094_v51, %v7101_v52  ;;  %v6464_v38 = vadd.f32 %v6210_v37, %v19852_v3  ;;  %v6230_v5 = vpop.f32.mrf.mxu0 }
 0x382   : > { %v17467_v59 = vpop.f32.mrf.mxu1  ;;  %v8017_v50 = vrot.slane %v8016_v40, 4  ;;  %7765 = vst [vmem:[#allocation2 + $0x90] sm:$0xf] %v7102_v27  ;;  %v7080_v8 = vrot.slane %v7078_v22, 7  ;;  %v8003_v53 = vrot.slane %v7081_v58, 5  ;;  %v8005_v43 = vrot.slane %v7078_v22, 4 }
 0x383   : > { %v17472_v23 = vrot.slane %v7123_v48, 7  ;;  %v17474_v47 = vrot.slane %v7126_v39, 5  ;;  %v8030_v33 = vrot.slane %v7123_v48, 4  ;;  %v7105_v0 = vshrl.u32 %v13354_v55, 16  ;;  %7915 = vst [vmem:[#allocation2 + $0xa0] sm:$0xf] %v13354_v55  ;;  %v17492_v3 = vpop.f32.mrf.mxu0 }
 0x384   : > { %v5914_v20 = vpop.f32.mrf.mxu1  ;;  %v7108_v46 = vshll.u32 %v13354_v55, 16  ;;  %v7083_v51 = vor.u32 %v7081_v58, %v7080_v8  ;;  %v7085_v18 = vrot.slane %v7080_v8, 4  ;;  %v8004_v37 = vsel %vm15702_vm2, %v8002_v42, %v8003_v53 }
 0x385   : > { %v8006_v52 = vor.u32 %v8005_v43, %v8003_v53  ;;  %8421 = vst [vmem:[#allocation2 + $0x74] sm:$0xf] %v8004_v37  ;;  %v17481_v40 = vor.u32 %v7126_v39, %v17472_v23  ;;  %v7130_v22 = vrot.slane %v17472_v23, 4  ;;  %v8031_v48 = vor.u32 %v8030_v33, %v17474_v47  ;;  %v14807_v39 = vld [vmem:[#allocation2 + $0x39c] ss:$12 sps:$4 sm:$0xff]  }
 0x386   : > { %v17476_v24 = vpop.f32.mrf.mxu1  ;;  %6108 = vmatmul.mubr.bf16.gmra.mxu1 %v14799_v28  ;;  %v17485_v27 = vrot.slane %v7105_v0, 7  ;;  %v7084_v28 = vsel %vm15777_vm5, %v7076_v57, %v7083_v51  ;;  %v7093_v42 = vsel %vm15777_vm5, %v7085_v18, %v17434_v7  ;;  %v8020_v43 = vrot.slane %v7105_v0, 4  ;;  %v14816_v37 = vld [vmem:[#allocation2 + $0x3b8] ss:$12 sps:$4 sm:$0xff]  }
 0x387   : > { %6115 = vmatprep.mubr.bf16.mxu1 %v14809_v14  ;;  %v8007_v58 = vrot.slane %v8006_v52, 4  ;;  %v8018_v14 = vrot.slane %v7108_v46, 5  ;;  %7763 = vst [vmem:[#allocation2 + $0x78] sm:$0xf] %v7084_v28  ;;  %7764 = vst [vmem:[#allocation2 + $0x84] sm:$0xf] %v7093_v42  ;;  %v6540_v51 = vadd.f32 %v17279_v29, %v6464_v38  ;;  %v6202_v18 = vadd.f32 %v17388_v63, %v17306_v35 }
 0x388   : > { %v5919_v55 = vpop.f32.mrf.mxu1  ;;  %v17494_v20 = vrot.slane %v8031_v48, 4  ;;  %v7110_v8 = vor.u32 %v7108_v46, %v17485_v27  ;;  %v7112_v53 = vrot.slane %v17485_v27, 4  ;;  %v6684_v52 = vld [vmem:[#allocation9 + $0x58] sm:$0xff]  ;;  %v6223_v48 = vadd.f32 %v17398_v1, %v17416_v25  ;;  %v19855_v1 = vld [vmem:[#allocation37_spill] sm:$0xff] }
 0x389   : > { %v8009_v7 = vsel %vm15702_vm2, %v8007_v58, %v17427_v13  ;;  %v8019_v57 = vsel %vm15702_vm2, %v8017_v50, %v8018_v14  ;;  %v8021_v0 = vor.u32 %v8020_v43, %v8018_v14  ;;  %v6215_v13 = vadd.f32 %v17414_v56, %v17378_v16  ;;  %v19853_v55 = vld [vmem:[#allocation38_spill] sm:$0xff]  ;;  %v19854_v58 = vld [vmem:[#allocation35_spill] sm:$0xff] }
 0x38a   : > { %v17498_v33 = vpop.f32.mrf.mxu1  ;;  %8422 = vst [vmem:[#allocation2 + $0x80] sm:$0xf] %v8009_v7  ;;  %v7111_v46 = vsel %vm15777_vm5, %v7103_v12, %v7110_v8  ;;  %8424 = vst [vmem:[#allocation2 + $0x98] sm:$0xf] %v8019_v57  ;;  %v6612_v38 = vmax.f32 %v6540_v51, 0.0  ;;  %v6462_v28 = vadd.f32 %v6202_v18, %v19853_v55  ;;  %v6226_v63 = vadd.f32 %v17431_v62, %v17439_v21  ;;  %v6233_v12 = vpop.f32.mrf.mxu0  ;;  %v19856_v7 = vld [vmem:[#allocation40_spill] sm:$0xff] }
 0x38b   : > { %7766 = vst [vmem:[#allocation2 + $0x9c] sm:$0xf] %v7111_v46  ;;  %v6218_v35 = vadd.f32 %v17446_v34, %v17396_v54  ;;  %v17519_v42 = vrot.slane %v8021_v0, 4  ;;  %v6467_v14 = vadd.f32 %v6223_v48, %v19854_v58  ;;  %v6465_v25 = vadd.f32 %v6215_v13, %v19855_v1  ;;  %v19857_v21 = vld [vmem:[#allocation42_spill] sm:$0xff]  ;;  %v6682_v54 = vld [vmem:[#allocation9 + $0x48] sm:$0xff]  ;;  %v6685_v46 = vld [vmem:[#allocation9 + $0x60] sm:$0xff] }
 0x38c   : > { %v5922_v50 = vpop.f32.mrf.mxu1  ;;  %v6231_v16 = vadd.f32 %v6230_v5, %v17448_v60  ;;  %v6756_v8 = vmul.f32 %v6684_v52, %v6612_v38  ;;  %v6538_v43 = vadd.f32 %v17279_v29, %v6462_v28  ;;  %v6468_v62 = vadd.f32 %v6226_v63, %v19856_v7  ;;  %v6687_v51 = vld [vmem:[#allocation9 + $0x70] sm:$0xff]  ;;  %v19858_v0 = vld [vmem:[#allocation41_spill] sm:$0xff] }
 0x38d   : > { %v6466_v57 = vadd.f32 %v6218_v35, %v19857_v21  ;;  %v6543_v34 = vadd.f32 %v17279_v29, %v6467_v14  ;;  %v6541_v18 = vadd.f32 %v17279_v29, %v6465_v25  ;;  %v6234_v5 = vadd.f32 %v6233_v12, %v17467_v59  ;;  %v6688_v50 = vld [vmem:[#allocation9 + $0x78] sm:$0xff]  ;;  %v14802_v55 = vld [vmem:[#allocation2 + $0x70] ss:$12 sps:$4 sm:$0xff]   ;;  %v14806_v7 = vld [vmem:[#allocation2 + $0x88] ss:$12 sps:$4 sm:$0xff]  }
 0x38e   : > { %v17524_v56 = vpop.f32.mrf.mxu1  ;;  %6116 = vmatmul.mubr.bf16.gmra.mxu1 %v14807_v39  ;;  %v6469_v60 = vadd.f32 %v6231_v16, %v19858_v0  ;;  %v13357_v52 = vpack.c.bf16 %v6756_v8, %v6756_v8  ;;  %v6610_v48 = vmax.f32 %v6538_v43, 0.0  ;;  %v6544_v13 = vadd.f32 %v17279_v29, %v6468_v62  ;;  %v6686_v35 = vld [vmem:[#allocation9 + $0x68] sm:$0xff]  ;;  %v19859_v14 = vld [vmem:[#allocation82_spill] sm:$0xff]  ;;  %9413 = vmatprep.mubr.bf16.mxu0 %v14802_v55 }
 0x38f   : > { %6123 = vmatprep.mubr.bf16.mxu1 %v14816_v37  ;;  %v6542_v38 = vadd.f32 %v17279_v29, %v6466_v57  ;;  %v14800_v37 = vld [vmem:[#allocation2 + $0x6c] ss:$12 sps:$4 sm:$0xff]   ;;  %v6615_v28 = vmax.f32 %v6543_v34, 0.0  ;;  %v6613_v63 = vmax.f32 %v6541_v18, 0.0  ;;  %v17539_v1 = vadd.f32 %v6234_v5, %v19859_v14  ;;  %v14814_v12 = vld [vmem:[#allocation2 + $0x3b4] ss:$12 sps:$4 sm:$0xff]  }
 0x390   : > { %v5927_v39 = vpop.f32.mrf.mxu1  ;;  %v17536_v58 = vadd.f32 %v17279_v29, %v6469_v60  ;;  %v7132_v25 = vshrl.u32 %v13357_v52, 16  ;;  %v7135_v16 = vshll.u32 %v13357_v52, 16  ;;  %7918 = vst [vmem:[#allocation2 + $0xc4] sm:$0xf] %v13357_v52  ;;  %v6754_v8 = vmul.f32 %v6682_v54, %v6610_v48  ;;  %v14830_v62 = vld [vmem:[#allocation8 + $0xb0] sm:$0xff]   ;;  %9414 = vmatmul.mubr.bf16.vlgmr.msra.gmra.mxu0 %v14800_v37 }
 0x391   : > { %v6616_v43 = vmax.f32 %v6544_v13, 0.0  ;;  %v6759_v21 = vmul.f32 %v6687_v51, %v6615_v28  ;;  %v6757_v57 = vmul.f32 %v6685_v46, %v6613_v63  ;;  %v6614_v34 = vmax.f32 %v6542_v38, 0.0  ;;  %9421 = vmatprep.mubr.bf16.mxu0 %v14806_v7  ;;  %14171 = vmatpush3.bf16.msra.mxu0 %v17222_v44  ;;  %v14818_v54 = vld [vmem:[#allocation2 + $0x74] ss:$12 sps:$4 sm:$0xff]  }
 0x392   : > { %v17541_v59 = vpop.f32.mrf.mxu1  ;;  %v6617_v18 = vmax.f32 %v17536_v58, 0.0  ;;  %v17544_v60 = vrot.slane %v7132_v25, 7  ;;  %v8033_v5 = vrot.slane %v7135_v16, 5  ;;  %v8035_v39 = vrot.slane %v7132_v25, 4  ;;  %v14850_v38 = vld [vmem:[#allocation8 + $0xa8] sm:$0xff]   ;;  %14172 = vmatprep.subr.bf16.mxu0 %v14830_v62 }
 0x393   : > { %v13355_v14 = vpack.c.bf16 %v6754_v8, %v6754_v8  ;;  %v13360_v52 = vpack.c.bf16 %v6759_v21, %v6759_v21  ;;  %v17547_v48 = vpack.c.bf16 %v6757_v57, %v6757_v57  ;;  %v17549_v13 = vmul.f32 %v6688_v50, %v6616_v43 }
 0x394   : > { %v5930_v0 = vpop.f32.mrf.mxu1  ;;  %v17551_v51 = vmul.f32 %v6686_v35, %v6614_v34  ;;  %v7137_v37 = vor.u32 %v7135_v16, %v17544_v60  ;;  %v7139_v55 = vrot.slane %v17544_v60, 4  ;;  %v8034_v44 = vsel %vm15702_vm2, %v17494_v20, %v8033_v5  ;;  %v17569_v60 = vpop.f32.mrf.mxu0 }
 0x395   : > { %v8036_v28 = vor.u32 %v8035_v39, %v8033_v5  ;;  %7916 = vst [vmem:[#allocation2 + $0xac] sm:$0xf] %v13355_v14  ;;  %8427 = vst [vmem:[#allocation2 + $0xbc] sm:$0xf] %v8034_v44  ;;  %v7114_v50 = vshrl.u32 %v13355_v14, 16  ;;  %v7117_v63 = vshll.u32 %v13355_v14, 16  ;;  %14173 = vmatpush3.bf16.msra.mxu0 %v14830_v62 }
 0x396   : > { %v17553_v46 = vpop.f32.mrf.mxu1  ;;  %6124 = vmatmul.mubr.bf16.gmra.mxu1 %v14814_v12  ;;  %v7159_v35 = vshrl.u32 %v13360_v52, 16  ;;  %v7162_v25 = vshll.u32 %v13360_v52, 16  ;;  %7921 = vst [vmem:[#allocation2 + $0xe8] sm:$0xf] %v13360_v52  ;;  %7919 = vst [vmem:[#allocation2 + $0xd0] sm:$0xf] %v17547_v48  ;;  %v7138_v16 = vsel %vm15777_vm5, %v7130_v22, %v7137_v37  ;;  %14174 = vmatprep.subr.bf16.mxu0 %v14850_v38 }
 0x397   : > { %14106 = vmatprep.mubr.bf16.mxu1 %v14818_v54  ;;  %v8037_v8 = vrot.slane %v8036_v28, 4  ;;  %v7141_v20 = vshrl.u32 %v17547_v48, 16  ;;  %v7144_v43 = vshll.u32 %v17547_v48, 16  ;;  %7769 = vst [vmem:[#allocation2 + $0xc0] sm:$0xf] %v7138_v16  ;;  %v7116_v7 = vrot.slane %v7114_v50, 7 }
 0x398   : > { %v5935_v12 = vpop.f32.mrf.mxu1  ;;  %v8023_v21 = vrot.slane %v7117_v63, 5  ;;  %v8025_v57 = vrot.slane %v7114_v50, 4  ;;  %v17567_v34 = vrot.slane %v7159_v35, 7  ;;  %v14804_v0 = vld [vmem:[#allocation2 + $0x84] ss:$12 sps:$4 sm:$0xff]   ;;  %v17573_v23 = vrot.slane %v7162_v25, 5 }
 0x399   : > { %v8050_v22 = vrot.slane %v7159_v35, 4  ;;  %v17575_v39 = vrot.slane %v7141_v20, 7  ;;  %v8038_v14 = vrot.slane %v7144_v43, 5  ;;  %v7119_v54 = vor.u32 %v7117_v63, %v7116_v7  ;;  %9422 = vmatmul.mubr.bf16.gmra.mxu0 %v14804_v0  ;;  %v14823_v44 = vld [vmem:[#allocation2 + $0x8c] ss:$12 sps:$4 sm:$0xff]  }
 0x39a   : > { %v17571_v5 = vpop.f32.mrf.mxu1  ;;  %v7121_v62 = vrot.slane %v7116_v7, 4  ;;  %v8024_v52 = vsel %vm15702_vm2, %v17519_v42, %v8023_v21  ;;  %v8026_v48 = vor.u32 %v8025_v57, %v8023_v21  ;;  %v17581_v28 = vor.u32 %v7162_v25, %v17567_v34  ;;  %v6689_v63 = vld [vmem:[#allocation9 + $0x80] sm:$0xff]  ;;  %14175 = vmatpush3.bf16.msra.mxu0 %v14850_v38  ;;  %v17594_v21 = vpop.f32.mrf.mxu0 }
 0x39b   : > { %8425 = vst [vmem:[#allocation2 + $0xa4] sm:$0xf] %v8024_v52  ;;  %v7166_v50 = vrot.slane %v17567_v34, 4  ;;  %v8051_v35 = vor.u32 %v8050_v22, %v17573_v23  ;;  %v7146_v12 = vor.u32 %v7144_v43, %v17575_v39  ;;  %v7120_v42 = vsel %vm15777_vm5, %v7112_v53, %v7119_v54 }
 0x39c   : > { %v5938_v37 = vpop.f32.mrf.mxu1  ;;  %v7129_v16 = vsel %vm15777_vm5, %v7121_v62, %v17481_v40  ;;  %v8027_v7 = vrot.slane %v8026_v48, 4  ;;  %v7148_v25 = vrot.slane %v17575_v39, 4  ;;  %7767 = vst [vmem:[#allocation2 + $0xa8] sm:$0xf] %v7120_v42  ;;  %v8039_v53 = vsel %vm15702_vm2, %v8037_v8, %v8038_v14 }
 0x39d   : > { %7768 = vst [vmem:[#allocation2 + $0xb4] sm:$0xf] %v7129_v16  ;;  %v8052_v38 = vrot.slane %v8051_v35, 4  ;;  %v7147_v27 = vsel %vm15777_vm5, %v7139_v55, %v7146_v12  ;;  %v8040_v43 = vrot.slane %v7141_v20, 4  ;;  %8428 = vst [vmem:[#allocation2 + $0xc8] sm:$0xf] %v8039_v53  ;;  %v13361_v0 = vpack.c.bf16 %v17549_v13, %v17549_v13 }
 0x39e   : > { %v17596_v57 = vpop.f32.mrf.mxu1  ;;  %14107 = vmatmul.mubr.bf16.vlgmr.msra.gmra.mxu1 %v14823_v44  ;;  %v8029_v40 = vsel %vm15702_vm2, %v8027_v7, %v17474_v47  ;;  %7770 = vst [vmem:[#allocation2 + $0xcc] sm:$0xf] %v7147_v27  ;;  %v13359_v22 = vpack.c.bf16 %v17551_v51, %v17551_v51  ;;  %v6761_v54 = vmul.f32 %v6689_v63, %v6617_v18  ;;  %v17621_v18 = vpop.f32.mrf.mxu0  ;;  %v19860_v44 = vld [vmem:[#allocation39_spill] sm:$0xff]  ;;  %v14867_v27 = vld [vmem:[#allocation8 + $0xa0] sm:$0xff]  }
 0x39f   : > { %8426 = vst [vmem:[#allocation2 + $0xb0] sm:$0xf] %v8029_v40  ;;  %v8041_v62 = vor.u32 %v8040_v43, %v8038_v14  ;;  %v17613_v8 = vadd.f32 %v17279_v29, %v17539_v1  ;;  %v6239_v47 = vadd.f32 %v17461_v36, %v17476_v24  ;;  %v17619_v20 = vadd.f32 %v17492_v3, %v17498_v33 }
 0x3a0   : > { %v5943_v55 = vpop.f32.mrf.mxu1  ;;  %v7168_v13 = vshrl.u32 %v13361_v0, 16  ;;  %v7171_v52 = vshll.u32 %v13361_v0, 16  ;;  %7922 = vst [vmem:[#allocation2 + $0xf4] sm:$0xf] %v13361_v0  ;;  %v7150_v51 = vshrl.u32 %v13359_v22, 16  ;;  %v7153_v58 = vshll.u32 %v13359_v22, 16  ;;  %14176 = vmatprep.subr.bf16.mxu0 %v14867_v27 }
 0x3a1   : > { %7920 = vst [vmem:[#allocation2 + $0xdc] sm:$0xf] %v13359_v22  ;;  %v8042_v48 = vrot.slane %v8041_v62, 4  ;;  %v13362_v1 = vpack.c.bf16 %v6761_v54, %v6761_v54  ;;  %v6618_v37 = vmax.f32 %v17613_v8, 0.0  ;;  %v6471_v24 = vadd.f32 %v6239_v47, %v19860_v44  ;;  %v6690_v22 = vld [vmem:[#allocation9 + $0x88] sm:$0xff]  ;;  %v6249_v54 = vpop.f32.mrf.mxu0  ;;  %14177 = vmatpush3.bf16.msra.mxu0 %v14867_v27 }
 0x3a2   : > { %v17623_v14 = vpop.f32.mrf.mxu1  ;;  %v7170_v36 = vrot.slane %v7168_v13, 7  ;;  %v8053_v35 = vrot.slane %v7171_v52, 5  ;;  %v8055_v3 = vrot.slane %v7168_v13, 4  ;;  %v7152_v33 = vrot.slane %v7150_v51, 7  ;;  %v14813_v55 = vld [vmem:[#allocation2 + $0xa0] ss:$12 sps:$4 sm:$0xff]  }
 0x3a3   : > { %v8043_v63 = vrot.slane %v7153_v58, 5  ;;  %v8045_v42 = vrot.slane %v7150_v51, 4  ;;  %v7177_v16 = vshrl.u32 %v13362_v1, 16  ;;  %v7180_v7 = vshll.u32 %v13362_v1, 16  ;;  %7923 = vst [vmem:[#allocation2 + $0x100] sm:$0xf] %v13362_v1  ;;  %9429 = vmatprep.mubr.bf16.mxu0 %v14813_v55 }
 0x3a4   : > { %v5946_v12 = vpop.f32.mrf.mxu1  ;;  %v7173_v53 = vor.u32 %v7171_v52, %v7170_v36  ;;  %v7175_v43 = vrot.slane %v7170_v36, 4  ;;  %v8054_v40 = vsel %vm15702_vm2, %v8052_v38, %v8053_v35  ;;  %v8056_v0 = vor.u32 %v8055_v3, %v8053_v35  ;;  %v14811_v1 = vld [vmem:[#allocation2 + $0x9c] ss:$12 sps:$4 sm:$0xff]   ;;  %v14822_v44 = vld [vmem:[#allocation2 + $0xb8] ss:$12 sps:$4 sm:$0xff]  }
 0x3a5   : > { %8431 = vst [vmem:[#allocation2 + $0xec] sm:$0xf] %v8054_v40  ;;  %v7155_v8 = vor.u32 %v7153_v58, %v7152_v33  ;;  %v7157_v47 = vrot.slane %v7152_v33, 4  ;;  %v8044_v13 = vsel %vm15702_vm2, %v8042_v48, %v8043_v63  ;;  %v8046_v51 = vor.u32 %v8045_v42, %v8043_v63  ;;  %v17639_v58 = vpop.f32.mrf.mxu0  ;;  %9430 = vmatmul.mubr.bf16.gmra.mxu0 %v14811_v1  ;;  %v6691_v55 = vld [vmem:[#allocation9 + $0x90] sm:$0xff]  ;;  %v6692_v1 = vld [vmem:[#allocation9 + $0x98] sm:$0xff] }
 0x3a6   : > { %v17629_v62 = vpop.f32.mrf.mxu1  ;;  %v7174_v38 = vsel %vm15777_vm5, %v7166_v50, %v7173_v53  ;;  %v8057_v52 = vrot.slane %v8056_v0, 4  ;;  %8429 = vst [vmem:[#allocation2 + $0xd4] sm:$0xf] %v8044_v13  ;;  %v17637_v36 = vrot.slane %v7177_v16, 7  ;;  %v8058_v35 = vrot.slane %v7180_v7, 5  ;;  %9437 = vmatprep.mubr.bf16.mxu0 %v14822_v44  ;;  %v19861_v0 = vld [vmem:[#allocation44_spill] sm:$0xff] }
 0x3a7   : > { %7773 = vst [vmem:[#allocation2 + $0xf0] sm:$0xf] %v7174_v38  ;;  %v7156_v48 = vsel %vm15777_vm5, %v7148_v25, %v7155_v8  ;;  %v7165_v34 = vsel %vm15777_vm5, %v7157_v47, %v17581_v28  ;;  %v8047_v50 = vrot.slane %v8046_v51, 4  ;;  %v8060_v33 = vrot.slane %v7177_v16, 4  ;;  %v14824_v12 = vld [vmem:[#allocation2 + $0xa4] ss:$12 sps:$4 sm:$0xff]  }
 0x3a8   : > { %v5951_v3 = vpop.f32.mrf.mxu1  ;;  %7771 = vst [vmem:[#allocation2 + $0xd8] sm:$0xf] %v7156_v48  ;;  %7772 = vst [vmem:[#allocation2 + $0xe4] sm:$0xf] %v7165_v34  ;;  %v7182_v63 = vor.u32 %v7180_v7, %v17637_v36  ;;  %v7184_v42 = vrot.slane %v17637_v36, 4  ;;  %v8059_v39 = vsel %vm15702_vm2, %v8057_v52, %v8058_v35  ;;  %v6762_v27 = vmul.f32 %v6690_v22, %v6618_v37  ;;  %v19862_v52 = vld [vmem:[#allocation81_spill] sm:$0xff] }
 0x3a9   : > { %v14828_v25 = vld [vmem:[#allocation2 + $0xbc] ss:$12 sps:$4 sm:$0xff]   ;;  %v8049_v28 = vsel %vm15702_vm2, %v8047_v50, %v17573_v23  ;;  %v8061_v16 = vor.u32 %v8060_v33, %v8058_v35  ;;  %8432 = vst [vmem:[#allocation2 + $0xf8] sm:$0xf] %v8059_v39  ;;  %v6547_v40 = vadd.f32 %v17279_v29, %v6471_v24  ;;  %v6472_v7 = vadd.f32 %v17619_v20, %v19861_v0  ;;  %v17665_v23 = vpop.f32.mrf.mxu0  ;;  %v14820_v33 = vld [vmem:[#allocation2 + $0xb4] ss:$12 sps:$4 sm:$0xff]  }
 0x3aa   : > { %v17652_v53 = vpop.f32.mrf.mxu1  ;;  %14110 = vmatprep.mubr.bf16.mxu1 %v14824_v12  ;;  %8430 = vst [vmem:[#allocation2 + $0xe0] sm:$0xf] %v8049_v28  ;;  %v7183_v37 = vsel %vm15777_vm5, %v7175_v43, %v7182_v63  ;;  %v13363_v22 = vpack.c.bf16 %v6762_v27, %v6762_v27  ;;  %v6247_v8 = vadd.f32 %v17594_v21, %v17524_v56  ;;  %v19863_v21 = vld [vmem:[#allocation83_spill] sm:$0xff]  ;;  %v19864_v48 = vld [vmem:[#allocation46_spill] sm:$0xff] }
 0x3ab   : > { %v6250_v47 = vadd.f32 %v6249_v54, %v17541_v59  ;;  %14111 = vmatmul.mubr.bf16.gmra.mxu1 %v14828_v25  ;;  %7774 = vst [vmem:[#allocation2 + $0xfc] sm:$0xf] %v7183_v37  ;;  %v8062_v24 = vrot.slane %v8061_v16, 4  ;;  %v6619_v51 = vmax.f32 %v6547_v40, 0.0  ;;  %v6548_v20 = vadd.f32 %v17279_v29, %v6472_v7  ;;  %v17682_v39 = vpop.f32.mrf.mxu0  ;;  %v14827_v0 = vld [vmem:[#allocation2 + $0xd0] ss:$12 sps:$4 sm:$0xff]  }
 0x3ac   : > { %v5954_v13 = vpop.f32.mrf.mxu1  ;;  %v6255_v43 = vadd.f32 %v17569_v60, %v17553_v46  ;;  %v7186_v44 = vshrl.u32 %v13363_v22, 16  ;;  %v7189_v38 = vshll.u32 %v13363_v22, 16  ;;  %7924 = vst [vmem:[#allocation2 + $0x10c] sm:$0xf] %v13363_v22  ;;  %v6473_v56 = vadd.f32 %v6247_v8, %v19862_v52  ;;  %v6693_v22 = vld [vmem:[#allocation9 + $0xa0] sm:$0xff] }
 0x3ad   : > { %v6474_v59 = vadd.f32 %v6250_v47, %v19863_v21  ;;  %v6763_v35 = vmul.f32 %v6691_v55, %v6619_v51  ;;  %v6620_v3 = vmax.f32 %v6548_v20, 0.0  ;;  %v17677_v50 = vadd.f32 %v17621_v18, %v17571_v5  ;;  %9438 = vmatmul.mubr.bf16.gmra.mxu0 %v14820_v33  ;;  %v6694_v55 = vld [vmem:[#allocation9 + $0xa8] sm:$0xff]  ;;  %v17696_v52 = vpop.f32.mrf.mxu0 }
 0x3ae   : > { %v17672_v54 = vpop.f32.mrf.mxu1  ;;  %v6475_v34 = vadd.f32 %v6255_v43, %v19864_v48  ;;  %v17679_v12 = vrot.slane %v7186_v44, 7  ;;  %v8063_v46 = vrot.slane %v7189_v38, 5  ;;  %v8065_v60 = vrot.slane %v7186_v44, 4  ;;  %9445 = vmatprep.mubr.bf16.mxu0 %v14827_v0 }
 0x3af   : > { %v6549_v63 = vadd.f32 %v17279_v29, %v6473_v56  ;;  %v13364_v25 = vpack.c.bf16 %v6763_v35, %v6763_v35  ;;  %v6764_v28 = vmul.f32 %v6692_v1, %v6620_v3  ;;  %v6550_v16 = vadd.f32 %v17279_v29, %v6474_v59  ;;  %v6695_v1 = vld [vmem:[#allocation9 + $0xb0] sm:$0xff] }
 0x3b0   : > { %v5959_v27 = vpop.f32.mrf.mxu1  ;;  %v6551_v40 = vadd.f32 %v17279_v29, %v6475_v34  ;;  %v7191_v5 = vor.u32 %v7189_v38, %v17679_v12  ;;  %v7193_v18 = vrot.slane %v17679_v12, 4  ;;  %v8064_v7 = vsel %vm15702_vm2, %v8062_v24, %v8063_v46 }
 0x3b1   : > { %v8066_v37 = vor.u32 %v8065_v60, %v8063_v46  ;;  %8433 = vst [vmem:[#allocation2 + $0x104] sm:$0xf] %v8064_v7  ;;  %v7195_v47 = vshrl.u32 %v13364_v25, 16  ;;  %v7198_v13 = vshll.u32 %v13364_v25, 16  ;;  %7925 = vst [vmem:[#allocation2 + $0x118] sm:$0xf] %v13364_v25  ;;  %v13365_v51 = vpack.c.bf16 %v6764_v28, %v6764_v28  ;;  %v17698_v46 = vpop.f32.mrf.mxu0 }
 0x3b2   : > { %v17690_v8 = vpop.f32.mrf.mxu1  ;;  %v6621_v20 = vmax.f32 %v6549_v63, 0.0  ;;  %v7192_v43 = vsel %vm15777_vm5, %v7184_v42, %v7191_v5  ;;  %v6622_v24 = vmax.f32 %v6550_v16, 0.0  ;;  %v6623_v38 = vmax.f32 %v6551_v40, 0.0  ;;  %v14829_v56 = vld [vmem:[#allocation2 + $0xd4] ss:$12 sps:$4 sm:$0xff]  }
 0x3b3   : > { %v8067_v44 = vrot.slane %v8066_v37, 4  ;;  %7775 = vst [vmem:[#allocation2 + $0x108] sm:$0xf] %v7192_v43  ;;  %v7197_v59 = vrot.slane %v7195_v47, 7  ;;  %v8068_v35 = vrot.slane %v7198_v13, 5  ;;  %v8070_v3 = vrot.slane %v7195_v47, 4  ;;  %14114 = vmatprep.mubr.bf16.mxu1 %v14829_v56 }
 0x3b4   : > { %v5962_v21 = vpop.f32.mrf.mxu1  ;;  %v7204_v48 = vshrl.u32 %v13365_v51, 16  ;;  %7926 = vst [vmem:[#allocation2 + $0x124] sm:$0xf] %v13365_v51  ;;  %v7207_v34 = vshll.u32 %v13365_v51, 16  ;;  %v6765_v33 = vmul.f32 %v6693_v22, %v6621_v20  ;;  %v6766_v12 = vmul.f32 %v6694_v55, %v6622_v24  ;;  %v14834_v42 = vld [vmem:[#allocation2 + $0xec] ss:$12 sps:$4 sm:$0xff]   ;;  %v17706_v24 = vpop.f32.mrf.mxu0 }
 0x3b5   : > { %v6767_v36 = vmul.f32 %v6695_v1, %v6623_v38  ;;  %v7200_v63 = vor.u32 %v7198_v13, %v7197_v59  ;;  %v7202_v27 = vrot.slane %v7197_v59, 4  ;;  %v8069_v25 = vsel %vm15702_vm2, %v8067_v44, %v8068_v35  ;;  %v14825_v16 = vld [vmem:[#allocation2 + $0xcc] ss:$12 sps:$4 sm:$0xff]   ;;  %v14833_v37 = vld [vmem:[#allocation2 + $0xe8] ss:$12 sps:$4 sm:$0xff]   ;;  %14115 = vmatmul.mubr.bf16.gmra.mxu1 %v14834_v42 }
 0x3b6   : > { %v17700_v60 = vpop.f32.mrf.mxu1  ;;  %v8071_v28 = vor.u32 %v8070_v3, %v8068_v35  ;;  %8434 = vst [vmem:[#allocation2 + $0x110] sm:$0xf] %v8069_v25  ;;  %v7206_v40 = vrot.slane %v7204_v48, 7  ;;  %v8073_v0 = vrot.slane %v7207_v34, 5  ;;  %v8075_v5 = vrot.slane %v7204_v48, 4  ;;  %9446 = vmatmul.mubr.bf16.gmra.mxu0 %v14825_v16 }
 0x3b7   : > { %v13366_v7 = vpack.c.bf16 %v6765_v33, %v6765_v33  ;;  %v7201_v55 = vsel %vm15777_vm5, %v7193_v18, %v7200_v63  ;;  %v13367_v51 = vpack.c.bf16 %v6766_v12, %v6766_v12  ;;  %v13368_v13 = vpack.c.bf16 %v6767_v36, %v6767_v36  ;;  %9453 = vmatprep.mubr.bf16.mxu0 %v14833_v37 }
 0x3b8   : > { %v5967_v22 = vpop.f32.mrf.mxu1  ;;  %v8072_v47 = vrot.slane %v8071_v28, 4  ;;  %7776 = vst [vmem:[#allocation2 + $0x114] sm:$0xf] %v7201_v55  ;;  %v7209_v20 = vor.u32 %v7207_v34, %v7206_v40  ;;  %v7211_v1 = vrot.slane %v7206_v40, 4  ;;  %v8076_v43 = vor.u32 %v8075_v5, %v8073_v0  ;;  %v17714_v5 = vpop.f32.mrf.mxu0 }
 0x3b9   : > { %v7213_v44 = vshrl.u32 %v13366_v7, 16  ;;  %7927 = vst [vmem:[#allocation2 + $0x130] sm:$0xf] %v13366_v7  ;;  %v7216_v21 = vshll.u32 %v13366_v7, 16  ;;  %v7222_v18 = vshrl.u32 %v13367_v51, 16  ;;  %v7225_v59 = vshll.u32 %v13367_v51, 16 }
 0x3ba   : > { %v17708_v38 = vpop.f32.mrf.mxu1  ;;  %v8074_v56 = vsel %vm15702_vm2, %v8072_v47, %v8073_v0  ;;  %7928 = vst [vmem:[#allocation2 + $0x13c] sm:$0xf] %v13367_v51  ;;  %7929 = vst [vmem:[#allocation2 + $0x148] sm:$0xf] %v13368_v13  ;;  %v7210_v35 = vsel %vm15777_vm5, %v7202_v27, %v7209_v20  ;;  %v8077_v3 = vrot.slane %v8076_v43, 4  ;;  %v7231_v16 = vshrl.u32 %v13368_v13, 16 }
 0x3bb   : > { %8435 = vst [vmem:[#allocation2 + $0x11c] sm:$0xf] %v8074_v56  ;;  %v7215_v48 = vrot.slane %v7213_v44, 7  ;;  %v8080_v34 = vrot.slane %v7213_v44, 4  ;;  %7777 = vst [vmem:[#allocation2 + $0x120] sm:$0xf] %v7210_v35 }
 0x3bc   : > { %v5970_v33 = vpop.f32.mrf.mxu1  ;;  %v8078_v12 = vrot.slane %v7216_v21, 5  ;;  %v7224_v36 = vrot.slane %v7222_v18, 7  ;;  %v8083_v42 = vrot.slane %v7225_v59, 5  ;;  %v8085_v63 = vrot.slane %v7222_v18, 4  ;;  %v14831_v0 = vld [vmem:[#allocation2 + $0xe4] ss:$12 sps:$4 sm:$0xff]  }
 0x3bd   : > { %v7218_v25 = vor.u32 %v7216_v21, %v7215_v48  ;;  %v7220_v28 = vrot.slane %v7215_v48, 4  ;;  %v7234_v40 = vshll.u32 %v13368_v13, 16  ;;  %v14835_v47 = vld [vmem:[#allocation2 + $0x104] ss:$12 sps:$4 sm:$0xff]   ;;  %v17722_v43 = vrot.slane %v7231_v16, 7 }
 0x3be   : > { %v17716_v7 = vpop.f32.mrf.mxu1  ;;  %v8079_v27 = vsel %vm15702_vm2, %v8077_v3, %v8078_v12  ;;  %v8081_v37 = vor.u32 %v8080_v34, %v8078_v12  ;;  %v7227_v22 = vor.u32 %v7225_v59, %v7224_v36  ;;  %v7229_v55 = vrot.slane %v7224_v36, 4  ;;  %v14838_v44 = vld [vmem:[#allocation2 + $0x100] ss:$12 sps:$4 sm:$0xff]   ;;  %14118 = vmatprep.mubr.bf16.mxu1 %v14835_v47  ;;  %9454 = vmatmul.mubr.bf16.gmra.mxu0 %v14831_v0  ;;  %v6281_v12 = vpop.f32.mrf.mxu0 }
 0x3bf   : > { %v7219_v51 = vsel %vm15777_vm5, %v7211_v1, %v7218_v25  ;;  %8436 = vst [vmem:[#allocation2 + $0x128] sm:$0xf] %v8079_v27  ;;  %v8086_v20 = vor.u32 %v8085_v63, %v8083_v42  ;;  %v8088_v13 = vrot.slane %v7234_v40, 5  ;;  %v8090_v35 = vrot.slane %v7231_v16, 4  ;;  %v19865_v3 = vld [vmem:[#allocation43_spill] sm:$0xff]  ;;  %9461 = vmatprep.mubr.bf16.mxu0 %v14838_v44  ;;  %v19866_v0 = vld [vmem:[#allocation48_spill] sm:$0xff] }
 0x3c0   : > { %v5975_v56 = vpop.f32.mrf.mxu1  ;;  %7778 = vst [vmem:[#allocation2 + $0x12c] sm:$0xf] %v7219_v51  ;;  %v8082_v21 = vrot.slane %v8081_v37, 4  ;;  %v7228_v18 = vsel %vm15777_vm5, %v7220_v28, %v7227_v22  ;;  %v6476_v59 = vadd.f32 %v17677_v50, %v19865_v3  ;;  %v7236_v48 = vor.u32 %v7234_v40, %v17722_v43  ;;  %v14883_v16 = vld [vmem:[#allocation8 + $0x38] sm:$0xff]   ;;  %v17746_v37 = vpop.f32.mrf.mxu0 }
 0x3c1   : > { %7779 = vst [vmem:[#allocation2 + $0x138] sm:$0xf] %v7228_v18  ;;  %v8087_v1 = vrot.slane %v8086_v20, 4  ;;  %v7238_v34 = vrot.slane %v17722_v43, 4  ;;  %v6263_v33 = vadd.f32 %v17665_v23, %v17596_v57  ;;  %v8091_v25 = vor.u32 %v8090_v35, %v8088_v13  ;;  %v6696_v23 = vld [vmem:[#allocation9 + $0xb8] sm:$0xff]  ;;  %10136 = vmatpush1.bf16.msra.mxu1 %v14883_v16  ;;  %v6698_v56 = vld [vmem:[#allocation9 + $0xc8] sm:$0xff] }
 0x3c2   : > { %v17732_v36 = vpop.f32.mrf.mxu1  ;;  %v8084_v63 = vsel %vm15702_vm2, %v8082_v21, %v8083_v42  ;;  %v6552_v50 = vadd.f32 %v17279_v29, %v6476_v59  ;;  %v6266_v28 = vadd.f32 %v17696_v52, %v17623_v14  ;;  %v7237_v40 = vsel %vm15777_vm5, %v7229_v55, %v7236_v48  ;;  %v6697_v52 = vld [vmem:[#allocation9 + $0xc0] sm:$0xff]  ;;  %v19867_v51 = vld [vmem:[#allocation47_spill] sm:$0xff]  ;;  %10137 = vmatprep.subr.bf16.mxu1 %v19634_v31 }
 0x3c3   : > { %8437 = vst [vmem:[#allocation2 + $0x134] sm:$0xf] %v8084_v63  ;;  %v8089_v57 = vsel %vm15702_vm2, %v8087_v1, %v8088_v13  ;;  %v6477_v27 = vadd.f32 %v6263_v33, %v19866_v0  ;;  %v6271_v42 = vadd.f32 %v17639_v58, %v17629_v62  ;;  %7780 = vst [vmem:[#allocation2 + $0x144] sm:$0xf] %v7237_v40  ;;  %v17748_v47 = vrot.slane %v8091_v25, 4  ;;  %v14885_v13 = vld [vmem:[#allocation8 + $0x98] sm:$0xff]  }
 0x3c4   : > { %v5978_v22 = vpop.f32.mrf.mxu1  ;;  %8438 = vst [vmem:[#allocation2 + $0x140] sm:$0xf] %v8089_v57  ;;  %v6624_v14 = vmax.f32 %v6552_v50, 0.0  ;;  %v6478_v55 = vadd.f32 %v6266_v28, %v19867_v51  ;;  %v6274_v20 = vadd.f32 %v17682_v39, %v17652_v53  ;;  %v19868_v62 = vld [vmem:[#allocation45_spill] sm:$0xff]  ;;  %v6279_v21 = vadd.f32 %v17706_v24, %v17672_v54  ;;  %v14836_v35 = vld [vmem:[#allocation2 + $0xfc] ss:$12 sps:$4 sm:$0xff]   ;;  %14178 = vmatprep.subr.bf16.mxu0 %v14885_v13  ;;  %v17768_v28 = vpop.f32.mrf.mxu0 }
 0x3c5   : > { %v6553_v44 = vadd.f32 %v17279_v29, %v6477_v27  ;;  %v6479_v58 = vadd.f32 %v6271_v42, %v19868_v62  ;;  %v6282_v18 = vadd.f32 %v6281_v12, %v17690_v8  ;;  %v19869_v39 = vld [vmem:[#allocation50_spill] sm:$0xff]  ;;  %v6287_v48 = vadd.f32 %v17698_v46, %v17700_v60  ;;  %v19870_v8 = vld [vmem:[#allocation52_spill] sm:$0xff]  ;;  %14179 = vmatpush3.bf16.msra.mxu0 %v14885_v13  ;;  %v19871_v60 = vld [vmem:[#allocation49_spill] sm:$0xff] }
 0x3c6   : > { %v17758_v3 = vpop.f32.mrf.mxu1  ;;  %v6768_v59 = vmul.f32 %v6696_v23, %v6624_v14  ;;  %v6554_v53 = vadd.f32 %v17279_v29, %v6478_v55  ;;  %v6480_v1 = vadd.f32 %v6274_v20, %v19869_v39  ;;  %v14839_v33 = vld [vmem:[#allocation2 + $0x11c] ss:$12 sps:$4 sm:$0xff]   ;;  %v6481_v24 = vadd.f32 %v6279_v21, %v19870_v8  ;;  %v14843_v50 = vld [vmem:[#allocation2 + $0x118] ss:$12 sps:$4 sm:$0xff]   ;;  %9462 = vmatmul.mubr.bf16.gmra.mxu0 %v14836_v35  ;;  %v17785_v35 = vpop.f32.mrf.mxu0 }
 0x3c7   : > { %v14889_v63 = vld [vmem:[#allocation8 + $0x30] sm:$0xff]   ;;  %v6625_v25 = vmax.f32 %v6553_v44, 0.0  ;;  %v6555_v54 = vadd.f32 %v17279_v29, %v6479_v58  ;;  %v6482_v12 = vadd.f32 %v6282_v18, %v17073_v15  ;;  %v17772_v0 = vadd.f32 %v6287_v48, %v19871_v60  ;;  %14119 = vmatmul.mubr.bf16.gmra.mxu1 %v14839_v33  ;;  %9469 = vmatprep.mubr.bf16.mxu0 %v14843_v50  ;;  %v6700_v44 = vld [vmem:[#allocation9 + $0xd8] sm:$0xff] }
 0x3c8   : > { %v5983_v16 = vpop.f32.mrf.mxu1  ;;  %v13369_v40 = vpack.c.bf16 %v6768_v59, %v6768_v59  ;;  %v6626_v57 = vmax.f32 %v6554_v53, 0.0  ;;  %v6699_v23 = vld [vmem:[#allocation9 + $0xd0] sm:$0xff]  ;;  %v6556_v46 = vadd.f32 %v17279_v29, %v6480_v1  ;;  %v17775_v22 = vadd.f32 %v17279_v29, %v6481_v24  ;;  %10138 = vmatpush1.bf16.msra.mxu1 %v14889_v63  ;;  %v17792_v60 = vpop.f32.mrf.mxu0 }
 0x3c9   : > { %v6769_v27 = vmul.f32 %v6697_v52, %v6625_v25  ;;  %v6627_v42 = vmax.f32 %v6555_v54, 0.0  ;;  %v17778_v15 = vadd.f32 %v17279_v29, %v6482_v12  ;;  %10139 = vmatprep.subr.bf16.mxu1 %v19634_v31  ;;  %v14841_v54 = vld [vmem:[#allocation2 + $0x114] ss:$12 sps:$4 sm:$0xff]  }
 0x3ca   : > { %v17780_v14 = vpop.f32.mrf.mxu1  ;;  %v7240_v51 = vshrl.u32 %v13369_v40, 16  ;;  %v7243_v55 = vshll.u32 %v13369_v40, 16  ;;  %7930 = vst [vmem:[#allocation2 + $0x154] sm:$0xf] %v13369_v40  ;;  %v6770_v20 = vmul.f32 %v6698_v56, %v6626_v57  ;;  %v6628_v13 = vmax.f32 %v6556_v46, 0.0 }
 0x3cb   : > { %v13370_v52 = vpack.c.bf16 %v6769_v27, %v6769_v27  ;;  %v6771_v62 = vmul.f32 %v6699_v23, %v6627_v42  ;;  %v6629_v58 = vmax.f32 %v17775_v22, 0.0  ;;  %v6630_v21 = vmax.f32 %v17778_v15, 0.0  ;;  %v14840_v18 = vld [vmem:[#allocation2 + $0x134] ss:$12 sps:$4 sm:$0xff]   ;;  %v14848_v27 = vld [vmem:[#allocation2 + $0x130] ss:$12 sps:$4 sm:$0xff]  }
 0x3cc   : > { %v5986_v59 = vpop.f32.mrf.mxu1  ;;  %v7242_v53 = vrot.slane %v7240_v51, 7  ;;  %v8093_v39 = vrot.slane %v7243_v55, 5  ;;  %v8095_v1 = vrot.slane %v7240_v51, 4  ;;  %v13371_v48 = vpack.c.bf16 %v6770_v20, %v6770_v20  ;;  %14122 = vmatprep.mubr.bf16.mxu1 %v14840_v18  ;;  %v17798_v18 = vpop.f32.mrf.mxu0 }
 0x3cd   : > { %v7249_v33 = vshrl.u32 %v13370_v52, 16  ;;  %v7252_v56 = vshll.u32 %v13370_v52, 16  ;;  %7931 = vst [vmem:[#allocation2 + $0x160] sm:$0xf] %v13370_v52  ;;  %v13372_v63 = vpack.c.bf16 %v6771_v62, %v6771_v62  ;;  %v6772_v25 = vmul.f32 %v6700_v44, %v6628_v13 }
 0x3ce   : > { %v17787_v8 = vpop.f32.mrf.mxu1  ;;  %v7245_v24 = vor.u32 %v7243_v55, %v7242_v53  ;;  %v7247_v12 = vrot.slane %v7242_v53, 4  ;;  %v8094_v50 = vsel %vm15702_vm2, %v17748_v47, %v8093_v39  ;;  %v8096_v16 = vor.u32 %v8095_v1, %v8093_v39  ;;  %7932 = vst [vmem:[#allocation2 + $0x16c] sm:$0xf] %v13371_v48  ;;  %9470 = vmatmul.mubr.bf16.gmra.mxu0 %v14841_v54  ;;  %v6701_v1 = vld [vmem:[#allocation9 + $0xe0] sm:$0xff] }
 0x3cf   : > { %8439 = vst [vmem:[#allocation2 + $0x14c] sm:$0xf] %v8094_v50  ;;  %v7251_v40 = vrot.slane %v7249_v33, 7  ;;  %v8098_v57 = vrot.slane %v7252_v56, 5  ;;  %v8100_v23 = vrot.slane %v7249_v33, 4  ;;  %v7258_v46 = vshrl.u32 %v13371_v48, 16  ;;  %9477 = vmatprep.mubr.bf16.mxu0 %v14848_v27 }
 0x3d0   : > { %7933 = vst [vmem:[#allocation2 + $0x178] sm:$0xf] %v13372_v63  ;;  %v5991_v42 = vpop.f32.mrf.mxu1  ;;  %v7246_v51 = vsel %vm15777_vm5, %v7238_v34, %v7245_v24  ;;  %v8097_v55 = vrot.slane %v8096_v16, 4  ;;  %v7261_v20 = vshll.u32 %v13371_v48, 16  ;;  %v7267_v47 = vshrl.u32 %v13372_v63, 16  ;;  %v6702_v24 = vld [vmem:[#allocation9 + $0xe8] sm:$0xff] }
 0x3d1   : > { %7781 = vst [vmem:[#allocation2 + $0x150] sm:$0xf] %v7246_v51  ;;  %v7254_v13 = vor.u32 %v7252_v56, %v7251_v40  ;;  %v7256_v44 = vrot.slane %v7251_v40, 4  ;;  %v8101_v52 = vor.u32 %v8100_v23, %v8098_v57  ;;  %v7260_v62 = vrot.slane %v7258_v46, 7  ;;  %v14894_v16 = vld [vmem:[#allocation8 + $0x28] sm:$0xff]  }
 0x3d2   : > { %v17800_v59 = vpop.f32.mrf.mxu1  ;;  %v8099_v43 = vsel %vm15702_vm2, %v8097_v55, %v8098_v57  ;;  %v8103_v53 = vrot.slane %v7261_v20, 5  ;;  %v8105_v39 = vrot.slane %v7258_v46, 4  ;;  %v17804_v34 = vrot.slane %v7267_v47, 7  ;;  %v14846_v55 = vld [vmem:[#allocation2 + $0x12c] ss:$12 sps:$4 sm:$0xff]   ;;  %10140 = vmatpush1.bf16.msra.mxu1 %v14894_v16 }
 0x3d3   : > { %v7255_v48 = vsel %vm15777_vm5, %v7247_v12, %v7254_v13  ;;  %v8102_v33 = vrot.slane %v8101_v52, 4  ;;  %8440 = vst [vmem:[#allocation2 + $0x158] sm:$0xf] %v8099_v43  ;;  %v7263_v56 = vor.u32 %v7261_v20, %v7260_v62  ;;  %v7265_v54 = vrot.slane %v7260_v62, 4  ;;  %v17815_v20 = vpop.f32.mrf.mxu0  ;;  %10141 = vmatprep.subr.bf16.mxu1 %v19634_v31 }
 0x3d4   : > { %v5994_v50 = vpop.f32.mrf.mxu1  ;;  %7782 = vst [vmem:[#allocation2 + $0x15c] sm:$0xf] %v7255_v48  ;;  %v8106_v40 = vor.u32 %v8105_v39, %v8103_v53  ;;  %v7270_v23 = vshll.u32 %v13372_v63, 16  ;;  %v7274_v57 = vrot.slane %v17804_v34, 4  ;;  %v8110_v27 = vrot.slane %v7267_v47, 4 }
 0x3d5   : > { %v7264_v46 = vsel %vm15777_vm5, %v7256_v44, %v7263_v56  ;;  %v8104_v42 = vsel %vm15702_vm2, %v8102_v33, %v8103_v53  ;;  %v13373_v12 = vpack.c.bf16 %v6772_v25, %v6772_v25  ;;  %v6773_v51 = vmul.f32 %v6701_v1, %v6629_v58  ;;  %v14899_v50 = vld [vmem:[#allocation8 + $0x20] sm:$0xff]  }
 0x3d6   : > { %v17817_v13 = vpop.f32.mrf.mxu1  ;;  %7783 = vst [vmem:[#allocation2 + $0x168] sm:$0xf] %v7264_v46  ;;  %v8107_v63 = vrot.slane %v8106_v40, 4  ;;  %8441 = vst [vmem:[#allocation2 + $0x164] sm:$0xf] %v8104_v42  ;;  %v7272_v47 = vor.u32 %v7270_v23, %v17804_v34  ;;  %v8108_v52 = vrot.slane %v7270_v23, 5  ;;  %v6774_v44 = vmul.f32 %v6702_v24, %v6630_v21  ;;  %9478 = vmatmul.mubr.bf16.gmra.mxu0 %v14846_v55 }
 0x3d7   : > { %v7276_v25 = vshrl.u32 %v13373_v12, 16  ;;  %v7279_v22 = vshll.u32 %v13373_v12, 16  ;;  %7934 = vst [vmem:[#allocation2 + $0x184] sm:$0xf] %v13373_v12  ;;  %v13374_v58 = vpack.c.bf16 %v6773_v51, %v6773_v51  ;;  %v17825_v62 = vadd.f32 %v17279_v29, %v17772_v0  ;;  %v14853_v21 = vld [vmem:[#allocation2 + $0x148] ss:$12 sps:$4 sm:$0xff]   ;;  %v17831_v0 = vpop.f32.mrf.mxu0  ;;  %10142 = vmatpush1.bf16.msra.mxu1 %v14899_v50 }
 0x3d8   : > { %v5999_v43 = vpop.f32.mrf.mxu1  ;;  %v7273_v53 = vsel %vm15777_vm5, %v7265_v54, %v7272_v47  ;;  %v8109_v39 = vsel %vm15702_vm2, %v8107_v63, %v8108_v52  ;;  %v8111_v34 = vor.u32 %v8110_v27, %v8108_v52  ;;  %v13375_v15 = vpack.c.bf16 %v6774_v44, %v6774_v44  ;;  %9485 = vmatprep.mubr.bf16.mxu0 %v14853_v21 }
 0x3d9   : > { %7784 = vst [vmem:[#allocation2 + $0x174] sm:$0xf] %v7273_v53  ;;  %8442 = vst [vmem:[#allocation2 + $0x170] sm:$0xf] %v8109_v39  ;;  %v7278_v1 = vrot.slane %v7276_v25, 7  ;;  %v8113_v48 = vrot.slane %v7279_v22, 5  ;;  %10143 = vmatprep.subr.bf16.mxu1 %v19634_v31  ;;  %v17842_v53 = vpop.f32.mrf.mxu0 }
 0x3da   : > { %v8115_v33 = vrot.slane %v7276_v25, 4  ;;  %v7285_v56 = vshrl.u32 %v13374_v58, 16  ;;  %7935 = vst [vmem:[#allocation2 + $0x190] sm:$0xf] %v13374_v58  ;;  %v17833_v24 = vpop.f32.mrf.mxu1  ;;  %v8112_v54 = vrot.slane %v8111_v34, 4  ;;  %v7288_v16 = vshll.u32 %v13374_v58, 16 }
 0x3db   : > { %v7294_v40 = vshrl.u32 %v13375_v15, 16  ;;  %v7297_v23 = vshll.u32 %v13375_v15, 16  ;;  %7936 = vst [vmem:[#allocation2 + $0x19c] sm:$0xf] %v13375_v15  ;;  %v7281_v27 = vor.u32 %v7279_v22, %v7278_v1  ;;  %v7283_v46 = vrot.slane %v7278_v1, 4 }
 0x3dc   : > { %v8116_v42 = vor.u32 %v8115_v33, %v8113_v48  ;;  %v7287_v12 = vrot.slane %v7285_v56, 7  ;;  %v14844_v51 = vld [vmem:[#allocation2 + $0x14c] ss:$12 sps:$4 sm:$0xff]   ;;  %v6002_v55 = vpop.f32.mrf.mxu1  ;;  %v8114_v63 = vsel %vm15702_vm2, %v8112_v54, %v8113_v48  ;;  %v8118_v47 = vrot.slane %v7288_v16, 5  ;;  %v14851_v33 = vld [vmem:[#allocation2 + $0x144] ss:$12 sps:$4 sm:$0xff]  }
 0x3dd   : > { %v8120_v52 = vrot.slane %v7285_v56, 4  ;;  %v17837_v44 = vrot.slane %v7294_v40, 7  ;;  %v7282_v25 = vsel %vm15777_vm5, %v7274_v57, %v7281_v27  ;;  %8443 = vst [vmem:[#allocation2 + $0x17c] sm:$0xf] %v8114_v63  ;;  %14123 = vmatmul.mubr.bf16.gmra.mxu1 %v14844_v51  ;;  %v8123_v1 = vrot.slane %v7297_v23, 5  ;;  %v6703_v48 = vld [vmem:[#allocation9 + $0xf0] sm:$0xff]  ;;  %v17853_v27 = vpop.f32.mrf.mxu0 }
 0x3de   : > { %v8117_v58 = vrot.slane %v8116_v42, 4  ;;  %v7290_v22 = vor.u32 %v7288_v16, %v7287_v12  ;;  %v7292_v43 = vrot.slane %v7287_v12, 4  ;;  %v17844_v39 = vpop.f32.mrf.mxu1  ;;  %7785 = vst [vmem:[#allocation2 + $0x180] sm:$0xf] %v7282_v25  ;;  %v8125_v50 = vrot.slane %v7294_v40, 4  ;;  %9486 = vmatmul.mubr.bf16.gmra.mxu0 %v14851_v33  ;;  %v14904_v25 = vld [vmem:[#allocation8 + $0x18] sm:$0xff]  }
 0x3df   : > { %v8121_v34 = vor.u32 %v8120_v52, %v8118_v47  ;;  %v7299_v15 = vor.u32 %v7297_v23, %v17837_v44  ;;  %v7301_v21 = vrot.slane %v17837_v44, 4  ;;  %v6631_v54 = vmax.f32 %v17825_v62, 0.0  ;;  %v14857_v16 = vld [vmem:[#allocation2 + $0x160] ss:$12 sps:$4 sm:$0xff]   ;;  %10144 = vmatpush1.bf16.msra.mxu1 %v14904_v25  ;;  %v6706_v33 = vld [vmem:[#allocation9 + $0x108] sm:$0xff] }
 0x3e0   : > { %v7291_v57 = vsel %vm15777_vm5, %v7283_v46, %v7290_v22  ;;  %v8119_v56 = vsel %vm15702_vm2, %v8117_v58, %v8118_v47  ;;  %v6007_v42 = vpop.f32.mrf.mxu1  ;;  %v6290_v51 = vadd.f32 %v17714_v5, %v17708_v38  ;;  %v6295_v46 = vadd.f32 %v17768_v28, %v17716_v7  ;;  %v14845_v55 = vld [vmem:[#allocation2 + $0x164] ss:$12 sps:$4 sm:$0xff]   ;;  %9493 = vmatprep.mubr.bf16.mxu0 %v14857_v16 }
 0x3e1   : > { %7786 = vst [vmem:[#allocation2 + $0x18c] sm:$0xf] %v7291_v57  ;;  %v8122_v12 = vrot.slane %v8121_v34, 4  ;;  %8444 = vst [vmem:[#allocation2 + $0x188] sm:$0xf] %v8119_v56  ;;  %v7300_v23 = vsel %vm15777_vm5, %v7292_v43, %v7299_v15  ;;  %v8126_v62 = vor.u32 %v8125_v50, %v8123_v1  ;;  %v6775_v40 = vmul.f32 %v6703_v48, %v6631_v54  ;;  %v19872_v5 = vld [vmem:[#allocation55_spill] sm:$0xff]  ;;  %v17875_v43 = vpop.f32.mrf.mxu0 }
 0x3e2   : > { %7787 = vst [vmem:[#allocation2 + $0x198] sm:$0xf] %v7300_v23  ;;  %v6298_v63 = vadd.f32 %v17792_v60, %v17732_v36  ;;  %v6303_v47 = vadd.f32 %v17746_v37, %v17758_v3  ;;  %v17865_v52 = vpop.f32.mrf.mxu1  ;;  %v6484_v7 = vadd.f32 %v6290_v51, %v19872_v5  ;;  %v6485_v28 = vadd.f32 %v6295_v46, %v17092_v17  ;;  %v6704_v60 = vld [vmem:[#allocation9 + $0xf8] sm:$0xff]  ;;  %v6707_v56 = vld [vmem:[#allocation9 + $0x110] sm:$0xff] }
 0x3e3   : > { %v8124_v38 = vsel %vm15702_vm2, %v8122_v12, %v8123_v1  ;;  %14126 = vmatprep.mubr.bf16.mxu1 %v14845_v55  ;;  %v6306_v58 = vadd.f32 %v17785_v35, %v17780_v14  ;;  %v8127_v22 = vrot.slane %v8126_v62, 4  ;;  %v13376_v36 = vpack.c.bf16 %v6775_v40, %v6775_v40  ;;  %v6705_v1 = vld [vmem:[#allocation9 + $0x100] sm:$0xff]  ;;  %10145 = vmatprep.subr.bf16.mxu1 %v19634_v31  ;;  %v6708_v12 = vld [vmem:[#allocation9 + $0x118] sm:$0xff]  ;;  %v14906_v23 = vld [vmem:[#allocation8 + $0x90] sm:$0xff]   ;;  %v17891_v40 = vpop.f32.mrf.mxu0 }
 0x3e4   : > { %8445 = vst [vmem:[#allocation2 + $0x194] sm:$0xf] %v8124_v38  ;;  %v6486_v37 = vadd.f32 %v6298_v63, %v17292_v61  ;;  %v6487_v3 = vadd.f32 %v6303_v47, %v17078_v49  ;;  %v6010_v34 = vpop.f32.mrf.mxu1  ;;  %v6560_v15 = vadd.f32 %v17279_v29, %v6484_v7  ;;  %v6561_v17 = vadd.f32 %v17279_v29, %v6485_v28  ;;  %v14855_v50 = vld [vmem:[#allocation2 + $0x15c] ss:$12 sps:$4 sm:$0xff]  }
 0x3e5   : > { %v6488_v48 = vadd.f32 %v6306_v58, %v17097_v32  ;;  %v6311_v14 = vadd.f32 %v17815_v20, %v17787_v8  ;;  %v7303_v35 = vshrl.u32 %v13376_v36, 16  ;;  %v7306_v61 = vshll.u32 %v13376_v36, 16  ;;  %7937 = vst [vmem:[#allocation2 + $0x1a8] sm:$0xf] %v13376_v36  ;;  %v14861_v20 = vld [vmem:[#allocation2 + $0x178] ss:$12 sps:$4 sm:$0xff]   ;;  %14180 = vmatprep.subr.bf16.mxu0 %v14906_v23 }
 0x3e6   : > { %v6562_v49 = vadd.f32 %v17279_v29, %v6486_v37  ;;  %v6563_v57 = vadd.f32 %v17279_v29, %v6487_v3  ;;  %v17885_v54 = vpop.f32.mrf.mxu1  ;;  %v6632_v16 = vmax.f32 %v6560_v15, 0.0  ;;  %v6633_v42 = vmax.f32 %v6561_v17, 0.0  ;;  %9494 = vmatmul.mubr.bf16.gmra.mxu0 %v14855_v50 }
 0x3e7   : > { %v6564_v32 = vadd.f32 %v17279_v29, %v6488_v48  ;;  %v6489_v8 = vadd.f32 %v6311_v14, %v17111_v11  ;;  %v17889_v51 = vrot.slane %v7303_v35, 7  ;;  %v8128_v46 = vrot.slane %v7306_v61, 5  ;;  %9501 = vmatprep.mubr.bf16.mxu0 %v14861_v20  ;;  %14181 = vmatpush3.bf16.msra.mxu0 %v14906_v23  ;;  %v17906_v14 = vpop.f32.mrf.mxu0 }
 0x3e8   : > { %v8130_v55 = vrot.slane %v7303_v35, 4  ;;  %v6634_v62 = vmax.f32 %v6562_v49, 0.0  ;;  %v6015_v63 = vpop.f32.mrf.mxu1  ;;  %v6776_v47 = vmul.f32 %v6704_v60, %v6632_v16  ;;  %v6777_v25 = vmul.f32 %v6705_v1, %v6633_v42  ;;  %v14849_v7 = vld [vmem:[#allocation2 + $0x17c] ss:$12 sps:$4 sm:$0xff]   ;;  %v14859_v42 = vld [vmem:[#allocation2 + $0x174] ss:$12 sps:$4 sm:$0xff]  }
 0x3e9   : > { %v6635_v38 = vmax.f32 %v6563_v57, 0.0  ;;  %v6636_v5 = vmax.f32 %v6564_v32, 0.0  ;;  %v7308_v28 = vor.u32 %v7306_v61, %v17889_v51  ;;  %v7310_v11 = vrot.slane %v17889_v51, 4  ;;  %14127 = vmatmul.mubr.bf16.gmra.mxu1 %v14849_v7  ;;  %v14910_v61 = vld [vmem:[#allocation8 + $0x10] sm:$0xff]   ;;  %v17913_v32 = vpop.f32.mrf.mxu0 }
 0x3ea   : > { %v8129_v58 = vsel %vm15702_vm2, %v8127_v22, %v8128_v46  ;;  %v8131_v36 = vor.u32 %v8130_v55, %v8128_v46  ;;  %v17897_v37 = vpop.f32.mrf.mxu1  ;;  %v13377_v60 = vpack.c.bf16 %v6776_v47, %v6776_v47  ;;  %v13378_v3 = vpack.c.bf16 %v6777_v25, %v6777_v25  ;;  %10146 = vmatpush1.bf16.msra.mxu1 %v14910_v61  ;;  %v14865_v25 = vld [vmem:[#allocation2 + $0x190] ss:$12 sps:$4 sm:$0xff]  }
 0x3eb   : > { %8446 = vst [vmem:[#allocation2 + $0x1a0] sm:$0xf] %v8129_v58  ;;  %v6778_v34 = vmul.f32 %v6706_v33, %v6634_v62  ;;  %v6779_v15 = vmul.f32 %v6707_v56, %v6635_v38  ;;  %v7309_v17 = vsel %vm15777_vm5, %v7301_v21, %v7308_v28  ;;  %v6780_v48 = vmul.f32 %v6708_v12, %v6636_v5 }
 0x3ec   : > { %v8132_v1 = vrot.slane %v8131_v36, 4  ;;  %v17904_v22 = vadd.f32 %v17279_v29, %v6489_v8  ;;  %v6018_v35 = vpop.f32.mrf.mxu1  ;;  %7788 = vst [vmem:[#allocation2 + $0x1a4] sm:$0xf] %v7309_v17  ;;  %v7312_v49 = vshrl.u32 %v13377_v60, 16  ;;  %v7315_v57 = vshll.u32 %v13377_v60, 16  ;;  %10147 = vmatprep.subr.bf16.mxu1 %v19634_v31  ;;  %v14915_v36 = vld [vmem:[#allocation8 + $0x8] sm:$0xff]  }
 0x3ed   : > { %7938 = vst [vmem:[#allocation2 + $0x1b4] sm:$0xf] %v13377_v60  ;;  %v7321_v33 = vshrl.u32 %v13378_v3, 16  ;;  %v7324_v56 = vshll.u32 %v13378_v3, 16  ;;  %7939 = vst [vmem:[#allocation2 + $0x1c0] sm:$0xf] %v13378_v3  ;;  %v13379_v44 = vpack.c.bf16 %v6778_v34, %v6778_v34  ;;  %v17908_v50 = vpack.c.bf16 %v6779_v15, %v6779_v15 }
 0x3ee   : > { %v17910_v21 = vpack.c.bf16 %v6780_v48, %v6780_v48  ;;  %v6637_v16 = vmax.f32 %v17904_v22, 0.0  ;;  %v17915_v12 = vpop.f32.mrf.mxu1  ;;  %v7314_v8 = vrot.slane %v7312_v49, 7  ;;  %v8133_v20 = vrot.slane %v7315_v57, 5  ;;  %9502 = vmatmul.mubr.bf16.gmra.mxu0 %v14859_v42  ;;  %v17922_v48 = vpop.f32.mrf.mxu0  ;;  %10148 = vmatpush1.bf16.msra.mxu1 %v14915_v36  ;;  %v14920_v36 = vld [vmem:[#allocation8] sm:$0xff]  }
 0x3ef   : > { %v8135_v23 = vrot.slane %v7312_v49, 4  ;;  %v7323_v46 = vrot.slane %v7321_v33, 7  ;;  %v8138_v55 = vrot.slane %v7324_v56, 5  ;;  %v8140_v62 = vrot.slane %v7321_v33, 4  ;;  %7940 = vst [vmem:[#allocation2 + $0x1cc] sm:$0xf] %v13379_v44  ;;  %9509 = vmatprep.mubr.bf16.mxu0 %v14865_v25  ;;  %10149 = vmatprep.subr.bf16.mxu1 %v19634_v31 }
 0x3f0   : > { %v7330_v63 = vshrl.u32 %v13379_v44, 16  ;;  %v7333_v47 = vshll.u32 %v13379_v44, 16  ;;  %7941 = vst [vmem:[#allocation2 + $0x1d8] sm:$0xf] %v17908_v50  ;;  %7942 = vst [vmem:[#allocation2 + $0x1e4] sm:$0xf] %v17910_v21  ;;  %v6023_v38 = vpop.f32.mrf.mxu1  ;;  %v7317_v5 = vor.u32 %v7315_v57, %v7314_v8  ;;  %v8134_v28 = vsel %vm15702_vm2, %v8132_v1, %v8133_v20 }
 0x3f1   : > { %v7319_v7 = vrot.slane %v7314_v8, 4  ;;  %v8136_v58 = vor.u32 %v8135_v23, %v8133_v20  ;;  %8447 = vst [vmem:[#allocation2 + $0x1ac] sm:$0xf] %v8134_v28  ;;  %v7326_v60 = vor.u32 %v7324_v56, %v7323_v46  ;;  %v7328_v3 = vrot.slane %v7323_v46, 4  ;;  %v6709_v46 = vld [vmem:[#allocation9 + $0x120] sm:$0xff] }
 0x3f2   : > { %v8141_v34 = vor.u32 %v8140_v62, %v8138_v55  ;;  %v7332_v15 = vrot.slane %v7330_v63, 7  ;;  %v14854_v17 = vld [vmem:[#allocation2 + $0x194] ss:$12 sps:$4 sm:$0xff]   ;;  %v17924_v35 = vpop.f32.mrf.mxu1  ;;  %v7318_v61 = vsel %vm15777_vm5, %v7310_v11, %v7317_v5  ;;  %v8143_v49 = vrot.slane %v7333_v47, 5  ;;  %v14863_v38 = vld [vmem:[#allocation2 + $0x18c] ss:$12 sps:$4 sm:$0xff]   ;;  %v17943_v5 = vpop.f32.mrf.mxu0  ;;  %10150 = vmatpush1.bf16.msra.mxu1 %v14920_v36 }
 0x3f3   : > { %v8137_v1 = vrot.slane %v8136_v58, 4  ;;  %v8145_v57 = vrot.slane %v7330_v63, 4  ;;  %7789 = vst [vmem:[#allocation2 + $0x1b0] sm:$0xf] %v7318_v61  ;;  %v7327_v33 = vsel %vm15777_vm5, %v7319_v7, %v7326_v60  ;;  %14130 = vmatprep.mubr.bf16.mxu1 %v14854_v17  ;;  %v7339_v20 = vshrl.u32 %v17908_v50, 16  ;;  %10151 = vmatprep.subr.bf16.mxu1 %v19634_v31 }
 0x3f4   : > { %v8142_v56 = vrot.slane %v8141_v34, 4  ;;  %v7335_v44 = vor.u32 %v7333_v47, %v7332_v15  ;;  %v7337_v42 = vrot.slane %v7332_v15, 4  ;;  %v6026_v8 = vpop.f32.mrf.mxu1  ;;  %7790 = vst [vmem:[#allocation2 + $0x1bc] sm:$0xf] %v7327_v33  ;;  %v7342_v23 = vshll.u32 %v17908_v50, 16 }
 0x3f5   : > { %v8139_v51 = vsel %vm15702_vm2, %v8137_v1, %v8138_v55  ;;  %v8146_v11 = vor.u32 %v8145_v57, %v8143_v49  ;;  %v7348_v47 = vshrl.u32 %v17910_v21, 16  ;;  %v7351_v25 = vshll.u32 %v17910_v21, 16  ;;  %v17955_v8 = vpop.f32.mrf.mxu0 }
 0x3f6   : > { %8448 = vst [vmem:[#allocation2 + $0x1b8] sm:$0xf] %v8139_v51  ;;  %v7336_v62 = vsel %vm15777_vm5, %v7328_v3, %v7335_v44  ;;  %v8144_v63 = vsel %vm15702_vm2, %v8142_v56, %v8143_v49  ;;  %v17945_v55 = vpop.f32.mrf.mxu1  ;;  %v7341_v50 = vrot.slane %v7339_v20, 7  ;;  %v8148_v28 = vrot.slane %v7342_v23, 5  ;;  %9510 = vmatmul.mubr.bf16.gmra.mxu0 %v14863_v38 }
 0x3f7   : > { %7791 = vst [vmem:[#allocation2 + $0x1c8] sm:$0xf] %v7336_v62  ;;  %v8147_v7 = vrot.slane %v8146_v11, 4  ;;  %8449 = vst [vmem:[#allocation2 + $0x1c4] sm:$0xf] %v8144_v63  ;;  %v8150_v58 = vrot.slane %v7339_v20, 4  ;;  %v6781_v15 = vmul.f32 %v6709_v46, %v6637_v16  ;;  %v6314_v11 = vadd.f32 %v17842_v53, %v17800_v59  ;;  %v17968_v38 = vpop.f32.mrf.mxu0 }
 0x3f8   : > { %v17947_v60 = vrot.slane %v7348_v47, 7  ;;  %v8153_v3 = vrot.slane %v7351_v25, 5  ;;  %v8155_v34 = vrot.slane %v7348_v47, 4  ;;  %v6031_v21 = vpop.f32.mrf.mxu1  ;;  %v7344_v17 = vor.u32 %v7342_v23, %v7341_v50  ;;  %v14870_v23 = vld [vmem:[#allocation2 + $0x1a8] ss:$12 sps:$4 sm:$0xff]  }
 0x3f9   : > { %v7346_v61 = vrot.slane %v7341_v50, 4  ;;  %v8149_v1 = vsel %vm15702_vm2, %v8147_v7, %v8148_v28  ;;  %v8151_v49 = vor.u32 %v8150_v58, %v8148_v28  ;;  %v13382_v44 = vpack.c.bf16 %v6781_v15, %v6781_v15  ;;  %9517 = vmatprep.mubr.bf16.mxu0 %v14870_v23 }
 0x3fa   : > { %8450 = vst [vmem:[#allocation2 + $0x1d0] sm:$0xf] %v8149_v1  ;;  %v7353_v57 = vor.u32 %v7351_v25, %v17947_v60  ;;  %v7355_v33 = vrot.slane %v17947_v60, 4  ;;  %v8156_v56 = vor.u32 %v8155_v34, %v8153_v3  ;;  %v17957_v22 = vpop.f32.mrf.mxu1  ;;  %v7345_v16 = vsel %vm15777_vm5, %v7337_v42, %v7344_v17  ;;  %v14925_v34 = vld [vmem:[#allocation8 + $0x78] sm:$0xff]   ;;  %v6711_v17 = vld [vmem:[#allocation9 + $0x130] sm:$0xff]  ;;  %v17991_v1 = vpop.f32.mrf.mxu0 }
 0x3fb   : > { %v8152_v51 = vrot.slane %v8151_v49, 4  ;;  %v6319_v20 = vadd.f32 %v17798_v18, %v17817_v13  ;;  %7792 = vst [vmem:[#allocation2 + $0x1d4] sm:$0xf] %v7345_v16  ;;  %v7357_v63 = vshrl.u32 %v13382_v44, 16  ;;  %v7360_v47 = vshll.u32 %v13382_v44, 16  ;;  %10152 = vmatpush2.bf16.msra.mxu1 %v14925_v34 }
 0x3fc   : > { %v7354_v46 = vsel %vm15777_vm5, %v7346_v61, %v7353_v57  ;;  %v8157_v62 = vrot.slane %v8156_v56, 4  ;;  %7943 = vst [vmem:[#allocation2 + $0x1f0] sm:$0xf] %v13382_v44  ;;  %v6034_v25 = vpop.f32.mrf.mxu1  ;;  %v6490_v59 = vadd.f32 %v6314_v11, %v17296_v9  ;;  %v6322_v13 = vadd.f32 %v17831_v0, %v17833_v24  ;;  %v6710_v9 = vld [vmem:[#allocation9 + $0x128] sm:$0xff]  ;;  %v14874_v61 = vld [vmem:[#allocation2 + $0x1c0] ss:$12 sps:$4 sm:$0xff]   ;;  %10153 = vmatprep.subr.bf16.mxu1 %v19634_v31 }
 0x3fd   : > { %7793 = vst [vmem:[#allocation2 + $0x1e0] sm:$0xf] %v7354_v46  ;;  %v8154_v42 = vsel %vm15702_vm2, %v8152_v51, %v8153_v3  ;;  %v6491_v18 = vadd.f32 %v6319_v20, %v17106_v19  ;;  %v14858_v53 = vld [vmem:[#allocation2 + $0x1ac] ss:$12 sps:$4 sm:$0xff]   ;;  %v17976_v7 = vrot.slane %v7357_v63, 7  ;;  %v8158_v50 = vrot.slane %v7360_v47, 5 }
 0x3fe   : > { %8451 = vst [vmem:[#allocation2 + $0x1dc] sm:$0xf] %v8154_v42  ;;  %v8160_v28 = vrot.slane %v7357_v63, 4  ;;  %v6327_v58 = vadd.f32 %v17875_v43, %v17844_v39  ;;  %v17980_v36 = vpop.f32.mrf.mxu1  ;;  %v6566_v60 = vadd.f32 %v17279_v29, %v6490_v59  ;;  %v6492_v3 = vadd.f32 %v6322_v13, %v17116_v30  ;;  %14131 = vmatmul.mubr.bf16.gmra.mxu1 %v14858_v53  ;;  %v14868_v24 = vld [vmem:[#allocation2 + $0x1a4] ss:$12 sps:$4 sm:$0xff]   ;;  %v6713_v42 = vld [vmem:[#allocation9 + $0x140] sm:$0xff]  ;;  %v18012_v13 = vpop.f32.mrf.mxu0 }
 0x3ff   : > { %v6567_v19 = vadd.f32 %v17279_v29, %v6491_v18  ;;  %v6330_v0 = vadd.f32 %v17906_v14, %v17865_v52  ;;  %v7362_v15 = vor.u32 %v7360_v47, %v17976_v7  ;;  %v7364_v21 = vrot.slane %v17976_v7, 4  ;;  %v19873_v14 = vld [vmem:[#allocation19_spill] sm:$0xff]  ;;  %9518 = vmatmul.mubr.bf16.gmra.mxu0 %v14868_v24 }
 0x400   : > { %v8159_v39 = vsel %vm15702_vm2, %v8157_v62, %v8158_v50  ;;  %v8161_v43 = vor.u32 %v8160_v28, %v8158_v50  ;;  %v6039_v49 = vpop.f32.mrf.mxu1  ;;  %v6638_v30 = vmax.f32 %v6566_v60, 0.0  ;;  %v6568_v52 = vadd.f32 %v17279_v29, %v6492_v3  ;;  %v6712_v11 = vld [vmem:[#allocation9 + $0x138] sm:$0xff]  ;;  %9525 = vmatprep.mubr.bf16.mxu0 %v14874_v61  ;;  %v14931_v62 = vld [vmem:[#allocation8 + $0x70] sm:$0xff]  }
 0x401   : > { %8452 = vst [vmem:[#allocation2 + $0x1e8] sm:$0xf] %v8159_v39  ;;  %v6639_v57 = vmax.f32 %v6567_v19, 0.0  ;;  %v6493_v56 = vadd.f32 %v6327_v58, %v19873_v14  ;;  %v14862_v44 = vld [vmem:[#allocation2 + $0x1c4] ss:$12 sps:$4 sm:$0xff]   ;;  %v7363_v16 = vsel %vm15777_vm5, %v7355_v33, %v7362_v15  ;;  %v6494_v20 = vadd.f32 %v6330_v0, %v17300_v2  ;;  %10154 = vmatpush2.bf16.msra.mxu1 %v14931_v62 }
 0x402   : > { %v17997_v51 = vrot.slane %v8161_v43, 4  ;;  %v6335_v23 = vadd.f32 %v17853_v27, %v17885_v54  ;;  %v18002_v46 = vpop.f32.mrf.mxu1  ;;  %7794 = vst [vmem:[#allocation2 + $0x1ec] sm:$0xf] %v7363_v16  ;;  %v6782_v63 = vmul.f32 %v6710_v9, %v6638_v30  ;;  %v6640_v25 = vmax.f32 %v6568_v52, 0.0  ;;  %14134 = vmatprep.mubr.bf16.mxu1 %v14862_v44  ;;  %v19874_v2 = vld [vmem:[#allocation51_spill] sm:$0xff]  ;;  %v6714_v9 = vld [vmem:[#allocation9 + $0x148] sm:$0xff]  ;;  %10155 = vmatprep.subr.bf16.mxu1 %v19634_v31 }
 0x403   : > { %v6783_v47 = vmul.f32 %v6711_v17, %v6639_v57  ;;  %v6569_v33 = vadd.f32 %v17279_v29, %v6493_v56  ;;  %v6570_v59 = vadd.f32 %v17279_v29, %v6494_v20  ;;  %v6338_v27 = vadd.f32 %v17891_v40, %v17897_v37  ;;  %v19875_v0 = vld [vmem:[#allocation53_spill] sm:$0xff]  ;;  %v19876_v40 = vld [vmem:[#allocation54_spill] sm:$0xff]  ;;  %v18027_v56 = vpop.f32.mrf.mxu0 }
 0x404   : > { %v6495_v18 = vadd.f32 %v6335_v23, %v19874_v2  ;;  %v6343_v54 = vadd.f32 %v17922_v48, %v17915_v12  ;;  %v6042_v53 = vpop.f32.mrf.mxu1  ;;  %v13383_v50 = vpack.c.bf16 %v6782_v63, %v6782_v63  ;;  %v6784_v58 = vmul.f32 %v6712_v11, %v6640_v25  ;;  %v14872_v12 = vld [vmem:[#allocation2 + $0x1bc] ss:$12 sps:$4 sm:$0xff]   ;;  %v14878_v48 = vld [vmem:[#allocation2 + $0x1d8] ss:$12 sps:$4 sm:$0xff]   ;;  %v14936_v15 = vld [vmem:[#allocation8 + $0x68] sm:$0xff]  }
 0x405   : > { %v13384_v28 = vpack.c.bf16 %v6783_v47, %v6783_v47  ;;  %v6641_v60 = vmax.f32 %v6569_v33, 0.0  ;;  %v6642_v19 = vmax.f32 %v6570_v59, 0.0  ;;  %v18018_v24 = vadd.f32 %v6338_v27, %v19875_v0  ;;  %v14927_v62 = vld [vmem:[#allocation8 + $0x88] sm:$0xff]   ;;  %10156 = vmatpush2.bf16.msra.mxu1 %v14936_v15  ;;  %v18031_v59 = vpop.f32.mrf.mxu0  ;;  %v14941_v2 = vld [vmem:[#allocation8 + $0x60] sm:$0xff]  }
 0x406   : > { %v18015_v3 = vadd.f32 %v17279_v29, %v6495_v18  ;;  %v18021_v37 = vadd.f32 %v6343_v54, %v19876_v40  ;;  %v18023_v34 = vpop.f32.mrf.mxu1  ;;  %v7366_v39 = vshrl.u32 %v13383_v50, 16  ;;  %v7369_v43 = vshll.u32 %v13383_v50, 16  ;;  %7944 = vst [vmem:[#allocation2 + $0x1fc] sm:$0xf] %v13383_v50  ;;  %14182 = vmatprep.subr.bf16.mxu0 %v14927_v62  ;;  %10157 = vmatprep.subr.bf16.mxu1 %v19634_v31  ;;  %v6715_v40 = vld [vmem:[#allocation9 + $0x150] sm:$0xff] }
 0x407   : > { %v7375_v17 = vshrl.u32 %v13384_v28, 16  ;;  %v7378_v61 = vshll.u32 %v13384_v28, 16  ;;  %7945 = vst [vmem:[#allocation2 + $0x208] sm:$0xf] %v13384_v28  ;;  %v13385_v49 = vpack.c.bf16 %v6784_v58, %v6784_v58  ;;  %v6785_v30 = vmul.f32 %v6713_v42, %v6641_v60  ;;  %9526 = vmatmul.mubr.bf16.gmra.mxu0 %v14872_v12  ;;  %v18049_v7 = vpop.f32.mrf.mxu0 }
 0x408   : > { %v6786_v57 = vmul.f32 %v6714_v9, %v6642_v19  ;;  %v6643_v52 = vmax.f32 %v18015_v3, 0.0  ;;  %v14866_v14 = vld [vmem:[#allocation2 + $0x1dc] ss:$12 sps:$4 sm:$0xff]   ;;  %v6047_v44 = vpop.f32.mrf.mxu1  ;;  %v7368_v16 = vrot.slane %v7366_v39, 7  ;;  %v8163_v11 = vrot.slane %v7369_v43, 5  ;;  %9533 = vmatprep.mubr.bf16.mxu0 %v14878_v48  ;;  %14183 = vmatpush3.bf16.msra.mxu0 %v14927_v62 }
 0x409   : > { %v8165_v20 = vrot.slane %v7366_v39, 4  ;;  %v7377_v23 = vrot.slane %v7375_v17, 7  ;;  %v8168_v63 = vrot.slane %v7378_v61, 5  ;;  %v8170_v47 = vrot.slane %v7375_v17, 4  ;;  %7946 = vst [vmem:[#allocation2 + $0x214] sm:$0xf] %v13385_v49  ;;  %14135 = vmatmul.mubr.bf16.gmra.mxu1 %v14866_v14 }
 0x40a   : > { %v7384_v25 = vshrl.u32 %v13385_v49, 16  ;;  %v7387_v33 = vshll.u32 %v13385_v49, 16  ;;  %v18029_v42 = vpop.f32.mrf.mxu1  ;;  %v7371_v18 = vor.u32 %v7369_v43, %v7368_v16  ;;  %v7373_v27 = vrot.slane %v7368_v16, 4  ;;  %10158 = vmatpush2.bf16.msra.mxu1 %v14941_v2  ;;  %v14876_v44 = vld [vmem:[#allocation2 + $0x1d4] ss:$12 sps:$4 sm:$0xff]  }
 0x40b   : > { %v8164_v54 = vsel %vm15702_vm2, %v17997_v51, %v8163_v11  ;;  %v8166_v53 = vor.u32 %v8165_v20, %v8163_v11  ;;  %v7380_v50 = vor.u32 %v7378_v61, %v7377_v23  ;;  %v7382_v28 = vrot.slane %v7377_v23, 4  ;;  %10159 = vmatprep.subr.bf16.mxu1 %v19634_v31 }
 0x40c   : > { %8453 = vst [vmem:[#allocation2 + $0x1f4] sm:$0xf] %v8164_v54  ;;  %v8171_v58 = vor.u32 %v8170_v47, %v8168_v63  ;;  %v18037_v60 = vrot.slane %v7384_v25, 7  ;;  %v6050_v9 = vpop.f32.mrf.mxu1  ;;  %v7372_v19 = vsel %vm15777_vm5, %v7364_v21, %v7371_v18  ;;  %v8173_v0 = vrot.slane %v7387_v33, 5  ;;  %v14946_v21 = vld [vmem:[#allocation8 + $0x58] sm:$0xff]  }
 0x40d   : > { %v8167_v3 = vrot.slane %v8166_v53, 4  ;;  %v8175_v51 = vrot.slane %v7384_v25, 4  ;;  %7795 = vst [vmem:[#allocation2 + $0x1f8] sm:$0xf] %v7372_v19  ;;  %v7381_v12 = vsel %vm15777_vm5, %v7373_v27, %v7380_v50  ;;  %v13386_v49 = vpack.c.bf16 %v6785_v30, %v6785_v30  ;;  %v14947_v27 = vld [vmem:[#allocation8 + $0x50] sm:$0xff]  }
 0x40e   : > { %v8172_v48 = vrot.slane %v8171_v58, 4  ;;  %v7389_v15 = vor.u32 %v7387_v33, %v18037_v60  ;;  %v7391_v39 = vrot.slane %v18037_v60, 4  ;;  %v18047_v43 = vpop.f32.mrf.mxu1  ;;  %7796 = vst [vmem:[#allocation2 + $0x204] sm:$0xf] %v7381_v12  ;;  %v13387_v14 = vpack.c.bf16 %v6786_v57, %v6786_v57  ;;  %10160 = vmatpush2.bf16.msra.mxu1 %v14946_v21  ;;  %v14882_v21 = vld [vmem:[#allocation2 + $0x1f0] ss:$12 sps:$4 sm:$0xff]  }
 0x40f   : > { %v8169_v17 = vsel %vm15702_vm2, %v8167_v3, %v8168_v63  ;;  %v8176_v61 = vor.u32 %v8175_v51, %v8173_v0  ;;  %v6787_v20 = vmul.f32 %v6715_v40, %v6643_v52  ;;  %v18060_v23 = vadd.f32 %v17279_v29, %v18018_v24  ;;  %7947 = vst [vmem:[#allocation2 + $0x220] sm:$0xf] %v13386_v49  ;;  %v18067_v24 = vpop.f32.mrf.mxu0 }
 0x410   : > { %8454 = vst [vmem:[#allocation2 + $0x200] sm:$0xf] %v8169_v17  ;;  %v7390_v16 = vsel %vm15777_vm5, %v7382_v28, %v7389_v15  ;;  %v8174_v11 = vsel %vm15702_vm2, %v8172_v48, %v8173_v0  ;;  %v6055_v62 = vpop.f32.mrf.mxu1  ;;  %v7393_v63 = vshrl.u32 %v13386_v49, 16  ;;  %v7396_v30 = vshll.u32 %v13386_v49, 16  ;;  %7948 = vst [vmem:[#allocation2 + $0x22c] sm:$0xf] %v13387_v14  ;;  %9534 = vmatmul.mubr.bf16.gmra.mxu0 %v14876_v44 }
 0x411   : > { %7797 = vst [vmem:[#allocation2 + $0x210] sm:$0xf] %v7390_v16  ;;  %v8177_v47 = vrot.slane %v8176_v61, 4  ;;  %8455 = vst [vmem:[#allocation2 + $0x20c] sm:$0xf] %v8174_v11  ;;  %v7402_v57 = vshrl.u32 %v13387_v14, 16  ;;  %v13388_v33 = vpack.c.bf16 %v6787_v20, %v6787_v20  ;;  %v18065_v52 = vadd.f32 %v17279_v29, %v18021_v37  ;;  %10161 = vmatprep.subr.bf16.mxu1 %v19634_v31  ;;  %v18076_v16 = vpop.f32.mrf.mxu0 }
 0x412   : > { %v7405_v25 = vshll.u32 %v13387_v14, 16  ;;  %v6644_v2 = vmax.f32 %v18060_v23, 0.0  ;;  %v18069_v18 = vpop.f32.mrf.mxu1  ;;  %v7395_v54 = vrot.slane %v7393_v63, 7  ;;  %v8178_v53 = vrot.slane %v7396_v30, 5  ;;  %v6716_v0 = vld [vmem:[#allocation9 + $0x158] sm:$0xff]  ;;  %10162 = vmatpush2.bf16.msra.mxu1 %v14947_v27  ;;  %v6717_v44 = vld [vmem:[#allocation9 + $0x160] sm:$0xff]  ;;  %9541 = vmatprep.mubr.bf16.mxu0 %v14882_v21 }
 0x413   : > { %v8180_v50 = vrot.slane %v7393_v63, 4  ;;  %v7404_v28 = vrot.slane %v7402_v57, 7  ;;  %v8185_v9 = vrot.slane %v7402_v57, 4  ;;  %v7411_v19 = vshrl.u32 %v13388_v33, 16  ;;  %7949 = vst [vmem:[#allocation2 + $0x238] sm:$0xf] %v13388_v33  ;;  %10163 = vmatprep.subr.bf16.mxu1 %v19634_v31 }
 0x414   : > { %v8183_v58 = vrot.slane %v7405_v25, 5  ;;  %v7414_v3 = vshll.u32 %v13388_v33, 16  ;;  %v6058_v51 = vpop.f32.mrf.mxu1  ;;  %v7398_v37 = vor.u32 %v7396_v30, %v7395_v54  ;;  %v7400_v40 = vrot.slane %v7395_v54, 4  ;;  %v14880_v15 = vld [vmem:[#allocation2 + $0x1ec] ss:$12 sps:$4 sm:$0xff]   ;;  %v14953_v20 = vld [vmem:[#allocation8 + $0x48] sm:$0xff]  }
 0x415   : > { %v8179_v12 = vsel %vm15702_vm2, %v8177_v47, %v8178_v53  ;;  %v8181_v48 = vor.u32 %v8180_v50, %v8178_v53  ;;  %v7407_v17 = vor.u32 %v7405_v25, %v7404_v28  ;;  %v7409_v61 = vrot.slane %v7404_v28, 4  ;;  %v18089_v53 = vpop.f32.mrf.mxu0 }
 0x416   : > { %8456 = vst [vmem:[#allocation2 + $0x218] sm:$0xf] %v8179_v12  ;;  %v8186_v49 = vor.u32 %v8185_v9, %v8183_v58  ;;  %v18074_v14 = vrot.slane %v7411_v19, 7  ;;  %v18078_v11 = vpop.f32.mrf.mxu1  ;;  %v7399_v23 = vsel %vm15777_vm5, %v7391_v39, %v7398_v37  ;;  %v8188_v47 = vrot.slane %v7414_v3, 5  ;;  %v14888_v9 = vld [vmem:[#allocation2 + $0x208] ss:$12 sps:$4 sm:$0xff]   ;;  %10164 = vmatpush2.bf16.msra.mxu1 %v14953_v20 }
 0x417   : > { %v8182_v62 = vrot.slane %v8181_v48, 4  ;;  %v8190_v63 = vrot.slane %v7411_v19, 4  ;;  %7798 = vst [vmem:[#allocation2 + $0x21c] sm:$0xf] %v7399_v23  ;;  %v7408_v30 = vsel %vm15777_vm5, %v7400_v40, %v7407_v17  ;;  %v14871_v27 = vld [vmem:[#allocation2 + $0x1f4] ss:$12 sps:$4 sm:$0xff]   ;;  %v6788_v50 = vmul.f32 %v6716_v0, %v6644_v2  ;;  %10165 = vmatprep.subr.bf16.mxu1 %v19634_v31  ;;  %v18113_v21 = vpop.f32.mrf.mxu0 }
 0x418   : > { %v8187_v57 = vrot.slane %v8186_v49, 4  ;;  %v7416_v25 = vor.u32 %v7414_v3, %v18074_v14  ;;  %v7418_v33 = vrot.slane %v18074_v14, 4  ;;  %v6063_v54 = vpop.f32.mrf.mxu1  ;;  %7799 = vst [vmem:[#allocation2 + $0x228] sm:$0xf] %v7408_v30  ;;  %v6645_v28 = vmax.f32 %v18065_v52, 0.0  ;;  %9542 = vmatmul.mubr.bf16.gmra.mxu0 %v14880_v15  ;;  %14138 = vmatprep.mubr.bf16.mxu1 %v14871_v27  ;;  %v14957_v52 = vld [vmem:[#allocation8 + $0x40] sm:$0xff]  }
 0x419   : > { %v8184_v60 = vsel %vm15702_vm2, %v8182_v62, %v8183_v58  ;;  %v8191_v39 = vor.u32 %v8190_v63, %v8188_v47  ;;  %v6346_v51 = vadd.f32 %v17955_v8, %v17924_v35  ;;  %v6351_v58 = vadd.f32 %v17913_v32, %v17945_v55  ;;  %9549 = vmatprep.mubr.bf16.mxu0 %v14888_v9  ;;  %v19877_v8 = vld [vmem:[#allocation56_spill] sm:$0xff] }
 0x41a   : > { %8457 = vst [vmem:[#allocation2 + $0x224] sm:$0xf] %v8184_v60  ;;  %v7417_v19 = vsel %vm15777_vm5, %v7409_v61, %v7416_v25  ;;  %v8189_v3 = vsel %vm15702_vm2, %v8187_v57, %v8188_v47  ;;  %v18102_v2 = vpop.f32.mrf.mxu1  ;;  %v13389_v37 = vpack.c.bf16 %v6788_v50, %v6788_v50  ;;  %v6789_v40 = vmul.f32 %v6717_v44, %v6645_v28  ;;  %v14949_v17 = vld [vmem:[#allocation8 + $0x80] sm:$0xff]   ;;  %v19878_v44 = vld [vmem:[#allocation62_spill] sm:$0xff]  ;;  %v18125_v50 = vpop.f32.mrf.mxu0 }
 0x41b   : > { %7800 = vst [vmem:[#allocation2 + $0x234] sm:$0xf] %v7417_v19  ;;  %v8192_v0 = vrot.slane %v8191_v39, 4  ;;  %8458 = vst [vmem:[#allocation2 + $0x230] sm:$0xf] %v8189_v3  ;;  %v6354_v12 = vadd.f32 %v17943_v5, %v17957_v22  ;;  %v6498_v35 = vadd.f32 %v6346_v51, %v17304_v26  ;;  %v6499_v48 = vadd.f32 %v6351_v58, %v19877_v8  ;;  %v6718_v22 = vld [vmem:[#allocation9 + $0x168] sm:$0xff] }
 0x41c   : > { %v6359_v32 = vadd.f32 %v17991_v1, %v17980_v36  ;;  %v6362_v55 = vadd.f32 %v18027_v56, %v18002_v46  ;;  %v6066_v15 = vpop.f32.mrf.mxu1  ;;  %v7420_v61 = vshrl.u32 %v13389_v37, 16  ;;  %v7423_v49 = vshll.u32 %v13389_v37, 16  ;;  %7950 = vst [vmem:[#allocation2 + $0x244] sm:$0xf] %v13389_v37  ;;  %10166 = vmatpush2.bf16.msra.mxu1 %v14957_v52  ;;  %v14886_v56 = vld [vmem:[#allocation2 + $0x204] ss:$12 sps:$4 sm:$0xff]   ;;  %14184 = vmatprep.subr.bf16.mxu0 %v14949_v17 }
 0x41d   : > { %v13390_v5 = vpack.c.bf16 %v6789_v40, %v6789_v40  ;;  %v6500_v20 = vadd.f32 %v6354_v12, %v19878_v44  ;;  %v14875_v26 = vld [vmem:[#allocation2 + $0x20c] ss:$12 sps:$4 sm:$0xff]   ;;  %v6574_v23 = vadd.f32 %v17279_v29, %v6498_v35  ;;  %v6575_v36 = vadd.f32 %v17279_v29, %v6499_v48  ;;  %14185 = vmatpush3.bf16.msra.mxu0 %v14949_v17  ;;  %v6720_v39 = vld [vmem:[#allocation9 + $0x178] sm:$0xff] }
 0x41e   : > { %v6501_v1 = vadd.f32 %v6359_v32, %v17186_v41  ;;  %v18120_v46 = vadd.f32 %v6362_v55, %v17312_v6  ;;  %v18122_v62 = vpop.f32.mrf.mxu1  ;;  %v7422_v47 = vrot.slane %v7420_v61, 7  ;;  %v8193_v63 = vrot.slane %v7423_v49, 5  ;;  %14139 = vmatmul.mubr.bf16.gmra.mxu1 %v14875_v26  ;;  %v6719_v60 = vld [vmem:[#allocation9 + $0x170] sm:$0xff]  ;;  %11546 = vmatprep.subr.bf16.mxu0 %v19634_v31  ;;  %v14893_v51 = vld [vmem:[#allocation2 + $0x220] ss:$12 sps:$4 sm:$0xff]  }
 0x41f   : > { %v8195_v30 = vrot.slane %v7420_v61, 4  ;;  %v7429_v57 = vshrl.u32 %v13390_v5, 16  ;;  %7951 = vst [vmem:[#allocation2 + $0x250] sm:$0xf] %v13390_v5  ;;  %v7432_v25 = vshll.u32 %v13390_v5, 16  ;;  %v6646_v27 = vmax.f32 %v6574_v23, 0.0 }
 0x420   : > { %v6647_v54 = vmax.f32 %v6575_v36, 0.0  ;;  %v6576_v41 = vadd.f32 %v17279_v29, %v6500_v20  ;;  %v6071_v6 = vpop.f32.mrf.mxu1  ;;  %v7425_v28 = vor.u32 %v7423_v49, %v7422_v47  ;;  %v7427_v9 = vrot.slane %v7422_v47, 4  ;;  %9550 = vmatmul.mubr.bf16.gmra.mxu0 %v14886_v56  ;;  %v18140_v49 = vpop.f32.mrf.mxu0 }
 0x421   : > { %v8194_v19 = vsel %vm15702_vm2, %v8192_v0, %v8193_v63  ;;  %v8196_v3 = vor.u32 %v8195_v30, %v8193_v63  ;;  %v18130_v58 = vrot.slane %v7429_v57, 7  ;;  %v8198_v52 = vrot.slane %v7432_v25, 5  ;;  %9557 = vmatprep.mubr.bf16.mxu0 %v14893_v51 }
 0x422   : > { %8459 = vst [vmem:[#allocation2 + $0x23c] sm:$0xf] %v8194_v19  ;;  %v8200_v37 = vrot.slane %v7429_v57, 4  ;;  %v6790_v40 = vmul.f32 %v6718_v22, %v6646_v27  ;;  %v18132_v12 = vpop.f32.mrf.mxu1  ;;  %v7426_v35 = vsel %vm15777_vm5, %v7418_v33, %v7425_v28  ;;  %v6791_v48 = vmul.f32 %v6719_v60, %v6647_v54  ;;  %v14879_v0 = vld [vmem:[#allocation2 + $0x224] ss:$12 sps:$4 sm:$0xff]   ;;  %v18149_v47 = vpop.f32.mrf.mxu0 }
 0x423   : > { %v8197_v8 = vrot.slane %v8196_v3, 4  ;;  %v6648_v32 = vmax.f32 %v6576_v41, 0.0  ;;  %7801 = vst [vmem:[#allocation2 + $0x240] sm:$0xf] %v7426_v35  ;;  %v7434_v55 = vor.u32 %v7432_v25, %v18130_v58  ;;  %v7436_v15 = vrot.slane %v18130_v58, 4  ;;  %14142 = vmatprep.mubr.bf16.mxu1 %v14879_v0 }
 0x424   : > { %v8201_v17 = vor.u32 %v8200_v37, %v8198_v52  ;;  %v13391_v61 = vpack.c.bf16 %v6790_v40, %v6790_v40  ;;  %v6074_v5 = vpop.f32.mrf.mxu1  ;;  %v13392_v22 = vpack.c.bf16 %v6791_v48, %v6791_v48  ;;  %v6577_v44 = vadd.f32 %v17279_v29, %v6501_v1  ;;  %v14891_v1 = vld [vmem:[#allocation2 + $0x21c] ss:$12 sps:$4 sm:$0xff]   ;;  %v18157_v35 = vpop.f32.mrf.mxu0 }
 0x425   : > { %v8199_v14 = vsel %vm15702_vm2, %v8197_v8, %v8198_v52  ;;  %v6792_v33 = vmul.f32 %v6720_v39, %v6648_v32  ;;  %v7435_v20 = vsel %vm15777_vm5, %v7427_v9, %v7434_v55  ;;  %v6578_v41 = vadd.f32 %v17279_v29, %v18120_v46  ;;  %v6721_v37 = vld [vmem:[#allocation9 + $0x180] sm:$0xff]  ;;  %v6722_v5 = vld [vmem:[#allocation9 + $0x188] sm:$0xff] }
 0x426   : > { %v8202_v26 = vrot.slane %v8201_v17, 4  ;;  %8460 = vst [vmem:[#allocation2 + $0x248] sm:$0xf] %v8199_v14  ;;  %v7438_v23 = vshrl.u32 %v13391_v61, 16  ;;  %v7441_v36 = vshll.u32 %v13391_v61, 16  ;;  %v18147_v56 = vpop.f32.mrf.mxu1  ;;  %v7447_v63 = vshrl.u32 %v13392_v22, 16 }
 0x427   : > { %7952 = vst [vmem:[#allocation2 + $0x25c] sm:$0xf] %v13391_v61  ;;  %7802 = vst [vmem:[#allocation2 + $0x24c] sm:$0xf] %v7435_v20  ;;  %v7450_v30 = vshll.u32 %v13392_v22, 16  ;;  %v13393_v57 = vpack.c.bf16 %v6792_v33, %v6792_v33  ;;  %v6649_v25 = vmax.f32 %v6577_v44, 0.0 }
 0x428   : > { %7953 = vst [vmem:[#allocation2 + $0x268] sm:$0xf] %v13392_v22  ;;  %v7440_v27 = vrot.slane %v7438_v23, 7  ;;  %v8203_v54 = vrot.slane %v7441_v36, 5  ;;  %v8205_v60 = vrot.slane %v7438_v23, 4  ;;  %v6079_v39 = vpop.f32.mrf.mxu1  ;;  %v7449_v6 = vrot.slane %v7447_v63, 7  ;;  %9558 = vmatmul.mubr.bf16.gmra.mxu0 %v14891_v1  ;;  %v18171_v1 = vpop.f32.mrf.mxu0 }
 0x429   : > { %v8208_v28 = vrot.slane %v7450_v30, 5  ;;  %v8210_v9 = vrot.slane %v7447_v63, 4  ;;  %v7456_v19 = vshrl.u32 %v13393_v57, 16  ;;  %7954 = vst [vmem:[#allocation2 + $0x274] sm:$0xf] %v13393_v57  ;;  %v7459_v17 = vshll.u32 %v13393_v57, 16 }
 0x42a   : > { %v7443_v3 = vor.u32 %v7441_v36, %v7440_v27  ;;  %v7445_v51 = vrot.slane %v7440_v27, 4  ;;  %v8204_v58 = vsel %vm15702_vm2, %v8202_v26, %v8203_v54  ;;  %v8206_v52 = vor.u32 %v8205_v60, %v8203_v54  ;;  %v18155_v40 = vpop.f32.mrf.mxu1  ;;  %v14898_v14 = vld [vmem:[#allocation2 + $0x238] ss:$12 sps:$4 sm:$0xff]  }
 0x42b   : > { %8461 = vst [vmem:[#allocation2 + $0x254] sm:$0xf] %v8204_v58  ;;  %v7452_v46 = vor.u32 %v7450_v30, %v7449_v6  ;;  %v7454_v8 = vrot.slane %v7449_v6, 4  ;;  %v8211_v48 = vor.u32 %v8210_v9, %v8208_v28  ;;  %v18159_v32 = vrot.slane %v7456_v19, 7  ;;  %9565 = vmatprep.mubr.bf16.mxu0 %v14898_v14  ;;  %v14968_v27 = vld [vmem:[#allocation8 + $0x238] sm:$0xff]   ;;  %v19880_v58 = vld [vmem:[#allocation61_spill] sm:$0xff] }
 0x42c   : > { %v7444_v0 = vsel %vm15777_vm5, %v7436_v15, %v7443_v3  ;;  %v8207_v55 = vrot.slane %v8206_v52, 4  ;;  %v8215_v61 = vrot.slane %v7456_v19, 4  ;;  %v6082_v22 = vpop.f32.mrf.mxu1  ;;  %v6793_v26 = vmul.f32 %v6721_v37, %v6649_v25  ;;  %v14896_v6 = vld [vmem:[#allocation2 + $0x234] ss:$12 sps:$4 sm:$0xff]   ;;  %14250 = vmatprep.subr.bf16.mxu1 %v14968_v27 }
 0x42d   : > { %7803 = vst [vmem:[#allocation2 + $0x258] sm:$0xf] %v7444_v0  ;;  %v7453_v33 = vsel %vm15777_vm5, %v7445_v51, %v7452_v46  ;;  %v8212_v44 = vrot.slane %v8211_v48, 4  ;;  %v7463_v20 = vrot.slane %v18159_v32, 4  ;;  %v14884_v23 = vld [vmem:[#allocation2 + $0x23c] ss:$12 sps:$4 sm:$0xff]   ;;  %v7461_v15 = vor.u32 %v7459_v17, %v18159_v32 }
 0x42e   : > { %7804 = vst [vmem:[#allocation2 + $0x264] sm:$0xf] %v7453_v33  ;;  %v8209_v36 = vsel %vm15702_vm2, %v8207_v55, %v8208_v28  ;;  %v8213_v63 = vrot.slane %v7459_v17, 5  ;;  %v6650_v30 = vmax.f32 %v6578_v41, 0.0  ;;  %v18169_v57 = vpop.f32.mrf.mxu1  ;;  %v13394_v54 = vpack.c.bf16 %v6793_v26, %v6793_v26  ;;  %14143 = vmatmul.mubr.bf16.gmra.mxu1 %v14884_v23  ;;  %v6724_v22 = vld [vmem:[#allocation9 + $0x198] sm:$0xff] }
 0x42f   : > { %8462 = vst [vmem:[#allocation2 + $0x260] sm:$0xf] %v8209_v36  ;;  %v6367_v25 = vadd.f32 %v17968_v38, %v18023_v34  ;;  %v6370_v60 = vadd.f32 %v18012_v13, %v18029_v42  ;;  %v6375_v39 = vadd.f32 %v18049_v7, %v18047_v43  ;;  %v7462_v41 = vsel %vm15777_vm5, %v7454_v8, %v7461_v15  ;;  %v19879_v42 = vld [vmem:[#allocation58_spill] sm:$0xff]  ;;  %v18190_v8 = vpop.f32.mrf.mxu0  ;;  %v6725_v36 = vld [vmem:[#allocation9 + $0x1a0] sm:$0xff] }
 0x430   : > { %v8214_v28 = vsel %vm15702_vm2, %v8212_v44, %v8213_v63  ;;  %v8216_v9 = vor.u32 %v8215_v61, %v8213_v63  ;;  %v6794_v19 = vmul.f32 %v6722_v5, %v6650_v30  ;;  %v6087_v3 = vpop.f32.mrf.mxu1  ;;  %7805 = vst [vmem:[#allocation2 + $0x270] sm:$0xf] %v7462_v41  ;;  %v7465_v38 = vshrl.u32 %v13394_v54, 16  ;;  %7955 = vst [vmem:[#allocation2 + $0x280] sm:$0xf] %v13394_v54 }
 0x431   : > { %8463 = vst [vmem:[#allocation2 + $0x26c] sm:$0xf] %v8214_v28  ;;  %v7468_v34 = vshll.u32 %v13394_v54, 16  ;;  %v6503_v13 = vadd.f32 %v6367_v25, %v17175_v10  ;;  %v6504_v43 = vadd.f32 %v6370_v60, %v19879_v42  ;;  %9566 = vmatmul.mubr.bf16.gmra.mxu0 %v14896_v6  ;;  %v6505_v52 = vadd.f32 %v6375_v39, %v19880_v58  ;;  %v6723_v10 = vld [vmem:[#allocation9 + $0x190] sm:$0xff]  ;;  %v18199_v25 = vpop.f32.mrf.mxu0  ;;  %v14909_v58 = vld [vmem:[#allocation2 + $0x268] ss:$12 sps:$4 sm:$0xff]  }
 0x432   : > { %v8217_v7 = vrot.slane %v8216_v9, 4  ;;  %v13395_v51 = vpack.c.bf16 %v6794_v19, %v6794_v19  ;;  %v6378_v37 = vadd.f32 %v18076_v16, %v18069_v18  ;;  %v18188_v46 = vpop.f32.mrf.mxu1  ;;  %v7467_v48 = vrot.slane %v7465_v38, 7  ;;  %v14903_v15 = vld [vmem:[#allocation2 + $0x250] ss:$12 sps:$4 sm:$0xff]  }
 0x433   : > { %v8218_v0 = vrot.slane %v7468_v34, 5  ;;  %v8220_v55 = vrot.slane %v7465_v38, 4  ;;  %v6579_v17 = vadd.f32 %v17279_v29, %v6503_v13  ;;  %v6580_v14 = vadd.f32 %v17279_v29, %v6504_v43  ;;  %9573 = vmatprep.mubr.bf16.mxu0 %v14903_v15 }
 0x434   : > { %v7474_v61 = vshrl.u32 %v13395_v51, 16  ;;  %v7477_v5 = vshll.u32 %v13395_v51, 16  ;;  %7956 = vst [vmem:[#allocation2 + $0x28c] sm:$0xf] %v13395_v51  ;;  %v6581_v33 = vadd.f32 %v17279_v29, %v6505_v52  ;;  %v6090_v44 = vpop.f32.mrf.mxu1  ;;  %v7470_v18 = vor.u32 %v7468_v34, %v7467_v48  ;;  %v14901_v13 = vld [vmem:[#allocation2 + $0x24c] ss:$12 sps:$4 sm:$0xff]  }
 0x435   : > { %v7472_v16 = vrot.slane %v7467_v48, 4  ;;  %v8219_v26 = vsel %vm15702_vm2, %v8217_v7, %v8218_v0  ;;  %v8221_v23 = vor.u32 %v8220_v55, %v8218_v0  ;;  %v6651_v54 = vmax.f32 %v6579_v17, 0.0  ;;  %v18216_v17 = vpop.f32.mrf.mxu0  ;;  %v19882_v44 = vld [vmem:[#allocation20_spill] sm:$0xff] }
 0x436   : > { %8464 = vst [vmem:[#allocation2 + $0x278] sm:$0xf] %v8219_v26  ;;  %v18197_v63 = vrot.slane %v7474_v61, 7  ;;  %v8223_v30 = vrot.slane %v7477_v5, 5  ;;  %v8225_v27 = vrot.slane %v7474_v61, 4  ;;  %v18201_v60 = vpop.f32.mrf.mxu1  ;;  %v7471_v39 = vsel %vm15777_vm5, %v7463_v20, %v7470_v18  ;;  %v19881_v20 = vld [vmem:[#allocation24_spill] sm:$0xff] }
 0x437   : > { %v8222_v6 = vrot.slane %v8221_v23, 4  ;;  %v6652_v41 = vmax.f32 %v6580_v14, 0.0  ;;  %v6653_v28 = vmax.f32 %v6581_v33, 0.0  ;;  %v14890_v9 = vld [vmem:[#allocation2 + $0x254] ss:$12 sps:$4 sm:$0xff]   ;;  %v6795_v34 = vmul.f32 %v6723_v10, %v6651_v54 }
 0x438   : > { %7806 = vst [vmem:[#allocation2 + $0x27c] sm:$0xf] %v7471_v39  ;;  %v7479_v19 = vor.u32 %v7477_v5, %v18197_v63  ;;  %v7481_v3 = vrot.slane %v18197_v63, 4  ;;  %v8226_v38 = vor.u32 %v8225_v27, %v8223_v30  ;;  %v6095_v42 = vpop.f32.mrf.mxu1  ;;  %v6506_v51 = vadd.f32 %v6378_v37, %v19881_v20  ;;  %14146 = vmatprep.mubr.bf16.mxu1 %v14890_v9  ;;  %v18226_v27 = vpop.f32.mrf.mxu0 }
 0x439   : > { %v8224_v32 = vsel %vm15702_vm2, %v8222_v6, %v8223_v30  ;;  %v6796_v43 = vmul.f32 %v6724_v22, %v6652_v41  ;;  %v6797_v7 = vmul.f32 %v6725_v36, %v6653_v28  ;;  %v13396_v0 = vpack.c.bf16 %v6795_v34, %v6795_v34  ;;  %9574 = vmatmul.mubr.bf16.gmra.mxu0 %v14901_v13 }
 0x43a   : > { %v7480_v52 = vsel %vm15777_vm5, %v7472_v16, %v7479_v19  ;;  %v8227_v48 = vrot.slane %v8226_v38, 4  ;;  %8465 = vst [vmem:[#allocation2 + $0x284] sm:$0xf] %v8224_v32  ;;  %v6383_v55 = vadd.f32 %v18031_v59, %v18078_v11  ;;  %v18218_v10 = vpop.f32.mrf.mxu1  ;;  %v6582_v37 = vadd.f32 %v17279_v29, %v6506_v51  ;;  %9581 = vmatprep.mubr.bf16.mxu0 %v14909_v58  ;;  %v14907_v38 = vld [vmem:[#allocation2 + $0x264] ss:$12 sps:$4 sm:$0xff]  }
 0x43b   : > { %7807 = vst [vmem:[#allocation2 + $0x288] sm:$0xf] %v7480_v52  ;;  %v13397_v61 = vpack.c.bf16 %v6796_v43, %v6796_v43  ;;  %v13398_v5 = vpack.c.bf16 %v6797_v7, %v6797_v7  ;;  %v6386_v14 = vadd.f32 %v18067_v24, %v18102_v2  ;;  %v7483_v22 = vshrl.u32 %v13396_v0, 16  ;;  %7957 = vst [vmem:[#allocation2 + $0x298] sm:$0xf] %v13396_v0  ;;  %v6726_v7 = vld [vmem:[#allocation9 + $0x1a8] sm:$0xff] }
 0x43c   : > { %v7486_v33 = vshll.u32 %v13396_v0, 16  ;;  %v6507_v18 = vadd.f32 %v6383_v55, %v19882_v44  ;;  %v6391_v59 = vadd.f32 %v18113_v21, %v18122_v62  ;;  %v6098_v11 = vpop.f32.mrf.mxu1  ;;  %v6654_v24 = vmax.f32 %v6582_v37, 0.0 }
 0x43d   : > { %v7492_v16 = vshrl.u32 %v13397_v61, 16  ;;  %v7495_v26 = vshll.u32 %v13397_v61, 16  ;;  %7958 = vst [vmem:[#allocation2 + $0x2a4] sm:$0xf] %v13397_v61  ;;  %v7501_v23 = vshrl.u32 %v13398_v5, 16  ;;  %v7504_v36 = vshll.u32 %v13398_v5, 16 }
 0x43e   : > { %7959 = vst [vmem:[#allocation2 + $0x2b0] sm:$0xf] %v13398_v5  ;;  %v7485_v15 = vrot.slane %v7483_v22, 7  ;;  %v8228_v63 = vrot.slane %v7486_v33, 5  ;;  %v8230_v30 = vrot.slane %v7483_v22, 4  ;;  %v18228_v54 = vpop.f32.mrf.mxu1  ;;  %v6583_v44 = vadd.f32 %v17279_v29, %v6507_v18  ;;  %v19883_v11 = vld [vmem:[#allocation59_spill] sm:$0xff] }
 0x43f   : > { %v14895_v2 = vld [vmem:[#allocation2 + $0x26c] ss:$12 sps:$4 sm:$0xff]   ;;  %v7494_v39 = vrot.slane %v7492_v16, 7  ;;  %v8233_v6 = vrot.slane %v7495_v26, 5  ;;  %v8235_v41 = vrot.slane %v7492_v16, 4  ;;  %v18230_v21 = vrot.slane %v7501_v23, 7 }
 0x440   : > { %v7488_v62 = vor.u32 %v7486_v33, %v7485_v15  ;;  %v7490_v28 = vrot.slane %v7485_v15, 4  ;;  %v8229_v9 = vsel %vm15702_vm2, %v8227_v48, %v8228_v63  ;;  %v8231_v19 = vor.u32 %v8230_v30, %v8228_v63  ;;  %14147 = vmatmul.mubr.bf16.gmra.mxu1 %v14895_v2  ;;  %v6103_v34 = vpop.f32.mrf.mxu1  ;;  %v18238_v48 = vpop.f32.mrf.mxu0  ;;  %v14914_v22 = vld [vmem:[#allocation2 + $0x280] ss:$12 sps:$4 sm:$0xff]   ;;  %v6727_v63 = vld [vmem:[#allocation9 + $0x1b0] sm:$0xff]  ;;  %v19884_v30 = vld [vmem:[#allocation57_spill] sm:$0xff] }
 0x441   : > { %8466 = vst [vmem:[#allocation2 + $0x290] sm:$0xf] %v8229_v9  ;;  %v7497_v13 = vor.u32 %v7495_v26, %v7494_v39  ;;  %v7499_v42 = vrot.slane %v7494_v39, 4  ;;  %v8236_v32 = vor.u32 %v8235_v41, %v8233_v6  ;;  %v7506_v43 = vor.u32 %v7504_v36, %v18230_v21  ;;  %9582 = vmatmul.mubr.bf16.gmra.mxu0 %v14907_v38  ;;  %v19885_v9 = vld [vmem:[#allocation70_spill] sm:$0xff] }
 0x442   : > { %v7489_v20 = vsel %vm15777_vm5, %v7481_v3, %v7488_v62  ;;  %v8232_v51 = vrot.slane %v8231_v19, 4  ;;  %v7508_v58 = vrot.slane %v18230_v21, 4  ;;  %v8238_v52 = vrot.slane %v7504_v36, 5  ;;  %v18240_v0 = vpop.f32.mrf.mxu1  ;;  %9589 = vmatprep.mubr.bf16.mxu0 %v14914_v22 }
 0x443   : > { %7808 = vst [vmem:[#allocation2 + $0x294] sm:$0xf] %v7489_v20  ;;  %v7498_v55 = vsel %vm15777_vm5, %v7490_v28, %v7497_v13  ;;  %v8237_v61 = vrot.slane %v8236_v32, 4  ;;  %v7507_v5 = vsel %vm15777_vm5, %v7499_v42, %v7506_v43  ;;  %v8240_v37 = vrot.slane %v7501_v23, 4  ;;  %v6728_v28 = vld [vmem:[#allocation9 + $0x1b8] sm:$0xff] }
 0x444   : > { %7809 = vst [vmem:[#allocation2 + $0x2a0] sm:$0xf] %v7498_v55  ;;  %v8234_v3 = vsel %vm15702_vm2, %v8232_v51, %v8233_v6  ;;  %7810 = vst [vmem:[#allocation2 + $0x2ac] sm:$0xf] %v7507_v5  ;;  %v6798_v33 = vmul.f32 %v6726_v7, %v6654_v24  ;;  %v6508_v16 = vadd.f32 %v6386_v14, %v19883_v11  ;;  %v6106_v26 = vpop.f32.mrf.mxu1  ;;  %v6655_v24 = vmax.f32 %v6583_v44, 0.0  ;;  %v18258_v6 = vpop.f32.mrf.mxu0  ;;  %v19886_v20 = vld [vmem:[#allocation23_spill] sm:$0xff] }
 0x445   : > { %8467 = vst [vmem:[#allocation2 + $0x29c] sm:$0xf] %v8234_v3  ;;  %v8239_v36 = vsel %vm15702_vm2, %v8237_v61, %v8238_v52  ;;  %v8241_v15 = vor.u32 %v8240_v37, %v8238_v52  ;;  %v6509_v23 = vadd.f32 %v6391_v59, %v19884_v30  ;;  %v6394_v2 = vadd.f32 %v18140_v49, %v18132_v12  ;;  %v14912_v49 = vld [vmem:[#allocation2 + $0x27c] ss:$12 sps:$4 sm:$0xff]   ;;  %v6730_v11 = vld [vmem:[#allocation9 + $0x1c8] sm:$0xff] }
 0x446   : > { %8468 = vst [vmem:[#allocation2 + $0x2a8] sm:$0xf] %v8239_v36  ;;  %v13399_v39 = vpack.c.bf16 %v6798_v33, %v6798_v33  ;;  %v6584_v18 = vadd.f32 %v17279_v29, %v6508_v16  ;;  %v6399_v14 = vadd.f32 %v18089_v53, %v18147_v56  ;;  %v18260_v41 = vpop.f32.mrf.mxu1  ;;  %v6402_v12 = vadd.f32 %v18125_v50, %v18155_v40  ;;  %v6729_v53 = vld [vmem:[#allocation9 + $0x1c0] sm:$0xff]  ;;  %v19887_v52 = vld [vmem:[#allocation66_spill] sm:$0xff]  ;;  %v18271_v37 = vpop.f32.mrf.mxu0 }
 0x447   : > { %v8242_v62 = vrot.slane %v8241_v15, 4  ;;  %v6585_v59 = vadd.f32 %v17279_v29, %v6509_v23  ;;  %v6510_v19 = vadd.f32 %v6394_v2, %v19885_v9  ;;  %v6799_v13 = vmul.f32 %v6727_v63, %v6655_v24  ;;  %v14919_v26 = vld [vmem:[#allocation2 + $0x298] ss:$12 sps:$4 sm:$0xff]  }
 0x448   : > { %v7510_v38 = vshrl.u32 %v13399_v39, 16  ;;  %v7513_v34 = vshll.u32 %v13399_v39, 16  ;;  %7960 = vst [vmem:[#allocation2 + $0x2bc] sm:$0xf] %v13399_v39  ;;  %v6656_v42 = vmax.f32 %v6584_v18, 0.0  ;;  %v6111_v56 = vpop.f32.mrf.mxu1  ;;  %v6511_v51 = vadd.f32 %v6399_v14, %v19886_v20 }
 0x449   : > { %v6657_v32 = vmax.f32 %v6585_v59, 0.0  ;;  %v6586_v43 = vadd.f32 %v17279_v29, %v6510_v19  ;;  %v14900_v7 = vld [vmem:[#allocation2 + $0x284] ss:$12 sps:$4 sm:$0xff]   ;;  %v18269_v55 = vadd.f32 %v6402_v12, %v19887_v52  ;;  %v13400_v40 = vpack.c.bf16 %v6799_v13, %v6799_v13  ;;  %9590 = vmatmul.mubr.bf16.gmra.mxu0 %v14912_v49 }
 0x44a   : > { %v7512_v61 = vrot.slane %v7510_v38, 7  ;;  %v8243_v5 = vrot.slane %v7513_v34, 5  ;;  %v8245_v50 = vrot.slane %v7510_v38, 4  ;;  %v18273_v22 = vpop.f32.mrf.mxu1  ;;  %v6800_v3 = vmul.f32 %v6728_v28, %v6656_v42  ;;  %14150 = vmatprep.mubr.bf16.mxu1 %v14900_v7  ;;  %9597 = vmatprep.mubr.bf16.mxu0 %v14919_v26 }
 0x44b   : > { %v6801_v33 = vmul.f32 %v6729_v53, %v6657_v32  ;;  %v6658_v44 = vmax.f32 %v6586_v43, 0.0  ;;  %v18276_v16 = vadd.f32 %v17279_v29, %v6511_v51  ;;  %7961 = vst [vmem:[#allocation2 + $0x2c8] sm:$0xf] %v13400_v40  ;;  %v7519_v2 = vshrl.u32 %v13400_v40, 16  ;;  %v14917_v56 = vld [vmem:[#allocation2 + $0x294] ss:$12 sps:$4 sm:$0xff]  }
 0x44c   : > { %v7515_v36 = vor.u32 %v7513_v34, %v7512_v61  ;;  %v7517_v15 = vrot.slane %v7512_v61, 4  ;;  %v8244_v63 = vsel %vm15702_vm2, %v8242_v62, %v8243_v5  ;;  %v8246_v30 = vor.u32 %v8245_v50, %v8243_v5  ;;  %v6114_v23 = vpop.f32.mrf.mxu1  ;;  %v18285_v62 = vpop.f32.mrf.mxu0 }
 0x44d   : > { %8469 = vst [vmem:[#allocation2 + $0x2b4] sm:$0xf] %v8244_v63  ;;  %v7522_v39 = vshll.u32 %v13400_v40, 16  ;;  %v13401_v24 = vpack.c.bf16 %v6800_v3, %v6800_v3  ;;  %v13402_v18 = vpack.c.bf16 %v6801_v33, %v6801_v33  ;;  %v14905_v14 = vld [vmem:[#allocation2 + $0x29c] ss:$12 sps:$4 sm:$0xff]   ;;  %v6802_v9 = vmul.f32 %v6730_v11, %v6658_v44 }
 0x44e   : > { %v7516_v28 = vsel %vm15777_vm5, %v7508_v58, %v7515_v36  ;;  %v8247_v59 = vrot.slane %v8246_v30, 4  ;;  %v6659_v19 = vmax.f32 %v18276_v16, 0.0  ;;  %v18287_v12 = vpop.f32.mrf.mxu1  ;;  %v7521_v49 = vrot.slane %v7519_v2, 7  ;;  %14151 = vmatmul.mubr.bf16.gmra.mxu1 %v14905_v14  ;;  %v18291_v40 = vpop.f32.mrf.mxu0  ;;  %v6731_v23 = vld [vmem:[#allocation9 + $0x1d0] sm:$0xff] }
 0x44f   : > { %7811 = vst [vmem:[#allocation2 + $0x2b8] sm:$0xf] %v7516_v28  ;;  %v8248_v38 = vrot.slane %v7522_v39, 5  ;;  %v8250_v34 = vrot.slane %v7519_v2, 4  ;;  %v7528_v13 = vshrl.u32 %v13401_v24, 16  ;;  %v7531_v21 = vshll.u32 %v13401_v24, 16 }
 0x450   : > { %7962 = vst [vmem:[#allocation2 + $0x2d4] sm:$0xf] %v13401_v24  ;;  %7963 = vst [vmem:[#allocation2 + $0x2e0] sm:$0xf] %v13402_v18  ;;  %v7537_v42 = vshrl.u32 %v13402_v18, 16  ;;  %v7540_v53 = vshll.u32 %v13402_v18, 16  ;;  %v13403_v58 = vpack.c.bf16 %v6802_v9, %v6802_v9  ;;  %v6119_v32 = vpop.f32.mrf.mxu1  ;;  %v7524_v43 = vor.u32 %v7522_v39, %v7521_v49  ;;  %v18297_v2 = vpop.f32.mrf.mxu0 }
 0x451   : > { %v7526_v7 = vrot.slane %v7521_v49, 4  ;;  %v8249_v20 = vsel %vm15702_vm2, %v8247_v59, %v8248_v38  ;;  %v8251_v51 = vor.u32 %v8250_v34, %v8248_v38  ;;  %v7530_v52 = vrot.slane %v7528_v13, 7  ;;  %9598 = vmatmul.mubr.bf16.gmra.mxu0 %v14917_v56  ;;  %v19888_v24 = vld [vmem:[#allocation21_spill] sm:$0xff] }
 0x452   : > { %8470 = vst [vmem:[#allocation2 + $0x2c0] sm:$0xf] %v8249_v20  ;;  %v8253_v61 = vrot.slane %v7531_v21, 5  ;;  %v8255_v5 = vrot.slane %v7528_v13, 4  ;;  %v7539_v50 = vrot.slane %v7537_v42, 7  ;;  %v18293_v3 = vpop.f32.mrf.mxu1  ;;  %v7525_v33 = vsel %vm15777_vm5, %v7517_v15, %v7524_v43  ;;  %v19889_v18 = vld [vmem:[#allocation65_spill] sm:$0xff]  ;;  %v9417_v13 = vpop.f32.mrf.mxu0 }
 0x453   : > { %7964 = vst [vmem:[#allocation2 + $0x2ec] sm:$0xf] %v13403_v58  ;;  %v8252_v44 = vrot.slane %v8251_v51, 4  ;;  %v8258_v11 = vrot.slane %v7540_v53, 5  ;;  %v8260_v16 = vrot.slane %v7537_v42, 4  ;;  %v7533_v26 = vor.u32 %v7531_v21, %v7530_v52 }
 0x454   : > { %7812 = vst [vmem:[#allocation2 + $0x2c4] sm:$0xf] %v7525_v33  ;;  %v7535_v36 = vrot.slane %v7530_v52, 4  ;;  %v8256_v63 = vor.u32 %v8255_v5, %v8253_v61  ;;  %v7542_v30 = vor.u32 %v7540_v53, %v7539_v50  ;;  %v6122_v39 = vpop.f32.mrf.mxu1  ;;  %v18301_v14 = vadd.f32 %v19889_v18, %v19888_v24  ;;  %v14924_v43 = vld [vmem:[#allocation2 + $0x2b0] ss:$12 sps:$4 sm:$0xff]  }
 0x455   : > { %v8254_v28 = vsel %vm15702_vm2, %v8252_v44, %v8253_v61  ;;  %v8261_v15 = vor.u32 %v8260_v16, %v8258_v11  ;;  %v7546_v59 = vshrl.u32 %v13403_v58, 16  ;;  %v7534_v9 = vsel %vm15777_vm5, %v7526_v7, %v7533_v26  ;;  %v18319_v61 = vpop.f32.mrf.mxu0  ;;  %v6732_v16 = vld [vmem:[#allocation9 + $0x1d8] sm:$0xff]  ;;  %9605 = vmatprep.mubr.bf16.mxu0 %v14924_v43 }
 0x456   : > { %v8257_v49 = vrot.slane %v8256_v63, 4  ;;  %8471 = vst [vmem:[#allocation2 + $0x2cc] sm:$0xf] %v8254_v28  ;;  %v7543_v38 = vsel %vm15777_vm5, %v7535_v36, %v7542_v30  ;;  %v7549_v34 = vshll.u32 %v13403_v58, 16  ;;  %v18309_v21 = vpop.f32.mrf.mxu1  ;;  %7813 = vst [vmem:[#allocation2 + $0x2d0] sm:$0xf] %v7534_v9  ;;  %v6803_v32 = vmul.f32 %v6731_v23, %v6659_v19 }
 0x457   : > { %7814 = vst [vmem:[#allocation2 + $0x2dc] sm:$0xf] %v7543_v38  ;;  %v8262_v42 = vrot.slane %v8261_v15, 4  ;;  %v18311_v53 = vrot.slane %v7546_v59, 7  ;;  %v8265_v56 = vrot.slane %v7546_v59, 4  ;;  %v6588_v51 = vadd.f32 %v17279_v29, %v18269_v55  ;;  %v9420_v30 = vpop.f32.mrf.mxu0 }
 0x458   : > { %v8259_v7 = vsel %vm15702_vm2, %v8257_v49, %v8258_v11  ;;  %v8263_v20 = vrot.slane %v7549_v34, 5  ;;  %v6407_v58 = vadd.f32 %v18157_v35, %v18169_v57  ;;  %v14922_v52 = vld [vmem:[#allocation2 + $0x2ac] ss:$12 sps:$4 sm:$0xff]   ;;  %v6127_v5 = vpop.f32.mrf.mxu1  ;;  %v7544_v33 = vrot.slane %v7539_v50, 4 }
 0x459   : > { %8472 = vst [vmem:[#allocation2 + $0x2d8] sm:$0xf] %v8259_v7  ;;  %v7551_v44 = vor.u32 %v7549_v34, %v18311_v53  ;;  %v13404_v19 = vpack.c.bf16 %v6803_v32, %v6803_v32  ;;  %v6410_v11 = vadd.f32 %v18190_v8, %v18188_v46  ;;  %v14911_v26 = vld [vmem:[#allocation2 + $0x2b4] ss:$12 sps:$4 sm:$0xff]   ;;  %v6660_v35 = vmax.f32 %v6588_v51, 0.0  ;;  %v19890_v57 = vld [vmem:[#allocation60_spill] sm:$0xff]  ;;  %9606 = vmatmul.mubr.bf16.gmra.mxu0 %v14922_v52  ;;  %v18335_v9 = vpop.f32.mrf.mxu0 }
 0x45a   : > { %v8264_v55 = vsel %vm15702_vm2, %v8262_v42, %v8263_v20  ;;  %v8266_v36 = vor.u32 %v8265_v56, %v8263_v20  ;;  %v6513_v63 = vadd.f32 %v6407_v58, %v19890_v57  ;;  %v18327_v50 = vpop.f32.mrf.mxu1  ;;  %v19891_v46 = vld [vmem:[#allocation73_spill] sm:$0xff]  ;;  %14154 = vmatprep.mubr.bf16.mxu1 %v14911_v26  ;;  %v6415_v59 = vadd.f32 %v18149_v47, %v18201_v60  ;;  %v6733_v42 = vld [vmem:[#allocation9 + $0x1e0] sm:$0xff]  ;;  %v19892_v20 = vld [vmem:[#allocation18_spill] sm:$0xff] }
 0x45b   : > { %v7552_v23 = vsel %vm15777_vm5, %v7544_v33, %v7551_v44  ;;  %8473 = vst [vmem:[#allocation2 + $0x2e4] sm:$0xf] %v8264_v55  ;;  %v7555_v39 = vshrl.u32 %v13404_v19, 16  ;;  %v7558_v24 = vshll.u32 %v13404_v19, 16  ;;  %7965 = vst [vmem:[#allocation2 + $0x2f8] sm:$0xf] %v13404_v19  ;;  %v6514_v8 = vadd.f32 %v6410_v11, %v19891_v46  ;;  %v9425_v5 = vpop.f32.mrf.mxu0 }
 0x45c   : > { %7815 = vst [vmem:[#allocation2 + $0x2e8] sm:$0xf] %v7552_v23  ;;  %v8267_v18 = vrot.slane %v8266_v36, 4  ;;  %v6804_v28 = vmul.f32 %v6732_v16, %v6660_v35  ;;  %v6589_v15 = vadd.f32 %v17279_v29, %v6513_v63  ;;  %v6130_v49 = vpop.f32.mrf.mxu1  ;;  %v6734_v7 = vld [vmem:[#allocation9 + $0x1e8] sm:$0xff]  ;;  %v6515_v51 = vadd.f32 %v6415_v59, %v19892_v20  ;;  %v19893_v57 = vld [vmem:[#allocation68_spill] sm:$0xff] }
 0x45d   : > { %v7557_v38 = vrot.slane %v7555_v39, 7  ;;  %v8268_v34 = vrot.slane %v7558_v24, 5  ;;  %v8270_v13 = vrot.slane %v7555_v39, 4  ;;  %v6590_v56 = vadd.f32 %v17279_v29, %v6514_v8  ;;  %v14930_v52 = vld [vmem:[#allocation2 + $0x2c8] ss:$12 sps:$4 sm:$0xff]  }
 0x45e   : > { %v13405_v32 = vpack.c.bf16 %v6804_v28, %v6804_v28  ;;  %v6661_v43 = vmax.f32 %v6589_v15, 0.0  ;;  %v6418_v58 = vadd.f32 %v18171_v1, %v18218_v10  ;;  %v18341_v47 = vpop.f32.mrf.mxu1  ;;  %v7553_v60 = vrot.slane %v18311_v53, 4  ;;  %v14928_v16 = vld [vmem:[#allocation2 + $0x2c4] ss:$12 sps:$4 sm:$0xff]   ;;  %9613 = vmatprep.mubr.bf16.mxu0 %v14930_v52  ;;  %v18346_v1 = vpop.f32.mrf.mxu0 }
 0x45f   : > { %v7560_v33 = vor.u32 %v7558_v24, %v7557_v38  ;;  %v8269_v44 = vsel %vm15702_vm2, %v8267_v18, %v8268_v34  ;;  %v8271_v19 = vor.u32 %v8270_v13, %v8268_v34  ;;  %v6662_v36 = vmax.f32 %v6590_v56, 0.0  ;;  %v6735_v18 = vld [vmem:[#allocation9 + $0x1f0] sm:$0xff]  ;;  %v14935_v13 = vld [vmem:[#allocation2 + $0x2e0] ss:$12 sps:$4 sm:$0xff]  }
 0x460   : > { %8474 = vst [vmem:[#allocation2 + $0x2f0] sm:$0xf] %v8269_v44  ;;  %v7564_v11 = vshrl.u32 %v13405_v32, 16  ;;  %v7567_v26 = vshll.u32 %v13405_v32, 16  ;;  %7966 = vst [vmem:[#allocation2 + $0x304] sm:$0xf] %v13405_v32  ;;  %v6805_v55 = vmul.f32 %v6733_v42, %v6661_v43  ;;  %v6591_v53 = vadd.f32 %v17279_v29, %v6515_v51  ;;  %v18352_v23 = vpop.f32.mrf.mxu1  ;;  %v9428_v28 = vpop.f32.mrf.mxu0 }
 0x461   : > { %v7561_v10 = vsel %vm15777_vm5, %v7553_v60, %v7560_v33  ;;  %v8272_v35 = vrot.slane %v8271_v19, 4  ;;  %v6516_v63 = vadd.f32 %v6418_v58, %v19893_v57  ;;  %v14916_v30 = vld [vmem:[#allocation2 + $0x2cc] ss:$12 sps:$4 sm:$0xff]   ;;  %9614 = vmatmul.mubr.bf16.gmra.mxu0 %v14928_v16  ;;  %v6806_v15 = vmul.f32 %v6734_v7, %v6662_v36  ;;  %v6736_v52 = vld [vmem:[#allocation9 + $0x1f8] sm:$0xff]  ;;  %v19894_v60 = vld [vmem:[#allocation25_spill] sm:$0xff] }
 0x462   : > { %7816 = vst [vmem:[#allocation2 + $0x2f4] sm:$0xf] %v7561_v10  ;;  %v7566_v39 = vrot.slane %v7564_v11, 7  ;;  %v8273_v24 = vrot.slane %v7567_v26, 5  ;;  %v8275_v46 = vrot.slane %v7564_v11, 4  ;;  %v13406_v8 = vpack.c.bf16 %v6805_v55, %v6805_v55  ;;  %14155 = vmatmul.mubr.bf16.gmra.mxu1 %v14916_v30  ;;  %9621 = vmatprep.mubr.bf16.mxu0 %v14935_v13  ;;  %v18359_v5 = vpop.f32.mrf.mxu1 }
 0x463   : > { %v6663_v59 = vmax.f32 %v6591_v53, 0.0  ;;  %v6592_v49 = vadd.f32 %v17279_v29, %v6516_v63  ;;  %v6423_v34 = vadd.f32 %v18216_v17, %v18228_v54  ;;  %v7562_v42 = vrot.slane %v7557_v38, 4  ;;  %v14933_v44 = vld [vmem:[#allocation2 + $0x2dc] ss:$12 sps:$4 sm:$0xff]  }
 0x464   : > { %v7569_v56 = vor.u32 %v7567_v26, %v7566_v39  ;;  %v8274_v32 = vsel %vm15702_vm2, %v8272_v35, %v8273_v24  ;;  %v8276_v43 = vor.u32 %v8275_v46, %v8273_v24  ;;  %7967 = vst [vmem:[#allocation2 + $0x310] sm:$0xf] %v13406_v8  ;;  %v7573_v20 = vshrl.u32 %v13406_v8, 16 }
 0x465   : > { %8475 = vst [vmem:[#allocation2 + $0x2fc] sm:$0xf] %v8274_v32  ;;  %v7576_v51 = vshll.u32 %v13406_v8, 16  ;;  %v13407_v58 = vpack.c.bf16 %v6806_v15, %v6806_v15  ;;  %v6807_v7 = vmul.f32 %v6735_v18, %v6663_v59  ;;  %v6664_v38 = vmax.f32 %v6592_v49, 0.0  ;;  %v18367_v46 = vpop.f32.mrf.mxu0  ;;  %v18369_v8 = vpop.f32.mrf.mxu1 }
 0x466   : > { %v7570_v17 = vsel %vm15777_vm5, %v7562_v42, %v7569_v56  ;;  %v8277_v54 = vrot.slane %v8276_v43, 4  ;;  %v6517_v33 = vadd.f32 %v6423_v34, %v19894_v60  ;;  %v7575_v19 = vrot.slane %v7573_v20, 7 }
 0x467   : > { %7817 = vst [vmem:[#allocation2 + $0x300] sm:$0xf] %v7570_v17  ;;  %v8278_v16 = vrot.slane %v7576_v51, 5  ;;  %v8280_v11 = vrot.slane %v7573_v20, 4  ;;  %v7582_v26 = vshrl.u32 %v13407_v58, 16  ;;  %v7571_v55 = vrot.slane %v7566_v39, 4  ;;  %v9433_v42 = vpop.f32.mrf.mxu0 }
 0x468   : > { %7968 = vst [vmem:[#allocation2 + $0x31c] sm:$0xf] %v13407_v58  ;;  %v7585_v36 = vshll.u32 %v13407_v58, 16  ;;  %v13408_v10 = vpack.c.bf16 %v6807_v7, %v6807_v7  ;;  %v6808_v35 = vmul.f32 %v6736_v52, %v6664_v38  ;;  %v14921_v53 = vld [vmem:[#allocation2 + $0x2e4] ss:$12 sps:$4 sm:$0xff]   ;;  %v7578_v57 = vor.u32 %v7576_v51, %v7575_v19 }
 0x469   : > { %v8279_v63 = vsel %vm15702_vm2, %v8277_v54, %v8278_v16  ;;  %v8281_v30 = vor.u32 %v8280_v11, %v8278_v16  ;;  %v6593_v24 = vadd.f32 %v17279_v29, %v6517_v33  ;;  %v7584_v18 = vrot.slane %v7582_v26, 7  ;;  %14158 = vmatprep.mubr.bf16.mxu1 %v14921_v53  ;;  %9622 = vmatmul.mubr.bf16.gmra.mxu0 %v14933_v44  ;;  %v18375_v17 = vpop.f32.mrf.mxu0 }
 0x46a   : > { %8476 = vst [vmem:[#allocation2 + $0x308] sm:$0xf] %v8279_v63  ;;  %v8283_v28 = vrot.slane %v7585_v36, 5  ;;  %v8285_v15 = vrot.slane %v7582_v26, 4  ;;  %v7591_v39 = vshrl.u32 %v13408_v10, 16  ;;  %v7579_v59 = vsel %vm15777_vm5, %v7571_v55, %v7578_v57  ;;  %v6737_v55 = vld [vmem:[#allocation9 + $0x200] sm:$0xff] }
 0x46b   : > { %7969 = vst [vmem:[#allocation2 + $0x328] sm:$0xf] %v13408_v10  ;;  %v8282_v49 = vrot.slane %v8281_v30, 4  ;;  %v7594_v34 = vshll.u32 %v13408_v10, 16  ;;  %v13409_v13 = vpack.c.bf16 %v6808_v35, %v6808_v35  ;;  %v7580_v56 = vrot.slane %v7575_v19, 4  ;;  %v18377_v54 = vpop.f32.mrf.mxu1  ;;  %v9436_v10 = vpop.f32.mrf.mxu0 }
 0x46c   : > { %7818 = vst [vmem:[#allocation2 + $0x30c] sm:$0xf] %v7579_v59  ;;  %v7587_v32 = vor.u32 %v7585_v36, %v7584_v18  ;;  %v8286_v43 = vor.u32 %v8285_v15, %v8283_v28  ;;  %v7593_v20 = vrot.slane %v7591_v39, 7  ;;  %v8290_v7 = vrot.slane %v7591_v39, 4  ;;  %v14940_v36 = vld [vmem:[#allocation2 + $0x2f8] ss:$12 sps:$4 sm:$0xff]  }
 0x46d   : > { %v8284_v51 = vsel %vm15702_vm2, %v8282_v49, %v8283_v28  ;;  %v8288_v58 = vrot.slane %v7594_v34, 5  ;;  %v7600_v52 = vshrl.u32 %v13409_v13, 16  ;;  %7970 = vst [vmem:[#allocation2 + $0x334] sm:$0xf] %v13409_v13  ;;  %v7589_v60 = vrot.slane %v7584_v18, 4  ;;  %9629 = vmatprep.mubr.bf16.mxu0 %v14940_v36  ;;  %v18390_v59 = vpop.f32.mrf.mxu0  ;;  %v18392_v49 = vpop.f32.mrf.mxu1  ;;  %v6739_v10 = vld [vmem:[#allocation9 + $0x210] sm:$0xff] }
 0x46e   : > { %v7588_v38 = vsel %vm15777_vm5, %v7580_v56, %v7587_v32  ;;  %v8287_v33 = vrot.slane %v8286_v43, 4  ;;  %8477 = vst [vmem:[#allocation2 + $0x314] sm:$0xf] %v8284_v51  ;;  %v7596_v44 = vor.u32 %v7594_v34, %v7593_v20  ;;  %v7603_v11 = vshll.u32 %v13409_v13, 16  ;;  %v14938_v30 = vld [vmem:[#allocation2 + $0x2f4] ss:$12 sps:$4 sm:$0xff]  }
 0x46f   : > { %7819 = vst [vmem:[#allocation2 + $0x318] sm:$0xf] %v7588_v38  ;;  %v8291_v19 = vor.u32 %v8290_v7, %v8288_v58  ;;  %v18381_v16 = vrot.slane %v7600_v52, 7  ;;  %v8295_v26 = vrot.slane %v7600_v52, 4  ;;  %v6665_v57 = vmax.f32 %v6593_v24, 0.0  ;;  %v19895_v13 = vld [vmem:[#allocation32_spill] sm:$0xff]  ;;  %v9441_v51 = vpop.f32.mrf.mxu0 }
 0x470   : > { %v7597_v35 = vsel %vm15777_vm5, %v7589_v60, %v7596_v44  ;;  %v8289_v53 = vsel %vm15702_vm2, %v8287_v33, %v8288_v58  ;;  %v6426_v63 = vadd.f32 %v18238_v48, %v18240_v0  ;;  %v7598_v18 = vrot.slane %v7593_v20, 4  ;;  %v6738_v38 = vld [vmem:[#allocation9 + $0x208] sm:$0xff]  ;;  %v19898_v60 = vld [vmem:[#allocation63_spill] sm:$0xff] }
 0x471   : > { %7820 = vst [vmem:[#allocation2 + $0x324] sm:$0xf] %v7597_v35  ;;  %v8292_v28 = vrot.slane %v8291_v19, 4  ;;  %8478 = vst [vmem:[#allocation2 + $0x320] sm:$0xf] %v8289_v53  ;;  %v7605_v15 = vor.u32 %v7603_v11, %v18381_v16  ;;  %v8293_v39 = vrot.slane %v7603_v11, 5  ;;  %v6809_v34 = vmul.f32 %v6737_v55, %v6665_v57  ;;  %9630 = vmatmul.mubr.bf16.gmra.mxu0 %v14938_v30  ;;  %v18415_v19 = vpop.f32.mrf.mxu1 }
 0x472   : > { %v6518_v42 = vadd.f32 %v6426_v63, %v19895_v13  ;;  %v6431_v24 = vadd.f32 %v18199_v25, %v18260_v41  ;;  %v6434_v48 = vadd.f32 %v18226_v27, %v18273_v22  ;;  %v14926_v0 = vld [vmem:[#allocation2 + $0x2fc] ss:$12 sps:$4 sm:$0xff]   ;;  %v6439_v20 = vadd.f32 %v18271_v37, %v18287_v12  ;;  %v18413_v12 = vpop.f32.mrf.mxu0  ;;  %v6740_v35 = vld [vmem:[#allocation9 + $0x218] sm:$0xff] }
 0x473   : > { %v7606_v56 = vsel %vm15777_vm5, %v7598_v18, %v7605_v15  ;;  %v8294_v32 = vsel %vm15702_vm2, %v8292_v28, %v8293_v39  ;;  %v8296_v43 = vor.u32 %v8295_v26, %v8293_v39  ;;  %v13410_v58 = vpack.c.bf16 %v6809_v34, %v6809_v34  ;;  %v19896_v41 = vld [vmem:[#allocation16_spill] sm:$0xff]  ;;  %14159 = vmatmul.mubr.bf16.gmra.mxu1 %v14926_v0  ;;  %v14945_v30 = vld [vmem:[#allocation2 + $0x310] ss:$12 sps:$4 sm:$0xff]  }
 0x474   : > { %7821 = vst [vmem:[#allocation2 + $0x330] sm:$0xf] %v7606_v56  ;;  %8479 = vst [vmem:[#allocation2 + $0x32c] sm:$0xf] %v8294_v32  ;;  %v6594_v25 = vadd.f32 %v17279_v29, %v6518_v42  ;;  %v6519_v27 = vadd.f32 %v6431_v24, %v19896_v41  ;;  %v19897_v22 = vld [vmem:[#allocation64_spill] sm:$0xff]  ;;  %v6521_v33 = vadd.f32 %v6439_v20, %v19898_v60  ;;  %v9444_v18 = vpop.f32.mrf.mxu0  ;;  %9637 = vmatprep.mubr.bf16.mxu0 %v14945_v30 }
 0x475   : > { %v6520_v7 = vadd.f32 %v6434_v48, %v19897_v22  ;;  %v8297_v52 = vrot.slane %v8296_v43, 4  ;;  %v6442_v44 = vadd.f32 %v18291_v40, %v18293_v3  ;;  %v6447_v37 = vadd.f32 %v18258_v6, %v18309_v21  ;;  %7971 = vst [vmem:[#allocation2 + $0x340] sm:$0xf] %v13410_v58  ;;  %v6741_v53 = vld [vmem:[#allocation9 + $0x220] sm:$0xff]  ;;  %v6742_v22 = vld [vmem:[#allocation9 + $0x228] sm:$0xff] }
 0x476   : > { %v7609_v11 = vshrl.u32 %v13410_v58, 16  ;;  %v7612_v26 = vshll.u32 %v13410_v58, 16  ;;  %v6666_v55 = vmax.f32 %v6594_v25, 0.0  ;;  %v6595_v36 = vadd.f32 %v17279_v29, %v6519_v27  ;;  %v19899_v6 = vld [vmem:[#allocation72_spill] sm:$0xff]  ;;  %v18427_v56 = vpop.f32.mrf.mxu0 }
 0x477   : > { %v6596_v57 = vadd.f32 %v17279_v29, %v6520_v7  ;;  %v6597_v40 = vadd.f32 %v17279_v29, %v6521_v33  ;;  %v6522_v3 = vadd.f32 %v6442_v44, %v18301_v14  ;;  %v6523_v21 = vadd.f32 %v6447_v37, %v19899_v6  ;;  %v14943_v63 = vld [vmem:[#allocation2 + $0x30c] ss:$12 sps:$4 sm:$0xff]   ;;  %v18429_v14 = vpop.f32.mrf.mxu1 }
 0x478   : > { %v18422_v28 = vrot.slane %v7609_v11, 7  ;;  %v8298_v15 = vrot.slane %v7612_v26, 5  ;;  %v8300_v39 = vrot.slane %v7609_v11, 4  ;;  %v6810_v34 = vmul.f32 %v6738_v38, %v6666_v55  ;;  %v18425_v0 = vld [vmem:[#allocation2 + $0x314] ss:$12 sps:$4 sm:$0xff]   ;;  %v9449_v7 = vpop.f32.mrf.mxu0 }
 0x479   : > { %v6667_v13 = vmax.f32 %v6595_v36, 0.0  ;;  %v6668_v42 = vmax.f32 %v6596_v57, 0.0  ;;  %v6669_v24 = vmax.f32 %v6597_v40, 0.0  ;;  %v6598_v48 = vadd.f32 %v17279_v29, %v6522_v3  ;;  %9638 = vmatmul.mubr.bf16.gmra.mxu0 %v14943_v63  ;;  %14162 = vmatprep.mubr.bf16.mxu1 %v18425_v0  ;;  %v18443_v36 = vpop.f32.mrf.mxu1 }
 0x47a   : > { %v7607_v32 = vrot.slane %v18381_v16, 4  ;;  %v7614_v43 = vor.u32 %v7612_v26, %v18422_v28  ;;  %v8299_v20 = vsel %vm15702_vm2, %v8297_v52, %v8298_v15  ;;  %v8301_v51 = vor.u32 %v8300_v39, %v8298_v15  ;;  %v14952_v52 = vld [vmem:[#allocation2 + $0x328] ss:$12 sps:$4 sm:$0xff]   ;;  %v18441_v55 = vpop.f32.mrf.mxu0 }
 0x47b   : > { %8480 = vst [vmem:[#allocation2 + $0x338] sm:$0xf] %v8299_v20  ;;  %v13411_v58 = vpack.c.bf16 %v6810_v34, %v6810_v34  ;;  %v6811_v25 = vmul.f32 %v6739_v10, %v6667_v13  ;;  %v6812_v41 = vmul.f32 %v6740_v35, %v6668_v42  ;;  %v6813_v27 = vmul.f32 %v6741_v53, %v6669_v24  ;;  %v14950_v34 = vld [vmem:[#allocation2 + $0x324] ss:$12 sps:$4 sm:$0xff]  }
 0x47c   : > { %v7615_v38 = vsel %vm15777_vm5, %v7607_v32, %v7614_v43  ;;  %v8302_v16 = vrot.slane %v8301_v51, 4  ;;  %v6670_v60 = vmax.f32 %v6598_v48, 0.0  ;;  %v18439_v33 = vadd.f32 %v17279_v29, %v6523_v21  ;;  %9645 = vmatprep.mubr.bf16.mxu0 %v14952_v52  ;;  %v9452_v63 = vpop.f32.mrf.mxu0  ;;  %v18449_v48 = vpop.f32.mrf.mxu1 }
 0x47d   : > { %7822 = vst [vmem:[#allocation2 + $0x33c] sm:$0xf] %v7615_v38  ;;  %v7618_v44 = vshrl.u32 %v13411_v58, 16  ;;  %v7621_v37 = vshll.u32 %v13411_v58, 16  ;;  %7972 = vst [vmem:[#allocation2 + $0x34c] sm:$0xf] %v13411_v58  ;;  %v13412_v11 = vpack.c.bf16 %v6811_v25, %v6811_v25  ;;  %v13413_v26 = vpack.c.bf16 %v6812_v41, %v6812_v41 }
 0x47e   : > { %v7616_v10 = vrot.slane %v18422_v28, 4  ;;  %v13414_v35 = vpack.c.bf16 %v6813_v27, %v6813_v27  ;;  %v6814_v53 = vmul.f32 %v6742_v22, %v6670_v60  ;;  %v6671_v57 = vmax.f32 %v18439_v33, 0.0  ;;  %v18451_v32 = vpop.f32.mrf.mxu0 }
 0x47f   : > { %v7620_v40 = vrot.slane %v7618_v44, 7  ;;  %v8303_v3 = vrot.slane %v7621_v37, 5  ;;  %v8305_v6 = vrot.slane %v7618_v44, 4  ;;  %v7627_v21 = vshrl.u32 %v13412_v11, 16  ;;  %7973 = vst [vmem:[#allocation2 + $0x358] sm:$0xf] %v13412_v11 }
 0x480   : > { %7974 = vst [vmem:[#allocation2 + $0x364] sm:$0xf] %v13413_v26  ;;  %v7630_v30 = vshll.u32 %v13412_v11, 16  ;;  %v7636_v18 = vshrl.u32 %v13413_v26, 16  ;;  %v7639_v15 = vshll.u32 %v13413_v26, 16  ;;  %v7645_v39 = vshrl.u32 %v13414_v35, 16  ;;  %v9457_v38 = vpop.f32.mrf.mxu0 }
 0x481   : > { %7975 = vst [vmem:[#allocation2 + $0x370] sm:$0xf] %v13414_v35  ;;  %v7623_v13 = vor.u32 %v7621_v37, %v7620_v40  ;;  %v7625_v28 = vrot.slane %v7620_v40, 4  ;;  %v8304_v42 = vsel %vm15702_vm2, %v8302_v16, %v8303_v3  ;;  %v8306_v24 = vor.u32 %v8305_v6, %v8303_v3  ;;  %9646 = vmatmul.mubr.bf16.gmra.mxu0 %v14950_v34  ;;  %v6743_v26 = vld [vmem:[#allocation9 + $0x230] sm:$0xff]  ;;  %v18462_v40 = vpop.f32.mrf.mxu1 }
 0x482   : > { %8481 = vst [vmem:[#allocation2 + $0x344] sm:$0xf] %v8304_v42  ;;  %v7629_v43 = vrot.slane %v7627_v21, 7  ;;  %v8308_v20 = vrot.slane %v7630_v30, 5  ;;  %v8310_v51 = vrot.slane %v7627_v21, 4  ;;  %v7638_v58 = vrot.slane %v7636_v18, 7  ;;  %v18464_v3 = vpop.f32.mrf.mxu0 }
 0x483   : > { %v7624_v25 = vsel %vm15777_vm5, %v7616_v10, %v7623_v13  ;;  %v8307_v41 = vrot.slane %v8306_v24, 4  ;;  %v8313_v27 = vrot.slane %v7639_v15, 5  ;;  %v8315_v22 = vrot.slane %v7636_v18, 4  ;;  %v18455_v7 = vld [vmem:[#allocation2 + $0x32c] ss:$12 sps:$4 sm:$0xff]  }
 0x484   : > { %7823 = vst [vmem:[#allocation2 + $0x348] sm:$0xf] %v7624_v25  ;;  %v7632_v16 = vor.u32 %v7630_v30, %v7629_v43  ;;  %v7634_v60 = vrot.slane %v7629_v43, 4  ;;  %v8311_v33 = vor.u32 %v8310_v51, %v8308_v20  ;;  %v7641_v52 = vor.u32 %v7639_v15, %v7638_v58  ;;  %14163 = vmatmul.mubr.bf16.gmra.mxu1 %v18455_v7  ;;  %v9460_v34 = vpop.f32.mrf.mxu0  ;;  %v19900_v51 = vld [vmem:[#allocation74_spill] sm:$0xff] }
 0x485   : > { %v8309_v44 = vsel %vm15702_vm2, %v8307_v41, %v8308_v20  ;;  %v8316_v37 = vor.u32 %v8315_v22, %v8313_v27  ;;  %v7647_v11 = vrot.slane %v7645_v39, 7  ;;  %v6450_v10 = vadd.f32 %v18285_v62, %v18327_v50  ;;  %v6744_v22 = vld [vmem:[#allocation9 + $0x238] sm:$0xff] }
 0x486   : > { %v7633_v6 = vsel %vm15777_vm5, %v7625_v28, %v7632_v16  ;;  %v8312_v21 = vrot.slane %v8311_v33, 4  ;;  %8482 = vst [vmem:[#allocation2 + $0x350] sm:$0xf] %v8309_v44  ;;  %v7642_v63 = vsel %vm15777_vm5, %v7634_v60, %v7641_v52  ;;  %v7648_v30 = vshll.u32 %v13414_v35, 16  ;;  %v18473_v35 = vpop.f32.mrf.mxu1 }
 0x487   : > { %7824 = vst [vmem:[#allocation2 + $0x354] sm:$0xf] %v7633_v6  ;;  %v7643_v18 = vrot.slane %v7638_v58, 4  ;;  %7825 = vst [vmem:[#allocation2 + $0x360] sm:$0xf] %v7642_v63  ;;  %v8317_v15 = vrot.slane %v8316_v37, 4  ;;  %v13415_v50 = vpack.c.bf16 %v6814_v53, %v6814_v53  ;;  %v6815_v43 = vmul.f32 %v6743_v26, %v6671_v57  ;;  %v18475_v58 = vpop.f32.mrf.mxu0 }
 0x488   : > { %v8320_v62 = vrot.slane %v7645_v39, 4  ;;  %v8314_v13 = vsel %vm15702_vm2, %v8312_v21, %v8313_v27  ;;  %v7650_v42 = vor.u32 %v7648_v30, %v7647_v11  ;;  %v8318_v24 = vrot.slane %v7648_v30, 5  ;;  %v14960_v6 = vld [vmem:[#allocation2 + $0x340] ss:$12 sps:$4 sm:$0xff]  }
 0x489   : > { %8483 = vst [vmem:[#allocation2 + $0x35c] sm:$0xf] %v8314_v13  ;;  %v7654_v28 = vshrl.u32 %v13415_v50, 16  ;;  %v7657_v20 = vshll.u32 %v13415_v50, 16  ;;  %7976 = vst [vmem:[#allocation2 + $0x37c] sm:$0xf] %v13415_v50  ;;  %v6524_v25 = vadd.f32 %v6450_v10, %v19900_v51  ;;  %v13416_v27 = vpack.c.bf16 %v6815_v43, %v6815_v43  ;;  %v9465_v52 = vpop.f32.mrf.mxu0  ;;  %9653 = vmatprep.mubr.bf16.mxu0 %v14960_v6 }
 0x48a   : > { %v7651_v53 = vsel %vm15777_vm5, %v7643_v18, %v7650_v42  ;;  %v8319_v39 = vsel %vm15702_vm2, %v8317_v15, %v8318_v24  ;;  %v8321_v41 = vor.u32 %v8320_v62, %v8318_v24  ;;  %v18484_v10 = vadd.f32 %v18341_v47, %v18335_v9  ;;  %v14120_v62 = vpop.f32.mrf.mxu1  ;;  %v14966_v43 = vld [vmem:[#allocation2 + $0x358] ss:$12 sps:$4 sm:$0xff]  }
 0x48b   : > { %7826 = vst [vmem:[#allocation2 + $0x36c] sm:$0xf] %v7651_v53  ;;  %8484 = vst [vmem:[#allocation2 + $0x368] sm:$0xf] %v8319_v39  ;;  %v7656_v57 = vrot.slane %v7654_v28, 7  ;;  %v8323_v38 = vrot.slane %v7657_v20, 5  ;;  %v6600_v60 = vadd.f32 %v17279_v29, %v6524_v25  ;;  %v18486_v50 = vpop.f32.mrf.mxu0  ;;  %v18496_v24 = vadd.f32 %v18352_v23, %v18297_v2 }
 0x48c   : > { %v8325_v16 = vrot.slane %v7654_v28, 4  ;;  %v14958_v33 = vld [vmem:[#allocation2 + $0x33c] ss:$12 sps:$4 sm:$0xff]   ;;  %v8322_v44 = vrot.slane %v8321_v41, 4  ;;  %v7663_v37 = vshrl.u32 %v13416_v27, 16  ;;  %v7666_v26 = vshll.u32 %v13416_v27, 16 }
 0x48d   : > { %7977 = vst [vmem:[#allocation2 + $0x388] sm:$0xf] %v13416_v27  ;;  %v7652_v21 = vrot.slane %v7647_v11, 4  ;;  %v7659_v63 = vor.u32 %v7657_v20, %v7656_v57  ;;  %v6672_v18 = vmax.f32 %v6600_v60, 0.0  ;;  %v14942_v15 = vld [vmem:[#allocation2 + $0x344] ss:$12 sps:$4 sm:$0xff]   ;;  %9654 = vmatmul.mubr.bf16.gmra.mxu0 %v14958_v33  ;;  %v9468_v28 = vpop.f32.mrf.mxu0  ;;  %v18501_v53 = vadd.f32 %v18359_v5, %v18346_v1  ;;  %v9752_v27 = vpop.f32.mrf.mxu1 }
 0x48e   : > { %v8326_v30 = vor.u32 %v8325_v16, %v8323_v38  ;;  %v8324_v29 = vsel %vm15702_vm2, %v8322_v44, %v8323_v38  ;;  %v18490_v34 = vrot.slane %v7663_v37, 7  ;;  %v8328_v13 = vrot.slane %v7666_v26, 5  ;;  %14166 = vmatprep.mubr.bf16.mxu1 %v14942_v15  ;;  %v14956_v23 = vld [vmem:[#allocation2 + $0x40] ss:$12 sps:$4 sm:$0xff]   ;;  %9661 = vmatprep.mubr.bf16.mxu0 %v14966_v43  ;;  %v8489_v15 = vld [vmem:[#allocation2 + $0x398] sm:$0xf] }
 0x48f   : > { %v8330_v42 = vrot.slane %v7663_v37, 4  ;;  %v7660_v9 = vsel %vm15777_vm5, %v7652_v21, %v7659_v63  ;;  %8485 = vst [vmem:[#allocation2 + $0x374] sm:$0xf] %v8324_v29  ;;  %v6816_v11 = vmul.f32 %v6744_v22, %v6672_v18  ;;  %v7661_v20 = vrot.slane %v7656_v57, 4  ;;  %v9471_v22 = vpop.f32.mrf.mxu0  ;;  %v14970_v28 = vld [vmem:[#allocation8 + $0x1b8] sm:$0xff]  }
 0x490   : > { %v8327_v47 = vrot.slane %v8326_v30, 4  ;;  %7827 = vst [vmem:[#allocation2 + $0x378] sm:$0xf] %v7660_v9  ;;  %v7668_v51 = vor.u32 %v7666_v26, %v18490_v34  ;;  %v18507_v2 = vadd.f32 %v18377_v54, %v18390_v59  ;;  %v18513_v1 = vadd.f32 %v18392_v49, %v18367_v46  ;;  %v14974_v9 = vld [vmem:[#allocation8 + $0x230] sm:$0xff]   ;;  %v14975_v18 = vld [vmem:[#allocation8 + $0x198] sm:$0xff]  }
 0x491   : > { %v8331_v25 = vor.u32 %v8330_v42, %v8328_v13  ;;  %v13417_v41 = vpack.c.bf16 %v6816_v11, %v6816_v11  ;;  %v18517_v5 = vadd.f32 %v18415_v19, %v18413_v12  ;;  %v18521_v60 = vadd.f32 %v18449_v48, %v18427_v56  ;;  %v9473_v33 = vpop.f32.mrf.mxu0  ;;  %v14967_v19 = vld [vmem:[#allocation2 + $0x44] ss:$12 sps:$4 sm:$0xff]   ;;  %v14121_v56 = vpop.f32.mrf.mxu1  ;;  %v14964_v48 = vld [vmem:[#allocation2 + $0x354] ss:$12 sps:$4 sm:$0xff]  }
 0x492   : > { %v8329_v39 = vsel %vm15702_vm2, %v8327_v47, %v8328_v13  ;;  %v7669_v57 = vsel %vm15777_vm5, %v7661_v20, %v7668_v51  ;;  %v14948_v38 = vld [vmem:[#allocation2 + $0x35c] ss:$12 sps:$4 sm:$0xff]   ;;  %v18525_v46 = vadd.f32 %v18443_v36, %v18451_v32  ;;  %v18529_v49 = vadd.f32 %v18462_v40, %v18464_v3  ;;  %v14963_v11 = vld [vmem:[#allocation2 + $0x58] ss:$12 sps:$4 sm:$0xff]  }
 0x493   : > { %8486 = vst [vmem:[#allocation2 + $0x380] sm:$0xf] %v8329_v39  ;;  %7828 = vst [vmem:[#allocation2 + $0x384] sm:$0xf] %v7669_v57  ;;  %v8332_v54 = vrot.slane %v8331_v25, 4  ;;  %v7672_v59 = vshrl.u32 %v13417_v41, 16  ;;  %14167 = vmatmul.mubr.bf16.gmra.mxu1 %v14948_v38  ;;  %v18532_v12 = vadd.f32 %v9752_v27, %v18475_v58  ;;  %v9474_v26 = vpop.f32.mrf.mxu0  ;;  %v18537_v32 = vadd.f32 %v14120_v62, %v9471_v22  ;;  %v18551_v42 = vpop.f32.mrf.mxu1 }
 0x494   : > { %v7675_v16 = vshll.u32 %v13417_v41, 16  ;;  %7978 = vst [vmem:[#allocation2 + $0x394] sm:$0xf] %v13417_v41  ;;  %10167 = vmatprep.mubr.bf16.mxu1 %v14956_v23  ;;  %v7670_v6 = vrot.slane %v18490_v34, 4  ;;  %v7832_v36 = vld [vmem:[#allocation2 + $0x39c] sm:$0x1]  ;;  %v18539_v40 = vadd.f32 %v14121_v56, %v9474_v26 }
 0x495   : > { %v7674_v52 = vrot.slane %v7672_v59, 7  ;;  %v8335_v37 = vrot.slane %v7672_v59, 4  ;;  %9662 = vmatmul.mubr.bf16.gmra.mxu0 %v14964_v48  ;;  %v9476_v30 = vpop.f32.mrf.mxu0  ;;  %v14969_v20 = vld [vmem:[#allocation2 + $0x5c] ss:$12 sps:$4 sm:$0xff]   ;;  %v14979_v39 = vld [vmem:[#allocation8 + $0x228] sm:$0xff]  }
 0x496   : > { %v8333_v44 = vrot.slane %v7675_v16, 5  ;;  %14186 = vmatprep.mubr.bf16.mxu0 %v14967_v19  ;;  %v15212_v27 = vld [vmem:[#allocation2 + $0x74] ss:$12 sps:$4 sm:$0xff]   ;;  %v14971_v22 = vld [vmem:[#allocation8 + $0x1b0] sm:$0xff]   ;;  %v14984_v33 = vld [vmem:[#allocation8 + $0x220] sm:$0xff]  }
 0x497   : > { %v7677_v3 = vor.u32 %v7675_v16, %v7674_v52  ;;  %v7679_v58 = vrot.slane %v7674_v52, 4  ;;  %v9479_v13 = vpop.f32.mrf.mxu0  ;;  %v14972_v19 = vld [vmem:[#allocation8 + $0x1a8] sm:$0xff]   ;;  %v15214_v48 = vld [vmem:[#allocation2 + $0x8c] ss:$12 sps:$4 sm:$0xff]  }
 0x498   : > { %v8334_v21 = vsel %vm15702_vm2, %v8332_v54, %v8333_v44  ;;  %v8336_v63 = vor.u32 %v8335_v37, %v8333_v44  ;;  %v14961_v54 = vld [vmem:[#allocation2 + $0x54] ss:$12 sps:$4 sm:$0xff]   ;;  %v15213_v52 = vld [vmem:[#allocation2 + $0x70] ss:$12 sps:$4 sm:$0xff]   ;;  %v15216_v30 = vld [vmem:[#allocation2 + $0x6c] ss:$12 sps:$4 sm:$0xff]  }
 0x499   : > { %8487 = vst [vmem:[#allocation2 + $0x38c] sm:$0xf] %v8334_v21  ;;  %v7678_v62 = vsel %vm15777_vm5, %v7670_v6, %v7677_v3  ;;  %v7833_v29 = vsel %vm7831_vm13, %v7679_v58, %v7832_v36  ;;  %v9481_v43 = vpop.f32.mrf.mxu0  ;;  %v15215_v6 = vld [vmem:[#allocation2 + $0xa4] ss:$12 sps:$4 sm:$0xff]   ;;  %v14973_v36 = vld [vmem:[#allocation8 + $0x1a0] sm:$0xff]  }
 0x49a   : > { %v8337_v34 = vrot.slane %v8336_v63, 4  ;;  %7829 = vst [vmem:[#allocation2 + $0x390] sm:$0xf] %v7678_v62  ;;  %7834 = vst [vmem:[#allocation2 + $0x39c] sm:$0x1] %v7833_v29 }
 0x49b   : > { %10168 = vmatmul.mubr.bf16.vlgmr.msra.gmra.mxu1 %v14954_v45  ;;  %v18555_v51 = vpop.f32.mrf.mxu0  ;;  %v15218_v45 = vld [vmem:[#allocation2 + $0xbc] ss:$12 sps:$4 sm:$0xff]  }
 0x49c   : > { %v8490_v47 = vsel %vm18545_vm14, %v8337_v34, %v8489_v15  ;;  %10175 = vmatprep.mubr.bf16.mxu1 %v14963_v11  ;;  %14251 = vmatpush3.bf16.msra.mxu1 %v15211_v4  ;;  %v15217_v15 = vld [vmem:[#allocation2 + $0x88] ss:$12 sps:$4 sm:$0xff]   ;;  %v14992_v34 = vld [vmem:[#allocation8 + $0x218] sm:$0xff]   ;;  %v14976_v11 = vld [vmem:[#allocation8 + $0x190] sm:$0xff]  }
 0x49d   : > { %8491 = vst [vmem:[#allocation2 + $0x398] sm:$0xf] %v8490_v47  ;;  %v14124_v25 = vpop.f32.mrf.mxu1  ;;  %14252 = vmatprep.subr.bf16.mxu1 %v14974_v9  ;;  %14187 = vmatmul.mubr.bf16.vlgmr.msra.gmra.mxu0 %v14969_v20  ;;  %v9484_v41 = vpop.f32.mrf.mxu0  ;;  %v15219_v47 = vld [vmem:[#allocation2 + $0xd4] ss:$12 sps:$4 sm:$0xff]   ;;  %v15220_v20 = vld [vmem:[#allocation2 + $0x84] ss:$12 sps:$4 sm:$0xff]  }
 0x49e   : > { %14190 = vmatprep.mubr.bf16.mxu0 %v15212_v27  ;;  %11547 = vmatpush1.bf16.msra.mxu0 %v14970_v28 }
 0x49f   : > { %v9768_v23 = vpop.f32.mrf.mxu1  ;;  %v9487_v38 = vpop.f32.mrf.mxu0  ;;  %11548 = vmatprep.subr.bf16.mxu0 %v19634_v31 }
 0x4a0   : > { %v18557_v57 = vadd.f32 %v9768_v23, %v9479_v13  ;;  %14253 = vmatpush3.bf16.msra.mxu1 %v14974_v9  ;;  %v18560_v59 = vadd.f32 %v14124_v25, %v9487_v38  ;;  %v14977_v25 = vld [vmem:[#allocation8 + $0x188] sm:$0xff]  }
 0x4a1   : > { %14254 = vmatprep.subr.bf16.mxu1 %v14979_v39  ;;  %v9489_v16 = vpop.f32.mrf.mxu0  ;;  %v14125_v44 = vpop.f32.mrf.mxu1 }
 0x4a2   : > { %11549 = vmatpush1.bf16.msra.mxu0 %v14971_v22  ;;  %v15222_v22 = vld [vmem:[#allocation2 + $0xec] ss:$12 sps:$4 sm:$0xff]  }
 0x4a3   : > { %10176 = vmatmul.mubr.bf16.gmra.mxu1 %v14961_v54  ;;  %v9490_v37 = vpop.f32.mrf.mxu0  ;;  %11550 = vmatprep.subr.bf16.mxu0 %v19634_v31  ;;  %v18565_v3 = vpop.f32.mrf.mxu1  ;;  %v15223_v54 = vld [vmem:[#allocation2 + $0x104] ss:$12 sps:$4 sm:$0xff]   ;;  %v14978_v16 = vld [vmem:[#allocation8 + $0x180] sm:$0xff]  }
 0x4a4   : > { %10183 = vmatprep.mubr.bf16.mxu1 %v15213_v52  ;;  %v18563_v56 = vadd.f32 %v14125_v44, %v9490_v37  ;;  %14255 = vmatpush3.bf16.msra.mxu1 %v14979_v39  ;;  %v15221_v39 = vld [vmem:[#allocation2 + $0xa0] ss:$12 sps:$4 sm:$0xff]   ;;  %v15224_v52 = vld [vmem:[#allocation2 + $0x9c] ss:$12 sps:$4 sm:$0xff]  }
 0x4a5   : > { %14191 = vmatmul.mubr.bf16.gmra.mxu0 %v15214_v48  ;;  %v9492_v26 = vpop.f32.mrf.mxu0  ;;  %14256 = vmatprep.subr.bf16.mxu1 %v14984_v33  ;;  %v14980_v44 = vld [vmem:[#allocation8 + $0x1f8] sm:$0xff]  }
 0x4a6   : > { %14194 = vmatprep.mubr.bf16.mxu0 %v15215_v6  ;;  %11551 = vmatpush1.bf16.msra.mxu0 %v14972_v19  ;;  %v15225_v48 = vld [vmem:[#allocation2 + $0xb8] ss:$12 sps:$4 sm:$0xff]  }
 0x4a7   : > { %v9495_v58 = vpop.f32.mrf.mxu0  ;;  %11552 = vmatprep.subr.bf16.mxu0 %v19634_v31 }
 0x4a8   : > { %14257 = vmatpush3.bf16.msra.mxu1 %v14984_v33 }
 0x4a9   : > { %v14128_v21 = vpop.f32.mrf.mxu1  ;;  %v9497_v63 = vpop.f32.mrf.mxu0  ;;  %14258 = vmatprep.subr.bf16.mxu1 %v14992_v34 }
 0x4aa   : > { %11553 = vmatpush1.bf16.msra.mxu0 %v14973_v36  ;;  %v15226_v36 = vld [vmem:[#allocation2 + $0x11c] ss:$12 sps:$4 sm:$0xff]  }
 0x4ab   : > { %10184 = vmatmul.mubr.bf16.gmra.mxu1 %v15216_v30  ;;  %v9784_v62 = vpop.f32.mrf.mxu1  ;;  %v18568_v29 = vpop.f32.mrf.mxu0  ;;  %11554 = vmatprep.subr.bf16.mxu0 %v19634_v31  ;;  %v14981_v63 = vld [vmem:[#allocation8 + $0x1f0] sm:$0xff]  }
 0x4ac   : > { %10191 = vmatprep.mubr.bf16.mxu1 %v15217_v15  ;;  %v18571_v13 = vadd.f32 %v9784_v62, %v9495_v58  ;;  %14259 = vmatpush3.bf16.msra.mxu1 %v14992_v34 }
 0x4ad   : > { %14195 = vmatmul.mubr.bf16.gmra.mxu0 %v15218_v45  ;;  %v9500_v9 = vpop.f32.mrf.mxu0  ;;  %v14129_v41 = vpop.f32.mrf.mxu1  ;;  %v15228_v45 = vld [vmem:[#allocation2 + $0xb4] ss:$12 sps:$4 sm:$0xff]  }
 0x4ae   : > { %14198 = vmatprep.mubr.bf16.mxu0 %v15219_v47  ;;  %11555 = vmatpush1.bf16.msra.mxu0 %v14975_v18  ;;  %v14982_v47 = vld [vmem:[#allocation8 + $0x1e8] sm:$0xff]  }
 0x4af   : > { %v9503_v43 = vpop.f32.mrf.mxu0  ;;  %11556 = vmatprep.subr.bf16.mxu0 %v19634_v31  ;;  %v18580_v37 = vpop.f32.mrf.mxu1 }
 0x4b0   : > { %v18574_v28 = vadd.f32 %v14128_v21, %v9503_v43  ;;  %v15227_v21 = vld [vmem:[#allocation2 + $0x134] ss:$12 sps:$4 sm:$0xff]  }
 0x4b1   : > { %v9505_v4 = vpop.f32.mrf.mxu0 }
 0x4b2   : > { %11557 = vmatpush1.bf16.msra.mxu0 %v14976_v11  ;;  %v15229_v11 = vld [vmem:[#allocation2 + $0xd0] ss:$12 sps:$4 sm:$0xff]  }
 0x4b3   : > { %10192 = vmatmul.mubr.bf16.gmra.mxu1 %v15220_v20  ;;  %v9506_v23 = vpop.f32.mrf.mxu0  ;;  %11558 = vmatprep.subr.bf16.mxu0 %v19634_v31  ;;  %v15230_v20 = vld [vmem:[#allocation2 + $0x14c] ss:$12 sps:$4 sm:$0xff]  }
 0x4b4   : > { %10199 = vmatprep.mubr.bf16.mxu1 %v15221_v39  ;;  %v18577_v27 = vadd.f32 %v14129_v41, %v9506_v23  ;;  %v15231_v41 = vld [vmem:[#allocation2 + $0x164] ss:$12 sps:$4 sm:$0xff]   ;;  %v14983_v23 = vld [vmem:[#allocation8 + $0x1e0] sm:$0xff]  }
 0x4b5   : > { %14199 = vmatmul.mubr.bf16.gmra.mxu0 %v15222_v22  ;;  %v9508_v38 = vpop.f32.mrf.mxu0 }
 0x4b6   : > { %14202 = vmatprep.mubr.bf16.mxu0 %v15223_v54  ;;  %11559 = vmatpush1.bf16.msra.mxu0 %v14977_v25 }
 0x4b7   : > { %v9511_v33 = vpop.f32.mrf.mxu0  ;;  %11560 = vmatprep.subr.bf16.mxu0 %v19634_v31 }
 0x4b9   : > { %v9513_v19 = vpop.f32.mrf.mxu0 }
 0x4ba   : > { %11561 = vmatpush1.bf16.msra.mxu0 %v14978_v16  ;;  %v15232_v16 = vld [vmem:[#allocation2 + $0xcc] ss:$12 sps:$4 sm:$0xff]   ;;  %v14985_v19 = vld [vmem:[#allocation8 + $0x1d8] sm:$0xff]  }
 0x4bb   : > { %10200 = vmatmul.mubr.bf16.gmra.mxu1 %v15224_v52  ;;  %v18582_v26 = vpop.f32.mrf.mxu0  ;;  %11562 = vmatprep.subr.bf16.mxu0 %v19634_v31  ;;  %v15233_v52 = vld [vmem:[#allocation2 + $0xe8] ss:$12 sps:$4 sm:$0xff]  }
 0x4bc   : > { %10207 = vmatprep.mubr.bf16.mxu1 %v15225_v48 }
 0x4bd   : > { %14203 = vmatmul.mubr.bf16.gmra.mxu0 %v15226_v36  ;;  %v9516_v58 = vpop.f32.mrf.mxu0  ;;  %v15234_v36 = vld [vmem:[#allocation2 + $0x17c] ss:$12 sps:$4 sm:$0xff]  }
 0x4be   : > { %v14132_v6 = vpop.f32.mrf.mxu1  ;;  %14206 = vmatprep.mubr.bf16.mxu0 %v15227_v21  ;;  %11563 = vmatpush2.bf16.msra.mxu0 %v14980_v44  ;;  %v15235_v21 = vld [vmem:[#allocation2 + $0x194] ss:$12 sps:$4 sm:$0xff]  }
 0x4bf   : > { %v9519_v18 = vpop.f32.mrf.mxu0  ;;  %11564 = vmatprep.subr.bf16.mxu0 %v19634_v31 }
 0x4c0   : > { %v9800_v30 = vpop.f32.mrf.mxu1  ;;  %v18588_v62 = vadd.f32 %v14132_v6, %v9519_v18  ;;  %v15005_v6 = vld [vmem:[#allocation8 + $0x210] sm:$0xff]  }
 0x4c1   : > { %v18586_v15 = vadd.f32 %v9800_v30, %v9511_v33  ;;  %v9521_v34 = vpop.f32.mrf.mxu0  ;;  %14260 = vmatprep.subr.bf16.mxu1 %v15005_v6 }
 0x4c2   : > { %v14133_v9 = vpop.f32.mrf.mxu1  ;;  %11565 = vmatpush2.bf16.msra.mxu0 %v14981_v63  ;;  %v14986_v63 = vld [vmem:[#allocation8 + $0x1d0] sm:$0xff]   ;;  %14261 = vmatpush3.bf16.msra.mxu1 %v15005_v6 }
 0x4c3   : > { %10208 = vmatmul.mubr.bf16.gmra.mxu1 %v15228_v45  ;;  %v9522_v43 = vpop.f32.mrf.mxu0  ;;  %11566 = vmatprep.subr.bf16.mxu0 %v19634_v31  ;;  %v15236_v45 = vld [vmem:[#allocation2 + $0xe4] ss:$12 sps:$4 sm:$0xff]  }
 0x4c4   : > { %10215 = vmatprep.mubr.bf16.mxu1 %v15229_v11  ;;  %v18591_v4 = vadd.f32 %v14133_v9, %v9522_v43  ;;  %v18593_v39 = vpop.f32.mrf.mxu1  ;;  %v14987_v9 = vld [vmem:[#allocation8 + $0x1c8] sm:$0xff]  }
 0x4c5   : > { %14207 = vmatmul.mubr.bf16.gmra.mxu0 %v15230_v20  ;;  %v9524_v25 = vpop.f32.mrf.mxu0 }
 0x4c6   : > { %14210 = vmatprep.mubr.bf16.mxu0 %v15231_v41  ;;  %11567 = vmatpush2.bf16.msra.mxu0 %v14982_v47  ;;  %v15237_v47 = vld [vmem:[#allocation2 + $0x100] ss:$12 sps:$4 sm:$0xff]  }
 0x4c7   : > { %v9527_v22 = vpop.f32.mrf.mxu0  ;;  %11568 = vmatprep.subr.bf16.mxu0 %v19634_v31  ;;  %v15238_v25 = vld [vmem:[#allocation2 + $0x1ac] ss:$12 sps:$4 sm:$0xff]  }
 0x4c9   : > { %v14136_v38 = vpop.f32.mrf.mxu1  ;;  %v9529_v54 = vpop.f32.mrf.mxu0 }
 0x4ca   : > { %11569 = vmatpush2.bf16.msra.mxu0 %v14983_v23  ;;  %v15239_v23 = vld [vmem:[#allocation2 + $0x1c4] ss:$12 sps:$4 sm:$0xff]  }
 0x4cb   : > { %10216 = vmatmul.mubr.bf16.gmra.mxu1 %v15232_v16  ;;  %v9816_v33 = vpop.f32.mrf.mxu1  ;;  %v18598_v48 = vpop.f32.mrf.mxu0  ;;  %11570 = vmatprep.subr.bf16.mxu0 %v19634_v31  ;;  %v15240_v16 = vld [vmem:[#allocation2 + $0xfc] ss:$12 sps:$4 sm:$0xff]  }
 0x4cc   : > { %10223 = vmatprep.mubr.bf16.mxu1 %v15233_v52  ;;  %v18596_v44 = vadd.f32 %v9816_v33, %v9527_v22  ;;  %v14988_v22 = vld [vmem:[#allocation8 + $0x1c0] sm:$0xff]  }
 0x4cd   : > { %14211 = vmatmul.mubr.bf16.gmra.mxu0 %v15234_v36  ;;  %v9532_v58 = vpop.f32.mrf.mxu0  ;;  %v14137_v11 = vpop.f32.mrf.mxu1  ;;  %v15242_v36 = vld [vmem:[#allocation2 + $0x1dc] ss:$12 sps:$4 sm:$0xff]  }
 0x4ce   : > { %14214 = vmatprep.mubr.bf16.mxu0 %v15235_v21  ;;  %11571 = vmatpush2.bf16.msra.mxu0 %v14985_v19  ;;  %v15241_v19 = vld [vmem:[#allocation2 + $0x118] ss:$12 sps:$4 sm:$0xff]   ;;  %v15243_v21 = vld [vmem:[#allocation2 + $0x1f4] ss:$12 sps:$4 sm:$0xff]  }
 0x4cf   : > { %11572 = vmatprep.subr.bf16.mxu0 %v19634_v31  ;;  %v18608_v33 = vpop.f32.mrf.mxu1 }
 0x4d0   : > { %v9535_v30 = vpop.f32.mrf.mxu0 }
 0x4d1   : > { %v18602_v18 = vadd.f32 %v14136_v38, %v9535_v30 }
 0x4d2   : > { %v9537_v34 = vpop.f32.mrf.mxu0  ;;  %11573 = vmatpush2.bf16.msra.mxu0 %v14986_v63 }
 0x4d3   : > { %10224 = vmatmul.mubr.bf16.gmra.mxu1 %v15236_v45  ;;  %11574 = vmatprep.subr.bf16.mxu0 %v19634_v31 }
 0x4d4   : > { %10231 = vmatprep.mubr.bf16.mxu1 %v15237_v47  ;;  %v9538_v43 = vpop.f32.mrf.mxu0  ;;  %v15245_v47 = vld [vmem:[#allocation2 + $0x130] ss:$12 sps:$4 sm:$0xff]  }
 0x4d5   : > { %v18605_v20 = vadd.f32 %v14137_v11, %v9538_v43  ;;  %14215 = vmatmul.mubr.bf16.gmra.mxu0 %v15238_v25 }
 0x4d6   : > { %v9540_v41 = vpop.f32.mrf.mxu0  ;;  %14218 = vmatprep.mubr.bf16.mxu0 %v15239_v23  ;;  %11575 = vmatpush2.bf16.msra.mxu0 %v14987_v9  ;;  %v15244_v9 = vld [vmem:[#allocation2 + $0x114] ss:$12 sps:$4 sm:$0xff]  }
 0x4d7   : > { %11576 = vmatprep.subr.bf16.mxu0 %v19634_v31  ;;  %v15246_v41 = vld [vmem:[#allocation2 + $0x20c] ss:$12 sps:$4 sm:$0xff]  }
 0x4d8   : > { %v9543_v38 = vpop.f32.mrf.mxu0 }
 0x4da   : > { %v9545_v54 = vpop.f32.mrf.mxu0  ;;  %11577 = vmatpush2.bf16.msra.mxu0 %v14988_v22  ;;  %v15247_v22 = vld [vmem:[#allocation2 + $0x224] ss:$12 sps:$4 sm:$0xff]  }
 0x4db   : > { %10232 = vmatmul.mubr.bf16.gmra.mxu1 %v15240_v16 }
 0x4dc   : > { %10239 = vmatprep.mubr.bf16.mxu1 %v15241_v19  ;;  %v18610_v52 = vpop.f32.mrf.mxu0 }
 0x4dd   : > { %14219 = vmatmul.mubr.bf16.gmra.mxu0 %v15242_v36 }
 0x4de   : > { %v14140_v6 = vpop.f32.mrf.mxu1  ;;  %v9548_v58 = vpop.f32.mrf.mxu0  ;;  %14222 = vmatprep.mubr.bf16.mxu0 %v15243_v21  ;;  %v15250_v21 = vld [vmem:[#allocation2 + $0x23c] ss:$12 sps:$4 sm:$0xff]  }
 0x4e0   : > { %v9832_v63 = vpop.f32.mrf.mxu1  ;;  %v9551_v30 = vpop.f32.mrf.mxu0 }
 0x4e1   : > { %v18612_v34 = vadd.f32 %v9832_v63, %v9543_v38  ;;  %v18614_v31 = vadd.f32 %v14140_v6, %v9551_v30  ;;  %v15248_v38 = vld [vmem:[#allocation2 + $0x12c] ss:$12 sps:$4 sm:$0xff]   ;;  %v15249_v6 = vld [vmem:[#allocation2 + $0x148] ss:$12 sps:$4 sm:$0xff]  }
 0x4e2   : > { %v9553_v45 = vpop.f32.mrf.mxu0  ;;  %v14141_v11 = vpop.f32.mrf.mxu1  ;;  %v15251_v30 = vld [vmem:[#allocation2 + $0x254] ss:$12 sps:$4 sm:$0xff]  }
 0x4e3   : > { %10240 = vmatmul.mubr.bf16.gmra.mxu1 %v15244_v9 }
 0x4e4   : > { %10247 = vmatprep.mubr.bf16.mxu1 %v15245_v47  ;;  %v9554_v43 = vpop.f32.mrf.mxu0  ;;  %v18618_v19 = vpop.f32.mrf.mxu1 }
 0x4e5   : > { %v18616_v25 = vadd.f32 %v14141_v11, %v9554_v43  ;;  %14223 = vmatmul.mubr.bf16.gmra.mxu0 %v15246_v41  ;;  %v15018_v43 = vld [vmem:[#allocation8 + $0x208] sm:$0xff]  }
 0x4e6   : > { %v9556_v23 = vpop.f32.mrf.mxu0  ;;  %14226 = vmatprep.mubr.bf16.mxu0 %v15247_v22  ;;  %14262 = vmatprep.subr.bf16.mxu1 %v15018_v43  ;;  %v15253_v22 = vld [vmem:[#allocation2 + $0x160] ss:$12 sps:$4 sm:$0xff]  }
 0x4e7   : > { %v15252_v23 = vld [vmem:[#allocation2 + $0x144] ss:$12 sps:$4 sm:$0xff]   ;;  %14263 = vmatpush3.bf16.msra.mxu1 %v15018_v43 }
 0x4e8   : > { %v9559_v54 = vpop.f32.mrf.mxu0 }
 0x4ea   : > { %v9561_v16 = vpop.f32.mrf.mxu0 }
 0x4eb   : > { %10248 = vmatmul.mubr.bf16.gmra.mxu1 %v15248_v38 }
 0x4ec   : > { %10255 = vmatprep.mubr.bf16.mxu1 %v15249_v6  ;;  %v18620_v36 = vpop.f32.mrf.mxu0 }
 0x4ed   : > { %19903 = vst [vmem:[#allocation17_spill] sm:$0xff] %v18620_v36  ;;  %14227 = vmatmul.mubr.bf16.gmra.mxu0 %v15250_v21  ;;  %v15254_v21 = vld [vmem:[#allocation2 + $0x26c] ss:$12 sps:$4 sm:$0xff]   ;;  %v15263_v36 = vld [vmem:[#allocation2 + $0x2e4] ss:$12 sps:$4 sm:$0xff]  }
 0x4ee   : > { %v14144_v58 = vpop.f32.mrf.mxu1  ;;  %v9564_v63 = vpop.f32.mrf.mxu0  ;;  %14230 = vmatprep.mubr.bf16.mxu0 %v15251_v30  ;;  %v15255_v30 = vld [vmem:[#allocation2 + $0x284] ss:$12 sps:$4 sm:$0xff]  }
 0x4f0   : > { %v9848_v45 = vpop.f32.mrf.mxu1 }
 0x4f1   : > { %v9567_v9 = vpop.f32.mrf.mxu0  ;;  %v18622_v47 = vadd.f32 %v9848_v45, %v9559_v54 }
 0x4f2   : > { %v18624_v11 = vadd.f32 %v14144_v58, %v9567_v9  ;;  %v14145_v16 = vpop.f32.mrf.mxu1  ;;  %v15256_v58 = vld [vmem:[#allocation2 + $0x15c] ss:$12 sps:$4 sm:$0xff]   ;;  %v15257_v9 = vld [vmem:[#allocation2 + $0x178] ss:$12 sps:$4 sm:$0xff]  }
 0x4f3   : > { %19904 = vst [vmem:[#allocation78_spill] sm:$0xff] %v18622_v47  ;;  %v9569_v41 = vpop.f32.mrf.mxu0  ;;  %10256 = vmatmul.mubr.bf16.gmra.mxu1 %v15252_v23  ;;  %v15264_v47 = vld [vmem:[#allocation2 + $0x18c] ss:$12 sps:$4 sm:$0xff]  }
 0x4f4   : > { %19905 = vst [vmem:[#allocation69_spill] sm:$0xff] %v18624_v11  ;;  %10263 = vmatprep.mubr.bf16.mxu1 %v15253_v22  ;;  %v18628_v41 = vpop.f32.mrf.mxu1  ;;  %v15258_v22 = vld [vmem:[#allocation2 + $0x29c] ss:$12 sps:$4 sm:$0xff]  }
 0x4f5   : > { %v9570_v38 = vpop.f32.mrf.mxu0  ;;  %14231 = vmatmul.mubr.bf16.gmra.mxu0 %v15254_v21  ;;  %19907 = vst [vmem:[#allocation71_spill] sm:$0xff] %v18628_v41 }
 0x4f6   : > { %v18626_v6 = vadd.f32 %v14145_v16, %v9570_v38  ;;  %14234 = vmatprep.mubr.bf16.mxu0 %v15255_v30  ;;  %v15259_v16 = vld [vmem:[#allocation2 + $0x2b4] ss:$12 sps:$4 sm:$0xff]  }
 0x4f7   : > { %v9572_v63 = vpop.f32.mrf.mxu0 }
 0x4f8   : > { %19906 = vst [vmem:[#allocation80_spill] sm:$0xff] %v18626_v6 }
 0x4f9   : > { %v9575_v54 = vpop.f32.mrf.mxu0 }
 0x4fb   : > { %10264 = vmatmul.mubr.bf16.gmra.mxu1 %v15256_v58  ;;  %v9577_v45 = vpop.f32.mrf.mxu0  ;;  %v15260_v58 = vld [vmem:[#allocation2 + $0x174] ss:$12 sps:$4 sm:$0xff]  }
 0x4fc   : > { %10271 = vmatprep.mubr.bf16.mxu1 %v15257_v9  ;;  %v15261_v9 = vld [vmem:[#allocation2 + $0x190] ss:$12 sps:$4 sm:$0xff]  }
 0x4fd   : > { %v18630_v23 = vpop.f32.mrf.mxu0  ;;  %14235 = vmatmul.mubr.bf16.gmra.mxu0 %v15258_v22 }
 0x4fe   : > { %19908 = vst [vmem:[#allocation29_spill] sm:$0xff] %v18630_v23  ;;  %14238 = vmatprep.mubr.bf16.mxu0 %v15259_v16  ;;  %v15262_v23 = vld [vmem:[#allocation2 + $0x2cc] ss:$12 sps:$4 sm:$0xff]  }
 0x4ff   : > { %v9580_v38 = vpop.f32.mrf.mxu0 }
 0x500   : > { %v14148_v43 = vpop.f32.mrf.mxu1 }
 0x501   : > { %v9583_v63 = vpop.f32.mrf.mxu0 }
 0x502   : > { %v9864_v21 = vpop.f32.mrf.mxu1  ;;  %v18634_v30 = vadd.f32 %v14148_v43, %v9583_v63 }
 0x503   : > { %v18632_v6 = vadd.f32 %v9864_v21, %v9575_v54  ;;  %10272 = vmatmul.mubr.bf16.gmra.mxu1 %v15260_v58  ;;  %v9585_v45 = vpop.f32.mrf.mxu0  ;;  %v15265_v21 = vld [vmem:[#allocation2 + $0x1a8] ss:$12 sps:$4 sm:$0xff]  }
 0x504   : > { %19910 = vst [vmem:[#allocation26_spill] sm:$0xff] %v18634_v30  ;;  %10279 = vmatprep.mubr.bf16.mxu1 %v15261_v9  ;;  %v14149_v11 = vpop.f32.mrf.mxu1  ;;  %v15266_v45 = vld [vmem:[#allocation2 + $0x2fc] ss:$12 sps:$4 sm:$0xff]   ;;  %v15268_v30 = vld [vmem:[#allocation2 + $0x1c0] ss:$12 sps:$4 sm:$0xff]  }
 0x505   : > { %19909 = vst [vmem:[#allocation76_spill] sm:$0xff] %v18632_v6  ;;  %v9586_v41 = vpop.f32.mrf.mxu0  ;;  %14239 = vmatmul.mubr.bf16.gmra.mxu0 %v15262_v23 }
 0x506   : > { %v18636_v22 = vadd.f32 %v14149_v11, %v9586_v41  ;;  %14242 = vmatprep.mubr.bf16.mxu0 %v15263_v36  ;;  %v18638_v43 = vpop.f32.mrf.mxu1 }
 0x507   : > { %v9588_v16 = vpop.f32.mrf.mxu0  ;;  %19912 = vst [vmem:[#allocation75_spill] sm:$0xff] %v18638_v43 }
 0x508   : > { %19911 = vst [vmem:[#allocation79_spill] sm:$0xff] %v18636_v22 }
 0x509   : > { %v9591_v38 = vpop.f32.mrf.mxu0 }
 0x50b   : > { %10280 = vmatmul.mubr.bf16.gmra.mxu1 %v15264_v47  ;;  %v9593_v54 = vpop.f32.mrf.mxu0  ;;  %v15031_v47 = vld [vmem:[#allocation8 + $0x200] sm:$0xff]  }
 0x50c   : > { %10287 = vmatprep.mubr.bf16.mxu1 %v15265_v21  ;;  %v15267_v54 = vld [vmem:[#allocation2 + $0x1a4] ss:$12 sps:$4 sm:$0xff]   ;;  %14264 = vmatprep.subr.bf16.mxu1 %v15031_v47 }
 0x50d   : > { %v9594_v63 = vpop.f32.mrf.mxu0  ;;  %14243 = vmatmul.mubr.bf16.gmra.mxu0 %v15266_v45  ;;  %v14991_v45 = vld [vmem:[#allocation2 + $0xa0] ss:$12 sps:$4 sm:$0xff]   ;;  %14265 = vmatpush3.bf16.msra.mxu1 %v15031_v47 }
 0x50e   : > { %v14152_v58 = vpop.f32.mrf.mxu1  ;;  %14246 = vmatprep.mubr.bf16.mxu0 %v18425_v0 }
 0x50f   : > { %v9596_v23 = vpop.f32.mrf.mxu0 }
 0x510   : > { %v9880_v11 = vpop.f32.mrf.mxu1 }
 0x511   : > { %v18641_v41 = vadd.f32 %v9880_v11, %v9591_v38  ;;  %v9599_v36 = vpop.f32.mrf.mxu0  ;;  %v15269_v11 = vld [vmem:[#allocation2 + $0x1bc] ss:$12 sps:$4 sm:$0xff]  }
 0x512   : > { %v14153_v9 = vpop.f32.mrf.mxu1  ;;  %v18643_v16 = vadd.f32 %v14152_v58, %v9599_v36 }
 0x513   : > { %19913 = vst [vmem:[#allocation31_spill] sm:$0xff] %v18641_v41  ;;  %10288 = vmatmul.mubr.bf16.gmra.mxu1 %v15267_v54  ;;  %v9601_v22 = vpop.f32.mrf.mxu0  ;;  %v14995_v54 = vld [vmem:[#allocation2 + $0xb8] ss:$12 sps:$4 sm:$0xff]  }
 0x514   : > { %19914 = vst [vmem:[#allocation77_spill] sm:$0xff] %v18643_v16  ;;  %10295 = vmatprep.mubr.bf16.mxu1 %v15268_v30  ;;  %v9883_v21 = vpop.f32.mrf.mxu1  ;;  %v15270_v22 = vld [vmem:[#allocation2 + $0x1d8] ss:$12 sps:$4 sm:$0xff]   ;;  %v14989_v30 = vld [vmem:[#allocation2 + $0x9c] ss:$12 sps:$4 sm:$0xff]  }
 0x515   : > { %v18645_v43 = vadd.f32 %v9883_v21, %v9594_v63  ;;  %v9602_v0 = vpop.f32.mrf.mxu0  ;;  %14247 = vmatmul.mubr.bf16.gmra.mxu0 %v18455_v7 }
 0x516   : > { %v18648_v38 = vadd.f32 %v14153_v9, %v9602_v0  ;;  %11578 = vmatprep.mubr.bf16.mxu0 %v14991_v45  ;;  %v15272_v45 = vld [vmem:[#allocation2 + $0x1f0] ss:$12 sps:$4 sm:$0xff]  }
 0x517   : > { %19915 = vst [vmem:[#allocation34_spill] sm:$0xff] %v18645_v43  ;;  %v9604_v58 = vpop.f32.mrf.mxu0  ;;  %v15271_v43 = vld [vmem:[#allocation2 + $0x1d4] ss:$12 sps:$4 sm:$0xff]  }
 0x518   : > { %19916 = vst [vmem:[#allocation30_spill] sm:$0xff] %v18648_v38  ;;  %v14993_v58 = vld [vmem:[#allocation2 + $0xb4] ss:$12 sps:$4 sm:$0xff]  }
 0x519   : > { %v9607_v23 = vpop.f32.mrf.mxu0 }
 0x51b   : > { %10296 = vmatmul.mubr.bf16.gmra.mxu1 %v15269_v11  ;;  %v9609_v36 = vpop.f32.mrf.mxu0 }
 0x51c   : > { %10303 = vmatprep.mubr.bf16.mxu1 %v15270_v22  ;;  %v14998_v36 = vld [vmem:[#allocation2 + $0xd0] ss:$12 sps:$4 sm:$0xff]  }
 0x51d   : > { %v9610_v16 = vpop.f32.mrf.mxu0  ;;  %11579 = vmatmul.mubr.bf16.vlgmr.msra.gmra.mxu0 %v14989_v30 }
 0x51e   : > { %11586 = vmatprep.mubr.bf16.mxu0 %v14995_v54 }
 0x51f   : > { %v9612_v63 = vpop.f32.mrf.mxu0 }
 0x521   : > { %v9615_v21 = vpop.f32.mrf.mxu0 }
 0x522   : > { %v14156_v47 = vpop.f32.mrf.mxu1 }
 0x523   : > { %10304 = vmatmul.mubr.bf16.gmra.mxu1 %v15271_v43  ;;  %v18650_v7 = vadd.f32 %v14156_v47, %v9615_v21  ;;  %v9617_v9 = vpop.f32.mrf.mxu0  ;;  %v15273_v21 = vld [vmem:[#allocation2 + $0x1ec] ss:$12 sps:$4 sm:$0xff]  }
 0x524   : > { %10311 = vmatprep.mubr.bf16.mxu1 %v15272_v45  ;;  %v9896_v0 = vpop.f32.mrf.mxu1  ;;  %v15274_v9 = vld [vmem:[#allocation2 + $0x208] ss:$12 sps:$4 sm:$0xff]   ;;  %v14996_v45 = vld [vmem:[#allocation2 + $0xcc] ss:$12 sps:$4 sm:$0xff]  }
 0x525   : > { %19917 = vst [vmem:[#allocation22_spill] sm:$0xff] %v18650_v7  ;;  %v18652_v11 = vadd.f32 %v9896_v0, %v9607_v23  ;;  %v9618_v22 = vpop.f32.mrf.mxu0  ;;  %11587 = vmatmul.mubr.bf16.gmra.mxu0 %v14993_v58  ;;  %v15001_v23 = vld [vmem:[#allocation2 + $0xe8] ss:$12 sps:$4 sm:$0xff]  }
 0x526   : > { %v14157_v38 = vpop.f32.mrf.mxu1  ;;  %11594 = vmatprep.mubr.bf16.mxu0 %v14998_v36 }
 0x527   : > { %19918 = vst [vmem:[#allocation27_spill] sm:$0xff] %v18652_v11  ;;  %v18654_v30 = vadd.f32 %v14157_v38, %v9618_v22  ;;  %v9620_v54 = vpop.f32.mrf.mxu0  ;;  %v15275_v38 = vld [vmem:[#allocation2 + $0x204] ss:$12 sps:$4 sm:$0xff]  }
 0x528   : > { %v9899_v63 = vpop.f32.mrf.mxu1  ;;  %v15276_v54 = vld [vmem:[#allocation2 + $0x220] ss:$12 sps:$4 sm:$0xff]  }
 0x529   : > { %19919 = vst [vmem:[#allocation28_spill] sm:$0xff] %v18654_v30  ;;  %v18656_v41 = vadd.f32 %v9899_v63, %v9610_v16  ;;  %v9623_v43 = vpop.f32.mrf.mxu0  ;;  %v14999_v16 = vld [vmem:[#allocation2 + $0xe4] ss:$12 sps:$4 sm:$0xff]  }
 0x52b   : > { %19920 = vst [vmem:[#allocation33_spill] sm:$0xff] %v18656_v41  ;;  %10312 = vmatmul.mubr.bf16.gmra.mxu1 %v15273_v21  ;;  %v9625_v47 = vpop.f32.mrf.mxu0 }
 0x52c   : > { %10319 = vmatprep.mubr.bf16.mxu1 %v15274_v9  ;;  %v15004_v47 = vld [vmem:[#allocation2 + $0x100] ss:$12 sps:$4 sm:$0xff]  }
 0x52d   : > { %v9626_v0 = vpop.f32.mrf.mxu0  ;;  %11595 = vmatmul.mubr.bf16.gmra.mxu0 %v14996_v45 }
 0x52e   : > { %11602 = vmatprep.mubr.bf16.mxu0 %v15001_v23 }
 0x52f   : > { %v9628_v7 = vpop.f32.mrf.mxu0 }
 0x531   : > { %v9631_v58 = vpop.f32.mrf.mxu0 }
 0x533   : > { %v14160_v36 = vpop.f32.mrf.mxu1  ;;  %10320 = vmatmul.mubr.bf16.gmra.mxu1 %v15275_v38  ;;  %v9633_v22 = vpop.f32.mrf.mxu0 }
 0x534   : > { %10327 = vmatprep.mubr.bf16.mxu1 %v15276_v54  ;;  %v18658_v63 = vadd.f32 %v14160_v36, %v9631_v58  ;;  %v15277_v22 = vld [vmem:[#allocation2 + $0x21c] ss:$12 sps:$4 sm:$0xff]   ;;  %v15278_v58 = vld [vmem:[#allocation2 + $0x238] ss:$12 sps:$4 sm:$0xff]  }
 0x535   : > { %v9912_v21 = vpop.f32.mrf.mxu1  ;;  %v9634_v30 = vpop.f32.mrf.mxu0  ;;  %11603 = vmatmul.mubr.bf16.gmra.mxu0 %v14999_v16  ;;  %v15002_v36 = vld [vmem:[#allocation2 + $0xfc] ss:$12 sps:$4 sm:$0xff]  }
 0x536   : > { %19921 = vst [vmem:[#allocation36_spill] sm:$0xff] %v18658_v63  ;;  %v18660_v9 = vadd.f32 %v9912_v21, %v9623_v43  ;;  %11610 = vmatprep.mubr.bf16.mxu0 %v15004_v47  ;;  %v15008_v63 = vld [vmem:[#allocation2 + $0x118] ss:$12 sps:$4 sm:$0xff]   ;;  %v15279_v21 = vld [vmem:[#allocation2 + $0x234] ss:$12 sps:$4 sm:$0xff]  }
 0x537   : > { %v14161_v41 = vpop.f32.mrf.mxu1  ;;  %v9636_v45 = vpop.f32.mrf.mxu0  ;;  %v15280_v47 = vld [vmem:[#allocation2 + $0x250] ss:$12 sps:$4 sm:$0xff]  }
 0x538   : > { %v18662_v7 = vadd.f32 %v14161_v41, %v9634_v30 }
 0x539   : > { %v9915_v23 = vpop.f32.mrf.mxu1  ;;  %v9639_v11 = vpop.f32.mrf.mxu0 }
 0x53a   : > { %19922 = vst [vmem:[#allocation38_spill] sm:$0xff] %v18662_v7  ;;  %v18664_v38 = vadd.f32 %v9915_v23, %v9626_v0  ;;  %v15006_v0 = vld [vmem:[#allocation2 + $0x114] ss:$12 sps:$4 sm:$0xff]   ;;  %v15011_v23 = vld [vmem:[#allocation2 + $0x130] ss:$12 sps:$4 sm:$0xff]  }
 0x53b   : > { %10328 = vmatmul.mubr.bf16.gmra.mxu1 %v15277_v22  ;;  %v9641_v54 = vpop.f32.mrf.mxu0 }
 0x53c   : > { %19923 = vst [vmem:[#allocation35_spill] sm:$0xff] %v18664_v38  ;;  %10335 = vmatprep.mubr.bf16.mxu1 %v15278_v58  ;;  %v15285_v38 = vld [vmem:[#allocation2 + $0x27c] ss:$12 sps:$4 sm:$0xff]  }
 0x53d   : > { %v9642_v6 = vpop.f32.mrf.mxu0  ;;  %11611 = vmatmul.mubr.bf16.gmra.mxu0 %v15002_v36 }
 0x53e   : > { %11618 = vmatprep.mubr.bf16.mxu0 %v15008_v63 }
 0x53f   : > { %v9644_v43 = vpop.f32.mrf.mxu0 }
 0x541   : > { %v9647_v16 = vpop.f32.mrf.mxu0 }
 0x543   : > { %10336 = vmatmul.mubr.bf16.gmra.mxu1 %v15279_v21  ;;  %v9649_v41 = vpop.f32.mrf.mxu0  ;;  %v15281_v21 = vld [vmem:[#allocation2 + $0x24c] ss:$12 sps:$4 sm:$0xff]  }
 0x544   : > { %v14164_v30 = vpop.f32.mrf.mxu1  ;;  %10343 = vmatprep.mubr.bf16.mxu1 %v15280_v47  ;;  %v15282_v47 = vld [vmem:[#allocation2 + $0x268] ss:$12 sps:$4 sm:$0xff]  }
 0x545   : > { %v18666_v45 = vadd.f32 %v14164_v30, %v9647_v16  ;;  %v9650_v22 = vpop.f32.mrf.mxu0  ;;  %11619 = vmatmul.mubr.bf16.gmra.mxu0 %v15006_v0  ;;  %v15009_v16 = vld [vmem:[#allocation2 + $0x12c] ss:$12 sps:$4 sm:$0xff]   ;;  %v15014_v30 = vld [vmem:[#allocation2 + $0x148] ss:$12 sps:$4 sm:$0xff]  }
 0x546   : > { %v9928_v54 = vpop.f32.mrf.mxu1  ;;  %11626 = vmatprep.mubr.bf16.mxu0 %v15011_v23  ;;  %v15283_v23 = vld [vmem:[#allocation2 + $0x264] ss:$12 sps:$4 sm:$0xff]  }
 0x547   : > { %19924 = vst [vmem:[#allocation37_spill] sm:$0xff] %v18666_v45  ;;  %v18668_v58 = vadd.f32 %v9928_v54, %v9639_v11  ;;  %v9652_v36 = vpop.f32.mrf.mxu0 }
 0x548   : > { %v14165_v63 = vpop.f32.mrf.mxu1  ;;  %v15284_v36 = vld [vmem:[#allocation2 + $0x280] ss:$12 sps:$4 sm:$0xff]  }
 0x549   : > { %19925 = vst [vmem:[#allocation40_spill] sm:$0xff] %v18668_v58  ;;  %v18670_v43 = vadd.f32 %v14165_v63, %v9650_v22  ;;  %v15012_v22 = vld [vmem:[#allocation2 + $0x144] ss:$12 sps:$4 sm:$0xff]  }
 0x54a   : > { %v9931_v7 = vpop.f32.mrf.mxu1 }
 0x54b   : > { %19926 = vst [vmem:[#allocation42_spill] sm:$0xff] %v18670_v43  ;;  %10344 = vmatmul.mubr.bf16.gmra.mxu1 %v15281_v21  ;;  %v18672_v41 = vadd.f32 %v9931_v7, %v9642_v6  ;;  %v15017_v21 = vld [vmem:[#allocation2 + $0x160] ss:$12 sps:$4 sm:$0xff]  }
 0x54c   : > { %10351 = vmatprep.mubr.bf16.mxu1 %v15282_v47 }
 0x54d   : > { %19927 = vst [vmem:[#allocation41_spill] sm:$0xff] %v18672_v41  ;;  %v9655_v45 = vpop.f32.mrf.mxu0  ;;  %11627 = vmatmul.mubr.bf16.gmra.mxu0 %v15009_v16 }
 0x54e   : > { %11634 = vmatprep.mubr.bf16.mxu0 %v15014_v30 }
 0x54f   : > { %v9657_v0 = vpop.f32.mrf.mxu0 }
 0x551   : > { %v9658_v11 = vpop.f32.mrf.mxu0 }
 0x553   : > { %v14168_v54 = vpop.f32.mrf.mxu1  ;;  %10352 = vmatmul.mubr.bf16.gmra.mxu1 %v15283_v23  ;;  %v9660_v63 = vpop.f32.mrf.mxu0 }
 0x554   : > { %10359 = vmatprep.mubr.bf16.mxu1 %v15284_v36 }
 0x555   : > { %v9944_v43 = vpop.f32.mrf.mxu1  ;;  %v9663_v7 = vpop.f32.mrf.mxu0  ;;  %11635 = vmatmul.mubr.bf16.gmra.mxu0 %v15012_v22 }
 0x556   : > { %v18674_v6 = vadd.f32 %v9944_v43, %v9655_v45  ;;  %v18676_v41 = vadd.f32 %v14168_v54, %v9663_v7  ;;  %11642 = vmatprep.mubr.bf16.mxu0 %v15017_v21  ;;  %v15286_v45 = vld [vmem:[#allocation2 + $0x298] ss:$12 sps:$4 sm:$0xff]   ;;  %v15015_v43 = vld [vmem:[#allocation2 + $0x15c] ss:$12 sps:$4 sm:$0xff]   ;;  %v9708_v21 = vadd.f32 %v18369_v8, %v18319_v61 }
 0x557   : > { %v14169_v47 = vpop.f32.mrf.mxu1  ;;  %v9665_v16 = vpop.f32.mrf.mxu0  ;;  %v15021_v54 = vld [vmem:[#allocation2 + $0x178] ss:$12 sps:$4 sm:$0xff]  }
 0x558   : > { %19928 = vst [vmem:[#allocation82_spill] sm:$0xff] %v18674_v6 }
 0x559   : > { %v9947_v30 = vpop.f32.mrf.mxu1  ;;  %v9666_v58 = vpop.f32.mrf.mxu0 }
 0x55a   : > { %v18678_v0 = vadd.f32 %v9947_v30, %v9658_v11  ;;  %v18680_v36 = vadd.f32 %v14169_v47, %v9666_v58 }
 0x55b   : > { %v10169_v23 = vpop.f32.mrf.mxu1  ;;  %10360 = vmatmul.mubr.bf16.gmra.mxu1 %v15285_v38  ;;  %v9668_v22 = vpop.f32.mrf.mxu0 }
 0x55c   : > { %19929 = vst [vmem:[#allocation39_spill] sm:$0xff] %v18680_v36  ;;  %v10170_v63 = vadd.f32 %v10169_v23, %v18496_v24  ;;  %10367 = vmatprep.mubr.bf16.mxu1 %v15286_v45  ;;  %v15287_v23 = vld [vmem:[#allocation2 + $0x294] ss:$12 sps:$4 sm:$0xff]  }
 0x55d   : > { %v10171_v6 = vpop.f32.mrf.mxu1  ;;  %v14188_v7 = vpop.f32.mrf.mxu0  ;;  %11643 = vmatmul.mubr.bf16.gmra.mxu0 %v15015_v43  ;;  %v15019_v22 = vld [vmem:[#allocation2 + $0x174] ss:$12 sps:$4 sm:$0xff]   ;;  %v15024_v43 = vld [vmem:[#allocation2 + $0x190] ss:$12 sps:$4 sm:$0xff]  }
 0x55e   : > { %11650 = vmatprep.mubr.bf16.mxu0 %v15021_v54  ;;  %v15288_v6 = vld [vmem:[#allocation2 + $0x2b0] ss:$12 sps:$4 sm:$0xff]  }
 0x55f   : > { %v10172_v11 = vpop.f32.mrf.mxu1  ;;  %v10458_v30 = vpop.f32.mrf.mxu0 }
 0x560   : > { %v10173_v16 = vadd.f32 %v10172_v11, %v9708_v21  ;;  %v18685_v58 = vadd.f32 %v10458_v30, %v10170_v63 }
 0x561   : > { %v10174_v38 = vpop.f32.mrf.mxu1  ;;  %v14189_v47 = vpop.f32.mrf.mxu0 }
 0x563   : > { %v10177_v24 = vpop.f32.mrf.mxu1  ;;  %10368 = vmatmul.mubr.bf16.gmra.mxu1 %v15287_v23  ;;  %v10461_v36 = vpop.f32.mrf.mxu0 }
 0x564   : > { %v10178_v45 = vadd.f32 %v10177_v24, %v18484_v10  ;;  %10375 = vmatprep.mubr.bf16.mxu1 %v15288_v6  ;;  %v18688_v8 = vadd.f32 %v10461_v36, %v10173_v16  ;;  %v15289_v6 = vld [vmem:[#allocation2 + $0x2ac] ss:$12 sps:$4 sm:$0xff]   ;;  %v15290_v16 = vld [vmem:[#allocation2 + $0x2c8] ss:$12 sps:$4 sm:$0xff]  }
 0x565   : > { %v10179_v61 = vpop.f32.mrf.mxu1  ;;  %v14192_v21 = vpop.f32.mrf.mxu0  ;;  %11651 = vmatmul.mubr.bf16.gmra.mxu0 %v15019_v22  ;;  %v15027_v22 = vld [vmem:[#allocation2 + $0x1a8] ss:$12 sps:$4 sm:$0xff]  }
 0x566   : > { %19930 = vst [vmem:[#allocation44_spill] sm:$0xff] %v18688_v8  ;;  %v18690_v54 = vadd.f32 %v14188_v7, %v10178_v45  ;;  %11658 = vmatprep.mubr.bf16.mxu0 %v15024_v43  ;;  %v15022_v7 = vld [vmem:[#allocation2 + $0x18c] ss:$12 sps:$4 sm:$0xff]   ;;  %v9724_v43 = vadd.f32 %v18429_v14, %v18375_v17  ;;  %v15025_v17 = vld [vmem:[#allocation2 + $0x1a4] ss:$12 sps:$4 sm:$0xff]  }
 0x567   : > { %v10180_v63 = vpop.f32.mrf.mxu1  ;;  %v10474_v30 = vpop.f32.mrf.mxu0 }
 0x568   : > { %v10181_v11 = vadd.f32 %v10180_v63, %v18501_v53 }
 0x569   : > { %v10182_v38 = vpop.f32.mrf.mxu1  ;;  %v14193_v10 = vpop.f32.mrf.mxu0 }
 0x56a   : > { %v18693_v23 = vadd.f32 %v14189_v47, %v10181_v11 }
 0x56b   : > { %v10185_v24 = vpop.f32.mrf.mxu1  ;;  %10376 = vmatmul.mubr.bf16.gmra.mxu1 %v15289_v6  ;;  %v10477_v45 = vpop.f32.mrf.mxu0 }
 0x56c   : > { %19931 = vst [vmem:[#allocation81_spill] sm:$0xff] %v18693_v23  ;;  %v10186_v36 = vadd.f32 %v10185_v24, %v18513_v1  ;;  %10383 = vmatprep.mubr.bf16.mxu1 %v15290_v16  ;;  %v15291_v16 = vld [vmem:[#allocation2 + $0x2c4] ss:$12 sps:$4 sm:$0xff]   ;;  %v15292_v23 = vld [vmem:[#allocation2 + $0x2e0] ss:$12 sps:$4 sm:$0xff]  }
 0x56d   : > { %v10187_v61 = vpop.f32.mrf.mxu1  ;;  %v14196_v63 = vpop.f32.mrf.mxu0  ;;  %11659 = vmatmul.mubr.bf16.gmra.mxu0 %v15022_v7 }
 0x56e   : > { %v18698_v53 = vadd.f32 %v10474_v30, %v10186_v36  ;;  %11666 = vmatprep.mubr.bf16.mxu0 %v15027_v22  ;;  %v15030_v36 = vld [vmem:[#allocation2 + $0x1c0] ss:$12 sps:$4 sm:$0xff]  }
 0x56f   : > { %v10188_v47 = vpop.f32.mrf.mxu1  ;;  %v10490_v38 = vpop.f32.mrf.mxu0 }
 0x570   : > { %v10189_v11 = vadd.f32 %v10188_v47, %v9724_v43 }
 0x571   : > { %v10190_v6 = vpop.f32.mrf.mxu1  ;;  %v14197_v1 = vpop.f32.mrf.mxu0 }
 0x572   : > { %v18700_v8 = vadd.f32 %v10477_v45, %v10189_v11 }
 0x573   : > { %v10193_v24 = vpop.f32.mrf.mxu1  ;;  %10384 = vmatmul.mubr.bf16.gmra.mxu1 %v15291_v16  ;;  %v10493_v14 = vpop.f32.mrf.mxu0 }
 0x574   : > { %19932 = vst [vmem:[#allocation83_spill] sm:$0xff] %v18700_v8  ;;  %v10194_v61 = vadd.f32 %v10193_v24, %v18507_v2  ;;  %10391 = vmatprep.mubr.bf16.mxu1 %v15292_v23  ;;  %v15293_v24 = vld [vmem:[#allocation2 + $0x2dc] ss:$12 sps:$4 sm:$0xff]   ;;  %v15034_v8 = vld [vmem:[#allocation2 + $0x1d8] ss:$12 sps:$4 sm:$0xff]  }
 0x575   : > { %v10195_v30 = vpop.f32.mrf.mxu1  ;;  %v18705_v22 = vpop.f32.mrf.mxu0  ;;  %11667 = vmatmul.mubr.bf16.gmra.mxu0 %v15025_v17 }
 0x576   : > { %v18703_v7 = vadd.f32 %v14192_v21, %v10194_v61  ;;  %11674 = vmatprep.mubr.bf16.mxu0 %v15030_v36  ;;  %v15294_v21 = vld [vmem:[#allocation2 + $0x2f8] ss:$12 sps:$4 sm:$0xff]   ;;  %v15028_v61 = vld [vmem:[#allocation2 + $0x1bc] ss:$12 sps:$4 sm:$0xff]  }
 0x577   : > { %v10196_v43 = vpop.f32.mrf.mxu1  ;;  %v10506_v47 = vpop.f32.mrf.mxu0 }
 0x578   : > { %v10197_v45 = vadd.f32 %v10196_v43, %v18517_v5  ;;  %v9740_v5 = vadd.f32 %v18473_v35, %v18441_v55  ;;  %v15296_v35 = vld [vmem:[#allocation2 + $0x310] ss:$12 sps:$4 sm:$0xff]  }
 0x579   : > { %v10198_v11 = vpop.f32.mrf.mxu1  ;;  %v18710_v2 = vpop.f32.mrf.mxu0 }
 0x57a   : > { %v18708_v6 = vadd.f32 %v14193_v10, %v10197_v45 }
 0x57b   : > { %v10201_v23 = vpop.f32.mrf.mxu1  ;;  %10392 = vmatmul.mubr.bf16.gmra.mxu1 %v15293_v24  ;;  %v10509_v30 = vpop.f32.mrf.mxu0 }
 0x57c   : > { %v10202_v16 = vadd.f32 %v10201_v23, %v18521_v60  ;;  %10399 = vmatprep.mubr.bf16.mxu1 %v15294_v21 }
 0x57d   : > { %v10203_v17 = vpop.f32.mrf.mxu1  ;;  %v18717_v10 = vpop.f32.mrf.mxu0  ;;  %11675 = vmatmul.mubr.bf16.gmra.mxu0 %v15028_v61 }
 0x57e   : > { %v18715_v36 = vadd.f32 %v10490_v38, %v10202_v16  ;;  %11682 = vmatprep.mubr.bf16.mxu0 %v15034_v8  ;;  %v15295_v17 = vld [vmem:[#allocation2 + $0x2f4] ss:$12 sps:$4 sm:$0xff]   ;;  %v15039_v8 = vld [vmem:[#allocation2 + $0x1f0] ss:$12 sps:$4 sm:$0xff]  }
 0x57f   : > { %v10204_v43 = vpop.f32.mrf.mxu1  ;;  %v18719_v11 = vpop.f32.mrf.mxu0  ;;  %v15032_v38 = vld [vmem:[#allocation2 + $0x1d4] ss:$12 sps:$4 sm:$0xff]  }
 0x580   : > { %19933 = vst [vmem:[#allocation46_spill] sm:$0xff] %v18715_v36  ;;  %v10205_v45 = vadd.f32 %v10204_v43, %v9740_v5  ;;  %v15044_v36 = vld [vmem:[#allocation2 + $0x208] ss:$12 sps:$4 sm:$0xff]  }
 0x581   : > { %v10206_v60 = vpop.f32.mrf.mxu1  ;;  %v18723_v24 = vpop.f32.mrf.mxu0 }
 0x582   : > { %v18721_v23 = vadd.f32 %v10493_v14, %v10205_v45 }
 0x583   : > { %v10209_v21 = vpop.f32.mrf.mxu1  ;;  %10400 = vmatmul.mubr.bf16.gmra.mxu1 %v15295_v17  ;;  %v18726_v16 = vpop.f32.mrf.mxu0 }
 0x584   : > { %19934 = vst [vmem:[#allocation43_spill] sm:$0xff] %v18721_v23  ;;  %v10210_v55 = vadd.f32 %v10209_v21, %v18525_v46  ;;  %10407 = vmatprep.mubr.bf16.mxu1 %v15296_v35  ;;  %v15297_v23 = vld [vmem:[#allocation2 + $0x30c] ss:$12 sps:$4 sm:$0xff]  }
 0x585   : > { %v10211_v61 = vpop.f32.mrf.mxu1  ;;  %v18730_v43 = vpop.f32.mrf.mxu0  ;;  %11683 = vmatmul.mubr.bf16.gmra.mxu0 %v15032_v38 }
 0x586   : > { %v18728_v5 = vadd.f32 %v14196_v63, %v10210_v55  ;;  %11690 = vmatprep.mubr.bf16.mxu0 %v15039_v8  ;;  %v15298_v55 = vld [vmem:[#allocation2 + $0x328] ss:$12 sps:$4 sm:$0xff]   ;;  %v15037_v61 = vld [vmem:[#allocation2 + $0x1ec] ss:$12 sps:$4 sm:$0xff]  }
 0x587   : > { %v10212_v14 = vpop.f32.mrf.mxu1  ;;  %v18733_v60 = vpop.f32.mrf.mxu0 }
 0x588   : > { %19935 = vst [vmem:[#allocation48_spill] sm:$0xff] %v18728_v5  ;;  %v10213_v45 = vadd.f32 %v10212_v14, %v18529_v49  ;;  %v9756_v49 = vadd.f32 %v18551_v42, %v18486_v50  ;;  %v15299_v5 = vld [vmem:[#allocation2 + $0x324] ss:$12 sps:$4 sm:$0xff]  }
 0x589   : > { %v10214_v17 = vpop.f32.mrf.mxu1  ;;  %v18737_v21 = vpop.f32.mrf.mxu0  ;;  %v15042_v42 = vld [vmem:[#allocation2 + $0x204] ss:$12 sps:$4 sm:$0xff]  }
 0x58a   : > { %v18735_v46 = vadd.f32 %v14197_v1, %v10213_v45 }
 0x58b   : > { %v10217_v35 = vpop.f32.mrf.mxu1  ;;  %10408 = vmatmul.mubr.bf16.gmra.mxu1 %v15297_v23  ;;  %v18740_v38 = vpop.f32.mrf.mxu0 }
 0x58c   : > { %19936 = vst [vmem:[#allocation47_spill] sm:$0xff] %v18735_v46  ;;  %v10218_v63 = vadd.f32 %v10217_v35, %v18532_v12  ;;  %10415 = vmatprep.mubr.bf16.mxu1 %v15298_v55  ;;  %v15035_v55 = vld [vmem:[#allocation2 + $0xa4] ss:$12 sps:$4 sm:$0xff]  }
 0x58d   : > { %v10219_v8 = vpop.f32.mrf.mxu1  ;;  %v18746_v1 = vpop.f32.mrf.mxu0  ;;  %11691 = vmatmul.mubr.bf16.gmra.mxu0 %v15037_v61 }
 0x58e   : > { %v18744_v14 = vadd.f32 %v10506_v47, %v10218_v63  ;;  %11698 = vmatprep.mubr.bf16.mxu0 %v15044_v36  ;;  %v15049_v36 = vld [vmem:[#allocation2 + $0x220] ss:$12 sps:$4 sm:$0xff]  }
 0x58f   : > { %v10220_v45 = vpop.f32.mrf.mxu1  ;;  %v18748_v17 = vpop.f32.mrf.mxu0 }
 0x590   : > { %v10221_v23 = vadd.f32 %v10220_v45, %v9756_v49 }
 0x591   : > { %v10222_v12 = vpop.f32.mrf.mxu1  ;;  %v18752_v46 = vpop.f32.mrf.mxu0 }
 0x592   : > { %v18750_v35 = vadd.f32 %v10509_v30, %v10221_v23 }
 0x593   : > { %v10225_v8 = vpop.f32.mrf.mxu1  ;;  %10416 = vmatmul.mubr.bf16.gmra.mxu1 %v15299_v5  ;;  %v18755_v47 = vpop.f32.mrf.mxu0 }
 0x594   : > { %19937 = vst [vmem:[#allocation45_spill] sm:$0xff] %v18750_v35  ;;  %v10226_v50 = vadd.f32 %v10225_v8, %v18537_v32  ;;  %14266 = vmatprep.mubr.bf16.mxu1 %v15035_v55  ;;  %v15036_v32 = vld [vmem:[#allocation2 + $0xbc] ss:$12 sps:$4 sm:$0xff]   ;;  %v15040_v55 = vld [vmem:[#allocation2 + $0xd4] ss:$12 sps:$4 sm:$0xff]  }
 0x595   : > { %v10227_v63 = vpop.f32.mrf.mxu1  ;;  %v18760_v49 = vpop.f32.mrf.mxu0  ;;  %11699 = vmatmul.mubr.bf16.gmra.mxu0 %v15042_v42 }
 0x596   : > { %v18758_v61 = vadd.f32 %v18705_v22, %v10226_v50  ;;  %11706 = vmatprep.mubr.bf16.mxu0 %v15049_v36  ;;  %v15047_v50 = vld [vmem:[#allocation2 + $0x21c] ss:$12 sps:$4 sm:$0xff]  }
 0x597   : > { %v10228_v30 = vpop.f32.mrf.mxu1  ;;  %v18763_v23 = vpop.f32.mrf.mxu0 }
 0x598   : > { %v10229_v45 = vadd.f32 %v10228_v30, %v18539_v40  ;;  %v15054_v40 = vld [vmem:[#allocation2 + $0x238] ss:$12 sps:$4 sm:$0xff]   ;;  %v9772_v30 = vadd.f32 %v18565_v3, %v18555_v51 }
 0x599   : > { %v10230_v5 = vpop.f32.mrf.mxu1  ;;  %v18768_v8 = vpop.f32.mrf.mxu0 }
 0x59a   : > { %v18766_v12 = vadd.f32 %v18710_v2, %v10229_v45 }
 0x59b   : > { %v10233_v63 = vpop.f32.mrf.mxu1  ;;  %14267 = vmatmul.mubr.bf16.vlgmr.msra.gmra.mxu1 %v15036_v32  ;;  %v18771_v42 = vpop.f32.mrf.mxu0 }
 0x59c   : > { %19938 = vst [vmem:[#allocation50_spill] sm:$0xff] %v18766_v12  ;;  %v10234_v22 = vadd.f32 %v10233_v63, %v18557_v57  ;;  %14270 = vmatprep.mubr.bf16.mxu1 %v15040_v55  ;;  %v15041_v55 = vld [vmem:[#allocation2 + $0xec] ss:$12 sps:$4 sm:$0xff]  }
 0x59d   : > { %v10235_v36 = vpop.f32.mrf.mxu1  ;;  %v18778_v2 = vpop.f32.mrf.mxu0  ;;  %11707 = vmatmul.mubr.bf16.gmra.mxu0 %v15047_v50 }
 0x59e   : > { %v18776_v5 = vadd.f32 %v18719_v11, %v10234_v22  ;;  %19939 = vst [vmem:[#allocation52_spill] sm:$0xff] %v18778_v2  ;;  %11714 = vmatprep.mubr.bf16.mxu0 %v15054_v40  ;;  %v15045_v36 = vld [vmem:[#allocation2 + $0x104] ss:$12 sps:$4 sm:$0xff]   ;;  %v15052_v11 = vld [vmem:[#allocation2 + $0x234] ss:$12 sps:$4 sm:$0xff]  }
 0x59f   : > { %v10236_v45 = vpop.f32.mrf.mxu1  ;;  %v18780_v35 = vpop.f32.mrf.mxu0  ;;  %v15059_v40 = vld [vmem:[#allocation2 + $0x250] ss:$12 sps:$4 sm:$0xff]  }
 0x5a0   : > { %v10237_v32 = vadd.f32 %v10236_v45, %v9772_v30 }
 0x5a1   : > { %v10238_v57 = vpop.f32.mrf.mxu1  ;;  %v18785_v12 = vpop.f32.mrf.mxu0 }
 0x5a2   : > { %v18783_v63 = vadd.f32 %v18726_v16, %v10237_v32  ;;  %19940 = vst [vmem:[#allocation49_spill] sm:$0xff] %v18785_v12 }
 0x5a3   : > { %v10241_v51 = vpop.f32.mrf.mxu1  ;;  %14271 = vmatmul.mubr.bf16.gmra.mxu1 %v15041_v55  ;;  %v18788_v22 = vpop.f32.mrf.mxu0 }
 0x5a4   : > { %v10242_v3 = vadd.f32 %v10241_v51, %v18560_v59  ;;  %14274 = vmatprep.mubr.bf16.mxu1 %v15045_v36  ;;  %v15046_v59 = vld [vmem:[#allocation2 + $0x11c] ss:$12 sps:$4 sm:$0xff]   ;;  %v15050_v51 = vld [vmem:[#allocation2 + $0x134] ss:$12 sps:$4 sm:$0xff]  }
 0x5a5   : > { %v10243_v50 = vpop.f32.mrf.mxu1  ;;  %v18793_v45 = vpop.f32.mrf.mxu0  ;;  %11715 = vmatmul.mubr.bf16.gmra.mxu0 %v15052_v11 }
 0x5a6   : > { %v18791_v30 = vadd.f32 %v18717_v10, %v10242_v3  ;;  %19941 = vst [vmem:[#allocation55_spill] sm:$0xff] %v18793_v45  ;;  %11722 = vmatprep.mubr.bf16.mxu0 %v15059_v40  ;;  %v15057_v3 = vld [vmem:[#allocation2 + $0x24c] ss:$12 sps:$4 sm:$0xff]  }
 0x5a7   : > { %v10244_v16 = vpop.f32.mrf.mxu1  ;;  %v18796_v57 = vpop.f32.mrf.mxu0 }
 0x5a8   : > { %v10245_v32 = vadd.f32 %v10244_v16, %v18563_v56  ;;  %19942 = vst [vmem:[#allocation19_spill] sm:$0xff] %v18796_v57  ;;  %v15064_v56 = vld [vmem:[#allocation2 + $0x268] ss:$12 sps:$4 sm:$0xff]   ;;  %v9788_v16 = vadd.f32 %v18580_v37, %v18568_v29  ;;  %v20005_v57 = vld [vmem:[#allocation27_spill] sm:$0xff] }
 0x5a9   : > { %v10246_v55 = vpop.f32.mrf.mxu1  ;;  %v18801_v50 = vpop.f32.mrf.mxu0 }
 0x5aa   : > { %v18799_v36 = vadd.f32 %v18723_v24, %v10245_v32  ;;  %19943 = vst [vmem:[#allocation51_spill] sm:$0xff] %v18801_v50 }
 0x5ab   : > { %v10249_v12 = vpop.f32.mrf.mxu1  ;;  %14275 = vmatmul.mubr.bf16.gmra.mxu1 %v15046_v59  ;;  %v18804_v11 = vpop.f32.mrf.mxu0 }
 0x5ac   : > { %v10250_v10 = vadd.f32 %v10249_v12, %v18571_v13  ;;  %14278 = vmatprep.mubr.bf16.mxu1 %v15050_v51  ;;  %19944 = vst [vmem:[#allocation53_spill] sm:$0xff] %v18804_v11  ;;  %v15051_v12 = vld [vmem:[#allocation2 + $0x14c] ss:$12 sps:$4 sm:$0xff]  }
 0x5ad   : > { %v10251_v40 = vpop.f32.mrf.mxu1  ;;  %v18811_v24 = vpop.f32.mrf.mxu0  ;;  %11723 = vmatmul.mubr.bf16.gmra.mxu0 %v15057_v3 }
 0x5ae   : > { %v18809_v55 = vadd.f32 %v18733_v60, %v10250_v10  ;;  %19945 = vst [vmem:[#allocation54_spill] sm:$0xff] %v18811_v24  ;;  %11730 = vmatprep.mubr.bf16.mxu0 %v15064_v56  ;;  %v15055_v40 = vld [vmem:[#allocation2 + $0x164] ss:$12 sps:$4 sm:$0xff]   ;;  %v15069_v56 = vld [vmem:[#allocation2 + $0x280] ss:$12 sps:$4 sm:$0xff]  }
 0x5af   : > { %v10252_v32 = vpop.f32.mrf.mxu1  ;;  %v18813_v50 = vpop.f32.mrf.mxu0  ;;  %v15062_v60 = vld [vmem:[#allocation2 + $0x264] ss:$12 sps:$4 sm:$0xff]  }
 0x5b0   : > { %v10253_v59 = vadd.f32 %v10252_v32, %v9788_v16  ;;  %19946 = vst [vmem:[#allocation56_spill] sm:$0xff] %v18813_v50 }
 0x5b1   : > { %v10254_v13 = vpop.f32.mrf.mxu1  ;;  %v18818_v11 = vpop.f32.mrf.mxu0 }
 0x5b2   : > { %v18816_v51 = vadd.f32 %v18740_v38, %v10253_v59  ;;  %19947 = vst [vmem:[#allocation62_spill] sm:$0xff] %v18818_v11  ;;  %v15101_v11 = vld [vmem:[#allocation2 + $0x32c] ss:$12 sps:$4 sm:$0xff]  }
 0x5b3   : > { %v10257_v29 = vpop.f32.mrf.mxu1  ;;  %14279 = vmatmul.mubr.bf16.gmra.mxu1 %v15051_v12  ;;  %v18821_v10 = vpop.f32.mrf.mxu0 }
 0x5b4   : > { %v10258_v37 = vadd.f32 %v10257_v29, %v18574_v28  ;;  %14282 = vmatprep.mubr.bf16.mxu1 %v15055_v40  ;;  %19948 = vst [vmem:[#allocation58_spill] sm:$0xff] %v18821_v10  ;;  %v15056_v28 = vld [vmem:[#allocation2 + $0x17c] ss:$12 sps:$4 sm:$0xff]   ;;  %v15060_v29 = vld [vmem:[#allocation2 + $0x194] ss:$12 sps:$4 sm:$0xff]  }
 0x5b5   : > { %v10259_v3 = vpop.f32.mrf.mxu1  ;;  %v18826_v32 = vpop.f32.mrf.mxu0  ;;  %11731 = vmatmul.mubr.bf16.gmra.mxu0 %v15062_v60 }
 0x5b6   : > { %v18824_v16 = vadd.f32 %v18730_v43, %v10258_v37  ;;  %19949 = vst [vmem:[#allocation61_spill] sm:$0xff] %v18826_v32  ;;  %11738 = vmatprep.mubr.bf16.mxu0 %v15069_v56  ;;  %v15067_v37 = vld [vmem:[#allocation2 + $0x27c] ss:$12 sps:$4 sm:$0xff]   ;;  %v19991_v32 = vld [vmem:[#allocation75_spill] sm:$0xff] }
 0x5b7   : > { %v10260_v38 = vpop.f32.mrf.mxu1  ;;  %v18829_v13 = vpop.f32.mrf.mxu0 }
 0x5b8   : > { %v10261_v59 = vadd.f32 %v10260_v38, %v18577_v27  ;;  %19950 = vst [vmem:[#allocation24_spill] sm:$0xff] %v18829_v13  ;;  %v15074_v27 = vld [vmem:[#allocation2 + $0x298] ss:$12 sps:$4 sm:$0xff]   ;;  %v9804_v38 = vadd.f32 %v18593_v39, %v18582_v26 }
 0x5b9   : > { %v10262_v12 = vpop.f32.mrf.mxu1  ;;  %v18834_v3 = vpop.f32.mrf.mxu0 }
 0x5ba   : > { %v18832_v40 = vadd.f32 %v18737_v21, %v10261_v59  ;;  %19951 = vst [vmem:[#allocation20_spill] sm:$0xff] %v18834_v3 }
 0x5bb   : > { %v10265_v10 = vpop.f32.mrf.mxu1  ;;  %14283 = vmatmul.mubr.bf16.gmra.mxu1 %v15056_v28  ;;  %v18837_v60 = vpop.f32.mrf.mxu0 }
 0x5bc   : > { %v10266_v43 = vadd.f32 %v10265_v10, %v18586_v15  ;;  %14286 = vmatprep.mubr.bf16.mxu1 %v15060_v29  ;;  %19952 = vst [vmem:[#allocation59_spill] sm:$0xff] %v18837_v60  ;;  %v15061_v10 = vld [vmem:[#allocation2 + $0x1ac] ss:$12 sps:$4 sm:$0xff]  }
 0x5bd   : > { %v10267_v56 = vpop.f32.mrf.mxu1  ;;  %v18844_v21 = vpop.f32.mrf.mxu0  ;;  %11739 = vmatmul.mubr.bf16.gmra.mxu0 %v15067_v37 }
 0x5be   : > { %v18842_v12 = vadd.f32 %v18748_v17, %v10266_v43  ;;  %19953 = vst [vmem:[#allocation57_spill] sm:$0xff] %v18844_v21  ;;  %11746 = vmatprep.mubr.bf16.mxu0 %v15074_v27  ;;  %v15065_v56 = vld [vmem:[#allocation2 + $0x1c4] ss:$12 sps:$4 sm:$0xff]   ;;  %v15072_v17 = vld [vmem:[#allocation2 + $0x294] ss:$12 sps:$4 sm:$0xff]  }
 0x5bf   : > { %v10268_v59 = vpop.f32.mrf.mxu1  ;;  %v18846_v3 = vpop.f32.mrf.mxu0  ;;  %v15079_v27 = vld [vmem:[#allocation2 + $0x2b0] ss:$12 sps:$4 sm:$0xff]   ;;  %v15114_v21 = vld [vmem:[#allocation2 + $0x358] ss:$12 sps:$4 sm:$0xff]  }
 0x5c0   : > { %v10269_v28 = vadd.f32 %v10268_v59, %v9804_v38  ;;  %19954 = vst [vmem:[#allocation70_spill] sm:$0xff] %v18846_v3 }
 0x5c1   : > { %v10270_v15 = vpop.f32.mrf.mxu1  ;;  %v18851_v60 = vpop.f32.mrf.mxu0 }
 0x5c2   : > { %v18849_v29 = vadd.f32 %v18755_v47, %v10269_v28  ;;  %19956 = vst [vmem:[#allocation66_spill] sm:$0xff] %v18851_v60  ;;  %v15096_v60 = vld [vmem:[#allocation2 + $0x2fc] ss:$12 sps:$4 sm:$0xff]  }
 0x5c3   : > { %v10273_v26 = vpop.f32.mrf.mxu1  ;;  %14287 = vmatmul.mubr.bf16.gmra.mxu1 %v15061_v10  ;;  %v18854_v43 = vpop.f32.mrf.mxu0 }
 0x5c4   : > { %19955 = vst [vmem:[#allocation23_spill] sm:$0xff] %v18849_v29  ;;  %v10274_v39 = vadd.f32 %v10273_v26, %v18588_v62  ;;  %14290 = vmatprep.mubr.bf16.mxu1 %v15065_v56  ;;  %19957 = vst [vmem:[#allocation21_spill] sm:$0xff] %v18854_v43  ;;  %v15066_v62 = vld [vmem:[#allocation2 + $0x1dc] ss:$12 sps:$4 sm:$0xff]   ;;  %v15070_v26 = vld [vmem:[#allocation2 + $0x1f4] ss:$12 sps:$4 sm:$0xff]  }
 0x5c5   : > { %v10275_v37 = vpop.f32.mrf.mxu1  ;;  %v18859_v59 = vpop.f32.mrf.mxu0  ;;  %11747 = vmatmul.mubr.bf16.gmra.mxu0 %v15072_v17 }
 0x5c6   : > { %v18857_v38 = vadd.f32 %v18746_v1, %v10274_v39  ;;  %19958 = vst [vmem:[#allocation65_spill] sm:$0xff] %v18859_v59  ;;  %11754 = vmatprep.mubr.bf16.mxu0 %v15079_v27  ;;  %v15077_v39 = vld [vmem:[#allocation2 + $0x2ac] ss:$12 sps:$4 sm:$0xff]  }
 0x5c7   : > { %v10276_v47 = vpop.f32.mrf.mxu1  ;;  %v18862_v15 = vpop.f32.mrf.mxu0 }
 0x5c8   : > { %v10277_v28 = vadd.f32 %v10276_v47, %v18591_v4  ;;  %19959 = vst [vmem:[#allocation60_spill] sm:$0xff] %v18862_v15  ;;  %v15084_v4 = vld [vmem:[#allocation2 + $0x2c8] ss:$12 sps:$4 sm:$0xff]   ;;  %v9820_v47 = vadd.f32 %v18608_v33, %v18598_v48 }
 0x5c9   : > { %v10278_v10 = vpop.f32.mrf.mxu1  ;;  %v18867_v37 = vpop.f32.mrf.mxu0 }
 0x5ca   : > { %v18865_v56 = vadd.f32 %v18752_v46, %v10277_v28  ;;  %19961 = vst [vmem:[#allocation18_spill] sm:$0xff] %v18867_v37 }
 0x5cb   : > { %v10281_v43 = vpop.f32.mrf.mxu1  ;;  %14291 = vmatmul.mubr.bf16.gmra.mxu1 %v15066_v62  ;;  %v18870_v17 = vpop.f32.mrf.mxu0 }
 0x5cc   : > { %19960 = vst [vmem:[#allocation73_spill] sm:$0xff] %v18865_v56  ;;  %v10282_v1 = vadd.f32 %v10281_v43, %v18596_v44  ;;  %14294 = vmatprep.mubr.bf16.mxu1 %v15070_v26  ;;  %19962 = vst [vmem:[#allocation68_spill] sm:$0xff] %v18870_v17  ;;  %v15071_v43 = vld [vmem:[#allocation2 + $0x20c] ss:$12 sps:$4 sm:$0xff]  }
 0x5cd   : > { %v10283_v27 = vpop.f32.mrf.mxu1  ;;  %v18877_v46 = vpop.f32.mrf.mxu0  ;;  %11755 = vmatmul.mubr.bf16.gmra.mxu0 %v15077_v39 }
 0x5ce   : > { %v18875_v10 = vadd.f32 %v18763_v23, %v10282_v1  ;;  %19964 = vst [vmem:[#allocation32_spill] sm:$0xff] %v18877_v46  ;;  %11762 = vmatprep.mubr.bf16.mxu0 %v15084_v4  ;;  %v15075_v27 = vld [vmem:[#allocation2 + $0x224] ss:$12 sps:$4 sm:$0xff]   ;;  %v15089_v4 = vld [vmem:[#allocation2 + $0x2e0] ss:$12 sps:$4 sm:$0xff]  }
 0x5cf   : > { %v10284_v28 = vpop.f32.mrf.mxu1  ;;  %v18879_v37 = vpop.f32.mrf.mxu0  ;;  %v15082_v23 = vld [vmem:[#allocation2 + $0x2c4] ss:$12 sps:$4 sm:$0xff]   ;;  %v15091_v46 = vld [vmem:[#allocation2 + $0x2cc] ss:$12 sps:$4 sm:$0xff]  }
 0x5d0   : > { %19963 = vst [vmem:[#allocation25_spill] sm:$0xff] %v18875_v10  ;;  %v10285_v62 = vadd.f32 %v10284_v28, %v9820_v47  ;;  %19965 = vst [vmem:[#allocation16_spill] sm:$0xff] %v18879_v37 }
 0x5d1   : > { %v10286_v44 = vpop.f32.mrf.mxu1  ;;  %v18884_v17 = vpop.f32.mrf.mxu0 }
 0x5d2   : > { %v18882_v26 = vadd.f32 %v18771_v42, %v10285_v62  ;;  %19967 = vst [vmem:[#allocation63_spill] sm:$0xff] %v18884_v17 }
 0x5d3   : > { %v10289_v48 = vpop.f32.mrf.mxu1  ;;  %14295 = vmatmul.mubr.bf16.gmra.mxu1 %v15071_v43  ;;  %v18887_v1 = vpop.f32.mrf.mxu0 }
 0x5d4   : > { %19966 = vst [vmem:[#allocation64_spill] sm:$0xff] %v18882_v26  ;;  %v10290_v33 = vadd.f32 %v10289_v48, %v18602_v18  ;;  %14298 = vmatprep.mubr.bf16.mxu1 %v15075_v27  ;;  %19968 = vst [vmem:[#allocation72_spill] sm:$0xff] %v18887_v1  ;;  %v15076_v18 = vld [vmem:[#allocation2 + $0x23c] ss:$12 sps:$4 sm:$0xff]   ;;  %v15080_v48 = vld [vmem:[#allocation2 + $0x254] ss:$12 sps:$4 sm:$0xff]  }
 0x5d5   : > { %v10291_v39 = vpop.f32.mrf.mxu1  ;;  %v18892_v28 = vpop.f32.mrf.mxu0  ;;  %11763 = vmatmul.mubr.bf16.gmra.mxu0 %v15082_v23  ;;  %v19982_v1 = vld [vmem:[#allocation71_spill] sm:$0xff] }
 0x5d6   : > { %v18890_v47 = vadd.f32 %v18760_v49, %v10290_v33  ;;  %19970 = vst [vmem:[#allocation84_spill] sm:$0xff] %v18892_v28  ;;  %11770 = vmatprep.mubr.bf16.mxu0 %v15089_v4  ;;  %v15087_v33 = vld [vmem:[#allocation2 + $0x2dc] ss:$12 sps:$4 sm:$0xff]  }
 0x5d7   : > { %v10292_v42 = vpop.f32.mrf.mxu1  ;;  %v18895_v44 = vpop.f32.mrf.mxu0 }
 0x5d8   : > { %19969 = vst [vmem:[#allocation74_spill] sm:$0xff] %v18890_v47  ;;  %v10293_v62 = vadd.f32 %v10292_v42, %v18605_v20  ;;  %19971 = vst [vmem:[#allocation85_spill] sm:$0xff] %v18895_v44  ;;  %v15094_v20 = vld [vmem:[#allocation2 + $0x2f8] ss:$12 sps:$4 sm:$0xff]   ;;  %v9836_v42 = vadd.f32 %v18618_v19, %v18610_v52  ;;  %v15092_v19 = vld [vmem:[#allocation2 + $0x2f4] ss:$12 sps:$4 sm:$0xff]  }
 0x5d9   : > { %v10294_v43 = vpop.f32.mrf.mxu1  ;;  %v18900_v39 = vpop.f32.mrf.mxu0  ;;  %v15104_v44 = vld [vmem:[#allocation2 + $0x328] ss:$12 sps:$4 sm:$0xff]  }
 0x5da   : > { %v18898_v27 = vadd.f32 %v18768_v8, %v10293_v62  ;;  %19973 = vst [vmem:[#allocation87_spill] sm:$0xff] %v18900_v39 }
 0x5db   : > { %v10297_v17 = vpop.f32.mrf.mxu1  ;;  %14299 = vmatmul.mubr.bf16.gmra.mxu1 %v15076_v18  ;;  %v18903_v23 = vpop.f32.mrf.mxu0 }
 0x5dc   : > { %19972 = vst [vmem:[#allocation86_spill] sm:$0xff] %v18898_v27  ;;  %v10298_v49 = vadd.f32 %v10297_v17, %v18612_v34  ;;  %14302 = vmatprep.mubr.bf16.mxu1 %v15080_v48  ;;  %19974 = vst [vmem:[#allocation88_spill] sm:$0xff] %v18903_v23  ;;  %v15081_v17 = vld [vmem:[#allocation2 + $0x26c] ss:$12 sps:$4 sm:$0xff]  }
 0x5dd   : > { %v10299_v4 = vpop.f32.mrf.mxu1  ;;  %v18910_v8 = vpop.f32.mrf.mxu0  ;;  %11771 = vmatmul.mubr.bf16.gmra.mxu0 %v15087_v33  ;;  %v15099_v33 = vld [vmem:[#allocation2 + $0x310] ss:$12 sps:$4 sm:$0xff]  }
 0x5de   : > { %v18908_v43 = vadd.f32 %v18780_v35, %v10298_v49  ;;  %11778 = vmatprep.mubr.bf16.mxu0 %v15094_v20  ;;  %v15085_v4 = vld [vmem:[#allocation2 + $0x284] ss:$12 sps:$4 sm:$0xff]  }
 0x5df   : > { %v10300_v62 = vpop.f32.mrf.mxu1  ;;  %v11582_v39 = vpop.f32.mrf.mxu0 }
 0x5e0   : > { %19975 = vst [vmem:[#allocation89_spill] sm:$0xff] %v18908_v43  ;;  %v10301_v18 = vadd.f32 %v10300_v62, %v9836_v42 }
 0x5e1   : > { %v10302_v34 = vpop.f32.mrf.mxu1  ;;  %v18915_v23 = vpop.f32.mrf.mxu0 }
 0x5e2   : > { %v18913_v48 = vadd.f32 %v18788_v22, %v10301_v18  ;;  %v15086_v18 = vld [vmem:[#allocation2 + $0x29c] ss:$12 sps:$4 sm:$0xff]   ;;  %v15090_v34 = vld [vmem:[#allocation2 + $0x2b4] ss:$12 sps:$4 sm:$0xff]  }
 0x5e3   : > { %v10305_v28 = vpop.f32.mrf.mxu1  ;;  %14303 = vmatmul.mubr.bf16.gmra.mxu1 %v15081_v17  ;;  %v11585_v35 = vpop.f32.mrf.mxu0 }
 0x5e4   : > { %19976 = vst [vmem:[#allocation90_spill] sm:$0xff] %v18913_v48  ;;  %v18918_v52 = vadd.f32 %v10305_v28, %v18614_v31  ;;  %14306 = vmatprep.mubr.bf16.mxu1 %v15085_v4  ;;  %v19979_v28 = vld [vmem:[#allocation78_spill] sm:$0xff] }
 0x5e5   : > { %v10307_v49 = vpop.f32.mrf.mxu1  ;;  %v18920_v20 = vpop.f32.mrf.mxu0  ;;  %11779 = vmatmul.mubr.bf16.gmra.mxu0 %v15092_v19  ;;  %v15097_v35 = vld [vmem:[#allocation2 + $0x30c] ss:$12 sps:$4 sm:$0xff]  }
 0x5e6   : > { %19977 = vst [vmem:[#allocation91_spill] sm:$0xff] %v18918_v52  ;;  %11786 = vmatprep.mubr.bf16.mxu0 %v15099_v33  ;;  %v19981_v33 = vld [vmem:[#allocation17_spill] sm:$0xff] }
 0x5e7   : > { %v10308_v39 = vpop.f32.mrf.mxu1  ;;  %v11590_v42 = vpop.f32.mrf.mxu0 }
 0x5e8   : > { %v18923_v22 = vadd.f32 %v10308_v39, %v18616_v25  ;;  %v9852_v25 = vadd.f32 %v19982_v1, %v19981_v33  ;;  %v15102_v1 = vld [vmem:[#allocation2 + $0x324] ss:$12 sps:$4 sm:$0xff]  }
 0x5e9   : > { %v10310_v62 = vpop.f32.mrf.mxu1  ;;  %v18925_v17 = vpop.f32.mrf.mxu0 }
 0x5ea   : > { %19978 = vst [vmem:[#allocation92_spill] sm:$0xff] %v18923_v22 }
 0x5eb   : > { %v10313_v31 = vpop.f32.mrf.mxu1  ;;  %14307 = vmatmul.mubr.bf16.gmra.mxu1 %v15086_v18  ;;  %v11593_v49 = vpop.f32.mrf.mxu0 }
 0x5ec   : > { %v18928_v4 = vadd.f32 %v10313_v31, %v19979_v28  ;;  %14310 = vmatprep.mubr.bf16.mxu1 %v15090_v34  ;;  %v15095_v31 = vld [vmem:[#allocation2 + $0x2e4] ss:$12 sps:$4 sm:$0xff]  }
 0x5ed   : > { %v10315_v19 = vpop.f32.mrf.mxu1  ;;  %v18932_v39 = vpop.f32.mrf.mxu0  ;;  %11787 = vmatmul.mubr.bf16.gmra.mxu0 %v15097_v35  ;;  %v19984_v49 = vld [vmem:[#allocation69_spill] sm:$0xff]  ;;  %v15109_v35 = vld [vmem:[#allocation2 + $0x340] ss:$12 sps:$4 sm:$0xff]  }
 0x5ee   : > { %19980 = vst [vmem:[#allocation78_spill] sm:$0xff] %v18928_v4  ;;  %11794 = vmatprep.mubr.bf16.mxu0 %v15104_v44 }
 0x5ef   : > { %v10316_v42 = vpop.f32.mrf.mxu1  ;;  %v11598_v37 = vpop.f32.mrf.mxu0 }
 0x5f0   : > { %v18934_v62 = vadd.f32 %v10316_v42, %v9852_v25  ;;  %v19986_v37 = vld [vmem:[#allocation80_spill] sm:$0xff] }
 0x5f1   : > { %v10318_v18 = vpop.f32.mrf.mxu1  ;;  %v18936_v28 = vpop.f32.mrf.mxu0 }
 0x5f2   : > { %19983 = vst [vmem:[#allocation17_spill] sm:$0xff] %v18934_v62  ;;  %v15111_v62 = vld [vmem:[#allocation2 + $0x38c] ss:$12 sps:$4 sm:$0xff]  }
 0x5f3   : > { %v10321_v34 = vpop.f32.mrf.mxu1  ;;  %14311 = vmatmul.mubr.bf16.gmra.mxu1 %v15091_v46  ;;  %v11601_v33 = vpop.f32.mrf.mxu0  ;;  %v15100_v46 = vld [vmem:[#allocation2 + $0x314] ss:$12 sps:$4 sm:$0xff]  }
 0x5f4   : > { %v18939_v19 = vadd.f32 %v10321_v34, %v19984_v49  ;;  %14314 = vmatprep.mubr.bf16.mxu1 %v15095_v31  ;;  %v19988_v31 = vld [vmem:[#allocation76_spill] sm:$0xff] }
 0x5f5   : > { %v10323_v15 = vpop.f32.mrf.mxu1  ;;  %v18941_v59 = vpop.f32.mrf.mxu0  ;;  %11795 = vmatmul.mubr.bf16.gmra.mxu0 %v15102_v1 }
 0x5f6   : > { %19985 = vst [vmem:[#allocation71_spill] sm:$0xff] %v18939_v19  ;;  %11802 = vmatprep.mubr.bf16.mxu0 %v15109_v35  ;;  %v15107_v15 = vld [vmem:[#allocation2 + $0x33c] ss:$12 sps:$4 sm:$0xff]   ;;  %v19990_v35 = vld [vmem:[#allocation29_spill] sm:$0xff] }
 0x5f7   : > { %v10324_v44 = vpop.f32.mrf.mxu1  ;;  %v11606_v42 = vpop.f32.mrf.mxu0 }
 0x5f8   : > { %v18944_v25 = vadd.f32 %v10324_v44, %v19986_v37  ;;  %v9868_v44 = vadd.f32 %v19991_v32, %v19990_v35  ;;  %v15112_v32 = vld [vmem:[#allocation2 + $0x354] ss:$12 sps:$4 sm:$0xff]  }
 0x5f9   : > { %v10326_v18 = vpop.f32.mrf.mxu1  ;;  %v18946_v3 = vpop.f32.mrf.mxu0 }
 0x5fa   : > { %19987 = vst [vmem:[#allocation69_spill] sm:$0xff] %v18944_v25 }
 0x5fb   : > { %v10329_v34 = vpop.f32.mrf.mxu1  ;;  %14315 = vmatmul.mubr.bf16.gmra.mxu1 %v15096_v60  ;;  %v11609_v33 = vpop.f32.mrf.mxu0 }
 0x5fc   : > { %v18949_v49 = vadd.f32 %v10329_v34, %v19988_v31  ;;  %14318 = vmatprep.mubr.bf16.mxu1 %v15100_v46  ;;  %v15105_v34 = vld [vmem:[#allocation2 + $0x344] ss:$12 sps:$4 sm:$0xff]   ;;  %v19993_v33 = vld [vmem:[#allocation26_spill] sm:$0xff] }
 0x5fd   : > { %v10331_v1 = vpop.f32.mrf.mxu1  ;;  %v18953_v37 = vpop.f32.mrf.mxu0  ;;  %11803 = vmatmul.mubr.bf16.gmra.mxu0 %v15107_v15  ;;  %v15117_v15 = vld [vmem:[#allocation2 + $0x370] ss:$12 sps:$4 sm:$0xff]  }
 0x5fe   : > { %19989 = vst [vmem:[#allocation80_spill] sm:$0xff] %v18949_v49  ;;  %11810 = vmatprep.mubr.bf16.mxu0 %v15114_v21 }
 0x5ff   : > { %v10332_v42 = vpop.f32.mrf.mxu1  ;;  %v11614_v13 = vpop.f32.mrf.mxu0 }
 0x600   : > { %v18955_v18 = vadd.f32 %v10332_v42, %v9868_v44  ;;  %v19995_v13 = vld [vmem:[#allocation79_spill] sm:$0xff] }
 0x601   : > { %v10334_v60 = vpop.f32.mrf.mxu1  ;;  %v18957_v31 = vpop.f32.mrf.mxu0 }
 0x602   : > { %19992 = vst [vmem:[#allocation76_spill] sm:$0xff] %v18955_v18  ;;  %v15106_v18 = vld [vmem:[#allocation2 + $0x35c] ss:$12 sps:$4 sm:$0xff]  }
 0x603   : > { %v10337_v46 = vpop.f32.mrf.mxu1  ;;  %14319 = vmatmul.mubr.bf16.gmra.mxu1 %v15101_v11  ;;  %v11617_v35 = vpop.f32.mrf.mxu0  ;;  %v15110_v11 = vld [vmem:[#allocation2 + $0x374] ss:$12 sps:$4 sm:$0xff]  }
 0x604   : > { %v18960_v1 = vadd.f32 %v10337_v46, %v19993_v33  ;;  %14322 = vmatprep.mubr.bf16.mxu1 %v15105_v34  ;;  %v19997_v34 = vld [vmem:[#allocation31_spill] sm:$0xff] }
 0x605   : > { %v10339_v50 = vpop.f32.mrf.mxu1  ;;  %v18962_v49 = vpop.f32.mrf.mxu0  ;;  %11811 = vmatmul.mubr.bf16.gmra.mxu0 %v15112_v32 }
 0x606   : > { %19994 = vst [vmem:[#allocation29_spill] sm:$0xff] %v18960_v1  ;;  %11818 = vmatprep.mubr.bf16.mxu0 %v15117_v15  ;;  %v15115_v50 = vld [vmem:[#allocation2 + $0x36c] ss:$12 sps:$4 sm:$0xff]   ;;  %v15120_v1 = vld [vmem:[#allocation2 + $0x388] ss:$12 sps:$4 sm:$0xff]  }
 0x607   : > { %v10340_v21 = vpop.f32.mrf.mxu1  ;;  %v11622_v42 = vpop.f32.mrf.mxu0 }
 0x608   : > { %v18965_v44 = vadd.f32 %v10340_v21, %v19995_v13  ;;  %v19999_v13 = vld [vmem:[#allocation34_spill] sm:$0xff] }
 0x609   : > { %v10342_v60 = vpop.f32.mrf.mxu1  ;;  %v18967_v24 = vpop.f32.mrf.mxu0 }
 0x60a   : > { %19996 = vst [vmem:[#allocation75_spill] sm:$0xff] %v18965_v44 }
 0x60b   : > { %v10345_v46 = vpop.f32.mrf.mxu1  ;;  %14323 = vmatmul.mubr.bf16.gmra.mxu1 %v15106_v18  ;;  %v11625_v35 = vpop.f32.mrf.mxu0 }
 0x60c   : > { %v18970_v33 = vadd.f32 %v10345_v46, %v19997_v34  ;;  %14326 = vmatprep.mubr.bf16.mxu1 %v15110_v11  ;;  %v20001_v11 = vld [vmem:[#allocation77_spill] sm:$0xff] }
 0x60d   : > { %v10347_v32 = vpop.f32.mrf.mxu1  ;;  %v18972_v15 = vpop.f32.mrf.mxu0  ;;  %11819 = vmatmul.mubr.bf16.gmra.mxu0 %v15115_v50  ;;  %v15118_v35 = vld [vmem:[#allocation2 + $0x384] ss:$12 sps:$4 sm:$0xff]   ;;  %v20003_v50 = vld [vmem:[#allocation30_spill] sm:$0xff] }
 0x60e   : > { %19998 = vst [vmem:[#allocation26_spill] sm:$0xff] %v18970_v33  ;;  %11826 = vmatprep.mubr.bf16.mxu0 %v15120_v1 }
 0x60f   : > { %v10348_v21 = vpop.f32.mrf.mxu1  ;;  %v11630_v60 = vpop.f32.mrf.mxu0 }
 0x610   : > { %v18975_v42 = vadd.f32 %v10348_v21, %v19999_v13 }
 0x611   : > { %v10350_v44 = vpop.f32.mrf.mxu1  ;;  %v18977_v18 = vpop.f32.mrf.mxu0 }
 0x612   : > { %20000 = vst [vmem:[#allocation79_spill] sm:$0xff] %v18975_v42 }
 0x613   : > { %v10353_v46 = vpop.f32.mrf.mxu1  ;;  %14327 = vmatmul.mubr.bf16.gmra.mxu1 %v15111_v62  ;;  %v11633_v32 = vpop.f32.mrf.mxu0 }
 0x614   : > { %v18980_v34 = vadd.f32 %v10353_v46, %v20001_v11  ;;  %v20007_v32 = vld [vmem:[#allocation33_spill] sm:$0xff] }
 0x615   : > { %v10355_v33 = vpop.f32.mrf.mxu1  ;;  %v18982_v25 = vpop.f32.mrf.mxu0  ;;  %11827 = vmatmul.mubr.bf16.gmra.mxu0 %v15118_v35 }
 0x616   : > { %20002 = vst [vmem:[#allocation31_spill] sm:$0xff] %v18980_v34 }
 0x617   : > { %v10356_v1 = vpop.f32.mrf.mxu1  ;;  %v11638_v13 = vpop.f32.mrf.mxu0 }
 0x618   : > { %v18985_v21 = vadd.f32 %v10356_v1, %v20003_v50  ;;  %v20009_v13 = vld [vmem:[#allocation22_spill] sm:$0xff] }
 0x619   : > { %v10358_v44 = vpop.f32.mrf.mxu1  ;;  %v18987_v60 = vpop.f32.mrf.mxu0 }
 0x61a   : > { %20004 = vst [vmem:[#allocation34_spill] sm:$0xff] %v18985_v21 }
 0x61b   : > { %v10361_v42 = vpop.f32.mrf.mxu1  ;;  %v11641_v46 = vpop.f32.mrf.mxu0 }
 0x61c   : > { %v18990_v62 = vadd.f32 %v10361_v42, %v20005_v57  ;;  %v20011_v46 = vld [vmem:[#allocation28_spill] sm:$0xff] }
 0x61d   : > { %v10363_v11 = vpop.f32.mrf.mxu1  ;;  %v18992_v34 = vpop.f32.mrf.mxu0 }
 0x61e   : > { %20006 = vst [vmem:[#allocation77_spill] sm:$0xff] %v18990_v62 }
 0x61f   : > { %v10364_v33 = vpop.f32.mrf.mxu1  ;;  %v11646_v35 = vpop.f32.mrf.mxu0 }
 0x620   : > { %v18995_v4 = vadd.f32 %v10364_v33, %v20007_v32 }
 0x621   : > { %v10366_v48 = vpop.f32.mrf.mxu1  ;;  %v18997_v1 = vpop.f32.mrf.mxu0 }
 0x622   : > { %20008 = vst [vmem:[#allocation30_spill] sm:$0xff] %v18995_v4 }
 0x623   : > { %v10369_v50 = vpop.f32.mrf.mxu1  ;;  %v11649_v21 = vpop.f32.mrf.mxu0 }
 0x624   : > { %v19000_v44 = vadd.f32 %v10369_v50, %v20009_v13 }
 0x625   : > { %v10371_v45 = vpop.f32.mrf.mxu1  ;;  %v19002_v57 = vpop.f32.mrf.mxu0 }
 0x626   : > { %20010 = vst [vmem:[#allocation27_spill] sm:$0xff] %v19000_v44  ;;  %v20014_v45 = vld [vmem:[#allocation35_spill] sm:$0xff] }
 0x627   : > { %v10372_v42 = vpop.f32.mrf.mxu1  ;;  %v11654_v62 = vpop.f32.mrf.mxu0 }
 0x628   : > { %v19005_v11 = vadd.f32 %v10372_v42, %v20011_v46 }
 0x629   : > { %v10374_v19 = vpop.f32.mrf.mxu1  ;;  %v19007_v33 = vpop.f32.mrf.mxu0 }
 0x62a   : > { %20012 = vst [vmem:[#allocation33_spill] sm:$0xff] %v19005_v11  ;;  %v20016_v19 = vld [vmem:[#allocation36_spill] sm:$0xff] }
 0x62b   : > { %v10377_v32 = vpop.f32.mrf.mxu1  ;;  %v11657_v35 = vpop.f32.mrf.mxu0 }
 0x62c   : > { %v19010_v48 = vadd.f32 %v10377_v32, %v18660_v9 }
 0x62d   : > { %v10379_v4 = vpop.f32.mrf.mxu1  ;;  %v19012_v50 = vpop.f32.mrf.mxu0 }
 0x62e   : > { %20013 = vst [vmem:[#allocation22_spill] sm:$0xff] %v19010_v48  ;;  %v20018_v4 = vld [vmem:[#allocation38_spill] sm:$0xff] }
 0x62f   : > { %v10380_v21 = vpop.f32.mrf.mxu1  ;;  %v11662_v44 = vpop.f32.mrf.mxu0 }
 0x630   : > { %v19015_v13 = vadd.f32 %v10380_v21, %v20014_v45 }
 0x631   : > { %v10382_v22 = vpop.f32.mrf.mxu1  ;;  %v19017_v42 = vpop.f32.mrf.mxu0 }
 0x632   : > { %20015 = vst [vmem:[#allocation28_spill] sm:$0xff] %v19015_v13  ;;  %v20020_v22 = vld [vmem:[#allocation40_spill] sm:$0xff] }
 0x633   : > { %v10385_v62 = vpop.f32.mrf.mxu1  ;;  %v11665_v11 = vpop.f32.mrf.mxu0 }
 0x634   : > { %v19020_v46 = vadd.f32 %v10385_v62, %v20016_v19 }
 0x635   : > { %v10387_v43 = vpop.f32.mrf.mxu1  ;;  %v19022_v9 = vpop.f32.mrf.mxu0 }
 0x636   : > { %20017 = vst [vmem:[#allocation35_spill] sm:$0xff] %v19020_v46  ;;  %v20022_v43 = vld [vmem:[#allocation41_spill] sm:$0xff] }
 0x637   : > { %v10388_v32 = vpop.f32.mrf.mxu1  ;;  %v11670_v48 = vpop.f32.mrf.mxu0 }
 0x638   : > { %v19025_v35 = vadd.f32 %v10388_v32, %v20018_v4 }
 0x639   : > { %v10390_v26 = vpop.f32.mrf.mxu1  ;;  %v19027_v21 = vpop.f32.mrf.mxu0 }
 0x63a   : > { %20019 = vst [vmem:[#allocation36_spill] sm:$0xff] %v19025_v35  ;;  %v20025_v26 = vld [vmem:[#allocation37_spill] sm:$0xff] }
 0x63b   : > { %v10393_v44 = vpop.f32.mrf.mxu1  ;;  %v11673_v13 = vpop.f32.mrf.mxu0 }
 0x63c   : > { %v19030_v45 = vadd.f32 %v10393_v44, %v20020_v22 }
 0x63d   : > { %v10395_v2 = vpop.f32.mrf.mxu1  ;;  %v19032_v62 = vpop.f32.mrf.mxu0 }
 0x63e   : > { %20021 = vst [vmem:[#allocation38_spill] sm:$0xff] %v19030_v45  ;;  %v20027_v2 = vld [vmem:[#allocation42_spill] sm:$0xff] }
 0x63f   : > { %v10396_v11 = vpop.f32.mrf.mxu1  ;;  %v11678_v46 = vpop.f32.mrf.mxu0 }
 0x640   : > { %v19035_v19 = vadd.f32 %v10396_v11, %v20022_v43 }
 0x641   : > { %v10398_v52 = vpop.f32.mrf.mxu1  ;;  %v19037_v32 = vpop.f32.mrf.mxu0 }
 0x642   : > { %20023 = vst [vmem:[#allocation40_spill] sm:$0xff] %v19035_v19  ;;  %20024 = vst [vmem:[#allocation41_spill] sm:$0xff] %v19037_v32  ;;  %v20029_v52 = vld [vmem:[#allocation82_spill] sm:$0xff] }
 0x643   : > { %v10401_v48 = vpop.f32.mrf.mxu1  ;;  %v11681_v35 = vpop.f32.mrf.mxu0 }
 0x644   : > { %v19040_v4 = vadd.f32 %v10401_v48, %v20025_v26 }
 0x645   : > { %v10403_v27 = vpop.f32.mrf.mxu1  ;;  %v19042_v44 = vpop.f32.mrf.mxu0 }
 0x646   : > { %20026 = vst [vmem:[#allocation37_spill] sm:$0xff] %v19040_v4  ;;  %v20037_v4 = vld [vmem:[#allocation39_spill] sm:$0xff] }
 0x647   : > { %v10404_v13 = vpop.f32.mrf.mxu1  ;;  %v11686_v45 = vpop.f32.mrf.mxu0 }
 0x648   : > { %v19045_v22 = vadd.f32 %v10404_v13, %v20027_v2 }
 0x649   : > { %v10406_v10 = vpop.f32.mrf.mxu1  ;;  %v19047_v11 = vpop.f32.mrf.mxu0 }
 0x64a   : > { %20028 = vst [vmem:[#allocation42_spill] sm:$0xff] %v19045_v22 }
 0x64b   : > { %v10409_v46 = vpop.f32.mrf.mxu1  ;;  %v11689_v19 = vpop.f32.mrf.mxu0 }
 0x64c   : > { %v19050_v43 = vadd.f32 %v10409_v46, %v20029_v52  ;;  %v20036_v52 = vld [vmem:[#allocation67_spill] sm:$0xff] }
 0x64d   : > { %v10411_v47 = vpop.f32.mrf.mxu1  ;;  %v19052_v48 = vpop.f32.mrf.mxu0 }
 0x64e   : > { %20030 = vst [vmem:[#allocation82_spill] sm:$0xff] %v19050_v43  ;;  %20031 = vst [vmem:[#allocation93_spill] sm:$0xff] %v19052_v48  ;;  %v12190_v43 = vsub.s32 1, %v20036_v52 }
 0x64f   : > { %v10412_v35 = vpop.f32.mrf.mxu1  ;;  %v11694_v26 = vpop.f32.mrf.mxu0 }
 0x650   : > { %v19055_v27 = vadd.f32 %v10412_v35, %v18678_v0 }
 0x651   : > { %v10414_v13 = vpop.f32.mrf.mxu1  ;;  %v19057_v2 = vpop.f32.mrf.mxu0 }
 0x652   : > { %20032 = vst [vmem:[#allocation94_spill] sm:$0xff] %v19055_v27  ;;  %20033 = vst [vmem:[#allocation95_spill] sm:$0xff] %v19057_v2  ;;  %v12256_v2 = vld [vmem:[%s15671_s17 + $0x24] sm:$0xf] }
 0x653   : > { %v10417_v10 = vpop.f32.mrf.mxu1  ;;  %v11697_v22 = vpop.f32.mrf.mxu0  ;;  %v12320_v48 = vunpack.c.l.bf16 %v12256_v2 }
 0x654   : > { %v19060_v45 = vadd.f32 %v10417_v10, %v18676_v41  ;;  %v13543_v41 = vld [vmem:[%s15671_s17 + $0x28] sm:$0xff]  }
 0x655   : > { %v10419_v46 = vpop.f32.mrf.mxu1  ;;  %v19062_v19 = vpop.f32.mrf.mxu0  ;;  %v15300_v10 = vld [vmem:[%s19576_s3] sm:$0x3]  ;;  %v13421_v32 = vunpack.c.l.bf16 %v13543_v41 }
 0x656   : > { %20034 = vst [vmem:[#allocation96_spill] sm:$0xff] %v19060_v45  ;;  %20035 = vst [vmem:[#allocation97_spill] sm:$0xff] %v19062_v19  ;;  %v19075_v46 = vrot.slane %v15300_v10, %v12190_v43 }
 0x657   : > { %v10420_v47 = vpop.f32.mrf.mxu1  ;;  %v11702_v35 = vpop.f32.mrf.mxu0 }
 0x658   : > { %v19066_v0 = vadd.f32 %v10420_v47, %v20037_v4  ;;  %v13422_v47 = vunpack.c.h.bf16 %v13543_v41 }
 0x659   : > { %v10422_v26 = vpop.f32.mrf.mxu1  ;;  %v19068_v13 = vpop.f32.mrf.mxu0 }
 0x65a   : > { %20038 = vst [vmem:[#allocation67_spill] sm:$0xff] %v19066_v0  ;;  %20039 = vst [vmem:[#allocation39_spill] sm:$0xff] %v19068_v13  ;;  %v13544_v26 = vld [vmem:[%s15671_s17 + $0x30] sm:$0xff]  }
 0x65b   : > { %v14268_v27 = vpop.f32.mrf.mxu1  ;;  %v11705_v52 = vpop.f32.mrf.mxu0 }
 0x65c   : > { %v11878_v22 = vadd.f32 %v14268_v27, %v18920_v20  ;;  %v13425_v52 = vunpack.c.l.bf16 %v13544_v26 }
 0x65d   : > { %v11869_v45 = vpop.f32.mrf.mxu1  ;;  %v19081_v0 = vpop.f32.mrf.mxu0 }
 0x65e   : > { %v12126_v4 = vadd.f32 %v11878_v22, %v18690_v54  ;;  %v11870_v35 = vadd.f32 %v11869_v45, %v18910_v8  ;;  %20040 = vst [vmem:[#allocation98_spill] sm:$0xff] %v19081_v0  ;;  %v20041_v8 = vld [vmem:[#allocation81_spill] sm:$0xff] }
 0x65f   : > { %v14269_v13 = vpop.f32.mrf.mxu1  ;;  %v11710_v10 = vpop.f32.mrf.mxu0 }
 0x660   : > { %v12194_v20 = vadd.f32 %v19075_v46, %v12126_v4  ;;  %v12124_v27 = vadd.f32 %v11870_v35, %v18685_v58  ;;  %v11881_v43 = vadd.f32 %v14269_v13, %v18925_v17  ;;  %v20042_v17 = vld [vmem:[#allocation44_spill] sm:$0xff]  ;;  %v13545_v10 = vld [vmem:[%s15671_s17 + $0x38] sm:$0xff]  }
 0x661   : > { %v11872_v19 = vpop.f32.mrf.mxu1  ;;  %v19090_v29 = vpop.f32.mrf.mxu0 }
 0x662   : > { %v12386_v54 = vadd.f32 %v13422_v47, %v12194_v20  ;;  %v12192_v22 = vadd.f32 %v19075_v46, %v12124_v27  ;;  %v12127_v45 = vadd.f32 %v11881_v43, %v20041_v8  ;;  %v11873_v0 = vadd.f32 %v11872_v19, %v18915_v23  ;;  %v19102_v27 = vld [vmem:[%s15671_s17 + $0x40] sm:$0xff]  }
 0x663   : > { %v14272_v4 = vpop.f32.mrf.mxu1  ;;  %v11713_v56 = vpop.f32.mrf.mxu0  ;;  %v13426_v43 = vunpack.c.h.bf16 %v13544_v26 }
 0x664   : > { %v12450_v58 = vmax.f32 %v12386_v54, 0.0  ;;  %v12384_v2 = vadd.f32 %v12320_v48, %v12192_v22  ;;  %v12195_v35 = vadd.f32 %v19075_v46, %v12127_v45  ;;  %v12125_v13 = vadd.f32 %v11873_v0, %v20042_v17 }
 0x665   : > { %v11894_v47 = vadd.f32 %v14272_v4, %v18941_v59  ;;  %v11885_v20 = vpop.f32.mrf.mxu1  ;;  %v19104_v0 = vpop.f32.mrf.mxu0  ;;  %v13430_v59 = vunpack.c.h.bf16 %v13545_v10 }
 0x666   : > { %12514 = vst [vmem:[%s19096_s28 + $0x10] sm:$0xff] %v12450_v58  ;;  %v12448_v23 = vmax.f32 %v12384_v2, 0.0  ;;  %v12387_v19 = vadd.f32 %v13425_v52, %v12195_v35  ;;  %v12193_v41 = vadd.f32 %v19075_v46, %v12125_v13  ;;  %v11886_v48 = vadd.f32 %v11885_v20, %v18932_v39 }
 0x667   : > { %v12130_v56 = vadd.f32 %v11894_v47, %v18703_v7  ;;  %v14273_v54 = vpop.f32.mrf.mxu1  ;;  %v11718_v39 = vpop.f32.mrf.mxu0  ;;  %v13433_v58 = vunpack.c.l.bf16 %v19102_v27 }
 0x668   : > { %12512 = vst [vmem:[%s19096_s28] sm:$0xff] %v12448_v23  ;;  %v12451_v22 = vmax.f32 %v12387_v19, 0.0  ;;  %v12385_v8 = vadd.f32 %v13421_v32, %v12193_v41  ;;  %v12128_v52 = vadd.f32 %v11886_v48, %v18698_v53  ;;  %v11897_v45 = vadd.f32 %v14273_v54, %v18946_v3  ;;  %v19117_v32 = vld [vmem:[%s15671_s17 + $0x48] sm:$0xff]  }
 0x669   : > { %v12198_v4 = vadd.f32 %v19075_v46, %v12130_v56  ;;  %v11888_v2 = vpop.f32.mrf.mxu1  ;;  %v19119_v53 = vpop.f32.mrf.mxu0  ;;  %v13429_v3 = vunpack.c.l.bf16 %v13545_v10  ;;  %v20043_v19 = vld [vmem:[#allocation83_spill] sm:$0xff]  ;;  %v13438_v56 = vunpack.c.h.bf16 %v19117_v32 }
 0x66a   : > { %12515 = vst [vmem:[%s19096_s28 + $0x18] sm:$0xff] %v12451_v22  ;;  %v12449_v7 = vmax.f32 %v12385_v8, 0.0  ;;  %v12196_v26 = vadd.f32 %v19075_v46, %v12128_v52  ;;  %v12131_v35 = vadd.f32 %v11897_v45, %v18708_v6  ;;  %v11889_v17 = vadd.f32 %v11888_v2, %v18936_v28  ;;  %v20044_v8 = vld [vmem:[#allocation48_spill] sm:$0xff] }
 0x66b   : > { %v12390_v13 = vadd.f32 %v13430_v59, %v12198_v4  ;;  %v14276_v47 = vpop.f32.mrf.mxu1  ;;  %v11721_v48 = vpop.f32.mrf.mxu0 }
 0x66c   : > { %12513 = vst [vmem:[%s19096_s28 + $0x8] sm:$0xff] %v12449_v7  ;;  %v12388_v20 = vadd.f32 %v13426_v43, %v12196_v26  ;;  %v12199_v23 = vadd.f32 %v19075_v46, %v12131_v35  ;;  %v12129_v41 = vadd.f32 %v11889_v17, %v20043_v19  ;;  %v11910_v6 = vadd.f32 %v14276_v47, %v18962_v49  ;;  %v19129_v43 = vld [vmem:[%s15671_s17 + $0x50] sm:$0xff]   ;;  %v20045_v35 = vld [vmem:[#allocation46_spill] sm:$0xff]  ;;  %v20046_v19 = vld [vmem:[#allocation47_spill] sm:$0xff] }
 0x66d   : > { %v12454_v28 = vmax.f32 %v12390_v13, 0.0  ;;  %v11901_v54 = vpop.f32.mrf.mxu1  ;;  %v19131_v45 = vpop.f32.mrf.mxu0  ;;  %v13434_v13 = vunpack.c.h.bf16 %v19102_v27  ;;  %v13441_v47 = vunpack.c.l.bf16 %v19129_v43 }
 0x66e   : > { %v12452_v22 = vmax.f32 %v12388_v20, 0.0  ;;  %v12391_v59 = vadd.f32 %v13433_v58, %v12199_v23  ;;  %v12197_v10 = vadd.f32 %v19075_v46, %v12129_v41  ;;  %v12134_v52 = vadd.f32 %v11910_v6, %v20044_v8  ;;  %v19145_v6 = vld [vmem:[%s15671_s17 + $0x58] sm:$0xff]  }
 0x66f   : > { %12518 = vst [vmem:[%s19096_s28 + $0x30] sm:$0xff] %v12454_v28  ;;  %v11902_v39 = vadd.f32 %v11901_v54, %v18953_v37  ;;  %v14277_v49 = vpop.f32.mrf.mxu1  ;;  %v11726_v26 = vpop.f32.mrf.mxu0  ;;  %v13437_v28 = vunpack.c.l.bf16 %v19117_v32 }
 0x670   : > { %12516 = vst [vmem:[%s19096_s28 + $0x20] sm:$0xff] %v12452_v22  ;;  %v12455_v4 = vmax.f32 %v12391_v59, 0.0  ;;  %v12389_v2 = vadd.f32 %v13429_v3, %v12197_v10  ;;  %v12202_v7 = vadd.f32 %v19075_v46, %v12134_v52  ;;  %v11913_v58 = vadd.f32 %v14277_v49, %v18967_v24  ;;  %v20047_v59 = vld [vmem:[#allocation43_spill] sm:$0xff] }
 0x671   : > { %v12132_v17 = vadd.f32 %v11902_v39, %v20045_v35  ;;  %v11904_v20 = vpop.f32.mrf.mxu1  ;;  %v19147_v24 = vpop.f32.mrf.mxu0 }
 0x672   : > { %12519 = vst [vmem:[%s19096_s28 + $0x38] sm:$0xff] %v12455_v4  ;;  %v12453_v37 = vmax.f32 %v12389_v2, 0.0  ;;  %v12394_v23 = vadd.f32 %v13438_v56, %v12202_v7  ;;  %v12135_v41 = vadd.f32 %v11913_v58, %v20046_v19  ;;  %v11905_v3 = vadd.f32 %v11904_v20, %v18957_v31  ;;  %v13550_v20 = vld [vmem:[%s15671_s17 + $0x60] sm:$0xff]  }
 0x673   : > { %v12200_v48 = vadd.f32 %v19075_v46, %v12132_v17  ;;  %v14280_v27 = vpop.f32.mrf.mxu1  ;;  %v11729_v8 = vpop.f32.mrf.mxu0  ;;  %v13446_v31 = vunpack.c.h.bf16 %v19145_v6 }
 0x674   : > { %12517 = vst [vmem:[%s19096_s28 + $0x28] sm:$0xff] %v12453_v37  ;;  %v12458_v54 = vmax.f32 %v12394_v23, 0.0  ;;  %v12203_v22 = vadd.f32 %v19075_v46, %v12135_v41  ;;  %v12133_v56 = vadd.f32 %v11905_v3, %v20047_v59  ;;  %v11926_v10 = vadd.f32 %v14280_v27, %v18982_v25  ;;  %v19172_v3 = vld [vmem:[%s15671_s17 + $0x68] sm:$0xff]  }
 0x675   : > { %v12392_v52 = vadd.f32 %v13434_v13, %v12200_v48  ;;  %v11917_v39 = vpop.f32.mrf.mxu1  ;;  %v19160_v7 = vpop.f32.mrf.mxu0  ;;  %v13442_v25 = vunpack.c.h.bf16 %v19129_v43  ;;  %v13449_v27 = vunpack.c.l.bf16 %v13550_v20 }
 0x676   : > { %12522 = vst [vmem:[%s19096_s28 + $0x50] sm:$0xff] %v12458_v54  ;;  %v12395_v49 = vadd.f32 %v13441_v47, %v12203_v22  ;;  %v12201_v32 = vadd.f32 %v19075_v46, %v12133_v56  ;;  %v12138_v4 = vadd.f32 %v11926_v10, %v18758_v61  ;;  %v11918_v2 = vadd.f32 %v11917_v39, %v18972_v15  ;;  %v20049_v56 = vld [vmem:[#allocation45_spill] sm:$0xff] }
 0x677   : > { %v12456_v58 = vmax.f32 %v12392_v52, 0.0  ;;  %v14281_v26 = vpop.f32.mrf.mxu1  ;;  %v11734_v37 = vpop.f32.mrf.mxu0  ;;  %v13445_v54 = vunpack.c.l.bf16 %v19145_v6 }
 0x678   : > { %v12459_v35 = vmax.f32 %v12395_v49, 0.0  ;;  %v12393_v17 = vadd.f32 %v13437_v28, %v12201_v32  ;;  %v12206_v13 = vadd.f32 %v19075_v46, %v12138_v4  ;;  %v12136_v47 = vadd.f32 %v11918_v2, %v18744_v14  ;;  %v20048_v14 = vld [vmem:[#allocation50_spill] sm:$0xff]  ;;  %v19188_v2 = vld [vmem:[%s15671_s17 + $0x70] sm:$0xff]  }
 0x679   : > { %12520 = vst [vmem:[%s19096_s28 + $0x40] sm:$0xff] %v12456_v58  ;;  %v11929_v61 = vadd.f32 %v14281_v26, %v18987_v60  ;;  %v11920_v15 = vpop.f32.mrf.mxu1  ;;  %v19174_v48 = vpop.f32.mrf.mxu0  ;;  %v13457_v37 = vunpack.c.l.bf16 %v19188_v2 }
 0x67a   : > { %12523 = vst [vmem:[%s19096_s28 + $0x58] sm:$0xff] %v12459_v35  ;;  %v12457_v23 = vmax.f32 %v12393_v17, 0.0  ;;  %v12398_v19 = vadd.f32 %v13446_v31, %v12206_v13  ;;  %v12204_v43 = vadd.f32 %v19075_v46, %v12136_v47  ;;  %v11921_v41 = vadd.f32 %v11920_v15, %v18977_v18 }
 0x67b   : > { %v12139_v28 = vadd.f32 %v11929_v61, %v20048_v14  ;;  %v14284_v60 = vpop.f32.mrf.mxu1  ;;  %v11737_v8 = vpop.f32.mrf.mxu0  ;;  %v13454_v31 = vunpack.c.h.bf16 %v19172_v3 }
 0x67c   : > { %12521 = vst [vmem:[%s19096_s28 + $0x48] sm:$0xff] %v12457_v23  ;;  %v12462_v22 = vmax.f32 %v12398_v19, 0.0  ;;  %v12396_v59 = vadd.f32 %v13442_v25, %v12204_v43  ;;  %v12137_v10 = vadd.f32 %v11921_v41, %v20049_v56  ;;  %v11942_v18 = vadd.f32 %v14284_v60, %v19002_v57  ;;  %v19200_v43 = vld [vmem:[%s15671_s17 + $0x78] sm:$0xff]  }
 0x67d   : > { %v12207_v52 = vadd.f32 %v19075_v46, %v12139_v28  ;;  %v11933_v39 = vpop.f32.mrf.mxu1  ;;  %v19190_v58 = vpop.f32.mrf.mxu0  ;;  %v13450_v57 = vunpack.c.h.bf16 %v13550_v20 }
 0x67e   : > { %12526 = vst [vmem:[%s19096_s28 + $0x70] sm:$0xff] %v12462_v22  ;;  %v12460_v49 = vmax.f32 %v12396_v59, 0.0  ;;  %v12205_v6 = vadd.f32 %v19075_v46, %v12137_v10  ;;  %v12142_v32 = vadd.f32 %v11942_v18, %v18791_v30  ;;  %v11934_v4 = vadd.f32 %v11933_v39, %v18992_v34 }
 0x67f   : > { %v12399_v25 = vadd.f32 %v13449_v27, %v12207_v52  ;;  %v14285_v26 = vpop.f32.mrf.mxu1  ;;  %v11742_v47 = vpop.f32.mrf.mxu0  ;;  %v13453_v22 = vunpack.c.l.bf16 %v19172_v3  ;;  %v13462_v59 = vunpack.c.h.bf16 %v19200_v43  ;;  %v19216_v52 = vld [vmem:[%s15671_s17 + $0x80] sm:$0xff]  }
 0x680   : > { %12524 = vst [vmem:[%s19096_s28 + $0x60] sm:$0xff] %v12460_v49  ;;  %v12397_v35 = vadd.f32 %v13445_v54, %v12205_v6  ;;  %v12210_v17 = vadd.f32 %v19075_v46, %v12142_v32  ;;  %v12140_v13 = vadd.f32 %v11934_v4, %v18776_v5  ;;  %v11945_v30 = vadd.f32 %v14285_v26, %v19007_v33 }
 0x681   : > { %v12463_v34 = vmax.f32 %v12399_v25, 0.0  ;;  %v11936_v61 = vpop.f32.mrf.mxu1  ;;  %v19202_v41 = vpop.f32.mrf.mxu0 }
 0x682   : > { %v12461_v15 = vmax.f32 %v12397_v35, 0.0  ;;  %v12402_v23 = vadd.f32 %v13454_v31, %v12210_v17  ;;  %v12208_v20 = vadd.f32 %v19075_v46, %v12140_v13  ;;  %v12143_v19 = vadd.f32 %v11945_v30, %v18799_v36 }
 0x683   : > { %12527 = vst [vmem:[%s19096_s28 + $0x78] sm:$0xff] %v12463_v34  ;;  %v11937_v5 = vadd.f32 %v11936_v61, %v18997_v1  ;;  %v14288_v33 = vpop.f32.mrf.mxu1  ;;  %v11745_v60 = vpop.f32.mrf.mxu0  ;;  %v13555_v61 = vld [vmem:[%s15671_s17 + $0x88] sm:$0xff]  }
 0x684   : > { %12525 = vst [vmem:[%s19096_s28 + $0x68] sm:$0xff] %v12461_v15  ;;  %v12466_v14 = vmax.f32 %v12402_v23, 0.0  ;;  %v12400_v28 = vadd.f32 %v13450_v57, %v12208_v20  ;;  %v12211_v27 = vadd.f32 %v19075_v46, %v12143_v19  ;;  %v11958_v54 = vadd.f32 %v14288_v33, %v19022_v9 }
 0x685   : > { %v12141_v36 = vadd.f32 %v11937_v5, %v18783_v63  ;;  %v11949_v56 = vpop.f32.mrf.mxu1  ;;  %v19218_v9 = vpop.f32.mrf.mxu0  ;;  %v13458_v63 = vunpack.c.h.bf16 %v19188_v2  ;;  %v19243_v5 = vld [vmem:[%s15671_s17 + $0x90] sm:$0xff]  }
 0x686   : > { %12530 = vst [vmem:[%s19096_s28 + $0x90] sm:$0xff] %v12466_v14  ;;  %v12464_v1 = vmax.f32 %v12400_v28, 0.0  ;;  %v12403_v10 = vadd.f32 %v13457_v37, %v12211_v27  ;;  %v12146_v18 = vadd.f32 %v11958_v54, %v18824_v16  ;;  %v11950_v8 = vadd.f32 %v11949_v56, %v19012_v50 }
 0x687   : > { %v12209_v31 = vadd.f32 %v19075_v46, %v12141_v36  ;;  %v14289_v3 = vpop.f32.mrf.mxu1  ;;  %v11750_v32 = vpop.f32.mrf.mxu0  ;;  %v13465_v50 = vunpack.c.l.bf16 %v19216_v52  ;;  %v13470_v14 = vunpack.c.h.bf16 %v13555_v61  ;;  %v13466_v28 = vunpack.c.h.bf16 %v19216_v52 }
 0x688   : > { %12528 = vst [vmem:[%s19096_s28 + $0x80] sm:$0xff] %v12464_v1  ;;  %v12467_v39 = vmax.f32 %v12403_v10, 0.0  ;;  %v12214_v49 = vadd.f32 %v19075_v46, %v12146_v18  ;;  %v12144_v6 = vadd.f32 %v11950_v8, %v18809_v55  ;;  %v11961_v16 = vadd.f32 %v14289_v3, %v19027_v21  ;;  %v20050_v10 = vld [vmem:[#allocation73_spill] sm:$0xff] }
 0x689   : > { %v12401_v4 = vadd.f32 %v13453_v22, %v12209_v31  ;;  %v11952_v25 = vpop.f32.mrf.mxu1  ;;  %v19231_v17 = vpop.f32.mrf.mxu0  ;;  %v13461_v21 = vunpack.c.l.bf16 %v19200_v43  ;;  %v20051_v8 = vld [vmem:[#allocation41_spill] sm:$0xff] }
 0x68a   : > { %12531 = vst [vmem:[%s19096_s28 + $0x98] sm:$0xff] %v12467_v39  ;;  %v12406_v57 = vadd.f32 %v13462_v59, %v12214_v49  ;;  %v12212_v2 = vadd.f32 %v19075_v46, %v12144_v6  ;;  %v12147_v26 = vadd.f32 %v11961_v16, %v18832_v40  ;;  %v11953_v35 = vadd.f32 %v11952_v25, %v19017_v42  ;;  %v19259_v31 = vld [vmem:[%s15671_s17 + $0x98] sm:$0xff]   ;;  %v20052_v6 = vld [vmem:[#allocation23_spill] sm:$0xff] }
 0x68b   : > { %v12465_v55 = vmax.f32 %v12401_v4, 0.0  ;;  %v14292_v13 = vpop.f32.mrf.mxu1  ;;  %v11753_v15 = vpop.f32.mrf.mxu0  ;;  %v13473_v59 = vunpack.c.l.bf16 %v19243_v5  ;;  %v20053_v32 = vld [vmem:[#allocation97_spill] sm:$0xff] }
 0x68c   : > { %v12470_v30 = vmax.f32 %v12406_v57, 0.0  ;;  %v12404_v47 = vadd.f32 %v13458_v63, %v12212_v2  ;;  %v12215_v34 = vadd.f32 %v19075_v46, %v12147_v26  ;;  %v12145_v37 = vadd.f32 %v11953_v35, %v18816_v51 }
 0x68d   : > { %12529 = vst [vmem:[%s19096_s28 + $0x88] sm:$0xff] %v12465_v55  ;;  %v11974_v40 = vadd.f32 %v14292_v13, %v19042_v44  ;;  %v11965_v42 = vpop.f32.mrf.mxu1  ;;  %v19245_v33 = vpop.f32.mrf.mxu0  ;;  %v13478_v57 = vunpack.c.h.bf16 %v19259_v31 }
 0x68e   : > { %12534 = vst [vmem:[%s19096_s28 + $0xb0] sm:$0xff] %v12470_v30  ;;  %v12468_v23 = vmax.f32 %v12404_v47, 0.0  ;;  %v12407_v20 = vadd.f32 %v13465_v50, %v12215_v34  ;;  %v12213_v19 = vadd.f32 %v19075_v46, %v12145_v37  ;;  %v11966_v43 = vadd.f32 %v11965_v42, %v19032_v62  ;;  %v19271_v30 = vld [vmem:[%s15671_s17 + $0xa0] sm:$0xff]   ;;  %v20055_v34 = vld [vmem:[#allocation93_spill] sm:$0xff] }
 0x68f   : > { %v12150_v51 = vadd.f32 %v11974_v40, %v18857_v38  ;;  %v14293_v44 = vpop.f32.mrf.mxu1  ;;  %v11758_v36 = vpop.f32.mrf.mxu0 }
 0x690   : > { %12532 = vst [vmem:[%s19096_s28 + $0xa0] sm:$0xff] %v12468_v23  ;;  %v12471_v27 = vmax.f32 %v12407_v20, 0.0  ;;  %v12405_v54 = vadd.f32 %v13461_v21, %v12213_v19  ;;  %v12148_v60 = vadd.f32 %v11966_v43, %v18842_v12  ;;  %v11977_v62 = vadd.f32 %v14293_v44, %v19047_v11  ;;  %v20054_v21 = vld [vmem:[#allocation74_spill] sm:$0xff]  ;;  %v20056_v23 = vld [vmem:[#allocation39_spill] sm:$0xff]  ;;  %v20057_v43 = vld [vmem:[#allocation25_spill] sm:$0xff] }
 0x691   : > { %v12218_v22 = vadd.f32 %v19075_v46, %v12150_v51  ;;  %v11968_v56 = vpop.f32.mrf.mxu1  ;;  %v19261_v12 = vpop.f32.mrf.mxu0  ;;  %v13469_v11 = vunpack.c.l.bf16 %v13555_v61  ;;  %v20059_v36 = vld [vmem:[#allocation95_spill] sm:$0xff] }
 0x692   : > { %12535 = vst [vmem:[%s19096_s28 + $0xb8] sm:$0xff] %v12471_v27  ;;  %v12469_v38 = vmax.f32 %v12405_v54, 0.0  ;;  %v12216_v1 = vadd.f32 %v19075_v46, %v12148_v60  ;;  %v12151_v18 = vadd.f32 %v11977_v62, %v20050_v10  ;;  %v11969_v52 = vadd.f32 %v11968_v56, %v20051_v8  ;;  %v20058_v60 = vld [vmem:[#allocation86_spill] sm:$0xff] }
 0x693   : > { %v12410_v63 = vadd.f32 %v13470_v14, %v12218_v22  ;;  %v14296_v3 = vpop.f32.mrf.mxu1  ;;  %v11761_v50 = vpop.f32.mrf.mxu0  ;;  %v13474_v14 = vunpack.c.h.bf16 %v19243_v5 }
 0x694   : > { %12533 = vst [vmem:[%s19096_s28 + $0xa8] sm:$0xff] %v12469_v38  ;;  %v12408_v39 = vadd.f32 %v13466_v28, %v12216_v1  ;;  %v12219_v49 = vadd.f32 %v19075_v46, %v12151_v18  ;;  %v12149_v16 = vadd.f32 %v11969_v52, %v20052_v6  ;;  %v11990_v4 = vadd.f32 %v14296_v3, %v20053_v32  ;;  %v20060_v38 = vld [vmem:[#allocation91_spill] sm:$0xff]  ;;  %v20061_v1 = vld [vmem:[#allocation52_spill] sm:$0xff] }
 0x695   : > { %v12474_v25 = vmax.f32 %v12410_v63, 0.0  ;;  %v11981_v2 = vpop.f32.mrf.mxu1  ;;  %v19273_v47 = vpop.f32.mrf.mxu0  ;;  %v13481_v28 = vunpack.c.l.bf16 %v19271_v30  ;;  %v10595_v10 = vadd.f32 %v20061_v1, %v20060_v38  ;;  %v13477_v18 = vunpack.c.l.bf16 %v19259_v31 }
 0x696   : > { %v12472_v26 = vmax.f32 %v12408_v39, 0.0  ;;  %v12411_v35 = vadd.f32 %v13473_v59, %v12219_v49  ;;  %v12217_v55 = vadd.f32 %v19075_v46, %v12149_v16  ;;  %v12154_v13 = vadd.f32 %v11990_v4, %v20054_v21  ;;  %v19287_v59 = vld [vmem:[%s15671_s17 + $0xa8] sm:$0xff]  }
 0x697   : > { %12538 = vst [vmem:[%s19096_s28 + $0xd0] sm:$0xff] %v12474_v25  ;;  %v11982_v37 = vadd.f32 %v11981_v2, %v20055_v34  ;;  %v14297_v61 = vpop.f32.mrf.mxu1  ;;  %v11766_v19 = vpop.f32.mrf.mxu0  ;;  %v13486_v16 = vunpack.c.h.bf16 %v19287_v59  ;;  %v20063_v25 = vld [vmem:[#allocation98_spill] sm:$0xff]  ;;  %v20064_v34 = vld [vmem:[#allocation89_spill] sm:$0xff] }
 0x698   : > { %12536 = vst [vmem:[%s19096_s28 + $0xc0] sm:$0xff] %v12472_v26  ;;  %v12475_v15 = vmax.f32 %v12411_v35, 0.0  ;;  %v12409_v40 = vadd.f32 %v13469_v11, %v12217_v55  ;;  %v12222_v42 = vadd.f32 %v19075_v46, %v12154_v13  ;;  %v11993_v20 = vadd.f32 %v14297_v61, %v20056_v23  ;;  %v20062_v11 = vld [vmem:[#allocation64_spill] sm:$0xff] }
 0x699   : > { %v12152_v51 = vadd.f32 %v11982_v37, %v20057_v43  ;;  %v11984_v44 = vpop.f32.mrf.mxu1  ;;  %v19289_v56 = vpop.f32.mrf.mxu0  ;;  %v13560_v61 = vld [vmem:[%s15671_s17 + $0xb0] sm:$0xff]  }
 0x69a   : > { %12539 = vst [vmem:[%s19096_s28 + $0xd8] sm:$0xff] %v12475_v15  ;;  %v12473_v27 = vmax.f32 %v12409_v40, 0.0  ;;  %v12414_v54 = vadd.f32 %v13478_v57, %v12222_v42  ;;  %v12155_v62 = vadd.f32 %v11993_v20, %v20058_v60  ;;  %v11985_v22 = vadd.f32 %v11984_v44, %v20059_v36  ;;  %v20065_v40 = vld [vmem:[#allocation92_spill] sm:$0xff]  ;;  %v20066_v42 = vld [vmem:[#allocation49_spill] sm:$0xff] }
 0x69b   : > { %v12220_v5 = vadd.f32 %v19075_v46, %v12152_v51  ;;  %v14300_v8 = vpop.f32.mrf.mxu1  ;;  %v11769_v49 = vpop.f32.mrf.mxu0  ;;  %v10598_v23 = vadd.f32 %v20066_v42, %v20065_v40  ;;  %v13489_v36 = vunpack.c.l.bf16 %v13560_v61 }
 0x69c   : > { %12537 = vst [vmem:[%s19096_s28 + $0xc8] sm:$0xff] %v12473_v27  ;;  %v12478_v52 = vmax.f32 %v12414_v54, 0.0  ;;  %v12223_v63 = vadd.f32 %v19075_v46, %v12155_v62  ;;  %v12153_v3 = vadd.f32 %v11985_v22, %v20062_v11  ;;  %v12006_v39 = vadd.f32 %v14300_v8, %v19104_v0  ;;  %v20067_v27 = vld [vmem:[#allocation71_spill] sm:$0xff]  ;;  %v20070_v8 = vld [vmem:[#allocation78_spill] sm:$0xff] }
 0x69d   : > { %v12412_v6 = vadd.f32 %v13474_v14, %v12220_v5  ;;  %v11997_v32 = vpop.f32.mrf.mxu1  ;;  %v19303_v2 = vpop.f32.mrf.mxu0  ;;  %v13482_v0 = vunpack.c.h.bf16 %v19271_v30  ;;  %v20068_v54 = vld [vmem:[#allocation55_spill] sm:$0xff] }
 0x69e   : > { %12542 = vst [vmem:[%s19096_s28 + $0xf0] sm:$0xff] %v12478_v52  ;;  %v12415_v4 = vadd.f32 %v13481_v28, %v12223_v63  ;;  %v12221_v31 = vadd.f32 %v19075_v46, %v12153_v3  ;;  %v12158_v50 = vadd.f32 %v12006_v39, %v10595_v10  ;;  %v11998_v57 = vadd.f32 %v11997_v32, %v20063_v25  ;;  %v19317_v28 = vld [vmem:[%s15671_s17 + $0xb8] sm:$0xff]   ;;  %v20071_v52 = vld [vmem:[#allocation19_spill] sm:$0xff] }
 0x69f   : > { %v12476_v26 = vmax.f32 %v12412_v6, 0.0  ;;  %v14301_v35 = vpop.f32.mrf.mxu1  ;;  %v11774_v15 = vpop.f32.mrf.mxu0  ;;  %v10611_v60 = vadd.f32 %v20068_v54, %v20067_v27  ;;  %v20069_v10 = vld [vmem:[#allocation90_spill] sm:$0xff]  ;;  %v10603_v63 = vadd.f32 %v20071_v52, %v20070_v8  ;;  %v13494_v3 = vunpack.c.h.bf16 %v19317_v28 }
 0x6a0   : > { %v12479_v55 = vmax.f32 %v12415_v4, 0.0  ;;  %v12413_v21 = vadd.f32 %v13477_v18, %v12221_v31  ;;  %v12226_v13 = vadd.f32 %v19075_v46, %v12158_v50  ;;  %v12156_v37 = vadd.f32 %v11998_v57, %v20064_v34  ;;  %v19335_v32 = vld [vmem:[%s15671_s17 + $0xc0] sm:$0xff]   ;;  %v20072_v4 = vld [vmem:[#allocation69_spill] sm:$0xff] }
 0x6a1   : > { %12540 = vst [vmem:[%s19096_s28 + $0xe0] sm:$0xff] %v12476_v26  ;;  %v12009_v20 = vadd.f32 %v14301_v35, %v19119_v53  ;;  %v12000_v19 = vpop.f32.mrf.mxu1  ;;  %v19319_v44 = vpop.f32.mrf.mxu0  ;;  %v13485_v53 = vunpack.c.l.bf16 %v19287_v59  ;;  %v20073_v31 = vld [vmem:[#allocation51_spill] sm:$0xff]  ;;  %v13490_v57 = vunpack.c.h.bf16 %v13560_v61  ;;  %v13497_v34 = vunpack.c.l.bf16 %v19335_v32 }
 0x6a2   : > { %12543 = vst [vmem:[%s19096_s28 + $0xf8] sm:$0xff] %v12479_v55  ;;  %v12477_v30 = vmax.f32 %v12413_v21, 0.0  ;;  %v12418_v43 = vadd.f32 %v13486_v16, %v12226_v13  ;;  %v12224_v51 = vadd.f32 %v19075_v46, %v12156_v37  ;;  %v12001_v14 = vadd.f32 %v12000_v19, %v19090_v29  ;;  %v20074_v19 = vld [vmem:[#allocation17_spill] sm:$0xff] }
 0x6a3   : > { %v12159_v62 = vadd.f32 %v12009_v20, %v10598_v23  ;;  %v14304_v22 = vpop.f32.mrf.mxu1  ;;  %v11777_v18 = vpop.f32.mrf.mxu0  ;;  %v10614_v50 = vadd.f32 %v20073_v31, %v20072_v4  ;;  %v19347_v23 = vld [vmem:[%s15671_s17 + $0xc8] sm:$0xff]  }
 0x6a4   : > { %12541 = vst [vmem:[%s19096_s28 + $0xe8] sm:$0xff] %v12477_v30  ;;  %v12482_v38 = vmax.f32 %v12418_v43, 0.0  ;;  %v12416_v1 = vadd.f32 %v13482_v0, %v12224_v51  ;;  %v12157_v5 = vadd.f32 %v12001_v14, %v20069_v10  ;;  %v12022_v29 = vadd.f32 %v14304_v22, %v19160_v7  ;;  %v20075_v30 = vld [vmem:[#allocation53_spill] sm:$0xff] }
 0x6a5   : > { %v12227_v11 = vadd.f32 %v19075_v46, %v12159_v62  ;;  %v12013_v39 = vpop.f32.mrf.mxu1  ;;  %v19337_v7 = vpop.f32.mrf.mxu0  ;;  %v10606_v43 = vadd.f32 %v20075_v30, %v20074_v19  ;;  %v20076_v51 = vld [vmem:[#allocation29_spill] sm:$0xff]  ;;  %v13502_v18 = vunpack.c.h.bf16 %v19347_v23 }
 0x6a6   : > { %12546 = vst [vmem:[%s19096_s28 + $0x110] sm:$0xff] %v12482_v38  ;;  %v12480_v59 = vmax.f32 %v12416_v1, 0.0  ;;  %v12225_v49 = vadd.f32 %v19075_v46, %v12157_v5  ;;  %v12162_v6 = vadd.f32 %v12022_v29, %v10611_v60  ;;  %v12014_v16 = vadd.f32 %v12013_v39, %v19131_v45  ;;  %v20078_v38 = vld [vmem:[#allocation80_spill] sm:$0xff]  ;;  %v20080_v39 = vld [vmem:[#allocation75_spill] sm:$0xff] }
 0x6a7   : > { %v12419_v25 = vadd.f32 %v13489_v36, %v12227_v11  ;;  %v14305_v26 = vpop.f32.mrf.mxu1  ;;  %v11782_v45 = vpop.f32.mrf.mxu0  ;;  %v20079_v1 = vld [vmem:[#allocation56_spill] sm:$0xff]  ;;  %v13493_v29 = vunpack.c.l.bf16 %v19317_v28  ;;  %v13498_v28 = vunpack.c.h.bf16 %v19335_v32 }
 0x6a8   : > { %12544 = vst [vmem:[%s19096_s28 + $0x100] sm:$0xff] %v12480_v59  ;;  %v12417_v0 = vadd.f32 %v13485_v53, %v12225_v49  ;;  %v12230_v35 = vadd.f32 %v19075_v46, %v12162_v6  ;;  %v12160_v55 = vadd.f32 %v12014_v16, %v10603_v63  ;;  %v12025_v21 = vadd.f32 %v14305_v26, %v19174_v48  ;;  %v20077_v48 = vld [vmem:[#allocation54_spill] sm:$0xff] }
 0x6a9   : > { %v12483_v13 = vmax.f32 %v12419_v25, 0.0  ;;  %v12016_v37 = vpop.f32.mrf.mxu1  ;;  %v19349_v20 = vpop.f32.mrf.mxu0  ;;  %v10627_v14 = vadd.f32 %v20077_v48, %v20076_v51  ;;  %v10619_v10 = vadd.f32 %v20079_v1, %v20078_v38  ;;  %v20081_v59 = vld [vmem:[#allocation62_spill] sm:$0xff] }
 0x6aa   : > { %v12481_v15 = vmax.f32 %v12417_v0, 0.0  ;;  %v12422_v40 = vadd.f32 %v13494_v3, %v12230_v35  ;;  %v12228_v42 = vadd.f32 %v19075_v46, %v12160_v55  ;;  %v12163_v61 = vadd.f32 %v12025_v21, %v10614_v50  ;;  %v19367_v3 = vld [vmem:[%s15671_s17 + $0xd0] sm:$0xff]   ;;  %v20083_v26 = vld [vmem:[#allocation58_spill] sm:$0xff] }
 0x6ab   : > { %12547 = vst [vmem:[%s19096_s28 + $0x118] sm:$0xff] %v12483_v13  ;;  %v12017_v27 = vadd.f32 %v12016_v37, %v19147_v24  ;;  %v14308_v54 = vpop.f32.mrf.mxu1  ;;  %v11785_v22 = vpop.f32.mrf.mxu0  ;;  %v10630_v49 = vadd.f32 %v20081_v59, %v20080_v39  ;;  %v13505_v55 = vunpack.c.l.bf16 %v19367_v3  ;;  %v20084_v48 = vld [vmem:[#allocation26_spill] sm:$0xff] }
 0x6ac   : > { %12545 = vst [vmem:[%s19096_s28 + $0x108] sm:$0xff] %v12481_v15  ;;  %v12486_v60 = vmax.f32 %v12422_v40, 0.0  ;;  %v12420_v62 = vadd.f32 %v13490_v57, %v12228_v42  ;;  %v12231_v36 = vadd.f32 %v19075_v46, %v12163_v61  ;;  %v12038_v53 = vadd.f32 %v14308_v54, %v19218_v9  ;;  %v20082_v57 = vld [vmem:[#allocation76_spill] sm:$0xff]  ;;  %v20087_v54 = vld [vmem:[#allocation61_spill] sm:$0xff]  ;;  %v19401_v1 = vld [vmem:[%s15671_s17 + $0xe0] sm:$0xff]  }
 0x6ad   : > { %v12161_v5 = vadd.f32 %v12017_v27, %v10606_v43  ;;  %v12029_v24 = vpop.f32.mrf.mxu1  ;;  %v19369_v9 = vpop.f32.mrf.mxu0  ;;  %v10622_v0 = vadd.f32 %v20083_v26, %v20082_v57  ;;  %v13501_v15 = vunpack.c.l.bf16 %v19347_v23  ;;  %v19389_v43 = vld [vmem:[%s15671_s17 + $0xd8] sm:$0xff]   ;;  %v19419_v57 = vld [vmem:[%s15671_s17 + $0xe8] sm:$0xff]  }
 0x6ae   : > { %12550 = vst [vmem:[%s19096_s28 + $0x130] sm:$0xff] %v12486_v60  ;;  %v12484_v8 = vmax.f32 %v12420_v62, 0.0  ;;  %v12423_v52 = vadd.f32 %v13497_v34, %v12231_v36  ;;  %v12166_v63 = vadd.f32 %v12038_v53, %v10627_v14  ;;  %v12030_v11 = vadd.f32 %v12029_v24, %v19190_v58  ;;  %v20085_v14 = vld [vmem:[#allocation24_spill] sm:$0xff]  ;;  %v20092_v26 = vld [vmem:[#allocation27_spill] sm:$0xff] }
 0x6af   : > { %v12229_v6 = vadd.f32 %v19075_v46, %v12161_v5  ;;  %v14309_v16 = vpop.f32.mrf.mxu1  ;;  %v11790_v25 = vpop.f32.mrf.mxu0  ;;  %v10635_v27 = vadd.f32 %v20085_v14, %v20084_v48  ;;  %v20088_v5 = vld [vmem:[#allocation34_spill] sm:$0xff]  ;;  %v20094_v14 = vld [vmem:[#allocation77_spill] sm:$0xff] }
 0x6b0   : > { %12548 = vst [vmem:[%s19096_s28 + $0x120] sm:$0xff] %v12484_v8  ;;  %v12487_v4 = vmax.f32 %v12423_v52, 0.0  ;;  %v12234_v31 = vadd.f32 %v19075_v46, %v12166_v63  ;;  %v12164_v50 = vadd.f32 %v12030_v11, %v10619_v10  ;;  %v12041_v58 = vadd.f32 %v14309_v16, %v19231_v17 }
 0x6b1   : > { %v12421_v35 = vadd.f32 %v13493_v29, %v12229_v6  ;;  %v12032_v21 = vpop.f32.mrf.mxu1  ;;  %v19384_v37 = vpop.f32.mrf.mxu0  ;;  %v20089_v29 = vld [vmem:[#allocation20_spill] sm:$0xff]  ;;  %v13510_v8 = vunpack.c.h.bf16 %v19389_v43  ;;  %v20091_v6 = vld [vmem:[#allocation59_spill] sm:$0xff] }
 0x6b2   : > { %12551 = vst [vmem:[%s19096_s28 + $0x138] sm:$0xff] %v12487_v4  ;;  %v12426_v45 = vadd.f32 %v13502_v18, %v12234_v31  ;;  %v12232_v32 = vadd.f32 %v19075_v46, %v12164_v50  ;;  %v12167_v13 = vadd.f32 %v12041_v58, %v10630_v49  ;;  %v12033_v34 = vadd.f32 %v12032_v21, %v19202_v41  ;;  %v20086_v41 = vld [vmem:[#allocation31_spill] sm:$0xff] }
 0x6b3   : > { %v12485_v17 = vmax.f32 %v12421_v35, 0.0  ;;  %v14312_v40 = vpop.f32.mrf.mxu1  ;;  %v11793_v51 = vpop.f32.mrf.mxu0  ;;  %v10643_v60 = vadd.f32 %v20087_v54, %v20086_v41  ;;  %v10646_v18 = vadd.f32 %v20089_v29, %v20088_v5  ;;  %v20090_v49 = vld [vmem:[#allocation79_spill] sm:$0xff]  ;;  %v13513_v4 = vunpack.c.l.bf16 %v19401_v1  ;;  %v20096_v54 = vld [vmem:[#allocation33_spill] sm:$0xff]  ;;  %v20098_v29 = vld [vmem:[#allocation30_spill] sm:$0xff] }
 0x6b4   : > { %v12490_v42 = vmax.f32 %v12426_v45, 0.0  ;;  %v12424_v61 = vadd.f32 %v13498_v28, %v12232_v32  ;;  %v12235_v19 = vadd.f32 %v19075_v46, %v12167_v13  ;;  %v12165_v30 = vadd.f32 %v12033_v34, %v10622_v0  ;;  %v20093_v0 = vld [vmem:[#allocation57_spill] sm:$0xff] }
 0x6b5   : > { %12549 = vst [vmem:[%s19096_s28 + $0x128] sm:$0xff] %v12485_v17  ;;  %v12054_v23 = vadd.f32 %v14312_v40, %v19273_v47  ;;  %v12045_v62 = vpop.f32.mrf.mxu1  ;;  %v19403_v10 = vpop.f32.mrf.mxu0  ;;  %v13506_v47 = vunpack.c.h.bf16 %v19367_v3  ;;  %v10638_v28 = vadd.f32 %v20091_v6, %v20090_v49  ;;  %v10659_v35 = vadd.f32 %v20093_v0, %v20092_v26  ;;  %v19432_v51 = vld [vmem:[%s15671_s17 + $0xf0] sm:$0xff]  }
 0x6b6   : > { %12554 = vst [vmem:[%s19096_s28 + $0x150] sm:$0xff] %v12490_v42  ;;  %v12488_v36 = vmax.f32 %v12424_v61, 0.0  ;;  %v12427_v53 = vadd.f32 %v13505_v55, %v12235_v19  ;;  %v12233_v22 = vadd.f32 %v19075_v46, %v12165_v30  ;;  %v12046_v38 = vadd.f32 %v12045_v62, %v19245_v33  ;;  %v20101_v49 = vld [vmem:[#allocation65_spill] sm:$0xff]  ;;  %v20103_v26 = vld [vmem:[#allocation60_spill] sm:$0xff] }
 0x6b7   : > { %v12170_v24 = vadd.f32 %v12054_v23, %v10643_v60  ;;  %v14313_v52 = vpop.f32.mrf.mxu1  ;;  %v11798_v59 = vpop.f32.mrf.mxu0  ;;  %v13509_v21 = vunpack.c.l.bf16 %v19389_v43  ;;  %v13518_v40 = vunpack.c.h.bf16 %v19419_v57 }
 0x6b8   : > { %12552 = vst [vmem:[%s19096_s28 + $0x140] sm:$0xff] %v12488_v36  ;;  %v12491_v63 = vmax.f32 %v12427_v53, 0.0  ;;  %v12425_v11 = vadd.f32 %v13501_v15, %v12233_v22  ;;  %v12168_v39 = vadd.f32 %v12046_v38, %v10635_v27  ;;  %v12057_v33 = vadd.f32 %v14313_v52, %v19289_v56  ;;  %v20095_v27 = vld [vmem:[#allocation70_spill] sm:$0xff] }
 0x6b9   : > { %v12238_v16 = vadd.f32 %v19075_v46, %v12170_v24  ;;  %v12048_v31 = vpop.f32.mrf.mxu1  ;;  %v19421_v56 = vpop.f32.mrf.mxu0  ;;  %v10651_v41 = vadd.f32 %v20095_v27, %v20094_v14  ;;  %v13521_v52 = vunpack.c.l.bf16 %v19432_v51  ;;  %v20105_v14 = vld [vmem:[#allocation68_spill] sm:$0xff] }
 0x6ba   : > { %12555 = vst [vmem:[%s19096_s28 + $0x158] sm:$0xff] %v12491_v63  ;;  %v12489_v3 = vmax.f32 %v12425_v11, 0.0  ;;  %v12236_v50 = vadd.f32 %v19075_v46, %v12168_v39  ;;  %v12171_v58 = vadd.f32 %v12057_v33, %v10646_v18  ;;  %v12049_v25 = vadd.f32 %v12048_v31, %v19261_v12  ;;  %v20099_v18 = vld [vmem:[#allocation21_spill] sm:$0xff] }
 0x6bb   : > { %v12430_v55 = vadd.f32 %v13510_v8, %v12238_v16  ;;  %v14316_v45 = vpop.f32.mrf.mxu1  ;;  %v11801_v17 = vpop.f32.mrf.mxu0  ;;  %v10654_v24 = vadd.f32 %v20099_v18, %v20098_v29 }
 0x6bc   : > { %12553 = vst [vmem:[%s19096_s28 + $0x148] sm:$0xff] %v12489_v3  ;;  %v12428_v32 = vadd.f32 %v13506_v47, %v12236_v50  ;;  %v12239_v13 = vadd.f32 %v19075_v46, %v12171_v58  ;;  %v12169_v34 = vadd.f32 %v12049_v25, %v10638_v28  ;;  %v12070_v12 = vadd.f32 %v14316_v45, %v19337_v7  ;;  %v20097_v7 = vld [vmem:[#allocation66_spill] sm:$0xff] }
 0x6bd   : > { %v12494_v15 = vmax.f32 %v12430_v55, 0.0  ;;  %v12061_v42 = vpop.f32.mrf.mxu1  ;;  %v19434_v48 = vpop.f32.mrf.mxu0  ;;  %v10662_v60 = vadd.f32 %v20097_v7, %v20096_v54  ;;  %v13514_v47 = vunpack.c.h.bf16 %v19401_v1  ;;  %v13517_v1 = vunpack.c.l.bf16 %v19419_v57  ;;  %v13569_v50 = vld [vmem:[%s15671_s17 + $0xf8] sm:$0xff]  }
 0x6be   : > { %v12492_v61 = vmax.f32 %v12428_v32, 0.0  ;;  %v12431_v19 = vadd.f32 %v13513_v4, %v12239_v13  ;;  %v12237_v30 = vadd.f32 %v19075_v46, %v12169_v34  ;;  %v12174_v43 = vadd.f32 %v12070_v12, %v10659_v35  ;;  %v20102_v25 = vld [vmem:[#allocation22_spill] sm:$0xff] }
 0x6bf   : > { %12558 = vst [vmem:[%s19096_s28 + $0x170] sm:$0xff] %v12494_v15  ;;  %v12062_v23 = vadd.f32 %v12061_v42, %v19303_v2  ;;  %v14317_v62 = vpop.f32.mrf.mxu1  ;;  %v11806_v5 = vpop.f32.mrf.mxu0  ;;  %v10667_v0 = vadd.f32 %v20103_v26, %v20102_v25  ;;  %v20107_v54 = vld [vmem:[#allocation18_spill] sm:$0xff]  ;;  %v13525_v29 = vunpack.c.l.bf16 %v13569_v50 }
 0x6c0   : > { %12556 = vst [vmem:[%s19096_s28 + $0x160] sm:$0xff] %v12492_v61  ;;  %v12495_v36 = vmax.f32 %v12431_v19, 0.0  ;;  %v12429_v53 = vadd.f32 %v13509_v21, %v12237_v30  ;;  %v12242_v22 = vadd.f32 %v19075_v46, %v12174_v43  ;;  %v12073_v38 = vadd.f32 %v14317_v62, %v19349_v20  ;;  %v20100_v20 = vld [vmem:[#allocation35_spill] sm:$0xff]  ;;  %v20104_v43 = vld [vmem:[#allocation28_spill] sm:$0xff] }
 0x6c1   : > { %v12172_v8 = vadd.f32 %v12062_v23, %v10651_v41  ;;  %v12064_v2 = vpop.f32.mrf.mxu1  ;;  %v19451_v59 = vpop.f32.mrf.mxu0  ;;  %v10675_v6 = vadd.f32 %v20101_v49, %v20100_v20  ;;  %v13526_v21 = vunpack.c.h.bf16 %v13569_v50  ;;  %v13570_v19 = vld [vmem:[%s15671_s17 + $0x100] sm:$0xff]   ;;  %v10670_v27 = vadd.f32 %v20105_v14, %v20104_v43  ;;  %v20106_v41 = vld [vmem:[#allocation36_spill] sm:$0xff] }
 0x6c2   : > { %12559 = vst [vmem:[%s19096_s28 + $0x178] sm:$0xff] %v12495_v36  ;;  %v12493_v63 = vmax.f32 %v12429_v53, 0.0  ;;  %v12434_v11 = vadd.f32 %v13518_v40, %v12242_v22  ;;  %v12175_v39 = vadd.f32 %v12073_v38, %v10662_v60  ;;  %v12065_v33 = vadd.f32 %v12064_v2, %v19319_v44  ;;  %v20108_v22 = vld [vmem:[#allocation37_spill] sm:$0xff]  ;;  %v20109_v38 = vld [vmem:[#allocation32_spill] sm:$0xff] }
 0x6c3   : > { %v12240_v28 = vadd.f32 %v19075_v46, %v12172_v8  ;;  %v14320_v16 = vpop.f32.mrf.mxu1  ;;  %v11809_v44 = vpop.f32.mrf.mxu0  ;;  %v10691_v5 = vadd.f32 %v20109_v38, %v20108_v22  ;;  %v13529_v8 = vunpack.c.l.bf16 %v13570_v19  ;;  %v13571_v2 = vld [vmem:[%s15671_s17 + $0x108] sm:$0xff]  }
 0x6c4   : > { %12557 = vst [vmem:[%s19096_s28 + $0x168] sm:$0xff] %v12493_v63  ;;  %v12498_v4 = vmax.f32 %v12434_v11, 0.0  ;;  %v12243_v31 = vadd.f32 %v19075_v46, %v12175_v39  ;;  %v12173_v3 = vadd.f32 %v12065_v33, %v10654_v24  ;;  %v12086_v58 = vadd.f32 %v14320_v16, %v19403_v10  ;;  %v20110_v39 = vld [vmem:[#allocation38_spill] sm:$0xff]  ;;  %v20118_v22 = vld [vmem:[#allocation96_spill] sm:$0xff] }
 0x6c5   : > { %v12432_v35 = vadd.f32 %v13514_v47, %v12240_v28  ;;  %v12077_v55 = vpop.f32.mrf.mxu1  ;;  %v11812_v34 = vpop.f32.mrf.mxu0  ;;  %v13522_v10 = vunpack.c.h.bf16 %v19432_v51  ;;  %v20119_v38 = vld [vmem:[#allocation84_spill] sm:$0xff] }
 0x6c6   : > { %12562 = vst [vmem:[%s19096_s28 + $0x190] sm:$0xff] %v12498_v4  ;;  %v12435_v45 = vadd.f32 %v13521_v52, %v12243_v31  ;;  %v12241_v57 = vadd.f32 %v19075_v46, %v12173_v3  ;;  %v12078_v32 = vadd.f32 %v12077_v55, %v19369_v9  ;;  %v12178_v13 = vadd.f32 %v12086_v58, %v10675_v6 }
 0x6c7   : > { %v12496_v12 = vmax.f32 %v12432_v35, 0.0  ;;  %v14321_v17 = vpop.f32.mrf.mxu1  ;;  %v11814_v30 = vpop.f32.mrf.mxu0  ;;  %v10678_v9 = vadd.f32 %v20107_v54, %v20106_v41  ;;  %v13534_v6 = vunpack.c.h.bf16 %v13571_v2  ;;  %v13530_v58 = vunpack.c.h.bf16 %v13570_v19  ;;  %v13572_v35 = vld [vmem:[%s15671_s17 + $0x110] sm:$0xff]  }
 0x6c8   : > { %v12499_v15 = vmax.f32 %v12435_v45, 0.0  ;;  %v12433_v40 = vadd.f32 %v13517_v1, %v12241_v57  ;;  %v12176_v42 = vadd.f32 %v12078_v32, %v10667_v0  ;;  %v12246_v61 = vadd.f32 %v19075_v46, %v12178_v13  ;;  %v20113_v45 = vld [vmem:[#allocation72_spill] sm:$0xff]  ;;  %v20114_v32 = vld [vmem:[#allocation42_spill] sm:$0xff] }
 0x6c9   : > { %12560 = vst [vmem:[%s19096_s28 + $0x180] sm:$0xff] %v12496_v12  ;;  %v12080_v7 = vpop.f32.mrf.mxu1  ;;  %v12089_v60 = vadd.f32 %v14321_v17, %v19421_v56  ;;  %v11815_v53 = vpop.f32.mrf.mxu0  ;;  %v13537_v30 = vunpack.c.l.bf16 %v13572_v35 }
 0x6ca   : > { %12563 = vst [vmem:[%s19096_s28 + $0x198] sm:$0xff] %v12499_v15  ;;  %v12497_v51 = vmax.f32 %v12433_v40, 0.0  ;;  %v12244_v23 = vadd.f32 %v19075_v46, %v12176_v42  ;;  %v12081_v62 = vadd.f32 %v12080_v7, %v19384_v37  ;;  %v12438_v36 = vadd.f32 %v13526_v21, %v12246_v61  ;;  %v20111_v37 = vld [vmem:[#allocation16_spill] sm:$0xff] }
 0x6cb   : > { %v14324_v18 = vpop.f32.mrf.mxu1  ;;  %v12179_v24 = vadd.f32 %v12089_v60, %v10678_v9  ;;  %v11817_v11 = vpop.f32.mrf.mxu0  ;;  %v10683_v33 = vadd.f32 %v20111_v37, %v20110_v39  ;;  %v20112_v21 = vld [vmem:[#allocation40_spill] sm:$0xff]  ;;  %v20116_v60 = vld [vmem:[#allocation82_spill] sm:$0xff] }
 0x6cc   : > { %12561 = vst [vmem:[%s19096_s28 + $0x188] sm:$0xff] %v12497_v51  ;;  %v12436_v47 = vadd.f32 %v13522_v10, %v12244_v23  ;;  %v12177_v56 = vadd.f32 %v12081_v62, %v10670_v27  ;;  %v12502_v52 = vmax.f32 %v12438_v36, 0.0  ;;  %v12102_v63 = vadd.f32 %v14324_v18, %v11812_v34 }
 0x6cd   : > { %v12093_v20 = vpop.f32.mrf.mxu1  ;;  %v12247_v49 = vadd.f32 %v19075_v46, %v12179_v24  ;;  %v11820_v31 = vpop.f32.mrf.mxu0  ;;  %v10686_v57 = vadd.f32 %v20113_v45, %v20112_v21  ;;  %v13533_v27 = vunpack.c.l.bf16 %v13571_v2 }
 0x6ce   : > { %v12500_v28 = vmax.f32 %v12436_v47, 0.0  ;;  %v12245_v1 = vadd.f32 %v19075_v46, %v12177_v56  ;;  %12566 = vst [vmem:[%s19096_s28 + $0x1b0] sm:$0xff] %v12502_v52  ;;  %v12094_v16 = vadd.f32 %v12093_v20, %v19434_v48  ;;  %v12182_v4 = vadd.f32 %v12102_v63, %v10691_v5  ;;  %v20115_v48 = vld [vmem:[#allocation63_spill] sm:$0xff]  ;;  %v13573_v52 = vld [vmem:[%s15671_s17 + $0x118] sm:$0xff]   ;;  %v20121_v20 = vld [vmem:[#allocation88_spill] sm:$0xff] }
 0x6cf   : > { %v12439_v3 = vadd.f32 %v13529_v8, %v12247_v49  ;;  %v14325_v50 = vpop.f32.mrf.mxu1  ;;  %v11822_v55 = vpop.f32.mrf.mxu0  ;;  %v10694_v13 = vadd.f32 %v20115_v48, %v20114_v32  ;;  %v10707_v5 = vadd.f32 %v20119_v38, %v20118_v22  ;;  %v13538_v56 = vunpack.c.h.bf16 %v13572_v35 }
 0x6d0   : > { %12564 = vst [vmem:[%s19096_s28 + $0x1a0] sm:$0xff] %v12500_v28  ;;  %v12437_v44 = vadd.f32 %v13525_v29, %v12245_v1  ;;  %v12180_v25 = vadd.f32 %v12094_v16, %v10683_v33  ;;  %v12250_v26 = vadd.f32 %v19075_v46, %v12182_v4  ;;  %v12105_v0 = vadd.f32 %v14325_v50, %v11815_v53  ;;  %v20120_v33 = vld [vmem:[#allocation94_spill] sm:$0xff] }
 0x6d1   : > { %v12503_v34 = vmax.f32 %v12439_v3, 0.0  ;;  %v12096_v12 = vpop.f32.mrf.mxu1  ;;  %v11823_v42 = vpop.f32.mrf.mxu0  ;;  %v13542_v37 = vunpack.c.h.bf16 %v13573_v52  ;;  %v10702_v49 = vadd.f32 %v20121_v20, %v20120_v33  ;;  %v12319_v4 = vld [vmem:[%s15671_s17 + $0x120] sm:$0xf]  ;;  %s15413_s17 = scalar_lea.vmem %s15412_s14, 16384 }
 0x6d2   : > { %v12501_v10 = vmax.f32 %v12437_v44, 0.0  ;;  %v12248_v17 = vadd.f32 %v19075_v46, %v12180_v25  ;;  %v12097_v15 = vadd.f32 %v12096_v12, %v19451_v59  ;;  %v12442_v40 = vadd.f32 %v13534_v6, %v12250_v26  ;;  %v20117_v59 = vld [vmem:[#allocation85_spill] sm:$0xff]  ;;  %v20123_v3 = vld [vmem:[#allocation87_spill] sm:$0xff]  ;;  %p15415_p0 = scmp.lt.s32.totalorder %s15413_s17, %s15407_s10 }
 0x6d3   : > { %12567 = vst [vmem:[%s19096_s28 + $0x1b8] sm:$0xff] %v12503_v34  ;;  %v14328_v61 = vpop.f32.mrf.mxu1  ;;  %v12183_v19 = vadd.f32 %v12105_v0, %v10694_v13  ;;  %v11825_v54 = vpop.f32.mrf.mxu0  ;;  %v10699_v51 = vadd.f32 %v20117_v59, %v20116_v60  ;;  %v13541_v0 = vunpack.c.l.bf16 %v13573_v52  ;;  %v12383_v45 = vunpack.c.l.bf16 %v12319_v4 }
 0x6d4   : > { %12565 = vst [vmem:[%s19096_s28 + $0x1a8] sm:$0xff] %v12501_v10  ;;  %v12440_v43 = vadd.f32 %v13530_v58, %v12248_v17  ;;  %v12181_v14 = vadd.f32 %v12097_v15, %v10686_v57  ;;  %v12506_v41 = vmax.f32 %v12442_v40, 0.0  ;;  %p15416_p2 = por %p15415_p0, %p15414_p13 }
 0x6d5   : > { %v12109_v9 = vpop.f32.mrf.mxu1  ;;  %v12251_v7 = vadd.f32 %v19075_v46, %v12183_v19  ;;  %v11828_v53 = vpop.f32.mrf.mxu0 }
 0x6d6   : > { %v12504_v23 = vmax.f32 %v12440_v43, 0.0  ;;  %v12249_v62 = vadd.f32 %v19075_v46, %v12181_v14  ;;  %12570 = vst [vmem:[%s19096_s28 + $0x1d0] sm:$0xff] %v12506_v41  ;;  %v12110_v36 = vadd.f32 %v12109_v9, %v11820_v31  ;;  %v12118_v24 = vadd.f32 %v14328_v61, %v11828_v53  ;;  %v20122_v31 = vld [vmem:[#allocation67_spill] sm:$0xff]  ;;  %p15417_p10 = pnand %p15416_p2, %p15410_p9 }
 0x6d7   : > { %v14329_v29 = vpop.f32.mrf.mxu1  ;;  %v12443_v18 = vadd.f32 %v13537_v30, %v12251_v7  ;;  %v11830_v2 = vpop.f32.mrf.mxu0  ;;  %v10710_v50 = vadd.f32 %v20123_v3, %v20122_v31 }
 0x6d8   : > { %12568 = vst [vmem:[%s19096_s28 + $0x1c0] sm:$0xff] %v12504_v23  ;;  %v12441_v8 = vadd.f32 %v13533_v27, %v12249_v62  ;;  %v12184_v47 = vadd.f32 %v12110_v36, %v10699_v51  ;;  %v12186_v39 = vadd.f32 %v12118_v24, %v10707_v5 }
 0x6d9   : > { %v12112_v63 = vpop.f32.mrf.mxu1  ;;  %v12507_v11 = vmax.f32 %v12443_v18, 0.0  ;;  %v11831_v16 = vpop.f32.mrf.mxu0 }
 0x6da   : > { %v12505_v6 = vmax.f32 %v12441_v8, 0.0  ;;  %v12252_v28 = vadd.f32 %v19075_v46, %v12184_v47  ;;  %v12113_v1 = vadd.f32 %v12112_v63, %v11823_v42  ;;  %v12254_v58 = vadd.f32 %v19075_v46, %v12186_v39 }
 0x6db   : > { %12571 = vst [vmem:[%s19096_s28 + $0x1d8] sm:$0xff] %v12507_v11  ;;  %v12121_v44 = vadd.f32 %v14329_v29, %v11831_v16  ;;  %v11833_v35 = vpop.f32.mrf.mxu0 }
 0x6dc   : > { %12569 = vst [vmem:[%s19096_s28 + $0x1c8] sm:$0xff] %v12505_v6  ;;  %v12444_v25 = vadd.f32 %v13538_v56, %v12252_v28  ;;  %v12185_v26 = vadd.f32 %v12113_v1, %v10702_v49  ;;  %v12446_v55 = vadd.f32 %v13542_v37, %v12254_v58 }
 0x6dd   : > { %v12187_v21 = vadd.f32 %v12121_v44, %v10710_v50 }
 0x6de   : > { %v12508_v57 = vmax.f32 %v12444_v25, 0.0  ;;  %v12253_v32 = vadd.f32 %v19075_v46, %v12185_v26  ;;  %v12510_v48 = vmax.f32 %v12446_v55, 0.0 }
 0x6df   : > { %v12255_v13 = vadd.f32 %v19075_v46, %v12187_v21 }
 0x6e0   : > { %12572 = vst [vmem:[%s19096_s28 + $0x1e0] sm:$0xff] %v12508_v57  ;;  %v12445_v34 = vadd.f32 %v13541_v0, %v12253_v32  ;;  %12574 = vst [vmem:[%s19096_s28 + $0x1f0] sm:$0xff] %v12510_v48 }
 0x6e1   : > { %v12447_v12 = vadd.f32 %v12383_v45, %v12255_v13 }
 0x6e2   : > { %v12509_v10 = vmax.f32 %v12445_v34, 0.0 }
 0x6e3   : > { %v12511_v17 = vmax.f32 %v12447_v12, 0.0 }
 0x6e4   : > { %12573 = vst [vmem:[%s19096_s28 + $0x1e8] sm:$0xff] %v12509_v10 }
 0x6e5   : > { %12575 = vst [vmem:[%s19096_s28 + $0x1f8] sm:$0xff] %v12511_v17 }
 0x6e6   : > { %15420 = shalt.err (!%p15417_p10)
}
 0x6e7   : > { %s15421_s24 = scalar_lea.hbm %s19526_s9, 8192  ;;  %s15425_s15 = scalar_lea.hbm %s19578_s5, 16384 }
 0x6e8   : > { %p15422_p6 = scmp.ne.s32.totalorder %s19526_s9, %s15421_s24  ;;  %p15426_p3 = scmp.lt.s32.totalorder %s19526_s9, %s19578_s5 }
 0x6e9   : > { %p15427_p11 = scmp.lt.s32.totalorder %s15425_s15, %s15421_s24 }
 0x6ea   : > { %p15423_p4 = pnand %p15422_p6, %p20124_p1 }
 0x6eb   : > { %p15428_p5 = por %p15427_p11, %p15426_p3 }
 0x6ec   : > { %p15424_p8 = pneg %p15423_p4 }
 0x6ee   : > { %p15429_p7 = pnand %p15428_p5, %p15424_p8 }
 0x6f0   : > { %15432 = shalt.err (!%p15429_p7)
}
 0x6f1   : > { %s15491_s30 = smov 128   ;;  %s15492_s8 = smov 8  }
 0x6f2   : > { %14347 = dma.vmem_to_hbm [thread:$0]  (%p20124_p1), %s19528_s29, 8192, %s19526_s9, %s12577_s22, %s15491_s30, %s15491_s30, %s15492_s8  }
 0x6f3 PF: > { %s12605_s27 = sand.u32 1, %s15467_s18   ;;  %p20125_p12 = scmp.ne.s32.totalorder %s19595_s25, 0 }
 0x6f4   : > { %p20126_p9 = scmp.ge.s32.totalorder %s15479_s21, 2  ;;  %s12606_s10 = scalar_lea.sflag [#allocation5], %s12605_s27 }
 0x6f6   : > { %p14364_p13 = pnand %p20126_p9, %p20125_p12 }
 0x6f8   : > { %p14365_p0 = pneg %p14364_p13 }
 0x6fa   : > { %15462 = dma.done.wait (%p14365_p0), %s12606_s10, 8192  }
 0x6fb   : > { %15464 = vsyncadd (%p14365_p0), %s12606_s10, 4294959104  ;;  %p20_p2 = scmp.ge.s32.totalorder %s15609_s6, 4   ;;  %s20127_s18 = smov %s15471_s19 }
 0x6fc   : > { %s20128_s19 = smov %s15475_s20  ;;  %s20129_s20 = smov %s15619_s12 }
 0x6fd   : > { %s20130_s21 = smov %s15609_s6  ;;  %22 = sbr.rel (!%p20_p2) target bundleno = 7 (0x7), region = 101 }
 0x702   :  { %12611 = vsyncpa [#allocation4], 1 }
 0x703   :  { %12613 = vsyncpa [#allocation4 + $0x1], 1 }
 0x704   :  { %12614 = vsyncpa [#allocation7], 1 }
 0x705   :  { %12615 = vsyncpa [#allocation10], 1 }
 0x706   :  { %12616 = vsyncpa [#allocation5], 1 }
 0x707   :  { %12618 = vsyncpa [#allocation5 + $0x1], 1 }

</bundles_post_ra>
